<compile_context>
chip_gen: v7x
topology: tpu7x:2x2x1
jax: 0.10.0
libtpu: 0.0.40
codegen_flags: <defaults>
</compile_context>

<pallas_src>
import numpy as np

import jax
import jax.numpy as jnp
from jax.experimental import pallas as pl
from jax.experimental.pallas import tpu as pltpu

_BN_EPS = 1e-5


# --------------------- static structural matrices (numpy) ---------------------

def _shift_mats(h, w):
    """T[t, q, p] = 1 iff 3x3-conv tap t (with zero pad=1) maps input pixel q
    onto output pixel p (flat index = row*w + col)."""
    hw = h * w
    t = np.zeros((9, hw, hw), np.float32)
    for kh in range(3):
        for kw in range(3):
            ti = kh * 3 + kw
            dh, dw = kh - 1, kw - 1
            for oh in range(h):
                ih = oh + dh
                if ih < 0 or ih >= h:
                    continue
                for ow in range(w):
                    iw = ow + dw
                    if iw < 0 or iw >= w:
                        continue
                    t[ti, ih * w + iw, oh * w + ow] = 1.0
    return t


def _pool_mats(h, w, k=2):
    """P[d, q, po] = 1 iff input pixel q is element d of 2x2 window po."""
    ho, wo = h // k, w // k
    p = np.zeros((k * k, h * w, ho * wo), np.float32)
    for dy in range(k):
        for dx in range(k):
            d = dy * k + dx
            for oh in range(ho):
                for ow in range(wo):
                    p[d, (oh * k + dy) * w + (ow * k + dx), oh * wo + ow] = 1.0
    return p


def _interp_matrix(n_in, n_out):
    """PyTorch UpsamplingBilinear2d (align_corners=True) 1-D interpolation."""
    if n_out == 1:
        src = np.zeros((1,), np.float64)
    else:
        src = np.arange(n_out, dtype=np.float64) * (n_in - 1) / (n_out - 1)
    i0 = np.clip(np.floor(src).astype(np.int64), 0, n_in - 1)
    i1 = np.minimum(i0 + 1, n_in - 1)
    w1 = src - i0
    w0 = 1.0 - w1
    m = np.zeros((n_out, n_in), np.float64)
    rows = np.arange(n_out)
    np.add.at(m, (rows, i0), w0)
    np.add.at(m, (rows, i1), w1)
    return m


def _upsample_mat(h, w, s):
    """Flat-layout bilinear x_flat (C, h*w) @ U -> (C, s*h*s*w)."""
    mh = _interp_matrix(h, h * s)
    mw = _interp_matrix(w, w * s)
    return np.kron(mh, mw).T.astype(np.float32)


# ------------------------------- fused kernel --------------------------------

def _forward_kernel(x_ref, t16_ref, t8_ref, p16_ref, p8_ref, u4_ref, u8_ref,
                    dw1_ref, db1_ref, dw2_ref, db2_ref,
                    ew1_ref, eb1_ref, ew2_ref, eb2_ref,
                    fw1_ref, fb1_ref, fw2_ref, fb2_ref,
                    cw1_ref, cb1_ref, cw2_ref, cb2_ref,
                    o_ref):
    f32 = jnp.float32

    def conv3x3(x, t_ref, w_ref, b_ref, act):
        cout, cin = w_ref.shape[1], w_ref.shape[2]
        hw = x.shape[1]
        acc = jnp.zeros((cout, hw), f32) + b_ref[...]
        for t in range(9):
            wt = w_ref[t]                                        # (cout, cin)
            if cin == 1:
                wx = wt * x                                      # (cout, hw)
            else:
                wx = jnp.dot(wt, x, preferred_element_type=f32)  # (cout, hw)
            acc = acc + jnp.dot(wx, t_ref[t], preferred_element_type=f32)
        if act == "relu":
            acc = jnp.maximum(acc, 0.0)
        elif act == "tanh":
            acc = jnp.tanh(acc)
        return acc

    def maxpool2(x, p_ref):
        q0 = jnp.dot(x, p_ref[0], preferred_element_type=f32)
        q1 = jnp.dot(x, p_ref[1], preferred_element_type=f32)
        q2 = jnp.dot(x, p_ref[2], preferred_element_type=f32)
        q3 = jnp.dot(x, p_ref[3], preferred_element_type=f32)
        return jnp.maximum(jnp.maximum(q0, q1), jnp.maximum(q2, q3))

    x = x_ref[0]                                                 # (3, 256)

    # ---- decoder: [Conv 3->8, ReLU, MaxPool2] [Conv 8->4, ReLU, MaxPool2]
    h = conv3x3(x, t16_ref, dw1_ref, db1_ref, "relu")            # (8, 256)
    h = maxpool2(h, p16_ref)                                     # (8, 64)
    h = conv3x3(h, t8_ref, dw2_ref, db2_ref, "relu")             # (4, 64)
    code = maxpool2(h, p8_ref)                                   # (4, 16)

    # ---- encoder: [Up x2, Conv 4->8, ReLU] [Up x2, Conv 8->1, Tanh]
    h = jnp.dot(code, u4_ref[...], preferred_element_type=f32)   # (4, 64)
    h = conv3x3(h, t8_ref, ew1_ref, eb1_ref, "relu")             # (8, 64)
    h = jnp.dot(h, u8_ref[...], preferred_element_type=f32)      # (8, 256)
    maps = conv3x3(h, t16_ref, ew2_ref, eb2_ref, "tanh")         # (1, 256)

    # ---- feature (eval-mode BatchNorm folded into conv weights/bias)
    h = conv3x3(maps, t16_ref, fw1_ref, fb1_ref, "relu")         # (4, 256)
    h = maxpool2(h, p16_ref)                                     # (4, 64)
    h = conv3x3(h, t8_ref, fw2_ref, fb2_ref, "relu")             # (8, 64)
    feat = maxpool2(h, p8_ref)                                   # (8, 16)

    # ---- classifier; (C, H*W) order == PyTorch .view(N, -1) on NCHW
    # TODO(synk): nn.Dropout is identity at inference; training-mode masking omitted.
    h1 = cb1_ref[...]                                            # (1, 32)
    for c in range(feat.shape[0]):
        h1 = h1 + jnp.dot(feat[c:c + 1, :], cw1_ref[c],
                          preferred_element_type=f32)
    h1 = jnp.maximum(h1, 0.0)
    logits = jnp.dot(h1, cw2_ref[...], preferred_element_type=f32) + cb2_ref[...]
    o_ref[0] = logits                                            # (1, 5)


# ------------------------------ wrapper / glue --------------------------------

_CONST_MAPS = {
    2: lambda i: (0, 0),
    3: lambda i: (0, 0, 0),
}


def _full_spec(shape):
    return pl.BlockSpec(tuple(shape), _CONST_MAPS[len(shape)])


def model_forward(x, params):
    """x: (N, 3, 16, 16) NCHW float32  ->  logits (N, 5)."""
    n = x.shape[0]
    assert x.shape[1:] == (3, 16, 16)

    # Structural constants (folded into the executable by jit).
    t16 = jnp.asarray(_shift_mats(16, 16))     # (9, 256, 256)
    t8 = jnp.asarray(_shift_mats(8, 8))        # (9, 64, 64)
    p16 = jnp.asarray(_pool_mats(16, 16))      # (4, 256, 64)
    p8 = jnp.asarray(_pool_mats(8, 8))         # (4, 64, 16)
    u4 = jnp.asarray(_upsample_mat(4, 4, 2))   # (16, 64)
    u8 = jnp.asarray(_upsample_mat(8, 8, 2))   # (64, 256)

    # Parameter prep: HWIO conv weights -> (9, Cout, Cin); biases -> (Cout, 1).
    def prep_conv(w, b):
        kh, kw, ci, co = w.shape
        wt = jnp.transpose(w, (0, 1, 3, 2)).reshape(kh * kw, co, ci)
        return wt, b.reshape(co, 1)

    def fold_bn(w, b, gamma, beta, mean, var):
        scale = gamma * jax.lax.rsqrt(var + _BN_EPS)
        return w * scale, (b - mean) * scale + beta

    dw1, db1 = prep_conv(params["dec_w1"], params["dec_b1"])
    dw2, db2 = prep_conv(params["dec_w2"], params["dec_b2"])
    ew1, eb1 = prep_conv(params["enc_w1"], params["enc_b1"])
    ew2, eb2 = prep_conv(params["enc_w2"], params["enc_b2"])
    fw1_r, fb1_r = fold_bn(params["d_w1"], params["d_b1"], params["bn1_g"],
                           params["bn1_b"], params["bn1_m"], params["bn1_v"])
    fw2_r, fb2_r = fold_bn(params["d_w2"], params["d_b2"], params["bn2_g"],
                           params["bn2_b"], params["bn2_m"], params["bn2_v"])
    fw1, fb1 = prep_conv(fw1_r, fb1_r)
    fw2, fb2 = prep_conv(fw2_r, fb2_r)
    cw1 = params["fc_w1"].reshape(8, 16, 32)
    cb1 = params["fc_b1"].reshape(1, 32)
    cw2 = params["fc_w2"]                      # (32, 5)
    cb2 = params["fc_b2"].reshape(1, 5)

    x_flat = x.reshape(n, 3, 256)              # glue only; NCHW -> (N, C, H*W)

    operands = (x_flat, t16, t8, p16, p8, u4, u8,
                dw1, db1, dw2, db2, ew1, eb1, ew2, eb2,
                fw1, fb1, fw2, fb2, cw1, cb1, cw2, cb2)

    in_specs = [pl.BlockSpec((1, 3, 256), lambda i: (i, 0, 0))]
    in_specs += [_full_spec(jnp.shape(op)) for op in operands[1:]]

    out = pl.pallas_call(
        _forward_kernel,
        out_shape=jax.ShapeDtypeStruct((n, 1, 5), jnp.float32),
        grid=(n,),
        in_specs=in_specs,
        out_specs=pl.BlockSpec((1, 1, 5), lambda i: (i, 0, 0)),
        compiler_params=pltpu.CompilerParams(
            dimension_semantics=("parallel",)),
    )(*operands)
    return out.reshape(n, 5)


# ------------------------------- parameters -----------------------------------

def init_params(key):
    def nrm(k, shape, scale=0.1):
        return scale * jax.random.normal(k, shape, jnp.float32)
    ks = jax.random.split(key, 16)
    p = {}
    # decoder convs (HWIO)
    p["dec_w1"] = nrm(ks[0], (3, 3, 3, 8)); p["dec_b1"] = nrm(ks[1], (8,))
    p["dec_w2"] = nrm(ks[2], (3, 3, 8, 4)); p["dec_b2"] = nrm(ks[3], (4,))
    # encoder convs (G_kernels[0] reset to 1 -> final conv outputs 1 channel)
    p["enc_w1"] = nrm(ks[4], (3, 3, 4, 8)); p["enc_b1"] = nrm(ks[5], (8,))
    p["enc_w2"] = nrm(ks[6], (3, 3, 8, 1)); p["enc_b2"] = nrm(ks[7], (1,))
    # discriminator convs + eval-mode BatchNorm stats
    p["d_w1"] = nrm(ks[8], (3, 3, 1, 4));  p["d_b1"] = nrm(ks[9], (4,))
    p["bn1_g"] = jnp.ones((4,), jnp.float32); p["bn1_b"] = jnp.zeros((4,), jnp.float32)
    p["bn1_m"] = nrm(ks[10], (4,));           p["bn1_v"] = jnp.full((4,), 0.9, jnp.float32)
    p["d_w2"] = nrm(ks[11], (3, 3, 4, 8)); p["d_b2"] = nrm(ks[12], (8,))
    p["bn2_g"] = jnp.ones((8,), jnp.float32); p["bn2_b"] = jnp.zeros((8,), jnp.float32)
    p["bn2_m"] = nrm(ks[13], (8,));           p["bn2_v"] = jnp.full((8,), 1.1, jnp.float32)
    # classifier linears (stored as (in, out))
    p["fc_w1"] = nrm(ks[14], (128, 32)); p["fc_b1"] = jnp.zeros((32,), jnp.float32)
    p["fc_w2"] = nrm(ks[15], (32, 5));   p["fc_b2"] = jnp.zeros((5,), jnp.float32)
    return p


# ---------------------------------- main ---------------------------------------

if __name__ == "__main__":
    key = jax.random.PRNGKey(0)
    kx, kp = jax.random.split(key)
    x = jax.random.normal(kx, (2, 3, 16, 16), jnp.float32)   # NCHW, like PyTorch
    params = init_params(kp)

    fwd = jax.jit(model_forward)
    out = jax.block_until_ready(fwd(x, params))
    assert out.shape == (2, 5), out.shape
    assert jnp.all(jnp.isfinite(out))
    print("KERNEL_OK")
</pallas_src>

<mosaic_0001>
module attributes {stable_mosaic.version = 11 : i64} {
  func.func @_forward_kernel(%arg0: i32, %arg1: memref<1x3x256xf32, #tpu.memory_space<vmem>>, %arg2: memref<9x256x256xf32, #tpu.memory_space<vmem>>, %arg3: memref<9x64x64xf32, #tpu.memory_space<vmem>>, %arg4: memref<4x256x64xf32, #tpu.memory_space<vmem>>, %arg5: memref<4x64x16xf32, #tpu.memory_space<vmem>>, %arg6: memref<16x64xf32, #tpu.memory_space<vmem>>, %arg7: memref<64x256xf32, #tpu.memory_space<vmem>>, %arg8: memref<9x8x3xf32, #tpu.memory_space<vmem>>, %arg9: memref<8x1xf32, #tpu.memory_space<vmem>>, %arg10: memref<9x4x8xf32, #tpu.memory_space<vmem>>, %arg11: memref<4x1xf32, #tpu.memory_space<vmem>>, %arg12: memref<9x8x4xf32, #tpu.memory_space<vmem>>, %arg13: memref<8x1xf32, #tpu.memory_space<vmem>>, %arg14: memref<9x1x8xf32, #tpu.memory_space<vmem>>, %arg15: memref<1x1xf32, #tpu.memory_space<vmem>>, %arg16: memref<9x4x1xf32, #tpu.memory_space<vmem>>, %arg17: memref<4x1xf32, #tpu.memory_space<vmem>>, %arg18: memref<9x8x4xf32, #tpu.memory_space<vmem>>, %arg19: memref<8x1xf32, #tpu.memory_space<vmem>>, %arg20: memref<8x16x32xf32, #tpu.memory_space<vmem>>, %arg21: memref<1x32xf32, #tpu.memory_space<vmem>>, %arg22: memref<32x5xf32, #tpu.memory_space<vmem>>, %arg23: memref<1x5xf32, #tpu.memory_space<vmem>>, %arg24: memref<1x1x5xf32, #tpu.memory_space<vmem>>) attributes {dimension_semantics = [#tpu.dimension_semantics<parallel>], iteration_bounds = array<i64: 2>, scalar_prefetch = 0 : i64, scratch_operands = 0 : i64, tpu.core_type = #tpu.core_type<tc>, window_params = [{transform_indices = @transform_0, window_bounds = array<i64: 1, 3, 256>}, {pipeline_mode = #tpu.pipeline_mode<synchronous>, transform_indices = @transform_1, window_bounds = array<i64: 9, 256, 256>}, {pipeline_mode = #tpu.pipeline_mode<synchronous>, transform_indices = @transform_2, window_bounds = array<i64: 9, 64, 64>}, {pipeline_mode = #tpu.pipeline_mode<synchronous>, transform_indices = @transform_3, window_bounds = array<i64: 4, 256, 64>}, {pipeline_mode = #tpu.pipeline_mode<synchronous>, transform_indices = @transform_4, window_bounds = array<i64: 4, 64, 16>}, {pipeline_mode = #tpu.pipeline_mode<synchronous>, transform_indices = @transform_5, window_bounds = array<i64: 16, 64>}, {pipeline_mode = #tpu.pipeline_mode<synchronous>, transform_indices = @transform_6, window_bounds = array<i64: 64, 256>}, {pipeline_mode = #tpu.pipeline_mode<synchronous>, transform_indices = @transform_7, window_bounds = array<i64: 9, 8, 3>}, {pipeline_mode = #tpu.pipeline_mode<synchronous>, transform_indices = @transform_8, window_bounds = array<i64: 8, 1>}, {pipeline_mode = #tpu.pipeline_mode<synchronous>, transform_indices = @transform_9, window_bounds = array<i64: 9, 4, 8>}, {pipeline_mode = #tpu.pipeline_mode<synchronous>, transform_indices = @transform_10, window_bounds = array<i64: 4, 1>}, {pipeline_mode = #tpu.pipeline_mode<synchronous>, transform_indices = @transform_11, window_bounds = array<i64: 9, 8, 4>}, {pipeline_mode = #tpu.pipeline_mode<synchronous>, transform_indices = @transform_12, window_bounds = array<i64: 8, 1>}, {pipeline_mode = #tpu.pipeline_mode<synchronous>, transform_indices = @transform_13, window_bounds = array<i64: 9, 1, 8>}, {pipeline_mode = #tpu.pipeline_mode<synchronous>, transform_indices = @transform_14, window_bounds = array<i64: 1, 1>}, {pipeline_mode = #tpu.pipeline_mode<synchronous>, transform_indices = @transform_15, window_bounds = array<i64: 9, 4, 1>}, {pipeline_mode = #tpu.pipeline_mode<synchronous>, transform_indices = @transform_16, window_bounds = array<i64: 4, 1>}, {pipeline_mode = #tpu.pipeline_mode<synchronous>, transform_indices = @transform_17, window_bounds = array<i64: 9, 8, 4>}, {pipeline_mode = #tpu.pipeline_mode<synchronous>, transform_indices = @transform_18, window_bounds = array<i64: 8, 1>}, {pipeline_mode = #tpu.pipeline_mode<synchronous>, transform_indices = @transform_19, window_bounds = array<i64: 8, 16, 32>}, {pipeline_mode = #tpu.pipeline_mode<synchronous>, transform_indices = @transform_20, window_bounds = array<i64: 1, 32>}, {pipeline_mode = #tpu.pipeline_mode<synchronous>, transform_indices = @transform_21, window_bounds = array<i64: 32, 5>}, {pipeline_mode = #tpu.pipeline_mode<synchronous>, transform_indices = @transform_22, window_bounds = array<i64: 1, 5>}, {transform_indices = @transform_23, window_bounds = array<i64: 1, 1, 5>}]} {
    %c0 = arith.constant 0 : index
    %c0_0 = arith.constant 0 : index
    %c0_1 = arith.constant 0 : index
    %0 = vector.load %arg1[%c0, %c0_0, %c0_1] : memref<1x3x256xf32, #tpu.memory_space<vmem>>, vector<1x3x256xf32>
    %1 = vector.shape_cast %0 : vector<1x3x256xf32> to vector<3x256xf32>
    %cst = arith.constant 0.000000e+00 : f32
    %2 = vector.broadcast %cst : f32 to vector<8x256xf32>
    %c0_2 = arith.constant 0 : index
    %c0_3 = arith.constant 0 : index
    %3 = vector.load %arg9[%c0_2, %c0_3] : memref<8x1xf32, #tpu.memory_space<vmem>>, vector<8x1xf32>
    %4 = vector.broadcast %3 : vector<8x1xf32> to vector<8x256xf32>
    %5 = arith.addf %2, %4 : vector<8x256xf32>
    %c0_4 = arith.constant 0 : index
    %c0_5 = arith.constant 0 : index
    %c0_6 = arith.constant 0 : index
    %6 = vector.load %arg8[%c0_4, %c0_5, %c0_6] : memref<9x8x3xf32, #tpu.memory_space<vmem>>, vector<1x8x3xf32>
    %7 = vector.shape_cast %6 : vector<1x8x3xf32> to vector<8x3xf32>
    %cst_7 = arith.constant dense<0.000000e+00> : vector<8x256xf32>
    %8 = tpu.matmul %7, %1, %cst_7 {dimension_numbers = #tpu.dot_dimension_numbers<[1], [0], [0], [1], [0, 0, 1, 1], [], []>} : vector<8x3xf32>, vector<3x256xf32>, vector<8x256xf32> -> vector<8x256xf32>
    %c0_8 = arith.constant 0 : index
    %c0_9 = arith.constant 0 : index
    %c0_10 = arith.constant 0 : index
    %9 = vector.load %arg2[%c0_8, %c0_9, %c0_10] : memref<9x256x256xf32, #tpu.memory_space<vmem>>, vector<1x256x256xf32>
    %10 = vector.shape_cast %9 : vector<1x256x256xf32> to vector<256x256xf32>
    %cst_11 = arith.constant dense<0.000000e+00> : vector<8x256xf32>
    %11 = tpu.matmul %8, %10, %cst_11 {dimension_numbers = #tpu.dot_dimension_numbers<[1], [0], [0], [1], [0, 0, 1, 1], [], []>} : vector<8x256xf32>, vector<256x256xf32>, vector<8x256xf32> -> vector<8x256xf32>
    %12 = arith.addf %5, %11 : vector<8x256xf32>
    %c1 = arith.constant 1 : index
    %c0_12 = arith.constant 0 : index
    %c0_13 = arith.constant 0 : index
    %13 = vector.load %arg8[%c1, %c0_12, %c0_13] : memref<9x8x3xf32, #tpu.memory_space<vmem>>, vector<1x8x3xf32>
    %14 = vector.shape_cast %13 : vector<1x8x3xf32> to vector<8x3xf32>
    %cst_14 = arith.constant dense<0.000000e+00> : vector<8x256xf32>
    %15 = tpu.matmul %14, %1, %cst_14 {dimension_numbers = #tpu.dot_dimension_numbers<[1], [0], [0], [1], [0, 0, 1, 1], [], []>} : vector<8x3xf32>, vector<3x256xf32>, vector<8x256xf32> -> vector<8x256xf32>
    %c1_15 = arith.constant 1 : index
    %c0_16 = arith.constant 0 : index
    %c0_17 = arith.constant 0 : index
    %16 = vector.load %arg2[%c1_15, %c0_16, %c0_17] : memref<9x256x256xf32, #tpu.memory_space<vmem>>, vector<1x256x256xf32>
    %17 = vector.shape_cast %16 : vector<1x256x256xf32> to vector<256x256xf32>
    %cst_18 = arith.constant dense<0.000000e+00> : vector<8x256xf32>
    %18 = tpu.matmul %15, %17, %cst_18 {dimension_numbers = #tpu.dot_dimension_numbers<[1], [0], [0], [1], [0, 0, 1, 1], [], []>} : vector<8x256xf32>, vector<256x256xf32>, vector<8x256xf32> -> vector<8x256xf32>
    %19 = arith.addf %12, %18 : vector<8x256xf32>
    %c2 = arith.constant 2 : index
    %c0_19 = arith.constant 0 : index
    %c0_20 = arith.constant 0 : index
    %20 = vector.load %arg8[%c2, %c0_19, %c0_20] : memref<9x8x3xf32, #tpu.memory_space<vmem>>, vector<1x8x3xf32>
    %21 = vector.shape_cast %20 : vector<1x8x3xf32> to vector<8x3xf32>
    %cst_21 = arith.constant dense<0.000000e+00> : vector<8x256xf32>
    %22 = tpu.matmul %21, %1, %cst_21 {dimension_numbers = #tpu.dot_dimension_numbers<[1], [0], [0], [1], [0, 0, 1, 1], [], []>} : vector<8x3xf32>, vector<3x256xf32>, vector<8x256xf32> -> vector<8x256xf32>
    %c2_22 = arith.constant 2 : index
    %c0_23 = arith.constant 0 : index
    %c0_24 = arith.constant 0 : index
    %23 = vector.load %arg2[%c2_22, %c0_23, %c0_24] : memref<9x256x256xf32, #tpu.memory_space<vmem>>, vector<1x256x256xf32>
    %24 = vector.shape_cast %23 : vector<1x256x256xf32> to vector<256x256xf32>
    %cst_25 = arith.constant dense<0.000000e+00> : vector<8x256xf32>
    %25 = tpu.matmul %22, %24, %cst_25 {dimension_numbers = #tpu.dot_dimension_numbers<[1], [0], [0], [1], [0, 0, 1, 1], [], []>} : vector<8x256xf32>, vector<256x256xf32>, vector<8x256xf32> -> vector<8x256xf32>
    %26 = arith.addf %19, %25 : vector<8x256xf32>
    %c3 = arith.constant 3 : index
    %c0_26 = arith.constant 0 : index
    %c0_27 = arith.constant 0 : index
    %27 = vector.load %arg8[%c3, %c0_26, %c0_27] : memref<9x8x3xf32, #tpu.memory_space<vmem>>, vector<1x8x3xf32>
    %28 = vector.shape_cast %27 : vector<1x8x3xf32> to vector<8x3xf32>
    %cst_28 = arith.constant dense<0.000000e+00> : vector<8x256xf32>
    %29 = tpu.matmul %28, %1, %cst_28 {dimension_numbers = #tpu.dot_dimension_numbers<[1], [0], [0], [1], [0, 0, 1, 1], [], []>} : vector<8x3xf32>, vector<3x256xf32>, vector<8x256xf32> -> vector<8x256xf32>
    %c3_29 = arith.constant 3 : index
    %c0_30 = arith.constant 0 : index
    %c0_31 = arith.constant 0 : index
    %30 = vector.load %arg2[%c3_29, %c0_30, %c0_31] : memref<9x256x256xf32, #tpu.memory_space<vmem>>, vector<1x256x256xf32>
    %31 = vector.shape_cast %30 : vector<1x256x256xf32> to vector<256x256xf32>
    %cst_32 = arith.constant dense<0.000000e+00> : vector<8x256xf32>
    %32 = tpu.matmul %29, %31, %cst_32 {dimension_numbers = #tpu.dot_dimension_numbers<[1], [0], [0], [1], [0, 0, 1, 1], [], []>} : vector<8x256xf32>, vector<256x256xf32>, vector<8x256xf32> -> vector<8x256xf32>
    %33 = arith.addf %26, %32 : vector<8x256xf32>
    %c4 = arith.constant 4 : index
    %c0_33 = arith.constant 0 : index
    %c0_34 = arith.constant 0 : index
    %34 = vector.load %arg8[%c4, %c0_33, %c0_34] : memref<9x8x3xf32, #tpu.memory_space<vmem>>, vector<1x8x3xf32>
    %35 = vector.shape_cast %34 : vector<1x8x3xf32> to vector<8x3xf32>
    %cst_35 = arith.constant dense<0.000000e+00> : vector<8x256xf32>
    %36 = tpu.matmul %35, %1, %cst_35 {dimension_numbers = #tpu.dot_dimension_numbers<[1], [0], [0], [1], [0, 0, 1, 1], [], []>} : vector<8x3xf32>, vector<3x256xf32>, vector<8x256xf32> -> vector<8x256xf32>
    %c4_36 = arith.constant 4 : index
    %c0_37 = arith.constant 0 : index
    %c0_38 = arith.constant 0 : index
    %37 = vector.load %arg2[%c4_36, %c0_37, %c0_38] : memref<9x256x256xf32, #tpu.memory_space<vmem>>, vector<1x256x256xf32>
    %38 = vector.shape_cast %37 : vector<1x256x256xf32> to vector<256x256xf32>
    %cst_39 = arith.constant dense<0.000000e+00> : vector<8x256xf32>
    %39 = tpu.matmul %36, %38, %cst_39 {dimension_numbers = #tpu.dot_dimension_numbers<[1], [0], [0], [1], [0, 0, 1, 1], [], []>} : vector<8x256xf32>, vector<256x256xf32>, vector<8x256xf32> -> vector<8x256xf32>
    %40 = arith.addf %33, %39 : vector<8x256xf32>
    %c5 = arith.constant 5 : index
    %c0_40 = arith.constant 0 : index
    %c0_41 = arith.constant 0 : index
    %41 = vector.load %arg8[%c5, %c0_40, %c0_41] : memref<9x8x3xf32, #tpu.memory_space<vmem>>, vector<1x8x3xf32>
    %42 = vector.shape_cast %41 : vector<1x8x3xf32> to vector<8x3xf32>
    %cst_42 = arith.constant dense<0.000000e+00> : vector<8x256xf32>
    %43 = tpu.matmul %42, %1, %cst_42 {dimension_numbers = #tpu.dot_dimension_numbers<[1], [0], [0], [1], [0, 0, 1, 1], [], []>} : vector<8x3xf32>, vector<3x256xf32>, vector<8x256xf32> -> vector<8x256xf32>
    %c5_43 = arith.constant 5 : index
    %c0_44 = arith.constant 0 : index
    %c0_45 = arith.constant 0 : index
    %44 = vector.load %arg2[%c5_43, %c0_44, %c0_45] : memref<9x256x256xf32, #tpu.memory_space<vmem>>, vector<1x256x256xf32>
    %45 = vector.shape_cast %44 : vector<1x256x256xf32> to vector<256x256xf32>
    %cst_46 = arith.constant dense<0.000000e+00> : vector<8x256xf32>
    %46 = tpu.matmul %43, %45, %cst_46 {dimension_numbers = #tpu.dot_dimension_numbers<[1], [0], [0], [1], [0, 0, 1, 1], [], []>} : vector<8x256xf32>, vector<256x256xf32>, vector<8x256xf32> -> vector<8x256xf32>
    %47 = arith.addf %40, %46 : vector<8x256xf32>
    %c6 = arith.constant 6 : index
    %c0_47 = arith.constant 0 : index
    %c0_48 = arith.constant 0 : index
    %48 = vector.load %arg8[%c6, %c0_47, %c0_48] : memref<9x8x3xf32, #tpu.memory_space<vmem>>, vector<1x8x3xf32>
    %49 = vector.shape_cast %48 : vector<1x8x3xf32> to vector<8x3xf32>
    %cst_49 = arith.constant dense<0.000000e+00> : vector<8x256xf32>
    %50 = tpu.matmul %49, %1, %cst_49 {dimension_numbers = #tpu.dot_dimension_numbers<[1], [0], [0], [1], [0, 0, 1, 1], [], []>} : vector<8x3xf32>, vector<3x256xf32>, vector<8x256xf32> -> vector<8x256xf32>
    %c6_50 = arith.constant 6 : index
    %c0_51 = arith.constant 0 : index
    %c0_52 = arith.constant 0 : index
    %51 = vector.load %arg2[%c6_50, %c0_51, %c0_52] : memref<9x256x256xf32, #tpu.memory_space<vmem>>, vector<1x256x256xf32>
    %52 = vector.shape_cast %51 : vector<1x256x256xf32> to vector<256x256xf32>
    %cst_53 = arith.constant dense<0.000000e+00> : vector<8x256xf32>
    %53 = tpu.matmul %50, %52, %cst_53 {dimension_numbers = #tpu.dot_dimension_numbers<[1], [0], [0], [1], [0, 0, 1, 1], [], []>} : vector<8x256xf32>, vector<256x256xf32>, vector<8x256xf32> -> vector<8x256xf32>
    %54 = arith.addf %47, %53 : vector<8x256xf32>
    %c7 = arith.constant 7 : index
    %c0_54 = arith.constant 0 : index
    %c0_55 = arith.constant 0 : index
    %55 = vector.load %arg8[%c7, %c0_54, %c0_55] : memref<9x8x3xf32, #tpu.memory_space<vmem>>, vector<1x8x3xf32>
    %56 = vector.shape_cast %55 : vector<1x8x3xf32> to vector<8x3xf32>
    %cst_56 = arith.constant dense<0.000000e+00> : vector<8x256xf32>
    %57 = tpu.matmul %56, %1, %cst_56 {dimension_numbers = #tpu.dot_dimension_numbers<[1], [0], [0], [1], [0, 0, 1, 1], [], []>} : vector<8x3xf32>, vector<3x256xf32>, vector<8x256xf32> -> vector<8x256xf32>
    %c7_57 = arith.constant 7 : index
    %c0_58 = arith.constant 0 : index
    %c0_59 = arith.constant 0 : index
    %58 = vector.load %arg2[%c7_57, %c0_58, %c0_59] : memref<9x256x256xf32, #tpu.memory_space<vmem>>, vector<1x256x256xf32>
    %59 = vector.shape_cast %58 : vector<1x256x256xf32> to vector<256x256xf32>
    %cst_60 = arith.constant dense<0.000000e+00> : vector<8x256xf32>
    %60 = tpu.matmul %57, %59, %cst_60 {dimension_numbers = #tpu.dot_dimension_numbers<[1], [0], [0], [1], [0, 0, 1, 1], [], []>} : vector<8x256xf32>, vector<256x256xf32>, vector<8x256xf32> -> vector<8x256xf32>
    %61 = arith.addf %54, %60 : vector<8x256xf32>
    %c8 = arith.constant 8 : index
    %c0_61 = arith.constant 0 : index
    %c0_62 = arith.constant 0 : index
    %62 = vector.load %arg8[%c8, %c0_61, %c0_62] : memref<9x8x3xf32, #tpu.memory_space<vmem>>, vector<1x8x3xf32>
    %63 = vector.shape_cast %62 : vector<1x8x3xf32> to vector<8x3xf32>
    %cst_63 = arith.constant dense<0.000000e+00> : vector<8x256xf32>
    %64 = tpu.matmul %63, %1, %cst_63 {dimension_numbers = #tpu.dot_dimension_numbers<[1], [0], [0], [1], [0, 0, 1, 1], [], []>} : vector<8x3xf32>, vector<3x256xf32>, vector<8x256xf32> -> vector<8x256xf32>
    %c8_64 = arith.constant 8 : index
    %c0_65 = arith.constant 0 : index
    %c0_66 = arith.constant 0 : index
    %65 = vector.load %arg2[%c8_64, %c0_65, %c0_66] : memref<9x256x256xf32, #tpu.memory_space<vmem>>, vector<1x256x256xf32>
    %66 = vector.shape_cast %65 : vector<1x256x256xf32> to vector<256x256xf32>
    %cst_67 = arith.constant dense<0.000000e+00> : vector<8x256xf32>
    %67 = tpu.matmul %64, %66, %cst_67 {dimension_numbers = #tpu.dot_dimension_numbers<[1], [0], [0], [1], [0, 0, 1, 1], [], []>} : vector<8x256xf32>, vector<256x256xf32>, vector<8x256xf32> -> vector<8x256xf32>
    %68 = arith.addf %61, %67 : vector<8x256xf32>
    %cst_68 = arith.constant 0.000000e+00 : f32
    %69 = vector.broadcast %cst_68 : f32 to vector<8x256xf32>
    %70 = arith.maximumf %68, %69 : vector<8x256xf32>
    %c0_69 = arith.constant 0 : index
    %c0_70 = arith.constant 0 : index
    %c0_71 = arith.constant 0 : index
    %71 = vector.load %arg4[%c0_69, %c0_70, %c0_71] : memref<4x256x64xf32, #tpu.memory_space<vmem>>, vector<1x256x64xf32>
    %72 = vector.shape_cast %71 : vector<1x256x64xf32> to vector<256x64xf32>
    %cst_72 = arith.constant dense<0.000000e+00> : vector<8x64xf32>
    %73 = tpu.matmul %70, %72, %cst_72 {dimension_numbers = #tpu.dot_dimension_numbers<[1], [0], [0], [1], [0, 0, 1, 1], [], []>} : vector<8x256xf32>, vector<256x64xf32>, vector<8x64xf32> -> vector<8x64xf32>
    %c1_73 = arith.constant 1 : index
    %c0_74 = arith.constant 0 : index
    %c0_75 = arith.constant 0 : index
    %74 = vector.load %arg4[%c1_73, %c0_74, %c0_75] : memref<4x256x64xf32, #tpu.memory_space<vmem>>, vector<1x256x64xf32>
    %75 = vector.shape_cast %74 : vector<1x256x64xf32> to vector<256x64xf32>
    %cst_76 = arith.constant dense<0.000000e+00> : vector<8x64xf32>
    %76 = tpu.matmul %70, %75, %cst_76 {dimension_numbers = #tpu.dot_dimension_numbers<[1], [0], [0], [1], [0, 0, 1, 1], [], []>} : vector<8x256xf32>, vector<256x64xf32>, vector<8x64xf32> -> vector<8x64xf32>
    %c2_77 = arith.constant 2 : index
    %c0_78 = arith.constant 0 : index
    %c0_79 = arith.constant 0 : index
    %77 = vector.load %arg4[%c2_77, %c0_78, %c0_79] : memref<4x256x64xf32, #tpu.memory_space<vmem>>, vector<1x256x64xf32>
    %78 = vector.shape_cast %77 : vector<1x256x64xf32> to vector<256x64xf32>
    %cst_80 = arith.constant dense<0.000000e+00> : vector<8x64xf32>
    %79 = tpu.matmul %70, %78, %cst_80 {dimension_numbers = #tpu.dot_dimension_numbers<[1], [0], [0], [1], [0, 0, 1, 1], [], []>} : vector<8x256xf32>, vector<256x64xf32>, vector<8x64xf32> -> vector<8x64xf32>
    %c3_81 = arith.constant 3 : index
    %c0_82 = arith.constant 0 : index
    %c0_83 = arith.constant 0 : index
    %80 = vector.load %arg4[%c3_81, %c0_82, %c0_83] : memref<4x256x64xf32, #tpu.memory_space<vmem>>, vector<1x256x64xf32>
    %81 = vector.shape_cast %80 : vector<1x256x64xf32> to vector<256x64xf32>
    %cst_84 = arith.constant dense<0.000000e+00> : vector<8x64xf32>
    %82 = tpu.matmul %70, %81, %cst_84 {dimension_numbers = #tpu.dot_dimension_numbers<[1], [0], [0], [1], [0, 0, 1, 1], [], []>} : vector<8x256xf32>, vector<256x64xf32>, vector<8x64xf32> -> vector<8x64xf32>
    %83 = arith.maximumf %73, %76 : vector<8x64xf32>
    %84 = arith.maximumf %79, %82 : vector<8x64xf32>
    %85 = arith.maximumf %83, %84 : vector<8x64xf32>
    %cst_85 = arith.constant 0.000000e+00 : f32
    %86 = vector.broadcast %cst_85 : f32 to vector<4x64xf32>
    %c0_86 = arith.constant 0 : index
    %c0_87 = arith.constant 0 : index
    %87 = vector.load %arg11[%c0_86, %c0_87] : memref<4x1xf32, #tpu.memory_space<vmem>>, vector<4x1xf32>
    %88 = vector.broadcast %87 : vector<4x1xf32> to vector<4x64xf32>
    %89 = arith.addf %86, %88 : vector<4x64xf32>
    %c0_88 = arith.constant 0 : index
    %c0_89 = arith.constant 0 : index
    %c0_90 = arith.constant 0 : index
    %90 = vector.load %arg10[%c0_88, %c0_89, %c0_90] : memref<9x4x8xf32, #tpu.memory_space<vmem>>, vector<1x4x8xf32>
    %91 = vector.shape_cast %90 : vector<1x4x8xf32> to vector<4x8xf32>
    %cst_91 = arith.constant dense<0.000000e+00> : vector<4x64xf32>
    %92 = tpu.matmul %91, %85, %cst_91 {dimension_numbers = #tpu.dot_dimension_numbers<[1], [0], [0], [1], [0, 0, 1, 1], [], []>} : vector<4x8xf32>, vector<8x64xf32>, vector<4x64xf32> -> vector<4x64xf32>
    %c0_92 = arith.constant 0 : index
    %c0_93 = arith.constant 0 : index
    %c0_94 = arith.constant 0 : index
    %93 = vector.load %arg3[%c0_92, %c0_93, %c0_94] : memref<9x64x64xf32, #tpu.memory_space<vmem>>, vector<1x64x64xf32>
    %94 = vector.shape_cast %93 : vector<1x64x64xf32> to vector<64x64xf32>
    %cst_95 = arith.constant dense<0.000000e+00> : vector<4x64xf32>
    %95 = tpu.matmul %92, %94, %cst_95 {dimension_numbers = #tpu.dot_dimension_numbers<[1], [0], [0], [1], [0, 0, 1, 1], [], []>} : vector<4x64xf32>, vector<64x64xf32>, vector<4x64xf32> -> vector<4x64xf32>
    %96 = arith.addf %89, %95 : vector<4x64xf32>
    %c1_96 = arith.constant 1 : index
    %c0_97 = arith.constant 0 : index
    %c0_98 = arith.constant 0 : index
    %97 = vector.load %arg10[%c1_96, %c0_97, %c0_98] : memref<9x4x8xf32, #tpu.memory_space<vmem>>, vector<1x4x8xf32>
    %98 = vector.shape_cast %97 : vector<1x4x8xf32> to vector<4x8xf32>
    %cst_99 = arith.constant dense<0.000000e+00> : vector<4x64xf32>
    %99 = tpu.matmul %98, %85, %cst_99 {dimension_numbers = #tpu.dot_dimension_numbers<[1], [0], [0], [1], [0, 0, 1, 1], [], []>} : vector<4x8xf32>, vector<8x64xf32>, vector<4x64xf32> -> vector<4x64xf32>
    %c1_100 = arith.constant 1 : index
    %c0_101 = arith.constant 0 : index
    %c0_102 = arith.constant 0 : index
    %100 = vector.load %arg3[%c1_100, %c0_101, %c0_102] : memref<9x64x64xf32, #tpu.memory_space<vmem>>, vector<1x64x64xf32>
    %101 = vector.shape_cast %100 : vector<1x64x64xf32> to vector<64x64xf32>
    %cst_103 = arith.constant dense<0.000000e+00> : vector<4x64xf32>
    %102 = tpu.matmul %99, %101, %cst_103 {dimension_numbers = #tpu.dot_dimension_numbers<[1], [0], [0], [1], [0, 0, 1, 1], [], []>} : vector<4x64xf32>, vector<64x64xf32>, vector<4x64xf32> -> vector<4x64xf32>
    %103 = arith.addf %96, %102 : vector<4x64xf32>
    %c2_104 = arith.constant 2 : index
    %c0_105 = arith.constant 0 : index
    %c0_106 = arith.constant 0 : index
    %104 = vector.load %arg10[%c2_104, %c0_105, %c0_106] : memref<9x4x8xf32, #tpu.memory_space<vmem>>, vector<1x4x8xf32>
    %105 = vector.shape_cast %104 : vector<1x4x8xf32> to vector<4x8xf32>
    %cst_107 = arith.constant dense<0.000000e+00> : vector<4x64xf32>
    %106 = tpu.matmul %105, %85, %cst_107 {dimension_numbers = #tpu.dot_dimension_numbers<[1], [0], [0], [1], [0, 0, 1, 1], [], []>} : vector<4x8xf32>, vector<8x64xf32>, vector<4x64xf32> -> vector<4x64xf32>
    %c2_108 = arith.constant 2 : index
    %c0_109 = arith.constant 0 : index
    %c0_110 = arith.constant 0 : index
    %107 = vector.load %arg3[%c2_108, %c0_109, %c0_110] : memref<9x64x64xf32, #tpu.memory_space<vmem>>, vector<1x64x64xf32>
    %108 = vector.shape_cast %107 : vector<1x64x64xf32> to vector<64x64xf32>
    %cst_111 = arith.constant dense<0.000000e+00> : vector<4x64xf32>
    %109 = tpu.matmul %106, %108, %cst_111 {dimension_numbers = #tpu.dot_dimension_numbers<[1], [0], [0], [1], [0, 0, 1, 1], [], []>} : vector<4x64xf32>, vector<64x64xf32>, vector<4x64xf32> -> vector<4x64xf32>
    %110 = arith.addf %103, %109 : vector<4x64xf32>
    %c3_112 = arith.constant 3 : index
    %c0_113 = arith.constant 0 : index
    %c0_114 = arith.constant 0 : index
    %111 = vector.load %arg10[%c3_112, %c0_113, %c0_114] : memref<9x4x8xf32, #tpu.memory_space<vmem>>, vector<1x4x8xf32>
    %112 = vector.shape_cast %111 : vector<1x4x8xf32> to vector<4x8xf32>
    %cst_115 = arith.constant dense<0.000000e+00> : vector<4x64xf32>
    %113 = tpu.matmul %112, %85, %cst_115 {dimension_numbers = #tpu.dot_dimension_numbers<[1], [0], [0], [1], [0, 0, 1, 1], [], []>} : vector<4x8xf32>, vector<8x64xf32>, vector<4x64xf32> -> vector<4x64xf32>
    %c3_116 = arith.constant 3 : index
    %c0_117 = arith.constant 0 : index
    %c0_118 = arith.constant 0 : index
    %114 = vector.load %arg3[%c3_116, %c0_117, %c0_118] : memref<9x64x64xf32, #tpu.memory_space<vmem>>, vector<1x64x64xf32>
    %115 = vector.shape_cast %114 : vector<1x64x64xf32> to vector<64x64xf32>
    %cst_119 = arith.constant dense<0.000000e+00> : vector<4x64xf32>
    %116 = tpu.matmul %113, %115, %cst_119 {dimension_numbers = #tpu.dot_dimension_numbers<[1], [0], [0], [1], [0, 0, 1, 1], [], []>} : vector<4x64xf32>, vector<64x64xf32>, vector<4x64xf32> -> vector<4x64xf32>
    %117 = arith.addf %110, %116 : vector<4x64xf32>
    %c4_120 = arith.constant 4 : index
    %c0_121 = arith.constant 0 : index
    %c0_122 = arith.constant 0 : index
    %118 = vector.load %arg10[%c4_120, %c0_121, %c0_122] : memref<9x4x8xf32, #tpu.memory_space<vmem>>, vector<1x4x8xf32>
    %119 = vector.shape_cast %118 : vector<1x4x8xf32> to vector<4x8xf32>
    %cst_123 = arith.constant dense<0.000000e+00> : vector<4x64xf32>
    %120 = tpu.matmul %119, %85, %cst_123 {dimension_numbers = #tpu.dot_dimension_numbers<[1], [0], [0], [1], [0, 0, 1, 1], [], []>} : vector<4x8xf32>, vector<8x64xf32>, vector<4x64xf32> -> vector<4x64xf32>
    %c4_124 = arith.constant 4 : index
    %c0_125 = arith.constant 0 : index
    %c0_126 = arith.constant 0 : index
    %121 = vector.load %arg3[%c4_124, %c0_125, %c0_126] : memref<9x64x64xf32, #tpu.memory_space<vmem>>, vector<1x64x64xf32>
    %122 = vector.shape_cast %121 : vector<1x64x64xf32> to vector<64x64xf32>
    %cst_127 = arith.constant dense<0.000000e+00> : vector<4x64xf32>
    %123 = tpu.matmul %120, %122, %cst_127 {dimension_numbers = #tpu.dot_dimension_numbers<[1], [0], [0], [1], [0, 0, 1, 1], [], []>} : vector<4x64xf32>, vector<64x64xf32>, vector<4x64xf32> -> vector<4x64xf32>
    %124 = arith.addf %117, %123 : vector<4x64xf32>
    %c5_128 = arith.constant 5 : index
    %c0_129 = arith.constant 0 : index
    %c0_130 = arith.constant 0 : index
    %125 = vector.load %arg10[%c5_128, %c0_129, %c0_130] : memref<9x4x8xf32, #tpu.memory_space<vmem>>, vector<1x4x8xf32>
    %126 = vector.shape_cast %125 : vector<1x4x8xf32> to vector<4x8xf32>
    %cst_131 = arith.constant dense<0.000000e+00> : vector<4x64xf32>
    %127 = tpu.matmul %126, %85, %cst_131 {dimension_numbers = #tpu.dot_dimension_numbers<[1], [0], [0], [1], [0, 0, 1, 1], [], []>} : vector<4x8xf32>, vector<8x64xf32>, vector<4x64xf32> -> vector<4x64xf32>
    %c5_132 = arith.constant 5 : index
    %c0_133 = arith.constant 0 : index
    %c0_134 = arith.constant 0 : index
    %128 = vector.load %arg3[%c5_132, %c0_133, %c0_134] : memref<9x64x64xf32, #tpu.memory_space<vmem>>, vector<1x64x64xf32>
    %129 = vector.shape_cast %128 : vector<1x64x64xf32> to vector<64x64xf32>
    %cst_135 = arith.constant dense<0.000000e+00> : vector<4x64xf32>
    %130 = tpu.matmul %127, %129, %cst_135 {dimension_numbers = #tpu.dot_dimension_numbers<[1], [0], [0], [1], [0, 0, 1, 1], [], []>} : vector<4x64xf32>, vector<64x64xf32>, vector<4x64xf32> -> vector<4x64xf32>
    %131 = arith.addf %124, %130 : vector<4x64xf32>
    %c6_136 = arith.constant 6 : index
    %c0_137 = arith.constant 0 : index
    %c0_138 = arith.constant 0 : index
    %132 = vector.load %arg10[%c6_136, %c0_137, %c0_138] : memref<9x4x8xf32, #tpu.memory_space<vmem>>, vector<1x4x8xf32>
    %133 = vector.shape_cast %132 : vector<1x4x8xf32> to vector<4x8xf32>
    %cst_139 = arith.constant dense<0.000000e+00> : vector<4x64xf32>
    %134 = tpu.matmul %133, %85, %cst_139 {dimension_numbers = #tpu.dot_dimension_numbers<[1], [0], [0], [1], [0, 0, 1, 1], [], []>} : vector<4x8xf32>, vector<8x64xf32>, vector<4x64xf32> -> vector<4x64xf32>
    %c6_140 = arith.constant 6 : index
    %c0_141 = arith.constant 0 : index
    %c0_142 = arith.constant 0 : index
    %135 = vector.load %arg3[%c6_140, %c0_141, %c0_142] : memref<9x64x64xf32, #tpu.memory_space<vmem>>, vector<1x64x64xf32>
    %136 = vector.shape_cast %135 : vector<1x64x64xf32> to vector<64x64xf32>
    %cst_143 = arith.constant dense<0.000000e+00> : vector<4x64xf32>
    %137 = tpu.matmul %134, %136, %cst_143 {dimension_numbers = #tpu.dot_dimension_numbers<[1], [0], [0], [1], [0, 0, 1, 1], [], []>} : vector<4x64xf32>, vector<64x64xf32>, vector<4x64xf32> -> vector<4x64xf32>
    %138 = arith.addf %131, %137 : vector<4x64xf32>
    %c7_144 = arith.constant 7 : index
    %c0_145 = arith.constant 0 : index
    %c0_146 = arith.constant 0 : index
    %139 = vector.load %arg10[%c7_144, %c0_145, %c0_146] : memref<9x4x8xf32, #tpu.memory_space<vmem>>, vector<1x4x8xf32>
    %140 = vector.shape_cast %139 : vector<1x4x8xf32> to vector<4x8xf32>
    %cst_147 = arith.constant dense<0.000000e+00> : vector<4x64xf32>
    %141 = tpu.matmul %140, %85, %cst_147 {dimension_numbers = #tpu.dot_dimension_numbers<[1], [0], [0], [1], [0, 0, 1, 1], [], []>} : vector<4x8xf32>, vector<8x64xf32>, vector<4x64xf32> -> vector<4x64xf32>
    %c7_148 = arith.constant 7 : index
    %c0_149 = arith.constant 0 : index
    %c0_150 = arith.constant 0 : index
    %142 = vector.load %arg3[%c7_148, %c0_149, %c0_150] : memref<9x64x64xf32, #tpu.memory_space<vmem>>, vector<1x64x64xf32>
    %143 = vector.shape_cast %142 : vector<1x64x64xf32> to vector<64x64xf32>
    %cst_151 = arith.constant dense<0.000000e+00> : vector<4x64xf32>
    %144 = tpu.matmul %141, %143, %cst_151 {dimension_numbers = #tpu.dot_dimension_numbers<[1], [0], [0], [1], [0, 0, 1, 1], [], []>} : vector<4x64xf32>, vector<64x64xf32>, vector<4x64xf32> -> vector<4x64xf32>
    %145 = arith.addf %138, %144 : vector<4x64xf32>
    %c8_152 = arith.constant 8 : index
    %c0_153 = arith.constant 0 : index
    %c0_154 = arith.constant 0 : index
    %146 = vector.load %arg10[%c8_152, %c0_153, %c0_154] : memref<9x4x8xf32, #tpu.memory_space<vmem>>, vector<1x4x8xf32>
    %147 = vector.shape_cast %146 : vector<1x4x8xf32> to vector<4x8xf32>
    %cst_155 = arith.constant dense<0.000000e+00> : vector<4x64xf32>
    %148 = tpu.matmul %147, %85, %cst_155 {dimension_numbers = #tpu.dot_dimension_numbers<[1], [0], [0], [1], [0, 0, 1, 1], [], []>} : vector<4x8xf32>, vector<8x64xf32>, vector<4x64xf32> -> vector<4x64xf32>
    %c8_156 = arith.constant 8 : index
    %c0_157 = arith.constant 0 : index
    %c0_158 = arith.constant 0 : index
    %149 = vector.load %arg3[%c8_156, %c0_157, %c0_158] : memref<9x64x64xf32, #tpu.memory_space<vmem>>, vector<1x64x64xf32>
    %150 = vector.shape_cast %149 : vector<1x64x64xf32> to vector<64x64xf32>
    %cst_159 = arith.constant dense<0.000000e+00> : vector<4x64xf32>
    %151 = tpu.matmul %148, %150, %cst_159 {dimension_numbers = #tpu.dot_dimension_numbers<[1], [0], [0], [1], [0, 0, 1, 1], [], []>} : vector<4x64xf32>, vector<64x64xf32>, vector<4x64xf32> -> vector<4x64xf32>
    %152 = arith.addf %145, %151 : vector<4x64xf32>
    %cst_160 = arith.constant 0.000000e+00 : f32
    %153 = vector.broadcast %cst_160 : f32 to vector<4x64xf32>
    %154 = arith.maximumf %152, %153 : vector<4x64xf32>
    %c0_161 = arith.constant 0 : index
    %c0_162 = arith.constant 0 : index
    %c0_163 = arith.constant 0 : index
    %155 = vector.load %arg5[%c0_161, %c0_162, %c0_163] : memref<4x64x16xf32, #tpu.memory_space<vmem>>, vector<1x64x16xf32>
    %156 = vector.shape_cast %155 : vector<1x64x16xf32> to vector<64x16xf32>
    %cst_164 = arith.constant dense<0.000000e+00> : vector<4x16xf32>
    %157 = tpu.matmul %154, %156, %cst_164 {dimension_numbers = #tpu.dot_dimension_numbers<[1], [0], [0], [1], [0, 0, 1, 1], [], []>} : vector<4x64xf32>, vector<64x16xf32>, vector<4x16xf32> -> vector<4x16xf32>
    %c1_165 = arith.constant 1 : index
    %c0_166 = arith.constant 0 : index
    %c0_167 = arith.constant 0 : index
    %158 = vector.load %arg5[%c1_165, %c0_166, %c0_167] : memref<4x64x16xf32, #tpu.memory_space<vmem>>, vector<1x64x16xf32>
    %159 = vector.shape_cast %158 : vector<1x64x16xf32> to vector<64x16xf32>
    %cst_168 = arith.constant dense<0.000000e+00> : vector<4x16xf32>
    %160 = tpu.matmul %154, %159, %cst_168 {dimension_numbers = #tpu.dot_dimension_numbers<[1], [0], [0], [1], [0, 0, 1, 1], [], []>} : vector<4x64xf32>, vector<64x16xf32>, vector<4x16xf32> -> vector<4x16xf32>
    %c2_169 = arith.constant 2 : index
    %c0_170 = arith.constant 0 : index
    %c0_171 = arith.constant 0 : index
    %161 = vector.load %arg5[%c2_169, %c0_170, %c0_171] : memref<4x64x16xf32, #tpu.memory_space<vmem>>, vector<1x64x16xf32>
    %162 = vector.shape_cast %161 : vector<1x64x16xf32> to vector<64x16xf32>
    %cst_172 = arith.constant dense<0.000000e+00> : vector<4x16xf32>
    %163 = tpu.matmul %154, %162, %cst_172 {dimension_numbers = #tpu.dot_dimension_numbers<[1], [0], [0], [1], [0, 0, 1, 1], [], []>} : vector<4x64xf32>, vector<64x16xf32>, vector<4x16xf32> -> vector<4x16xf32>
    %c3_173 = arith.constant 3 : index
    %c0_174 = arith.constant 0 : index
    %c0_175 = arith.constant 0 : index
    %164 = vector.load %arg5[%c3_173, %c0_174, %c0_175] : memref<4x64x16xf32, #tpu.memory_space<vmem>>, vector<1x64x16xf32>
    %165 = vector.shape_cast %164 : vector<1x64x16xf32> to vector<64x16xf32>
    %cst_176 = arith.constant dense<0.000000e+00> : vector<4x16xf32>
    %166 = tpu.matmul %154, %165, %cst_176 {dimension_numbers = #tpu.dot_dimension_numbers<[1], [0], [0], [1], [0, 0, 1, 1], [], []>} : vector<4x64xf32>, vector<64x16xf32>, vector<4x16xf32> -> vector<4x16xf32>
    %167 = arith.maximumf %157, %160 : vector<4x16xf32>
    %168 = arith.maximumf %163, %166 : vector<4x16xf32>
    %169 = arith.maximumf %167, %168 : vector<4x16xf32>
    %c0_177 = arith.constant 0 : index
    %c0_178 = arith.constant 0 : index
    %170 = vector.load %arg6[%c0_177, %c0_178] : memref<16x64xf32, #tpu.memory_space<vmem>>, vector<16x64xf32>
    %cst_179 = arith.constant dense<0.000000e+00> : vector<4x64xf32>
    %171 = tpu.matmul %169, %170, %cst_179 {dimension_numbers = #tpu.dot_dimension_numbers<[1], [0], [0], [1], [0, 0, 1, 1], [], []>} : vector<4x16xf32>, vector<16x64xf32>, vector<4x64xf32> -> vector<4x64xf32>
    %cst_180 = arith.constant 0.000000e+00 : f32
    %172 = vector.broadcast %cst_180 : f32 to vector<8x64xf32>
    %c0_181 = arith.constant 0 : index
    %c0_182 = arith.constant 0 : index
    %173 = vector.load %arg13[%c0_181, %c0_182] : memref<8x1xf32, #tpu.memory_space<vmem>>, vector<8x1xf32>
    %174 = vector.broadcast %173 : vector<8x1xf32> to vector<8x64xf32>
    %175 = arith.addf %172, %174 : vector<8x64xf32>
    %c0_183 = arith.constant 0 : index
    %c0_184 = arith.constant 0 : index
    %c0_185 = arith.constant 0 : index
    %176 = vector.load %arg12[%c0_183, %c0_184, %c0_185] : memref<9x8x4xf32, #tpu.memory_space<vmem>>, vector<1x8x4xf32>
    %177 = vector.shape_cast %176 : vector<1x8x4xf32> to vector<8x4xf32>
    %cst_186 = arith.constant dense<0.000000e+00> : vector<8x64xf32>
    %178 = tpu.matmul %177, %171, %cst_186 {dimension_numbers = #tpu.dot_dimension_numbers<[1], [0], [0], [1], [0, 0, 1, 1], [], []>} : vector<8x4xf32>, vector<4x64xf32>, vector<8x64xf32> -> vector<8x64xf32>
    %c0_187 = arith.constant 0 : index
    %c0_188 = arith.constant 0 : index
    %c0_189 = arith.constant 0 : index
    %179 = vector.load %arg3[%c0_187, %c0_188, %c0_189] : memref<9x64x64xf32, #tpu.memory_space<vmem>>, vector<1x64x64xf32>
    %180 = vector.shape_cast %179 : vector<1x64x64xf32> to vector<64x64xf32>
    %cst_190 = arith.constant dense<0.000000e+00> : vector<8x64xf32>
    %181 = tpu.matmul %178, %180, %cst_190 {dimension_numbers = #tpu.dot_dimension_numbers<[1], [0], [0], [1], [0, 0, 1, 1], [], []>} : vector<8x64xf32>, vector<64x64xf32>, vector<8x64xf32> -> vector<8x64xf32>
    %182 = arith.addf %175, %181 : vector<8x64xf32>
    %c1_191 = arith.constant 1 : index
    %c0_192 = arith.constant 0 : index
    %c0_193 = arith.constant 0 : index
    %183 = vector.load %arg12[%c1_191, %c0_192, %c0_193] : memref<9x8x4xf32, #tpu.memory_space<vmem>>, vector<1x8x4xf32>
    %184 = vector.shape_cast %183 : vector<1x8x4xf32> to vector<8x4xf32>
    %cst_194 = arith.constant dense<0.000000e+00> : vector<8x64xf32>
    %185 = tpu.matmul %184, %171, %cst_194 {dimension_numbers = #tpu.dot_dimension_numbers<[1], [0], [0], [1], [0, 0, 1, 1], [], []>} : vector<8x4xf32>, vector<4x64xf32>, vector<8x64xf32> -> vector<8x64xf32>
    %c1_195 = arith.constant 1 : index
    %c0_196 = arith.constant 0 : index
    %c0_197 = arith.constant 0 : index
    %186 = vector.load %arg3[%c1_195, %c0_196, %c0_197] : memref<9x64x64xf32, #tpu.memory_space<vmem>>, vector<1x64x64xf32>
    %187 = vector.shape_cast %186 : vector<1x64x64xf32> to vector<64x64xf32>
    %cst_198 = arith.constant dense<0.000000e+00> : vector<8x64xf32>
    %188 = tpu.matmul %185, %187, %cst_198 {dimension_numbers = #tpu.dot_dimension_numbers<[1], [0], [0], [1], [0, 0, 1, 1], [], []>} : vector<8x64xf32>, vector<64x64xf32>, vector<8x64xf32> -> vector<8x64xf32>
    %189 = arith.addf %182, %188 : vector<8x64xf32>
    %c2_199 = arith.constant 2 : index
    %c0_200 = arith.constant 0 : index
    %c0_201 = arith.constant 0 : index
    %190 = vector.load %arg12[%c2_199, %c0_200, %c0_201] : memref<9x8x4xf32, #tpu.memory_space<vmem>>, vector<1x8x4xf32>
    %191 = vector.shape_cast %190 : vector<1x8x4xf32> to vector<8x4xf32>
    %cst_202 = arith.constant dense<0.000000e+00> : vector<8x64xf32>
    %192 = tpu.matmul %191, %171, %cst_202 {dimension_numbers = #tpu.dot_dimension_numbers<[1], [0], [0], [1], [0, 0, 1, 1], [], []>} : vector<8x4xf32>, vector<4x64xf32>, vector<8x64xf32> -> vector<8x64xf32>
    %c2_203 = arith.constant 2 : index
    %c0_204 = arith.constant 0 : index
    %c0_205 = arith.constant 0 : index
    %193 = vector.load %arg3[%c2_203, %c0_204, %c0_205] : memref<9x64x64xf32, #tpu.memory_space<vmem>>, vector<1x64x64xf32>
    %194 = vector.shape_cast %193 : vector<1x64x64xf32> to vector<64x64xf32>
    %cst_206 = arith.constant dense<0.000000e+00> : vector<8x64xf32>
    %195 = tpu.matmul %192, %194, %cst_206 {dimension_numbers = #tpu.dot_dimension_numbers<[1], [0], [0], [1], [0, 0, 1, 1], [], []>} : vector<8x64xf32>, vector<64x64xf32>, vector<8x64xf32> -> vector<8x64xf32>
    %196 = arith.addf %189, %195 : vector<8x64xf32>
    %c3_207 = arith.constant 3 : index
    %c0_208 = arith.constant 0 : index
    %c0_209 = arith.constant 0 : index
    %197 = vector.load %arg12[%c3_207, %c0_208, %c0_209] : memref<9x8x4xf32, #tpu.memory_space<vmem>>, vector<1x8x4xf32>
    %198 = vector.shape_cast %197 : vector<1x8x4xf32> to vector<8x4xf32>
    %cst_210 = arith.constant dense<0.000000e+00> : vector<8x64xf32>
    %199 = tpu.matmul %198, %171, %cst_210 {dimension_numbers = #tpu.dot_dimension_numbers<[1], [0], [0], [1], [0, 0, 1, 1], [], []>} : vector<8x4xf32>, vector<4x64xf32>, vector<8x64xf32> -> vector<8x64xf32>
    %c3_211 = arith.constant 3 : index
    %c0_212 = arith.constant 0 : index
    %c0_213 = arith.constant 0 : index
    %200 = vector.load %arg3[%c3_211, %c0_212, %c0_213] : memref<9x64x64xf32, #tpu.memory_space<vmem>>, vector<1x64x64xf32>
    %201 = vector.shape_cast %200 : vector<1x64x64xf32> to vector<64x64xf32>
    %cst_214 = arith.constant dense<0.000000e+00> : vector<8x64xf32>
    %202 = tpu.matmul %199, %201, %cst_214 {dimension_numbers = #tpu.dot_dimension_numbers<[1], [0], [0], [1], [0, 0, 1, 1], [], []>} : vector<8x64xf32>, vector<64x64xf32>, vector<8x64xf32> -> vector<8x64xf32>
    %203 = arith.addf %196, %202 : vector<8x64xf32>
    %c4_215 = arith.constant 4 : index
    %c0_216 = arith.constant 0 : index
    %c0_217 = arith.constant 0 : index
    %204 = vector.load %arg12[%c4_215, %c0_216, %c0_217] : memref<9x8x4xf32, #tpu.memory_space<vmem>>, vector<1x8x4xf32>
    %205 = vector.shape_cast %204 : vector<1x8x4xf32> to vector<8x4xf32>
    %cst_218 = arith.constant dense<0.000000e+00> : vector<8x64xf32>
    %206 = tpu.matmul %205, %171, %cst_218 {dimension_numbers = #tpu.dot_dimension_numbers<[1], [0], [0], [1], [0, 0, 1, 1], [], []>} : vector<8x4xf32>, vector<4x64xf32>, vector<8x64xf32> -> vector<8x64xf32>
    %c4_219 = arith.constant 4 : index
    %c0_220 = arith.constant 0 : index
    %c0_221 = arith.constant 0 : index
    %207 = vector.load %arg3[%c4_219, %c0_220, %c0_221] : memref<9x64x64xf32, #tpu.memory_space<vmem>>, vector<1x64x64xf32>
    %208 = vector.shape_cast %207 : vector<1x64x64xf32> to vector<64x64xf32>
    %cst_222 = arith.constant dense<0.000000e+00> : vector<8x64xf32>
    %209 = tpu.matmul %206, %208, %cst_222 {dimension_numbers = #tpu.dot_dimension_numbers<[1], [0], [0], [1], [0, 0, 1, 1], [], []>} : vector<8x64xf32>, vector<64x64xf32>, vector<8x64xf32> -> vector<8x64xf32>
    %210 = arith.addf %203, %209 : vector<8x64xf32>
    %c5_223 = arith.constant 5 : index
    %c0_224 = arith.constant 0 : index
    %c0_225 = arith.constant 0 : index
    %211 = vector.load %arg12[%c5_223, %c0_224, %c0_225] : memref<9x8x4xf32, #tpu.memory_space<vmem>>, vector<1x8x4xf32>
    %212 = vector.shape_cast %211 : vector<1x8x4xf32> to vector<8x4xf32>
    %cst_226 = arith.constant dense<0.000000e+00> : vector<8x64xf32>
    %213 = tpu.matmul %212, %171, %cst_226 {dimension_numbers = #tpu.dot_dimension_numbers<[1], [0], [0], [1], [0, 0, 1, 1], [], []>} : vector<8x4xf32>, vector<4x64xf32>, vector<8x64xf32> -> vector<8x64xf32>
    %c5_227 = arith.constant 5 : index
    %c0_228 = arith.constant 0 : index
    %c0_229 = arith.constant 0 : index
    %214 = vector.load %arg3[%c5_227, %c0_228, %c0_229] : memref<9x64x64xf32, #tpu.memory_space<vmem>>, vector<1x64x64xf32>
    %215 = vector.shape_cast %214 : vector<1x64x64xf32> to vector<64x64xf32>
    %cst_230 = arith.constant dense<0.000000e+00> : vector<8x64xf32>
    %216 = tpu.matmul %213, %215, %cst_230 {dimension_numbers = #tpu.dot_dimension_numbers<[1], [0], [0], [1], [0, 0, 1, 1], [], []>} : vector<8x64xf32>, vector<64x64xf32>, vector<8x64xf32> -> vector<8x64xf32>
    %217 = arith.addf %210, %216 : vector<8x64xf32>
    %c6_231 = arith.constant 6 : index
    %c0_232 = arith.constant 0 : index
    %c0_233 = arith.constant 0 : index
    %218 = vector.load %arg12[%c6_231, %c0_232, %c0_233] : memref<9x8x4xf32, #tpu.memory_space<vmem>>, vector<1x8x4xf32>
    %219 = vector.shape_cast %218 : vector<1x8x4xf32> to vector<8x4xf32>
    %cst_234 = arith.constant dense<0.000000e+00> : vector<8x64xf32>
    %220 = tpu.matmul %219, %171, %cst_234 {dimension_numbers = #tpu.dot_dimension_numbers<[1], [0], [0], [1], [0, 0, 1, 1], [], []>} : vector<8x4xf32>, vector<4x64xf32>, vector<8x64xf32> -> vector<8x64xf32>
    %c6_235 = arith.constant 6 : index
    %c0_236 = arith.constant 0 : index
    %c0_237 = arith.constant 0 : index
    %221 = vector.load %arg3[%c6_235, %c0_236, %c0_237] : memref<9x64x64xf32, #tpu.memory_space<vmem>>, vector<1x64x64xf32>
    %222 = vector.shape_cast %221 : vector<1x64x64xf32> to vector<64x64xf32>
    %cst_238 = arith.constant dense<0.000000e+00> : vector<8x64xf32>
    %223 = tpu.matmul %220, %222, %cst_238 {dimension_numbers = #tpu.dot_dimension_numbers<[1], [0], [0], [1], [0, 0, 1, 1], [], []>} : vector<8x64xf32>, vector<64x64xf32>, vector<8x64xf32> -> vector<8x64xf32>
    %224 = arith.addf %217, %223 : vector<8x64xf32>
    %c7_239 = arith.constant 7 : index
    %c0_240 = arith.constant 0 : index
    %c0_241 = arith.constant 0 : index
    %225 = vector.load %arg12[%c7_239, %c0_240, %c0_241] : memref<9x8x4xf32, #tpu.memory_space<vmem>>, vector<1x8x4xf32>
    %226 = vector.shape_cast %225 : vector<1x8x4xf32> to vector<8x4xf32>
    %cst_242 = arith.constant dense<0.000000e+00> : vector<8x64xf32>
    %227 = tpu.matmul %226, %171, %cst_242 {dimension_numbers = #tpu.dot_dimension_numbers<[1], [0], [0], [1], [0, 0, 1, 1], [], []>} : vector<8x4xf32>, vector<4x64xf32>, vector<8x64xf32> -> vector<8x64xf32>
    %c7_243 = arith.constant 7 : index
    %c0_244 = arith.constant 0 : index
    %c0_245 = arith.constant 0 : index
    %228 = vector.load %arg3[%c7_243, %c0_244, %c0_245] : memref<9x64x64xf32, #tpu.memory_space<vmem>>, vector<1x64x64xf32>
    %229 = vector.shape_cast %228 : vector<1x64x64xf32> to vector<64x64xf32>
    %cst_246 = arith.constant dense<0.000000e+00> : vector<8x64xf32>
    %230 = tpu.matmul %227, %229, %cst_246 {dimension_numbers = #tpu.dot_dimension_numbers<[1], [0], [0], [1], [0, 0, 1, 1], [], []>} : vector<8x64xf32>, vector<64x64xf32>, vector<8x64xf32> -> vector<8x64xf32>
    %231 = arith.addf %224, %230 : vector<8x64xf32>
    %c8_247 = arith.constant 8 : index
    %c0_248 = arith.constant 0 : index
    %c0_249 = arith.constant 0 : index
    %232 = vector.load %arg12[%c8_247, %c0_248, %c0_249] : memref<9x8x4xf32, #tpu.memory_space<vmem>>, vector<1x8x4xf32>
    %233 = vector.shape_cast %232 : vector<1x8x4xf32> to vector<8x4xf32>
    %cst_250 = arith.constant dense<0.000000e+00> : vector<8x64xf32>
    %234 = tpu.matmul %233, %171, %cst_250 {dimension_numbers = #tpu.dot_dimension_numbers<[1], [0], [0], [1], [0, 0, 1, 1], [], []>} : vector<8x4xf32>, vector<4x64xf32>, vector<8x64xf32> -> vector<8x64xf32>
    %c8_251 = arith.constant 8 : index
    %c0_252 = arith.constant 0 : index
    %c0_253 = arith.constant 0 : index
    %235 = vector.load %arg3[%c8_251, %c0_252, %c0_253] : memref<9x64x64xf32, #tpu.memory_space<vmem>>, vector<1x64x64xf32>
    %236 = vector.shape_cast %235 : vector<1x64x64xf32> to vector<64x64xf32>
    %cst_254 = arith.constant dense<0.000000e+00> : vector<8x64xf32>
    %237 = tpu.matmul %234, %236, %cst_254 {dimension_numbers = #tpu.dot_dimension_numbers<[1], [0], [0], [1], [0, 0, 1, 1], [], []>} : vector<8x64xf32>, vector<64x64xf32>, vector<8x64xf32> -> vector<8x64xf32>
    %238 = arith.addf %231, %237 : vector<8x64xf32>
    %cst_255 = arith.constant 0.000000e+00 : f32
    %239 = vector.broadcast %cst_255 : f32 to vector<8x64xf32>
    %240 = arith.maximumf %238, %239 : vector<8x64xf32>
    %c0_256 = arith.constant 0 : index
    %c0_257 = arith.constant 0 : index
    %241 = vector.load %arg7[%c0_256, %c0_257] : memref<64x256xf32, #tpu.memory_space<vmem>>, vector<64x256xf32>
    %cst_258 = arith.constant dense<0.000000e+00> : vector<8x256xf32>
    %242 = tpu.matmul %240, %241, %cst_258 {dimension_numbers = #tpu.dot_dimension_numbers<[1], [0], [0], [1], [0, 0, 1, 1], [], []>} : vector<8x64xf32>, vector<64x256xf32>, vector<8x256xf32> -> vector<8x256xf32>
    %cst_259 = arith.constant 0.000000e+00 : f32
    %243 = vector.broadcast %cst_259 : f32 to vector<1x256xf32>
    %c0_260 = arith.constant 0 : index
    %c0_261 = arith.constant 0 : index
    %244 = vector.load %arg15[%c0_260, %c0_261] : memref<1x1xf32, #tpu.memory_space<vmem>>, vector<1x1xf32>
    %245 = vector.broadcast %244 : vector<1x1xf32> to vector<1x256xf32>
    %246 = arith.addf %243, %245 : vector<1x256xf32>
    %c0_262 = arith.constant 0 : index
    %c0_263 = arith.constant 0 : index
    %c0_264 = arith.constant 0 : index
    %247 = vector.load %arg14[%c0_262, %c0_263, %c0_264] : memref<9x1x8xf32, #tpu.memory_space<vmem>>, vector<1x1x8xf32>
    %248 = vector.shape_cast %247 : vector<1x1x8xf32> to vector<1x8xf32>
    %cst_265 = arith.constant dense<0.000000e+00> : vector<1x256xf32>
    %249 = tpu.matmul %248, %242, %cst_265 {dimension_numbers = #tpu.dot_dimension_numbers<[1], [0], [0], [1], [0, 0, 1, 1], [], []>} : vector<1x8xf32>, vector<8x256xf32>, vector<1x256xf32> -> vector<1x256xf32>
    %c0_266 = arith.constant 0 : index
    %c0_267 = arith.constant 0 : index
    %c0_268 = arith.constant 0 : index
    %250 = vector.load %arg2[%c0_266, %c0_267, %c0_268] : memref<9x256x256xf32, #tpu.memory_space<vmem>>, vector<1x256x256xf32>
    %251 = vector.shape_cast %250 : vector<1x256x256xf32> to vector<256x256xf32>
    %cst_269 = arith.constant dense<0.000000e+00> : vector<1x256xf32>
    %252 = tpu.matmul %249, %251, %cst_269 {dimension_numbers = #tpu.dot_dimension_numbers<[1], [0], [0], [1], [0, 0, 1, 1], [], []>} : vector<1x256xf32>, vector<256x256xf32>, vector<1x256xf32> -> vector<1x256xf32>
    %253 = arith.addf %246, %252 : vector<1x256xf32>
    %c1_270 = arith.constant 1 : index
    %c0_271 = arith.constant 0 : index
    %c0_272 = arith.constant 0 : index
    %254 = vector.load %arg14[%c1_270, %c0_271, %c0_272] : memref<9x1x8xf32, #tpu.memory_space<vmem>>, vector<1x1x8xf32>
    %255 = vector.shape_cast %254 : vector<1x1x8xf32> to vector<1x8xf32>
    %cst_273 = arith.constant dense<0.000000e+00> : vector<1x256xf32>
    %256 = tpu.matmul %255, %242, %cst_273 {dimension_numbers = #tpu.dot_dimension_numbers<[1], [0], [0], [1], [0, 0, 1, 1], [], []>} : vector<1x8xf32>, vector<8x256xf32>, vector<1x256xf32> -> vector<1x256xf32>
    %c1_274 = arith.constant 1 : index
    %c0_275 = arith.constant 0 : index
    %c0_276 = arith.constant 0 : index
    %257 = vector.load %arg2[%c1_274, %c0_275, %c0_276] : memref<9x256x256xf32, #tpu.memory_space<vmem>>, vector<1x256x256xf32>
    %258 = vector.shape_cast %257 : vector<1x256x256xf32> to vector<256x256xf32>
    %cst_277 = arith.constant dense<0.000000e+00> : vector<1x256xf32>
    %259 = tpu.matmul %256, %258, %cst_277 {dimension_numbers = #tpu.dot_dimension_numbers<[1], [0], [0], [1], [0, 0, 1, 1], [], []>} : vector<1x256xf32>, vector<256x256xf32>, vector<1x256xf32> -> vector<1x256xf32>
    %260 = arith.addf %253, %259 : vector<1x256xf32>
    %c2_278 = arith.constant 2 : index
    %c0_279 = arith.constant 0 : index
    %c0_280 = arith.constant 0 : index
    %261 = vector.load %arg14[%c2_278, %c0_279, %c0_280] : memref<9x1x8xf32, #tpu.memory_space<vmem>>, vector<1x1x8xf32>
    %262 = vector.shape_cast %261 : vector<1x1x8xf32> to vector<1x8xf32>
    %cst_281 = arith.constant dense<0.000000e+00> : vector<1x256xf32>
    %263 = tpu.matmul %262, %242, %cst_281 {dimension_numbers = #tpu.dot_dimension_numbers<[1], [0], [0], [1], [0, 0, 1, 1], [], []>} : vector<1x8xf32>, vector<8x256xf32>, vector<1x256xf32> -> vector<1x256xf32>
    %c2_282 = arith.constant 2 : index
    %c0_283 = arith.constant 0 : index
    %c0_284 = arith.constant 0 : index
    %264 = vector.load %arg2[%c2_282, %c0_283, %c0_284] : memref<9x256x256xf32, #tpu.memory_space<vmem>>, vector<1x256x256xf32>
    %265 = vector.shape_cast %264 : vector<1x256x256xf32> to vector<256x256xf32>
    %cst_285 = arith.constant dense<0.000000e+00> : vector<1x256xf32>
    %266 = tpu.matmul %263, %265, %cst_285 {dimension_numbers = #tpu.dot_dimension_numbers<[1], [0], [0], [1], [0, 0, 1, 1], [], []>} : vector<1x256xf32>, vector<256x256xf32>, vector<1x256xf32> -> vector<1x256xf32>
    %267 = arith.addf %260, %266 : vector<1x256xf32>
    %c3_286 = arith.constant 3 : index
    %c0_287 = arith.constant 0 : index
    %c0_288 = arith.constant 0 : index
    %268 = vector.load %arg14[%c3_286, %c0_287, %c0_288] : memref<9x1x8xf32, #tpu.memory_space<vmem>>, vector<1x1x8xf32>
    %269 = vector.shape_cast %268 : vector<1x1x8xf32> to vector<1x8xf32>
    %cst_289 = arith.constant dense<0.000000e+00> : vector<1x256xf32>
    %270 = tpu.matmul %269, %242, %cst_289 {dimension_numbers = #tpu.dot_dimension_numbers<[1], [0], [0], [1], [0, 0, 1, 1], [], []>} : vector<1x8xf32>, vector<8x256xf32>, vector<1x256xf32> -> vector<1x256xf32>
    %c3_290 = arith.constant 3 : index
    %c0_291 = arith.constant 0 : index
    %c0_292 = arith.constant 0 : index
    %271 = vector.load %arg2[%c3_290, %c0_291, %c0_292] : memref<9x256x256xf32, #tpu.memory_space<vmem>>, vector<1x256x256xf32>
    %272 = vector.shape_cast %271 : vector<1x256x256xf32> to vector<256x256xf32>
    %cst_293 = arith.constant dense<0.000000e+00> : vector<1x256xf32>
    %273 = tpu.matmul %270, %272, %cst_293 {dimension_numbers = #tpu.dot_dimension_numbers<[1], [0], [0], [1], [0, 0, 1, 1], [], []>} : vector<1x256xf32>, vector<256x256xf32>, vector<1x256xf32> -> vector<1x256xf32>
    %274 = arith.addf %267, %273 : vector<1x256xf32>
    %c4_294 = arith.constant 4 : index
    %c0_295 = arith.constant 0 : index
    %c0_296 = arith.constant 0 : index
    %275 = vector.load %arg14[%c4_294, %c0_295, %c0_296] : memref<9x1x8xf32, #tpu.memory_space<vmem>>, vector<1x1x8xf32>
    %276 = vector.shape_cast %275 : vector<1x1x8xf32> to vector<1x8xf32>
    %cst_297 = arith.constant dense<0.000000e+00> : vector<1x256xf32>
    %277 = tpu.matmul %276, %242, %cst_297 {dimension_numbers = #tpu.dot_dimension_numbers<[1], [0], [0], [1], [0, 0, 1, 1], [], []>} : vector<1x8xf32>, vector<8x256xf32>, vector<1x256xf32> -> vector<1x256xf32>
    %c4_298 = arith.constant 4 : index
    %c0_299 = arith.constant 0 : index
    %c0_300 = arith.constant 0 : index
    %278 = vector.load %arg2[%c4_298, %c0_299, %c0_300] : memref<9x256x256xf32, #tpu.memory_space<vmem>>, vector<1x256x256xf32>
    %279 = vector.shape_cast %278 : vector<1x256x256xf32> to vector<256x256xf32>
    %cst_301 = arith.constant dense<0.000000e+00> : vector<1x256xf32>
    %280 = tpu.matmul %277, %279, %cst_301 {dimension_numbers = #tpu.dot_dimension_numbers<[1], [0], [0], [1], [0, 0, 1, 1], [], []>} : vector<1x256xf32>, vector<256x256xf32>, vector<1x256xf32> -> vector<1x256xf32>
    %281 = arith.addf %274, %280 : vector<1x256xf32>
    %c5_302 = arith.constant 5 : index
    %c0_303 = arith.constant 0 : index
    %c0_304 = arith.constant 0 : index
    %282 = vector.load %arg14[%c5_302, %c0_303, %c0_304] : memref<9x1x8xf32, #tpu.memory_space<vmem>>, vector<1x1x8xf32>
    %283 = vector.shape_cast %282 : vector<1x1x8xf32> to vector<1x8xf32>
    %cst_305 = arith.constant dense<0.000000e+00> : vector<1x256xf32>
    %284 = tpu.matmul %283, %242, %cst_305 {dimension_numbers = #tpu.dot_dimension_numbers<[1], [0], [0], [1], [0, 0, 1, 1], [], []>} : vector<1x8xf32>, vector<8x256xf32>, vector<1x256xf32> -> vector<1x256xf32>
    %c5_306 = arith.constant 5 : index
    %c0_307 = arith.constant 0 : index
    %c0_308 = arith.constant 0 : index
    %285 = vector.load %arg2[%c5_306, %c0_307, %c0_308] : memref<9x256x256xf32, #tpu.memory_space<vmem>>, vector<1x256x256xf32>
    %286 = vector.shape_cast %285 : vector<1x256x256xf32> to vector<256x256xf32>
    %cst_309 = arith.constant dense<0.000000e+00> : vector<1x256xf32>
    %287 = tpu.matmul %284, %286, %cst_309 {dimension_numbers = #tpu.dot_dimension_numbers<[1], [0], [0], [1], [0, 0, 1, 1], [], []>} : vector<1x256xf32>, vector<256x256xf32>, vector<1x256xf32> -> vector<1x256xf32>
    %288 = arith.addf %281, %287 : vector<1x256xf32>
    %c6_310 = arith.constant 6 : index
    %c0_311 = arith.constant 0 : index
    %c0_312 = arith.constant 0 : index
    %289 = vector.load %arg14[%c6_310, %c0_311, %c0_312] : memref<9x1x8xf32, #tpu.memory_space<vmem>>, vector<1x1x8xf32>
    %290 = vector.shape_cast %289 : vector<1x1x8xf32> to vector<1x8xf32>
    %cst_313 = arith.constant dense<0.000000e+00> : vector<1x256xf32>
    %291 = tpu.matmul %290, %242, %cst_313 {dimension_numbers = #tpu.dot_dimension_numbers<[1], [0], [0], [1], [0, 0, 1, 1], [], []>} : vector<1x8xf32>, vector<8x256xf32>, vector<1x256xf32> -> vector<1x256xf32>
    %c6_314 = arith.constant 6 : index
    %c0_315 = arith.constant 0 : index
    %c0_316 = arith.constant 0 : index
    %292 = vector.load %arg2[%c6_314, %c0_315, %c0_316] : memref<9x256x256xf32, #tpu.memory_space<vmem>>, vector<1x256x256xf32>
    %293 = vector.shape_cast %292 : vector<1x256x256xf32> to vector<256x256xf32>
    %cst_317 = arith.constant dense<0.000000e+00> : vector<1x256xf32>
    %294 = tpu.matmul %291, %293, %cst_317 {dimension_numbers = #tpu.dot_dimension_numbers<[1], [0], [0], [1], [0, 0, 1, 1], [], []>} : vector<1x256xf32>, vector<256x256xf32>, vector<1x256xf32> -> vector<1x256xf32>
    %295 = arith.addf %288, %294 : vector<1x256xf32>
    %c7_318 = arith.constant 7 : index
    %c0_319 = arith.constant 0 : index
    %c0_320 = arith.constant 0 : index
    %296 = vector.load %arg14[%c7_318, %c0_319, %c0_320] : memref<9x1x8xf32, #tpu.memory_space<vmem>>, vector<1x1x8xf32>
    %297 = vector.shape_cast %296 : vector<1x1x8xf32> to vector<1x8xf32>
    %cst_321 = arith.constant dense<0.000000e+00> : vector<1x256xf32>
    %298 = tpu.matmul %297, %242, %cst_321 {dimension_numbers = #tpu.dot_dimension_numbers<[1], [0], [0], [1], [0, 0, 1, 1], [], []>} : vector<1x8xf32>, vector<8x256xf32>, vector<1x256xf32> -> vector<1x256xf32>
    %c7_322 = arith.constant 7 : index
    %c0_323 = arith.constant 0 : index
    %c0_324 = arith.constant 0 : index
    %299 = vector.load %arg2[%c7_322, %c0_323, %c0_324] : memref<9x256x256xf32, #tpu.memory_space<vmem>>, vector<1x256x256xf32>
    %300 = vector.shape_cast %299 : vector<1x256x256xf32> to vector<256x256xf32>
    %cst_325 = arith.constant dense<0.000000e+00> : vector<1x256xf32>
    %301 = tpu.matmul %298, %300, %cst_325 {dimension_numbers = #tpu.dot_dimension_numbers<[1], [0], [0], [1], [0, 0, 1, 1], [], []>} : vector<1x256xf32>, vector<256x256xf32>, vector<1x256xf32> -> vector<1x256xf32>
    %302 = arith.addf %295, %301 : vector<1x256xf32>
    %c8_326 = arith.constant 8 : index
    %c0_327 = arith.constant 0 : index
    %c0_328 = arith.constant 0 : index
    %303 = vector.load %arg14[%c8_326, %c0_327, %c0_328] : memref<9x1x8xf32, #tpu.memory_space<vmem>>, vector<1x1x8xf32>
    %304 = vector.shape_cast %303 : vector<1x1x8xf32> to vector<1x8xf32>
    %cst_329 = arith.constant dense<0.000000e+00> : vector<1x256xf32>
    %305 = tpu.matmul %304, %242, %cst_329 {dimension_numbers = #tpu.dot_dimension_numbers<[1], [0], [0], [1], [0, 0, 1, 1], [], []>} : vector<1x8xf32>, vector<8x256xf32>, vector<1x256xf32> -> vector<1x256xf32>
    %c8_330 = arith.constant 8 : index
    %c0_331 = arith.constant 0 : index
    %c0_332 = arith.constant 0 : index
    %306 = vector.load %arg2[%c8_330, %c0_331, %c0_332] : memref<9x256x256xf32, #tpu.memory_space<vmem>>, vector<1x256x256xf32>
    %307 = vector.shape_cast %306 : vector<1x256x256xf32> to vector<256x256xf32>
    %cst_333 = arith.constant dense<0.000000e+00> : vector<1x256xf32>
    %308 = tpu.matmul %305, %307, %cst_333 {dimension_numbers = #tpu.dot_dimension_numbers<[1], [0], [0], [1], [0, 0, 1, 1], [], []>} : vector<1x256xf32>, vector<256x256xf32>, vector<1x256xf32> -> vector<1x256xf32>
    %309 = arith.addf %302, %308 : vector<1x256xf32>
    %310 = math.tanh %309 : vector<1x256xf32>
    %cst_334 = arith.constant 0.000000e+00 : f32
    %311 = vector.broadcast %cst_334 : f32 to vector<4x256xf32>
    %c0_335 = arith.constant 0 : index
    %c0_336 = arith.constant 0 : index
    %312 = vector.load %arg17[%c0_335, %c0_336] : memref<4x1xf32, #tpu.memory_space<vmem>>, vector<4x1xf32>
    %313 = vector.broadcast %312 : vector<4x1xf32> to vector<4x256xf32>
    %314 = arith.addf %311, %313 : vector<4x256xf32>
    %c0_337 = arith.constant 0 : index
    %c0_338 = arith.constant 0 : index
    %c0_339 = arith.constant 0 : index
    %315 = vector.load %arg16[%c0_337, %c0_338, %c0_339] : memref<9x4x1xf32, #tpu.memory_space<vmem>>, vector<1x4x1xf32>
    %316 = vector.shape_cast %315 : vector<1x4x1xf32> to vector<4x1xf32>
    %317 = vector.broadcast %316 : vector<4x1xf32> to vector<4x256xf32>
    %318 = vector.broadcast %310 : vector<1x256xf32> to vector<4x256xf32>
    %319 = arith.mulf %317, %318 : vector<4x256xf32>
    %c0_340 = arith.constant 0 : index
    %c0_341 = arith.constant 0 : index
    %c0_342 = arith.constant 0 : index
    %320 = vector.load %arg2[%c0_340, %c0_341, %c0_342] : memref<9x256x256xf32, #tpu.memory_space<vmem>>, vector<1x256x256xf32>
    %321 = vector.shape_cast %320 : vector<1x256x256xf32> to vector<256x256xf32>
    %cst_343 = arith.constant dense<0.000000e+00> : vector<4x256xf32>
    %322 = tpu.matmul %319, %321, %cst_343 {dimension_numbers = #tpu.dot_dimension_numbers<[1], [0], [0], [1], [0, 0, 1, 1], [], []>} : vector<4x256xf32>, vector<256x256xf32>, vector<4x256xf32> -> vector<4x256xf32>
    %323 = arith.addf %314, %322 : vector<4x256xf32>
    %c1_344 = arith.constant 1 : index
    %c0_345 = arith.constant 0 : index
    %c0_346 = arith.constant 0 : index
    %324 = vector.load %arg16[%c1_344, %c0_345, %c0_346] : memref<9x4x1xf32, #tpu.memory_space<vmem>>, vector<1x4x1xf32>
    %325 = vector.shape_cast %324 : vector<1x4x1xf32> to vector<4x1xf32>
    %326 = vector.broadcast %325 : vector<4x1xf32> to vector<4x256xf32>
    %327 = vector.broadcast %310 : vector<1x256xf32> to vector<4x256xf32>
    %328 = arith.mulf %326, %327 : vector<4x256xf32>
    %c1_347 = arith.constant 1 : index
    %c0_348 = arith.constant 0 : index
    %c0_349 = arith.constant 0 : index
    %329 = vector.load %arg2[%c1_347, %c0_348, %c0_349] : memref<9x256x256xf32, #tpu.memory_space<vmem>>, vector<1x256x256xf32>
    %330 = vector.shape_cast %329 : vector<1x256x256xf32> to vector<256x256xf32>
    %cst_350 = arith.constant dense<0.000000e+00> : vector<4x256xf32>
    %331 = tpu.matmul %328, %330, %cst_350 {dimension_numbers = #tpu.dot_dimension_numbers<[1], [0], [0], [1], [0, 0, 1, 1], [], []>} : vector<4x256xf32>, vector<256x256xf32>, vector<4x256xf32> -> vector<4x256xf32>
    %332 = arith.addf %323, %331 : vector<4x256xf32>
    %c2_351 = arith.constant 2 : index
    %c0_352 = arith.constant 0 : index
    %c0_353 = arith.constant 0 : index
    %333 = vector.load %arg16[%c2_351, %c0_352, %c0_353] : memref<9x4x1xf32, #tpu.memory_space<vmem>>, vector<1x4x1xf32>
    %334 = vector.shape_cast %333 : vector<1x4x1xf32> to vector<4x1xf32>
    %335 = vector.broadcast %334 : vector<4x1xf32> to vector<4x256xf32>
    %336 = vector.broadcast %310 : vector<1x256xf32> to vector<4x256xf32>
    %337 = arith.mulf %335, %336 : vector<4x256xf32>
    %c2_354 = arith.constant 2 : index
    %c0_355 = arith.constant 0 : index
    %c0_356 = arith.constant 0 : index
    %338 = vector.load %arg2[%c2_354, %c0_355, %c0_356] : memref<9x256x256xf32, #tpu.memory_space<vmem>>, vector<1x256x256xf32>
    %339 = vector.shape_cast %338 : vector<1x256x256xf32> to vector<256x256xf32>
    %cst_357 = arith.constant dense<0.000000e+00> : vector<4x256xf32>
    %340 = tpu.matmul %337, %339, %cst_357 {dimension_numbers = #tpu.dot_dimension_numbers<[1], [0], [0], [1], [0, 0, 1, 1], [], []>} : vector<4x256xf32>, vector<256x256xf32>, vector<4x256xf32> -> vector<4x256xf32>
    %341 = arith.addf %332, %340 : vector<4x256xf32>
    %c3_358 = arith.constant 3 : index
    %c0_359 = arith.constant 0 : index
    %c0_360 = arith.constant 0 : index
    %342 = vector.load %arg16[%c3_358, %c0_359, %c0_360] : memref<9x4x1xf32, #tpu.memory_space<vmem>>, vector<1x4x1xf32>
    %343 = vector.shape_cast %342 : vector<1x4x1xf32> to vector<4x1xf32>
    %344 = vector.broadcast %343 : vector<4x1xf32> to vector<4x256xf32>
    %345 = vector.broadcast %310 : vector<1x256xf32> to vector<4x256xf32>
    %346 = arith.mulf %344, %345 : vector<4x256xf32>
    %c3_361 = arith.constant 3 : index
    %c0_362 = arith.constant 0 : index
    %c0_363 = arith.constant 0 : index
    %347 = vector.load %arg2[%c3_361, %c0_362, %c0_363] : memref<9x256x256xf32, #tpu.memory_space<vmem>>, vector<1x256x256xf32>
    %348 = vector.shape_cast %347 : vector<1x256x256xf32> to vector<256x256xf32>
    %cst_364 = arith.constant dense<0.000000e+00> : vector<4x256xf32>
    %349 = tpu.matmul %346, %348, %cst_364 {dimension_numbers = #tpu.dot_dimension_numbers<[1], [0], [0], [1], [0, 0, 1, 1], [], []>} : vector<4x256xf32>, vector<256x256xf32>, vector<4x256xf32> -> vector<4x256xf32>
    %350 = arith.addf %341, %349 : vector<4x256xf32>
    %c4_365 = arith.constant 4 : index
    %c0_366 = arith.constant 0 : index
    %c0_367 = arith.constant 0 : index
    %351 = vector.load %arg16[%c4_365, %c0_366, %c0_367] : memref<9x4x1xf32, #tpu.memory_space<vmem>>, vector<1x4x1xf32>
    %352 = vector.shape_cast %351 : vector<1x4x1xf32> to vector<4x1xf32>
    %353 = vector.broadcast %352 : vector<4x1xf32> to vector<4x256xf32>
    %354 = vector.broadcast %310 : vector<1x256xf32> to vector<4x256xf32>
    %355 = arith.mulf %353, %354 : vector<4x256xf32>
    %c4_368 = arith.constant 4 : index
    %c0_369 = arith.constant 0 : index
    %c0_370 = arith.constant 0 : index
    %356 = vector.load %arg2[%c4_368, %c0_369, %c0_370] : memref<9x256x256xf32, #tpu.memory_space<vmem>>, vector<1x256x256xf32>
    %357 = vector.shape_cast %356 : vector<1x256x256xf32> to vector<256x256xf32>
    %cst_371 = arith.constant dense<0.000000e+00> : vector<4x256xf32>
    %358 = tpu.matmul %355, %357, %cst_371 {dimension_numbers = #tpu.dot_dimension_numbers<[1], [0], [0], [1], [0, 0, 1, 1], [], []>} : vector<4x256xf32>, vector<256x256xf32>, vector<4x256xf32> -> vector<4x256xf32>
    %359 = arith.addf %350, %358 : vector<4x256xf32>
    %c5_372 = arith.constant 5 : index
    %c0_373 = arith.constant 0 : index
    %c0_374 = arith.constant 0 : index
    %360 = vector.load %arg16[%c5_372, %c0_373, %c0_374] : memref<9x4x1xf32, #tpu.memory_space<vmem>>, vector<1x4x1xf32>
    %361 = vector.shape_cast %360 : vector<1x4x1xf32> to vector<4x1xf32>
    %362 = vector.broadcast %361 : vector<4x1xf32> to vector<4x256xf32>
    %363 = vector.broadcast %310 : vector<1x256xf32> to vector<4x256xf32>
    %364 = arith.mulf %362, %363 : vector<4x256xf32>
    %c5_375 = arith.constant 5 : index
    %c0_376 = arith.constant 0 : index
    %c0_377 = arith.constant 0 : index
    %365 = vector.load %arg2[%c5_375, %c0_376, %c0_377] : memref<9x256x256xf32, #tpu.memory_space<vmem>>, vector<1x256x256xf32>
    %366 = vector.shape_cast %365 : vector<1x256x256xf32> to vector<256x256xf32>
    %cst_378 = arith.constant dense<0.000000e+00> : vector<4x256xf32>
    %367 = tpu.matmul %364, %366, %cst_378 {dimension_numbers = #tpu.dot_dimension_numbers<[1], [0], [0], [1], [0, 0, 1, 1], [], []>} : vector<4x256xf32>, vector<256x256xf32>, vector<4x256xf32> -> vector<4x256xf32>
    %368 = arith.addf %359, %367 : vector<4x256xf32>
    %c6_379 = arith.constant 6 : index
    %c0_380 = arith.constant 0 : index
    %c0_381 = arith.constant 0 : index
    %369 = vector.load %arg16[%c6_379, %c0_380, %c0_381] : memref<9x4x1xf32, #tpu.memory_space<vmem>>, vector<1x4x1xf32>
    %370 = vector.shape_cast %369 : vector<1x4x1xf32> to vector<4x1xf32>
    %371 = vector.broadcast %370 : vector<4x1xf32> to vector<4x256xf32>
    %372 = vector.broadcast %310 : vector<1x256xf32> to vector<4x256xf32>
    %373 = arith.mulf %371, %372 : vector<4x256xf32>
    %c6_382 = arith.constant 6 : index
    %c0_383 = arith.constant 0 : index
    %c0_384 = arith.constant 0 : index
    %374 = vector.load %arg2[%c6_382, %c0_383, %c0_384] : memref<9x256x256xf32, #tpu.memory_space<vmem>>, vector<1x256x256xf32>
    %375 = vector.shape_cast %374 : vector<1x256x256xf32> to vector<256x256xf32>
    %cst_385 = arith.constant dense<0.000000e+00> : vector<4x256xf32>
    %376 = tpu.matmul %373, %375, %cst_385 {dimension_numbers = #tpu.dot_dimension_numbers<[1], [0], [0], [1], [0, 0, 1, 1], [], []>} : vector<4x256xf32>, vector<256x256xf32>, vector<4x256xf32> -> vector<4x256xf32>
    %377 = arith.addf %368, %376 : vector<4x256xf32>
    %c7_386 = arith.constant 7 : index
    %c0_387 = arith.constant 0 : index
    %c0_388 = arith.constant 0 : index
    %378 = vector.load %arg16[%c7_386, %c0_387, %c0_388] : memref<9x4x1xf32, #tpu.memory_space<vmem>>, vector<1x4x1xf32>
    %379 = vector.shape_cast %378 : vector<1x4x1xf32> to vector<4x1xf32>
    %380 = vector.broadcast %379 : vector<4x1xf32> to vector<4x256xf32>
    %381 = vector.broadcast %310 : vector<1x256xf32> to vector<4x256xf32>
    %382 = arith.mulf %380, %381 : vector<4x256xf32>
    %c7_389 = arith.constant 7 : index
    %c0_390 = arith.constant 0 : index
    %c0_391 = arith.constant 0 : index
    %383 = vector.load %arg2[%c7_389, %c0_390, %c0_391] : memref<9x256x256xf32, #tpu.memory_space<vmem>>, vector<1x256x256xf32>
    %384 = vector.shape_cast %383 : vector<1x256x256xf32> to vector<256x256xf32>
    %cst_392 = arith.constant dense<0.000000e+00> : vector<4x256xf32>
    %385 = tpu.matmul %382, %384, %cst_392 {dimension_numbers = #tpu.dot_dimension_numbers<[1], [0], [0], [1], [0, 0, 1, 1], [], []>} : vector<4x256xf32>, vector<256x256xf32>, vector<4x256xf32> -> vector<4x256xf32>
    %386 = arith.addf %377, %385 : vector<4x256xf32>
    %c8_393 = arith.constant 8 : index
    %c0_394 = arith.constant 0 : index
    %c0_395 = arith.constant 0 : index
    %387 = vector.load %arg16[%c8_393, %c0_394, %c0_395] : memref<9x4x1xf32, #tpu.memory_space<vmem>>, vector<1x4x1xf32>
    %388 = vector.shape_cast %387 : vector<1x4x1xf32> to vector<4x1xf32>
    %389 = vector.broadcast %388 : vector<4x1xf32> to vector<4x256xf32>
    %390 = vector.broadcast %310 : vector<1x256xf32> to vector<4x256xf32>
    %391 = arith.mulf %389, %390 : vector<4x256xf32>
    %c8_396 = arith.constant 8 : index
    %c0_397 = arith.constant 0 : index
    %c0_398 = arith.constant 0 : index
    %392 = vector.load %arg2[%c8_396, %c0_397, %c0_398] : memref<9x256x256xf32, #tpu.memory_space<vmem>>, vector<1x256x256xf32>
    %393 = vector.shape_cast %392 : vector<1x256x256xf32> to vector<256x256xf32>
    %cst_399 = arith.constant dense<0.000000e+00> : vector<4x256xf32>
    %394 = tpu.matmul %391, %393, %cst_399 {dimension_numbers = #tpu.dot_dimension_numbers<[1], [0], [0], [1], [0, 0, 1, 1], [], []>} : vector<4x256xf32>, vector<256x256xf32>, vector<4x256xf32> -> vector<4x256xf32>
    %395 = arith.addf %386, %394 : vector<4x256xf32>
    %cst_400 = arith.constant 0.000000e+00 : f32
    %396 = vector.broadcast %cst_400 : f32 to vector<4x256xf32>
    %397 = arith.maximumf %395, %396 : vector<4x256xf32>
    %c0_401 = arith.constant 0 : index
    %c0_402 = arith.constant 0 : index
    %c0_403 = arith.constant 0 : index
    %398 = vector.load %arg4[%c0_401, %c0_402, %c0_403] : memref<4x256x64xf32, #tpu.memory_space<vmem>>, vector<1x256x64xf32>
    %399 = vector.shape_cast %398 : vector<1x256x64xf32> to vector<256x64xf32>
    %cst_404 = arith.constant dense<0.000000e+00> : vector<4x64xf32>
    %400 = tpu.matmul %397, %399, %cst_404 {dimension_numbers = #tpu.dot_dimension_numbers<[1], [0], [0], [1], [0, 0, 1, 1], [], []>} : vector<4x256xf32>, vector<256x64xf32>, vector<4x64xf32> -> vector<4x64xf32>
    %c1_405 = arith.constant 1 : index
    %c0_406 = arith.constant 0 : index
    %c0_407 = arith.constant 0 : index
    %401 = vector.load %arg4[%c1_405, %c0_406, %c0_407] : memref<4x256x64xf32, #tpu.memory_space<vmem>>, vector<1x256x64xf32>
    %402 = vector.shape_cast %401 : vector<1x256x64xf32> to vector<256x64xf32>
    %cst_408 = arith.constant dense<0.000000e+00> : vector<4x64xf32>
    %403 = tpu.matmul %397, %402, %cst_408 {dimension_numbers = #tpu.dot_dimension_numbers<[1], [0], [0], [1], [0, 0, 1, 1], [], []>} : vector<4x256xf32>, vector<256x64xf32>, vector<4x64xf32> -> vector<4x64xf32>
    %c2_409 = arith.constant 2 : index
    %c0_410 = arith.constant 0 : index
    %c0_411 = arith.constant 0 : index
    %404 = vector.load %arg4[%c2_409, %c0_410, %c0_411] : memref<4x256x64xf32, #tpu.memory_space<vmem>>, vector<1x256x64xf32>
    %405 = vector.shape_cast %404 : vector<1x256x64xf32> to vector<256x64xf32>
    %cst_412 = arith.constant dense<0.000000e+00> : vector<4x64xf32>
    %406 = tpu.matmul %397, %405, %cst_412 {dimension_numbers = #tpu.dot_dimension_numbers<[1], [0], [0], [1], [0, 0, 1, 1], [], []>} : vector<4x256xf32>, vector<256x64xf32>, vector<4x64xf32> -> vector<4x64xf32>
    %c3_413 = arith.constant 3 : index
    %c0_414 = arith.constant 0 : index
    %c0_415 = arith.constant 0 : index
    %407 = vector.load %arg4[%c3_413, %c0_414, %c0_415] : memref<4x256x64xf32, #tpu.memory_space<vmem>>, vector<1x256x64xf32>
    %408 = vector.shape_cast %407 : vector<1x256x64xf32> to vector<256x64xf32>
    %cst_416 = arith.constant dense<0.000000e+00> : vector<4x64xf32>
    %409 = tpu.matmul %397, %408, %cst_416 {dimension_numbers = #tpu.dot_dimension_numbers<[1], [0], [0], [1], [0, 0, 1, 1], [], []>} : vector<4x256xf32>, vector<256x64xf32>, vector<4x64xf32> -> vector<4x64xf32>
    %410 = arith.maximumf %400, %403 : vector<4x64xf32>
    %411 = arith.maximumf %406, %409 : vector<4x64xf32>
    %412 = arith.maximumf %410, %411 : vector<4x64xf32>
    %cst_417 = arith.constant 0.000000e+00 : f32
    %413 = vector.broadcast %cst_417 : f32 to vector<8x64xf32>
    %c0_418 = arith.constant 0 : index
    %c0_419 = arith.constant 0 : index
    %414 = vector.load %arg19[%c0_418, %c0_419] : memref<8x1xf32, #tpu.memory_space<vmem>>, vector<8x1xf32>
    %415 = vector.broadcast %414 : vector<8x1xf32> to vector<8x64xf32>
    %416 = arith.addf %413, %415 : vector<8x64xf32>
    %c0_420 = arith.constant 0 : index
    %c0_421 = arith.constant 0 : index
    %c0_422 = arith.constant 0 : index
    %417 = vector.load %arg18[%c0_420, %c0_421, %c0_422] : memref<9x8x4xf32, #tpu.memory_space<vmem>>, vector<1x8x4xf32>
    %418 = vector.shape_cast %417 : vector<1x8x4xf32> to vector<8x4xf32>
    %cst_423 = arith.constant dense<0.000000e+00> : vector<8x64xf32>
    %419 = tpu.matmul %418, %412, %cst_423 {dimension_numbers = #tpu.dot_dimension_numbers<[1], [0], [0], [1], [0, 0, 1, 1], [], []>} : vector<8x4xf32>, vector<4x64xf32>, vector<8x64xf32> -> vector<8x64xf32>
    %c0_424 = arith.constant 0 : index
    %c0_425 = arith.constant 0 : index
    %c0_426 = arith.constant 0 : index
    %420 = vector.load %arg3[%c0_424, %c0_425, %c0_426] : memref<9x64x64xf32, #tpu.memory_space<vmem>>, vector<1x64x64xf32>
    %421 = vector.shape_cast %420 : vector<1x64x64xf32> to vector<64x64xf32>
    %cst_427 = arith.constant dense<0.000000e+00> : vector<8x64xf32>
    %422 = tpu.matmul %419, %421, %cst_427 {dimension_numbers = #tpu.dot_dimension_numbers<[1], [0], [0], [1], [0, 0, 1, 1], [], []>} : vector<8x64xf32>, vector<64x64xf32>, vector<8x64xf32> -> vector<8x64xf32>
    %423 = arith.addf %416, %422 : vector<8x64xf32>
    %c1_428 = arith.constant 1 : index
    %c0_429 = arith.constant 0 : index
    %c0_430 = arith.constant 0 : index
    %424 = vector.load %arg18[%c1_428, %c0_429, %c0_430] : memref<9x8x4xf32, #tpu.memory_space<vmem>>, vector<1x8x4xf32>
    %425 = vector.shape_cast %424 : vector<1x8x4xf32> to vector<8x4xf32>
    %cst_431 = arith.constant dense<0.000000e+00> : vector<8x64xf32>
    %426 = tpu.matmul %425, %412, %cst_431 {dimension_numbers = #tpu.dot_dimension_numbers<[1], [0], [0], [1], [0, 0, 1, 1], [], []>} : vector<8x4xf32>, vector<4x64xf32>, vector<8x64xf32> -> vector<8x64xf32>
    %c1_432 = arith.constant 1 : index
    %c0_433 = arith.constant 0 : index
    %c0_434 = arith.constant 0 : index
    %427 = vector.load %arg3[%c1_432, %c0_433, %c0_434] : memref<9x64x64xf32, #tpu.memory_space<vmem>>, vector<1x64x64xf32>
    %428 = vector.shape_cast %427 : vector<1x64x64xf32> to vector<64x64xf32>
    %cst_435 = arith.constant dense<0.000000e+00> : vector<8x64xf32>
    %429 = tpu.matmul %426, %428, %cst_435 {dimension_numbers = #tpu.dot_dimension_numbers<[1], [0], [0], [1], [0, 0, 1, 1], [], []>} : vector<8x64xf32>, vector<64x64xf32>, vector<8x64xf32> -> vector<8x64xf32>
    %430 = arith.addf %423, %429 : vector<8x64xf32>
    %c2_436 = arith.constant 2 : index
    %c0_437 = arith.constant 0 : index
    %c0_438 = arith.constant 0 : index
    %431 = vector.load %arg18[%c2_436, %c0_437, %c0_438] : memref<9x8x4xf32, #tpu.memory_space<vmem>>, vector<1x8x4xf32>
    %432 = vector.shape_cast %431 : vector<1x8x4xf32> to vector<8x4xf32>
    %cst_439 = arith.constant dense<0.000000e+00> : vector<8x64xf32>
    %433 = tpu.matmul %432, %412, %cst_439 {dimension_numbers = #tpu.dot_dimension_numbers<[1], [0], [0], [1], [0, 0, 1, 1], [], []>} : vector<8x4xf32>, vector<4x64xf32>, vector<8x64xf32> -> vector<8x64xf32>
    %c2_440 = arith.constant 2 : index
    %c0_441 = arith.constant 0 : index
    %c0_442 = arith.constant 0 : index
    %434 = vector.load %arg3[%c2_440, %c0_441, %c0_442] : memref<9x64x64xf32, #tpu.memory_space<vmem>>, vector<1x64x64xf32>
    %435 = vector.shape_cast %434 : vector<1x64x64xf32> to vector<64x64xf32>
    %cst_443 = arith.constant dense<0.000000e+00> : vector<8x64xf32>
    %436 = tpu.matmul %433, %435, %cst_443 {dimension_numbers = #tpu.dot_dimension_numbers<[1], [0], [0], [1], [0, 0, 1, 1], [], []>} : vector<8x64xf32>, vector<64x64xf32>, vector<8x64xf32> -> vector<8x64xf32>
    %437 = arith.addf %430, %436 : vector<8x64xf32>
    %c3_444 = arith.constant 3 : index
    %c0_445 = arith.constant 0 : index
    %c0_446 = arith.constant 0 : index
    %438 = vector.load %arg18[%c3_444, %c0_445, %c0_446] : memref<9x8x4xf32, #tpu.memory_space<vmem>>, vector<1x8x4xf32>
    %439 = vector.shape_cast %438 : vector<1x8x4xf32> to vector<8x4xf32>
    %cst_447 = arith.constant dense<0.000000e+00> : vector<8x64xf32>
    %440 = tpu.matmul %439, %412, %cst_447 {dimension_numbers = #tpu.dot_dimension_numbers<[1], [0], [0], [1], [0, 0, 1, 1], [], []>} : vector<8x4xf32>, vector<4x64xf32>, vector<8x64xf32> -> vector<8x64xf32>
    %c3_448 = arith.constant 3 : index
    %c0_449 = arith.constant 0 : index
    %c0_450 = arith.constant 0 : index
    %441 = vector.load %arg3[%c3_448, %c0_449, %c0_450] : memref<9x64x64xf32, #tpu.memory_space<vmem>>, vector<1x64x64xf32>
    %442 = vector.shape_cast %441 : vector<1x64x64xf32> to vector<64x64xf32>
    %cst_451 = arith.constant dense<0.000000e+00> : vector<8x64xf32>
    %443 = tpu.matmul %440, %442, %cst_451 {dimension_numbers = #tpu.dot_dimension_numbers<[1], [0], [0], [1], [0, 0, 1, 1], [], []>} : vector<8x64xf32>, vector<64x64xf32>, vector<8x64xf32> -> vector<8x64xf32>
    %444 = arith.addf %437, %443 : vector<8x64xf32>
    %c4_452 = arith.constant 4 : index
    %c0_453 = arith.constant 0 : index
    %c0_454 = arith.constant 0 : index
    %445 = vector.load %arg18[%c4_452, %c0_453, %c0_454] : memref<9x8x4xf32, #tpu.memory_space<vmem>>, vector<1x8x4xf32>
    %446 = vector.shape_cast %445 : vector<1x8x4xf32> to vector<8x4xf32>
    %cst_455 = arith.constant dense<0.000000e+00> : vector<8x64xf32>
    %447 = tpu.matmul %446, %412, %cst_455 {dimension_numbers = #tpu.dot_dimension_numbers<[1], [0], [0], [1], [0, 0, 1, 1], [], []>} : vector<8x4xf32>, vector<4x64xf32>, vector<8x64xf32> -> vector<8x64xf32>
    %c4_456 = arith.constant 4 : index
    %c0_457 = arith.constant 0 : index
    %c0_458 = arith.constant 0 : index
    %448 = vector.load %arg3[%c4_456, %c0_457, %c0_458] : memref<9x64x64xf32, #tpu.memory_space<vmem>>, vector<1x64x64xf32>
    %449 = vector.shape_cast %448 : vector<1x64x64xf32> to vector<64x64xf32>
    %cst_459 = arith.constant dense<0.000000e+00> : vector<8x64xf32>
    %450 = tpu.matmul %447, %449, %cst_459 {dimension_numbers = #tpu.dot_dimension_numbers<[1], [0], [0], [1], [0, 0, 1, 1], [], []>} : vector<8x64xf32>, vector<64x64xf32>, vector<8x64xf32> -> vector<8x64xf32>
    %451 = arith.addf %444, %450 : vector<8x64xf32>
    %c5_460 = arith.constant 5 : index
    %c0_461 = arith.constant 0 : index
    %c0_462 = arith.constant 0 : index
    %452 = vector.load %arg18[%c5_460, %c0_461, %c0_462] : memref<9x8x4xf32, #tpu.memory_space<vmem>>, vector<1x8x4xf32>
    %453 = vector.shape_cast %452 : vector<1x8x4xf32> to vector<8x4xf32>
    %cst_463 = arith.constant dense<0.000000e+00> : vector<8x64xf32>
    %454 = tpu.matmul %453, %412, %cst_463 {dimension_numbers = #tpu.dot_dimension_numbers<[1], [0], [0], [1], [0, 0, 1, 1], [], []>} : vector<8x4xf32>, vector<4x64xf32>, vector<8x64xf32> -> vector<8x64xf32>
    %c5_464 = arith.constant 5 : index
    %c0_465 = arith.constant 0 : index
    %c0_466 = arith.constant 0 : index
    %455 = vector.load %arg3[%c5_464, %c0_465, %c0_466] : memref<9x64x64xf32, #tpu.memory_space<vmem>>, vector<1x64x64xf32>
    %456 = vector.shape_cast %455 : vector<1x64x64xf32> to vector<64x64xf32>
    %cst_467 = arith.constant dense<0.000000e+00> : vector<8x64xf32>
    %457 = tpu.matmul %454, %456, %cst_467 {dimension_numbers = #tpu.dot_dimension_numbers<[1], [0], [0], [1], [0, 0, 1, 1], [], []>} : vector<8x64xf32>, vector<64x64xf32>, vector<8x64xf32> -> vector<8x64xf32>
    %458 = arith.addf %451, %457 : vector<8x64xf32>
    %c6_468 = arith.constant 6 : index
    %c0_469 = arith.constant 0 : index
    %c0_470 = arith.constant 0 : index
    %459 = vector.load %arg18[%c6_468, %c0_469, %c0_470] : memref<9x8x4xf32, #tpu.memory_space<vmem>>, vector<1x8x4xf32>
    %460 = vector.shape_cast %459 : vector<1x8x4xf32> to vector<8x4xf32>
    %cst_471 = arith.constant dense<0.000000e+00> : vector<8x64xf32>
    %461 = tpu.matmul %460, %412, %cst_471 {dimension_numbers = #tpu.dot_dimension_numbers<[1], [0], [0], [1], [0, 0, 1, 1], [], []>} : vector<8x4xf32>, vector<4x64xf32>, vector<8x64xf32> -> vector<8x64xf32>
    %c6_472 = arith.constant 6 : index
    %c0_473 = arith.constant 0 : index
    %c0_474 = arith.constant 0 : index
    %462 = vector.load %arg3[%c6_472, %c0_473, %c0_474] : memref<9x64x64xf32, #tpu.memory_space<vmem>>, vector<1x64x64xf32>
    %463 = vector.shape_cast %462 : vector<1x64x64xf32> to vector<64x64xf32>
    %cst_475 = arith.constant dense<0.000000e+00> : vector<8x64xf32>
    %464 = tpu.matmul %461, %463, %cst_475 {dimension_numbers = #tpu.dot_dimension_numbers<[1], [0], [0], [1], [0, 0, 1, 1], [], []>} : vector<8x64xf32>, vector<64x64xf32>, vector<8x64xf32> -> vector<8x64xf32>
    %465 = arith.addf %458, %464 : vector<8x64xf32>
    %c7_476 = arith.constant 7 : index
    %c0_477 = arith.constant 0 : index
    %c0_478 = arith.constant 0 : index
    %466 = vector.load %arg18[%c7_476, %c0_477, %c0_478] : memref<9x8x4xf32, #tpu.memory_space<vmem>>, vector<1x8x4xf32>
    %467 = vector.shape_cast %466 : vector<1x8x4xf32> to vector<8x4xf32>
    %cst_479 = arith.constant dense<0.000000e+00> : vector<8x64xf32>
    %468 = tpu.matmul %467, %412, %cst_479 {dimension_numbers = #tpu.dot_dimension_numbers<[1], [0], [0], [1], [0, 0, 1, 1], [], []>} : vector<8x4xf32>, vector<4x64xf32>, vector<8x64xf32> -> vector<8x64xf32>
    %c7_480 = arith.constant 7 : index
    %c0_481 = arith.constant 0 : index
    %c0_482 = arith.constant 0 : index
    %469 = vector.load %arg3[%c7_480, %c0_481, %c0_482] : memref<9x64x64xf32, #tpu.memory_space<vmem>>, vector<1x64x64xf32>
    %470 = vector.shape_cast %469 : vector<1x64x64xf32> to vector<64x64xf32>
    %cst_483 = arith.constant dense<0.000000e+00> : vector<8x64xf32>
    %471 = tpu.matmul %468, %470, %cst_483 {dimension_numbers = #tpu.dot_dimension_numbers<[1], [0], [0], [1], [0, 0, 1, 1], [], []>} : vector<8x64xf32>, vector<64x64xf32>, vector<8x64xf32> -> vector<8x64xf32>
    %472 = arith.addf %465, %471 : vector<8x64xf32>
    %c8_484 = arith.constant 8 : index
    %c0_485 = arith.constant 0 : index
    %c0_486 = arith.constant 0 : index
    %473 = vector.load %arg18[%c8_484, %c0_485, %c0_486] : memref<9x8x4xf32, #tpu.memory_space<vmem>>, vector<1x8x4xf32>
    %474 = vector.shape_cast %473 : vector<1x8x4xf32> to vector<8x4xf32>
    %cst_487 = arith.constant dense<0.000000e+00> : vector<8x64xf32>
    %475 = tpu.matmul %474, %412, %cst_487 {dimension_numbers = #tpu.dot_dimension_numbers<[1], [0], [0], [1], [0, 0, 1, 1], [], []>} : vector<8x4xf32>, vector<4x64xf32>, vector<8x64xf32> -> vector<8x64xf32>
    %c8_488 = arith.constant 8 : index
    %c0_489 = arith.constant 0 : index
    %c0_490 = arith.constant 0 : index
    %476 = vector.load %arg3[%c8_488, %c0_489, %c0_490] : memref<9x64x64xf32, #tpu.memory_space<vmem>>, vector<1x64x64xf32>
    %477 = vector.shape_cast %476 : vector<1x64x64xf32> to vector<64x64xf32>
    %cst_491 = arith.constant dense<0.000000e+00> : vector<8x64xf32>
    %478 = tpu.matmul %475, %477, %cst_491 {dimension_numbers = #tpu.dot_dimension_numbers<[1], [0], [0], [1], [0, 0, 1, 1], [], []>} : vector<8x64xf32>, vector<64x64xf32>, vector<8x64xf32> -> vector<8x64xf32>
    %479 = arith.addf %472, %478 : vector<8x64xf32>
    %cst_492 = arith.constant 0.000000e+00 : f32
    %480 = vector.broadcast %cst_492 : f32 to vector<8x64xf32>
    %481 = arith.maximumf %479, %480 : vector<8x64xf32>
    %c0_493 = arith.constant 0 : index
    %c0_494 = arith.constant 0 : index
    %c0_495 = arith.constant 0 : index
    %482 = vector.load %arg5[%c0_493, %c0_494, %c0_495] : memref<4x64x16xf32, #tpu.memory_space<vmem>>, vector<1x64x16xf32>
    %483 = vector.shape_cast %482 : vector<1x64x16xf32> to vector<64x16xf32>
    %cst_496 = arith.constant dense<0.000000e+00> : vector<8x16xf32>
    %484 = tpu.matmul %481, %483, %cst_496 {dimension_numbers = #tpu.dot_dimension_numbers<[1], [0], [0], [1], [0, 0, 1, 1], [], []>} : vector<8x64xf32>, vector<64x16xf32>, vector<8x16xf32> -> vector<8x16xf32>
    %c1_497 = arith.constant 1 : index
    %c0_498 = arith.constant 0 : index
    %c0_499 = arith.constant 0 : index
    %485 = vector.load %arg5[%c1_497, %c0_498, %c0_499] : memref<4x64x16xf32, #tpu.memory_space<vmem>>, vector<1x64x16xf32>
    %486 = vector.shape_cast %485 : vector<1x64x16xf32> to vector<64x16xf32>
    %cst_500 = arith.constant dense<0.000000e+00> : vector<8x16xf32>
    %487 = tpu.matmul %481, %486, %cst_500 {dimension_numbers = #tpu.dot_dimension_numbers<[1], [0], [0], [1], [0, 0, 1, 1], [], []>} : vector<8x64xf32>, vector<64x16xf32>, vector<8x16xf32> -> vector<8x16xf32>
    %c2_501 = arith.constant 2 : index
    %c0_502 = arith.constant 0 : index
    %c0_503 = arith.constant 0 : index
    %488 = vector.load %arg5[%c2_501, %c0_502, %c0_503] : memref<4x64x16xf32, #tpu.memory_space<vmem>>, vector<1x64x16xf32>
    %489 = vector.shape_cast %488 : vector<1x64x16xf32> to vector<64x16xf32>
    %cst_504 = arith.constant dense<0.000000e+00> : vector<8x16xf32>
    %490 = tpu.matmul %481, %489, %cst_504 {dimension_numbers = #tpu.dot_dimension_numbers<[1], [0], [0], [1], [0, 0, 1, 1], [], []>} : vector<8x64xf32>, vector<64x16xf32>, vector<8x16xf32> -> vector<8x16xf32>
    %c3_505 = arith.constant 3 : index
    %c0_506 = arith.constant 0 : index
    %c0_507 = arith.constant 0 : index
    %491 = vector.load %arg5[%c3_505, %c0_506, %c0_507] : memref<4x64x16xf32, #tpu.memory_space<vmem>>, vector<1x64x16xf32>
    %492 = vector.shape_cast %491 : vector<1x64x16xf32> to vector<64x16xf32>
    %cst_508 = arith.constant dense<0.000000e+00> : vector<8x16xf32>
    %493 = tpu.matmul %481, %492, %cst_508 {dimension_numbers = #tpu.dot_dimension_numbers<[1], [0], [0], [1], [0, 0, 1, 1], [], []>} : vector<8x64xf32>, vector<64x16xf32>, vector<8x16xf32> -> vector<8x16xf32>
    %494 = arith.maximumf %484, %487 : vector<8x16xf32>
    %495 = arith.maximumf %490, %493 : vector<8x16xf32>
    %496 = arith.maximumf %494, %495 : vector<8x16xf32>
    %c0_509 = arith.constant 0 : index
    %c0_510 = arith.constant 0 : index
    %497 = vector.load %arg21[%c0_509, %c0_510] : memref<1x32xf32, #tpu.memory_space<vmem>>, vector<1x32xf32>
    %498 = vector.extract_strided_slice %496 {offsets = [0, 0], sizes = [1, 16], strides = [1, 1]} : vector<8x16xf32> to vector<1x16xf32>
    %c0_511 = arith.constant 0 : index
    %c0_512 = arith.constant 0 : index
    %c0_513 = arith.constant 0 : index
    %499 = vector.load %arg20[%c0_511, %c0_512, %c0_513] : memref<8x16x32xf32, #tpu.memory_space<vmem>>, vector<1x16x32xf32>
    %500 = vector.shape_cast %499 : vector<1x16x32xf32> to vector<16x32xf32>
    %cst_514 = arith.constant dense<0.000000e+00> : vector<1x32xf32>
    %501 = tpu.matmul %498, %500, %cst_514 {dimension_numbers = #tpu.dot_dimension_numbers<[1], [0], [0], [1], [0, 0, 1, 1], [], []>} : vector<1x16xf32>, vector<16x32xf32>, vector<1x32xf32> -> vector<1x32xf32>
    %502 = arith.addf %497, %501 : vector<1x32xf32>
    %503 = vector.extract_strided_slice %496 {offsets = [1, 0], sizes = [1, 16], strides = [1, 1]} : vector<8x16xf32> to vector<1x16xf32>
    %c1_515 = arith.constant 1 : index
    %c0_516 = arith.constant 0 : index
    %c0_517 = arith.constant 0 : index
    %504 = vector.load %arg20[%c1_515, %c0_516, %c0_517] : memref<8x16x32xf32, #tpu.memory_space<vmem>>, vector<1x16x32xf32>
    %505 = vector.shape_cast %504 : vector<1x16x32xf32> to vector<16x32xf32>
    %cst_518 = arith.constant dense<0.000000e+00> : vector<1x32xf32>
    %506 = tpu.matmul %503, %505, %cst_518 {dimension_numbers = #tpu.dot_dimension_numbers<[1], [0], [0], [1], [0, 0, 1, 1], [], []>} : vector<1x16xf32>, vector<16x32xf32>, vector<1x32xf32> -> vector<1x32xf32>
    %507 = arith.addf %502, %506 : vector<1x32xf32>
    %508 = vector.extract_strided_slice %496 {offsets = [2, 0], sizes = [1, 16], strides = [1, 1]} : vector<8x16xf32> to vector<1x16xf32>
    %c2_519 = arith.constant 2 : index
    %c0_520 = arith.constant 0 : index
    %c0_521 = arith.constant 0 : index
    %509 = vector.load %arg20[%c2_519, %c0_520, %c0_521] : memref<8x16x32xf32, #tpu.memory_space<vmem>>, vector<1x16x32xf32>
    %510 = vector.shape_cast %509 : vector<1x16x32xf32> to vector<16x32xf32>
    %cst_522 = arith.constant dense<0.000000e+00> : vector<1x32xf32>
    %511 = tpu.matmul %508, %510, %cst_522 {dimension_numbers = #tpu.dot_dimension_numbers<[1], [0], [0], [1], [0, 0, 1, 1], [], []>} : vector<1x16xf32>, vector<16x32xf32>, vector<1x32xf32> -> vector<1x32xf32>
    %512 = arith.addf %507, %511 : vector<1x32xf32>
    %513 = vector.extract_strided_slice %496 {offsets = [3, 0], sizes = [1, 16], strides = [1, 1]} : vector<8x16xf32> to vector<1x16xf32>
    %c3_523 = arith.constant 3 : index
    %c0_524 = arith.constant 0 : index
    %c0_525 = arith.constant 0 : index
    %514 = vector.load %arg20[%c3_523, %c0_524, %c0_525] : memref<8x16x32xf32, #tpu.memory_space<vmem>>, vector<1x16x32xf32>
    %515 = vector.shape_cast %514 : vector<1x16x32xf32> to vector<16x32xf32>
    %cst_526 = arith.constant dense<0.000000e+00> : vector<1x32xf32>
    %516 = tpu.matmul %513, %515, %cst_526 {dimension_numbers = #tpu.dot_dimension_numbers<[1], [0], [0], [1], [0, 0, 1, 1], [], []>} : vector<1x16xf32>, vector<16x32xf32>, vector<1x32xf32> -> vector<1x32xf32>
    %517 = arith.addf %512, %516 : vector<1x32xf32>
    %518 = vector.extract_strided_slice %496 {offsets = [4, 0], sizes = [1, 16], strides = [1, 1]} : vector<8x16xf32> to vector<1x16xf32>
    %c4_527 = arith.constant 4 : index
    %c0_528 = arith.constant 0 : index
    %c0_529 = arith.constant 0 : index
    %519 = vector.load %arg20[%c4_527, %c0_528, %c0_529] : memref<8x16x32xf32, #tpu.memory_space<vmem>>, vector<1x16x32xf32>
    %520 = vector.shape_cast %519 : vector<1x16x32xf32> to vector<16x32xf32>
    %cst_530 = arith.constant dense<0.000000e+00> : vector<1x32xf32>
    %521 = tpu.matmul %518, %520, %cst_530 {dimension_numbers = #tpu.dot_dimension_numbers<[1], [0], [0], [1], [0, 0, 1, 1], [], []>} : vector<1x16xf32>, vector<16x32xf32>, vector<1x32xf32> -> vector<1x32xf32>
    %522 = arith.addf %517, %521 : vector<1x32xf32>
    %523 = vector.extract_strided_slice %496 {offsets = [5, 0], sizes = [1, 16], strides = [1, 1]} : vector<8x16xf32> to vector<1x16xf32>
    %c5_531 = arith.constant 5 : index
    %c0_532 = arith.constant 0 : index
    %c0_533 = arith.constant 0 : index
    %524 = vector.load %arg20[%c5_531, %c0_532, %c0_533] : memref<8x16x32xf32, #tpu.memory_space<vmem>>, vector<1x16x32xf32>
    %525 = vector.shape_cast %524 : vector<1x16x32xf32> to vector<16x32xf32>
    %cst_534 = arith.constant dense<0.000000e+00> : vector<1x32xf32>
    %526 = tpu.matmul %523, %525, %cst_534 {dimension_numbers = #tpu.dot_dimension_numbers<[1], [0], [0], [1], [0, 0, 1, 1], [], []>} : vector<1x16xf32>, vector<16x32xf32>, vector<1x32xf32> -> vector<1x32xf32>
    %527 = arith.addf %522, %526 : vector<1x32xf32>
    %528 = vector.extract_strided_slice %496 {offsets = [6, 0], sizes = [1, 16], strides = [1, 1]} : vector<8x16xf32> to vector<1x16xf32>
    %c6_535 = arith.constant 6 : index
    %c0_536 = arith.constant 0 : index
    %c0_537 = arith.constant 0 : index
    %529 = vector.load %arg20[%c6_535, %c0_536, %c0_537] : memref<8x16x32xf32, #tpu.memory_space<vmem>>, vector<1x16x32xf32>
    %530 = vector.shape_cast %529 : vector<1x16x32xf32> to vector<16x32xf32>
    %cst_538 = arith.constant dense<0.000000e+00> : vector<1x32xf32>
    %531 = tpu.matmul %528, %530, %cst_538 {dimension_numbers = #tpu.dot_dimension_numbers<[1], [0], [0], [1], [0, 0, 1, 1], [], []>} : vector<1x16xf32>, vector<16x32xf32>, vector<1x32xf32> -> vector<1x32xf32>
    %532 = arith.addf %527, %531 : vector<1x32xf32>
    %533 = vector.extract_strided_slice %496 {offsets = [7, 0], sizes = [1, 16], strides = [1, 1]} : vector<8x16xf32> to vector<1x16xf32>
    %c7_539 = arith.constant 7 : index
    %c0_540 = arith.constant 0 : index
    %c0_541 = arith.constant 0 : index
    %534 = vector.load %arg20[%c7_539, %c0_540, %c0_541] : memref<8x16x32xf32, #tpu.memory_space<vmem>>, vector<1x16x32xf32>
    %535 = vector.shape_cast %534 : vector<1x16x32xf32> to vector<16x32xf32>
    %cst_542 = arith.constant dense<0.000000e+00> : vector<1x32xf32>
    %536 = tpu.matmul %533, %535, %cst_542 {dimension_numbers = #tpu.dot_dimension_numbers<[1], [0], [0], [1], [0, 0, 1, 1], [], []>} : vector<1x16xf32>, vector<16x32xf32>, vector<1x32xf32> -> vector<1x32xf32>
    %537 = arith.addf %532, %536 : vector<1x32xf32>
    %cst_543 = arith.constant 0.000000e+00 : f32
    %538 = vector.broadcast %cst_543 : f32 to vector<1x32xf32>
    %539 = arith.maximumf %537, %538 : vector<1x32xf32>
    %c0_544 = arith.constant 0 : index
    %c0_545 = arith.constant 0 : index
    %540 = vector.load %arg22[%c0_544, %c0_545] : memref<32x5xf32, #tpu.memory_space<vmem>>, vector<32x5xf32>
    %cst_546 = arith.constant dense<0.000000e+00> : vector<1x5xf32>
    %541 = tpu.matmul %539, %540, %cst_546 {dimension_numbers = #tpu.dot_dimension_numbers<[1], [0], [0], [1], [0, 0, 1, 1], [], []>} : vector<1x32xf32>, vector<32x5xf32>, vector<1x5xf32> -> vector<1x5xf32>
    %c0_547 = arith.constant 0 : index
    %c0_548 = arith.constant 0 : index
    %542 = vector.load %arg23[%c0_547, %c0_548] : memref<1x5xf32, #tpu.memory_space<vmem>>, vector<1x5xf32>
    %543 = arith.addf %541, %542 : vector<1x5xf32>
    %c0_549 = arith.constant 0 : index
    %c0_550 = arith.constant 0 : index
    %c0_551 = arith.constant 0 : index
    %544 = vector.load %arg24[%c0_549, %c0_550, %c0_551] : memref<1x1x5xf32, #tpu.memory_space<vmem>>, vector<1x1x5xf32>
    %545 = vector.shape_cast %544 : vector<1x1x5xf32> to vector<1x5xf32>
    %546 = vector.shape_cast %543 : vector<1x5xf32> to vector<1x1x5xf32>
    tpu.vector_store %arg24[%c0_549, %c0_550, %c0_551], %546 {strides = array<i32>} : memref<1x1x5xf32, #tpu.memory_space<vmem>>, vector<1x1x5xf32>,
    return
  }
  func.func @transform_0(%arg0: i32) -> (i32, i32, i32) {
    %c0_i32 = arith.constant 0 : i32
    %c0_i32_0 = arith.constant 0 : i32
    %c0_i32_1 = arith.constant 0 : i32
    return %arg0, %c0_i32, %c0_i32_0 : i32, i32, i32
  }
  func.func @transform_1(%arg0: i32) -> (i32, i32, i32) {
    %c0_i32 = arith.constant 0 : i32
    %c0_i32_0 = arith.constant 0 : i32
    %c0_i32_1 = arith.constant 0 : i32
    %c0_i32_2 = arith.constant 0 : i32
    return %c0_i32, %c0_i32_0, %c0_i32_1 : i32, i32, i32
  }
  func.func @transform_2(%arg0: i32) -> (i32, i32, i32) {
    %c0_i32 = arith.constant 0 : i32
    %c0_i32_0 = arith.constant 0 : i32
    %c0_i32_1 = arith.constant 0 : i32
    %c0_i32_2 = arith.constant 0 : i32
    return %c0_i32, %c0_i32_0, %c0_i32_1 : i32, i32, i32
  }
  func.func @transform_3(%arg0: i32) -> (i32, i32, i32) {
    %c0_i32 = arith.constant 0 : i32
    %c0_i32_0 = arith.constant 0 : i32
    %c0_i32_1 = arith.constant 0 : i32
    %c0_i32_2 = arith.constant 0 : i32
    return %c0_i32, %c0_i32_0, %c0_i32_1 : i32, i32, i32
  }
  func.func @transform_4(%arg0: i32) -> (i32, i32, i32) {
    %c0_i32 = arith.constant 0 : i32
    %c0_i32_0 = arith.constant 0 : i32
    %c0_i32_1 = arith.constant 0 : i32
    %c0_i32_2 = arith.constant 0 : i32
    return %c0_i32, %c0_i32_0, %c0_i32_1 : i32, i32, i32
  }
  func.func @transform_5(%arg0: i32) -> (i32, i32) {
    %c0_i32 = arith.constant 0 : i32
    %c0_i32_0 = arith.constant 0 : i32
    %c0_i32_1 = arith.constant 0 : i32
    return %c0_i32, %c0_i32_0 : i32, i32
  }
  func.func @transform_6(%arg0: i32) -> (i32, i32) {
    %c0_i32 = arith.constant 0 : i32
    %c0_i32_0 = arith.constant 0 : i32
    %c0_i32_1 = arith.constant 0 : i32
    return %c0_i32, %c0_i32_0 : i32, i32
  }
  func.func @transform_7(%arg0: i32) -> (i32, i32, i32) {
    %c0_i32 = arith.constant 0 : i32
    %c0_i32_0 = arith.constant 0 : i32
    %c0_i32_1 = arith.constant 0 : i32
    %c0_i32_2 = arith.constant 0 : i32
    return %c0_i32, %c0_i32_0, %c0_i32_1 : i32, i32, i32
  }
  func.func @transform_8(%arg0: i32) -> (i32, i32) {
    %c0_i32 = arith.constant 0 : i32
    %c0_i32_0 = arith.constant 0 : i32
    %c0_i32_1 = arith.constant 0 : i32
    return %c0_i32, %c0_i32_0 : i32, i32
  }
  func.func @transform_9(%arg0: i32) -> (i32, i32, i32) {
    %c0_i32 = arith.constant 0 : i32
    %c0_i32_0 = arith.constant 0 : i32
    %c0_i32_1 = arith.constant 0 : i32
    %c0_i32_2 = arith.constant 0 : i32
    return %c0_i32, %c0_i32_0, %c0_i32_1 : i32, i32, i32
  }
  func.func @transform_10(%arg0: i32) -> (i32, i32) {
    %c0_i32 = arith.constant 0 : i32
    %c0_i32_0 = arith.constant 0 : i32
    %c0_i32_1 = arith.constant 0 : i32
    return %c0_i32, %c0_i32_0 : i32, i32
  }
  func.func @transform_11(%arg0: i32) -> (i32, i32, i32) {
    %c0_i32 = arith.constant 0 : i32
    %c0_i32_0 = arith.constant 0 : i32
    %c0_i32_1 = arith.constant 0 : i32
    %c0_i32_2 = arith.constant 0 : i32
    return %c0_i32, %c0_i32_0, %c0_i32_1 : i32, i32, i32
  }
  func.func @transform_12(%arg0: i32) -> (i32, i32) {
    %c0_i32 = arith.constant 0 : i32
    %c0_i32_0 = arith.constant 0 : i32
    %c0_i32_1 = arith.constant 0 : i32
    return %c0_i32, %c0_i32_0 : i32, i32
  }
  func.func @transform_13(%arg0: i32) -> (i32, i32, i32) {
    %c0_i32 = arith.constant 0 : i32
    %c0_i32_0 = arith.constant 0 : i32
    %c0_i32_1 = arith.constant 0 : i32
    %c0_i32_2 = arith.constant 0 : i32
    return %c0_i32, %c0_i32_0, %c0_i32_1 : i32, i32, i32
  }
  func.func @transform_14(%arg0: i32) -> (i32, i32) {
    %c0_i32 = arith.constant 0 : i32
    %c0_i32_0 = arith.constant 0 : i32
    %c0_i32_1 = arith.constant 0 : i32
    return %c0_i32, %c0_i32_0 : i32, i32
  }
  func.func @transform_15(%arg0: i32) -> (i32, i32, i32) {
    %c0_i32 = arith.constant 0 : i32
    %c0_i32_0 = arith.constant 0 : i32
    %c0_i32_1 = arith.constant 0 : i32
    %c0_i32_2 = arith.constant 0 : i32
    return %c0_i32, %c0_i32_0, %c0_i32_1 : i32, i32, i32
  }
  func.func @transform_16(%arg0: i32) -> (i32, i32) {
    %c0_i32 = arith.constant 0 : i32
    %c0_i32_0 = arith.constant 0 : i32
    %c0_i32_1 = arith.constant 0 : i32
    return %c0_i32, %c0_i32_0 : i32, i32
  }
  func.func @transform_17(%arg0: i32) -> (i32, i32, i32) {
    %c0_i32 = arith.constant 0 : i32
    %c0_i32_0 = arith.constant 0 : i32
    %c0_i32_1 = arith.constant 0 : i32
    %c0_i32_2 = arith.constant 0 : i32
    return %c0_i32, %c0_i32_0, %c0_i32_1 : i32, i32, i32
  }
  func.func @transform_18(%arg0: i32) -> (i32, i32) {
    %c0_i32 = arith.constant 0 : i32
    %c0_i32_0 = arith.constant 0 : i32
    %c0_i32_1 = arith.constant 0 : i32
    return %c0_i32, %c0_i32_0 : i32, i32
  }
  func.func @transform_19(%arg0: i32) -> (i32, i32, i32) {
    %c0_i32 = arith.constant 0 : i32
    %c0_i32_0 = arith.constant 0 : i32
    %c0_i32_1 = arith.constant 0 : i32
    %c0_i32_2 = arith.constant 0 : i32
    return %c0_i32, %c0_i32_0, %c0_i32_1 : i32, i32, i32
  }
  func.func @transform_20(%arg0: i32) -> (i32, i32) {
    %c0_i32 = arith.constant 0 : i32
    %c0_i32_0 = arith.constant 0 : i32
    %c0_i32_1 = arith.constant 0 : i32
    return %c0_i32, %c0_i32_0 : i32, i32
  }
  func.func @transform_21(%arg0: i32) -> (i32, i32) {
    %c0_i32 = arith.constant 0 : i32
    %c0_i32_0 = arith.constant 0 : i32
    %c0_i32_1 = arith.constant 0 : i32
    return %c0_i32, %c0_i32_0 : i32, i32
  }
  func.func @transform_22(%arg0: i32) -> (i32, i32) {
    %c0_i32 = arith.constant 0 : i32
    %c0_i32_0 = arith.constant 0 : i32
    %c0_i32_1 = arith.constant 0 : i32
    return %c0_i32, %c0_i32_0 : i32, i32
  }
  func.func @transform_23(%arg0: i32) -> (i32, i32, i32) {
    %c0_i32 = arith.constant 0 : i32
    %c0_i32_0 = arith.constant 0 : i32
    %c0_i32_1 = arith.constant 0 : i32
    return %arg0, %c0_i32, %c0_i32_0 : i32, i32, i32
  }
}

</mosaic_0001>

<bundles_post_ra>
// kernel: model_forward.1
= control target key start
LH: loop header
LB: loop body
LE: loop exit
PB: predicated region body
PF: predicated region fallthrough
CT: control target
= control target key end

     0   :  { %s19479_s0 = inlined_call_operand.vmem [shape: f32[2,3,256], index: 0, kind: input, shape index: {}]   ;;  %s19480_s1 = inlined_call_operand.hbm [shape: f32[9,256,256], index: 1, kind: input, shape index: {}]   ;;  %s19481_s2 = inlined_call_operand.hbm [shape: f32[9,64,64], index: 2, kind: input, shape index: {}]   ;;  %s19482_s3 = inlined_call_operand.hbm [shape: f32[4,256,64], index: 3, kind: input, shape index: {}]   ;;  %s19483_s4 = inlined_call_operand.hbm [shape: f32[4,64,16], index: 4, kind: input, shape index: {}]   ;;  %s19484_s5 = inlined_call_operand.hbm [shape: f32[16,64], index: 5, kind: input, shape index: {}]   ;;  %s19485_s6 = inlined_call_operand.hbm [shape: f32[64,256], index: 6, kind: input, shape index: {}]   ;;  %s19486_s7 = inlined_call_operand.vmem [shape: f32[9,8,3], index: 7, kind: input, shape index: {}]   ;;  %s19487_s8 = inlined_call_operand.vmem [shape: f32[8,1], index: 8, kind: input, shape index: {}]   ;;  %s19488_s9 = inlined_call_operand.hbm [shape: f32[9,4,8], index: 9, kind: input, shape index: {}]   ;;  %s19489_s10 = inlined_call_operand.vmem [shape: f32[4,1], index: 10, kind: input, shape index: {}]   ;;  %s19490_s11 = inlined_call_operand.vmem [shape: f32[9,8,4], index: 11, kind: input, shape index: {}]   ;;  %s19491_s12 = inlined_call_operand.vmem [shape: f32[8,1], index: 12, kind: input, shape index: {}]   ;;  %s19492_s13 = inlined_call_operand.hbm [shape: f32[9,1,8], index: 13, kind: input, shape index: {}]   ;;  %s19493_s14 = inlined_call_operand.<no memory space> [shape: f32[1,1], index: 14, kind: input, shape index: {}]   ;;  %s19494_s15 = inlined_call_operand.vmem [shape: f32[9,4,1], index: 15, kind: input, shape index: {}]   ;;  %s19495_s16 = inlined_call_operand.vmem [shape: f32[4,1], index: 16, kind: input, shape index: {}]   ;;  %s19496_s17 = inlined_call_operand.vmem [shape: f32[9,8,4], index: 17, kind: input, shape index: {}]   ;;  %s19497_s18 = inlined_call_operand.vmem [shape: f32[8,1], index: 18, kind: input, shape index: {}]   ;;  %s19498_s19 = inlined_call_operand.vmem [shape: f32[8,16,32], index: 19, kind: input, shape index: {}]   ;;  %s19499_s20 = inlined_call_operand.hbm [shape: f32[1,32], index: 20, kind: input, shape index: {}]   ;;  %s19500_s21 = inlined_call_operand.vmem [shape: f32[32,5], index: 21, kind: input, shape index: {}]   ;;  %s19501_s22 = inlined_call_operand.hbm [shape: f32[1,5], index: 22, kind: input, shape index: {}]   ;;  %s19502_s23 = inlined_call_operand.hbm [shape: f32[2,1,5], index: 23, kind: output, shape index: {}]  }
   0x1   :  { %20207 = sst [smem:[#allocation427_spill]] %s19479_s0  ;;  %v28_v0 = vstv %s19493_s14 }
   0x2   :  { %20208 = sst [smem:[#allocation428_spill]] %s19480_s1  ;;  %29 = vst [vmem:[#allocation2] sm:$0x1] %v28_v0 }
   0x3   :  { %20209 = sst [smem:[#allocation429_spill]] %s19481_s2 }
   0x4   :  { %20210 = sst [smem:[#allocation430_spill]] %s19482_s3 }
   0x5   :  { %20211 = sst [smem:[#allocation431_spill]] %s19483_s4 }
   0x6   :  { %20212 = sst [smem:[#allocation432_spill]] %s19484_s5 }
   0x7   :  { %20213 = sst [smem:[#allocation433_spill]] %s19485_s6 }
   0x8   :  { %20214 = sst [smem:[#allocation434_spill]] %s19486_s7 }
   0x9   :  { %20215 = sst [smem:[#allocation435_spill]] %s19492_s13 }
   0xa   :  { %20216 = sst [smem:[#allocation436_spill]] %s19495_s16 }
   0xb   :  { %20217 = sst [smem:[#allocation437_spill]] %s19496_s17 }
   0xc   :  { %20218 = sst [smem:[#allocation438_spill]] %s19498_s19 }
   0xd   :  { %20219 = sst [smem:[#allocation439_spill]] %s19500_s21 }
   0xe   :  { %20220 = sst [smem:[#allocation440_spill]] %s19502_s23 }
   0xf   :  { %30 = vsyncpa [#allocation4], 0 }
  0x10   :  { %31 = vsyncpa [#allocation7], 0 }
  0x11   :  { %32 = vsyncpa [#allocation10], 0 }
  0x12   :  { %33 = vsyncpa [#allocation13], 0 }
  0x13   :  { %34 = vsyncpa [#allocation16], 0 }
  0x14   :  { %35 = vsyncpa [#allocation19], 0 }
  0x15   :  { %36 = vsyncpa [#allocation5], 0 }
  0x16   :  { %38 = vsyncpa [#allocation5 + $0x1], 0  ;;  %s16371_s24 = smov 0   ;;  %s16373_s25 = smov 0  }
  0x17   :  { %s16375_s5 = smov 0   ;;  %s16377_s1 = smov 0  }
  0x18 LB: > { %20221 = sst [smem:[#allocation28_spill]] %s16212_s24  ;;  %s16392_s14 = sadd.s32 4294967295, %s16224_s1   ;;  %s16224_s1 = sphi %s16377_s1, %s21268_s1   ;;  %s16220_s5 = sphi %s16375_s5, %s21271_s5   ;;  %s16216_s25 = sphi %s16373_s25, %s21270_s25   ;;  %s16212_s24 = sphi %s16371_s24, %s21269_s24  }
  0x19   : > { %20222 = sst [smem:[#allocation29_spill]] %s16216_s25  ;;  %s11369_s26 = sadd.s32 4294967294, %s16224_s1  }
  0x1a   : > { %20223 = sst [smem:[#allocation30_spill]] %s16220_s5  ;;  %s16396_s2 = sadd.s32 1, %s16224_s1  }
  0x1b   : > { %20224 = sst [smem:[#allocation31_spill]] %s16224_s1  ;;  %s539_s6 = sadd.s32 1, %s16220_s5 }
  0x1c   : > { %20225 = sst [smem:[#allocation32_spill]] %s16396_s2  ;;  %s536_s27 = ssub.s32 %s16224_s1, %s16396_s2 }
  0x1d   : > { %p549_p0 = scmp.ne.s32.totalorder %s16220_s5, %s16216_s25  ;;  %p537_p1 = scmp.eq.s32.totalorder %s536_s27, 0 }
  0x1e   : > { %p550_p2 = scmp.eq.s32.totalorder %s16392_s14, 1  ;;  %p555_p3 = scmp.ne.s32.totalorder %s16216_s25, %s16212_s24 }
  0x1f   : > { %p556_p4 = scmp.eq.s32.totalorder %s11369_s26, 1  ;;  %p11370_p7 = scmp.ge.s32.totalorder %s16224_s1, 1 }
  0x20   : > { %s16407_s7 = scalar_select %p537_p1, %s16220_s5, %s539_s6  }
  0x21   : > { %p16409_p5 = por %p550_p2, %p549_p0  ;;  %p16413_p6 = por %p556_p4, %p555_p3 }
  0x22   : > { %20226 = sst [smem:[#allocation33_spill]] %s16407_s7  ;;  %p563_p8 = scmp.lt.s32.totalorder %s16224_s1, 3 }
  0x23   : > { %s20227_s28 = scalar_select %p16409_p5, 1, 0 }
  0x24   : > { %s20229_s29 = scalar_select %p16413_p6, 1, 0 }
  0x25   : > { %20228 = sst [smem:[#allocation34_spill]] %s20227_s28  ;;  %p19517_p9 = scmp.eq.s32.totalorder %s16392_s14, 0 }
  0x26   : > { %20230 = sst [smem:[#allocation35_spill]] %s20229_s29  ;;  %p16420_p10 = pnand %p11370_p7, %p563_p8 }
  0x27   : > { %s16226_s0 = smov [#allocation6]   ;;  %s16227_s26 = smov [#allocation9]  }
  0x28   : > { %s20231_s3 = scalar_select %p16420_p10, 1, 0 }
  0x29   : > { %s588_s4 = sshll.u32 %s16226_s0, 4  ;;  %p15742_p11 = pneg %p16420_p10  ;;  %s589_s4 = int_to_ptr.vmem [resolvable:$true] %s588_s4 }
  0x2a   : > { %s614_s6 = sshll.u32 %s16227_s26, 4  ;;  %s20233_s5 = sld [smem:[#allocation429_spill]]  ;;  %s16432_s6 = int_to_ptr.vmem [resolvable:$true] %s614_s6 }
  0x2b   : > { %p16428_p12 = pnand %p19517_p9, %p15742_p11 }
  0x2d   : > { %p16442_p0 = pneg %p16428_p12 }
  0x30   : > { %s20234_s2 = smov %s20233_s5  ;;  %s15858_s29 = scalar_lea.hbm %s20233_s5, 9216 }
  0x31   : > { %p15859_p13 = scmp.ne.s32.totalorder %s20234_s2, %s15858_s29  ;;  %p15865_p3 = scmp.lt.u32.totalorder %s15858_s29, %s20234_s2 }
  0x33   : > { %p15861_p1 = pnand %p16442_p0, %p15859_p13 }
  0x35   : > { %p15862_p2 = pneg %p15861_p1 }
  0x37   : > { %p15867_p4 = pnand %p15865_p3, %p15862_p2 }
  0x39   : > { %15870 = shalt.err (!%p15867_p4)
}
  0x3a   : > { %s15871_s5 = scalar_lea.vmem %s589_s4, 9216  ;;  %p15879_p9 = scmp.lt.s32.totalorder %s589_s4, %s589_s4 }
  0x3b   : > { %p15872_p7 = scmp.ne.s32.totalorder %s589_s4, %s15871_s5  ;;  %p15880_p6 = scmp.lt.s32.totalorder %s15871_s5, %s15871_s5 }
  0x3d   : > { %p15874_p8 = pnand %p15872_p7, %p16442_p0  ;;  %p15881_p5 = por %p15880_p6, %p15879_p9 }
  0x3f   : > { %p15875_p11 = pneg %p15874_p8 }
  0x41   : > { %p15882_p10 = pnand %p15881_p5, %p15875_p11 }
  0x43   : > { %15885 = shalt.err (!%p15882_p10)
}
  0x44   : > { %s19527_s24 = smov 128   ;;  %s19529_s1 = smov 8  }
  0x45   : > { %15748 = dma.hbm_to_vmem [thread:$0]  (!%p16428_p12), %s20234_s2, 9216, %s589_s4, [#allocation7], %s19527_s24, %s19527_s24, %s19529_s1  }
  0x46   : > { %s20236_s26 = sld [smem:[#allocation431_spill]] }
  0x4c   : > { %s15886_s28 = scalar_lea.hbm %s20236_s26, 4096 }
  0x4d   : > { %p15887_p5 = scmp.ne.s32.totalorder %s20236_s26, %s15886_s28  ;;  %p15893_p10 = scmp.lt.u32.totalorder %s15886_s28, %s20236_s26 }
  0x4f   : > { %p15889_p6 = pnand %p15887_p5, %p16442_p0 }
  0x51   : > { %p15890_p9 = pneg %p15889_p6 }
  0x53   : > { %p15895_p13 = pnand %p15893_p10, %p15890_p9 }
  0x55   : > { %15898 = shalt.err (!%p15895_p13)
}
  0x56   : > { %s15899_s4 = scalar_lea.vmem %s16432_s6, 4096  ;;  %p15907_p4 = scmp.lt.s32.totalorder %s16432_s6, %s16432_s6 }
  0x57   : > { %p15900_p1 = scmp.ne.s32.totalorder %s16432_s6, %s15899_s4  ;;  %p15908_p7 = scmp.lt.s32.totalorder %s15899_s4, %s15899_s4 }
  0x59   : > { %p15902_p2 = pnand %p15900_p1, %p16442_p0  ;;  %p15909_p8 = por %p15908_p7, %p15907_p4 }
  0x5b   : > { %p15903_p3 = pneg %p15902_p2 }
  0x5d   : > { %p15910_p11 = pnand %p15909_p8, %p15903_p3 }
  0x5f   : > { %15913 = shalt.err (!%p15910_p11)
}
  0x60   : > { %15754 = dma.hbm_to_vmem [thread:$0]  (!%p16428_p12), %s20236_s26, 4096, %s16432_s6, [#allocation10], %s19527_s24, %s19527_s24, %s19529_s1  }
  0x61   : > { %s16230_s25 = smov [#allocation12]   ;;  %s16231_s23 = smov [#allocation15]  }
  0x62   : > { %s640_s28 = sshll.u32 %s16230_s25, 4  ;;  %s681_s7 = sshll.u32 %s16231_s23, 4  ;;  %s641_s28 = int_to_ptr.vmem [resolvable:$true] %s640_s28  ;;  %s16487_s7 = int_to_ptr.vmem [resolvable:$true] %s681_s7 }
  0x63   : > { %s20237_s5 = sld [smem:[#allocation433_spill]] }
  0x69   : > { %s20238_s4 = smov %s20237_s5  ;;  %s15914_s2 = scalar_lea.hbm %s20237_s5, 2048 }
  0x6a   : > { %p15915_p5 = scmp.ne.s32.totalorder %s20238_s4, %s15914_s2  ;;  %p15921_p10 = scmp.lt.u32.totalorder %s15914_s2, %s20238_s4 }
  0x6c   : > { %p15917_p6 = pnand %p15915_p5, %p16442_p0 }
  0x6e   : > { %p15918_p9 = pneg %p15917_p6 }
  0x70   : > { %p15923_p13 = pnand %p15921_p10, %p15918_p9 }
  0x72   : > { %15926 = shalt.err (!%p15923_p13)
}
  0x73   : > { %s15927_s21 = scalar_lea.vmem %s641_s28, 2048  ;;  %p15935_p4 = scmp.lt.s32.totalorder %s641_s28, %s641_s28 }
  0x74   : > { %p15928_p1 = scmp.ne.s32.totalorder %s641_s28, %s15927_s21  ;;  %p15936_p7 = scmp.lt.s32.totalorder %s15927_s21, %s15927_s21 }
  0x76   : > { %p15930_p2 = pnand %p15928_p1, %p16442_p0  ;;  %p15937_p8 = por %p15936_p7, %p15935_p4 }
  0x78   : > { %p15931_p3 = pneg %p15930_p2 }
  0x7a   : > { %p15938_p11 = pnand %p15937_p8, %p15931_p3 }
  0x7c   : > { %15941 = shalt.err (!%p15938_p11)
}
  0x7d   : > { %s19531_s16 = smov 256   ;;  %s16233_s17 = smov 16  }
  0x7e   : > { %15760 = dma.hbm_to_vmem [thread:$0]  (!%p16428_p12), %s20238_s4, 2048, %s641_s28, [#allocation13], %s19531_s16, %s19531_s16, %s16233_s17  }
  0x7f   : > { %s20239_s13 = sld [smem:[#allocation435_spill]] }
  0x85   : > { %s15942_s27 = scalar_lea.hbm %s20239_s13, 144 }
  0x86   : > { %p15943_p5 = scmp.ne.s32.totalorder %s20239_s13, %s15942_s27  ;;  %p15949_p10 = scmp.lt.u32.totalorder %s15942_s27, %s20239_s13 }
  0x88   : > { %p15945_p6 = pnand %p15943_p5, %p16442_p0 }
  0x8a   : > { %p15946_p9 = pneg %p15945_p6 }
  0x8c   : > { %p15951_p13 = pnand %p15949_p10, %p15946_p9 }
  0x8e   : > { %15954 = shalt.err (!%p15951_p13)
}
  0x8f   : > { %s15955_s28 = scalar_lea.vmem %s16487_s7, 144  ;;  %s15962_s2 = scalar_lea.vmem %s16487_s7, 160 }
  0x90   : > { %p15956_p1 = scmp.ne.s32.totalorder %s16487_s7, %s15955_s28  ;;  %p15963_p4 = scmp.lt.s32.totalorder %s16487_s7, %s16487_s7 }
  0x91   : > { %p15964_p7 = scmp.lt.s32.totalorder %s15962_s2, %s15955_s28 }
  0x92   : > { %p15958_p2 = pnand %p15956_p1, %p16442_p0 }
  0x93   : > { %p15965_p8 = por %p15964_p7, %p15963_p4 }
  0x94   : > { %p15959_p3 = pneg %p15958_p2 }
  0x96   : > { %p15966_p11 = pnand %p15965_p8, %p15959_p3 }
  0x98   : > { %15969 = shalt.err (!%p15966_p11)
}
  0x99   : > { %s16234_s25 = smov 1   ;;  %s16235_s27 = smov [#allocation3]  }
  0x9a   : > { %15766 = dma.hbm_to_vmem [thread:$0]  (!%p16428_p12), %s20239_s13, 144, %s16487_s7, [#allocation16], %s16233_s17, %s16233_s17, %s16234_s25  }
  0x9b   : > { %s575_s5 = sshll.u32 %s16235_s27, 4  ;;  %s16236_s19 = smov [#allocation8]   ;;  %s576_s5 = int_to_ptr.vmem [resolvable:$true] %s575_s5 }
  0x9c   : > { %s601_s6 = sshll.u32 %s16236_s19, 4  ;;  %s20240_s2 = sld [smem:[#allocation428_spill]]  ;;  %s602_s6 = int_to_ptr.vmem [resolvable:$true] %s601_s6 }
  0xa2   : > { %s15970_s24 = scalar_lea.hbm %s20240_s2, 73728 }
  0xa3   : > { %p15971_p5 = scmp.ne.s32.totalorder %s20240_s2, %s15970_s24  ;;  %p15977_p10 = scmp.lt.u32.totalorder %s15970_s24, %s20240_s2 }
  0xa5   : > { %p15973_p6 = pnand %p15971_p5, %p16442_p0 }
  0xa7   : > { %p15974_p9 = pneg %p15973_p6 }
  0xa9   : > { %p15979_p13 = pnand %p15977_p10, %p15974_p9 }
  0xab   : > { %15982 = shalt.err (!%p15979_p13)
}
  0xac   : > { %s15983_s7 = scalar_lea.vmem %s576_s5, 73728  ;;  %p15991_p4 = scmp.lt.s32.totalorder %s576_s5, %s576_s5 }
  0xad   : > { %p15984_p1 = scmp.ne.s32.totalorder %s576_s5, %s15983_s7  ;;  %p15992_p7 = scmp.lt.s32.totalorder %s15983_s7, %s15983_s7 }
  0xaf   : > { %p15986_p2 = pnand %p15984_p1, %p16442_p0  ;;  %p15993_p8 = por %p15992_p7, %p15991_p4 }
  0xb1   : > { %p15987_p3 = pneg %p15986_p2 }
  0xb3   : > { %p15994_p11 = pnand %p15993_p8, %p15987_p3 }
  0xb5   : > { %15997 = shalt.err (!%p15994_p11)
}
  0xb6   : > { %s20241_s1 = smov 256   ;;  %s20242_s29 = sld [smem:[#allocation430_spill]] }
  0xb7   : > { %15745 = dma.hbm_to_vmem [thread:$0]  (!%p16428_p12), %s20240_s2, 73728, %s576_s5, [#allocation4], %s20241_s1, %s20241_s1, %s16233_s17  }
  0xbc   : > { %s15998_s27 = scalar_lea.hbm %s20242_s29, 16384 }
  0xbd   : > { %p15999_p5 = scmp.ne.s32.totalorder %s20242_s29, %s15998_s27  ;;  %p16005_p10 = scmp.lt.u32.totalorder %s15998_s27, %s20242_s29 }
  0xbf   : > { %p16001_p6 = pnand %p15999_p5, %p16442_p0 }
  0xc1   : > { %p16002_p9 = pneg %p16001_p6 }
  0xc3   : > { %p16007_p13 = pnand %p16005_p10, %p16002_p9 }
  0xc5   : > { %16010 = shalt.err (!%p16007_p13)
}
  0xc6   : > { %s16011_s7 = scalar_lea.vmem %s602_s6, 16384  ;;  %p16019_p4 = scmp.lt.s32.totalorder %s602_s6, %s602_s6 }
  0xc7   : > { %p16012_p1 = scmp.ne.s32.totalorder %s602_s6, %s16011_s7  ;;  %p16020_p7 = scmp.lt.s32.totalorder %s16011_s7, %s16011_s7 }
  0xc9   : > { %p16014_p2 = pnand %p16012_p1, %p16442_p0  ;;  %p16021_p8 = por %p16020_p7, %p16019_p4 }
  0xcb   : > { %p16015_p3 = pneg %p16014_p2 }
  0xcd   : > { %p16022_p11 = pnand %p16021_p8, %p16015_p3 }
  0xcf   : > { %16025 = shalt.err (!%p16022_p11)
}
  0xd0   : > { %s20243_s17 = smov 8   ;;  %s20244_s5 = smov 128  }
  0xd1   : > { %15751 = dma.hbm_to_vmem [thread:$0]  (!%p16428_p12), %s20242_s29, 16384, %s602_s6, [#allocation7], %s20244_s5, %s20244_s5, %s20243_s17  }
  0xd2   : > { %s16237_s24 = smov [#allocation11]   ;;  %s16238_s25 = smov [#allocation14]  }
  0xd3   : > { %s627_s16 = sshll.u32 %s16237_s24, 4  ;;  %s659_s27 = sshll.u32 %s16238_s25, 4  ;;  %s628_s16 = int_to_ptr.vmem [resolvable:$true] %s627_s16  ;;  %s660_s27 = int_to_ptr.vmem [resolvable:$true] %s659_s27 }
  0xd4   : > { %s20245_s28 = sld [smem:[#allocation432_spill]] }
  0xda   : > { %s16026_s23 = scalar_lea.hbm %s20245_s28, 256 }
  0xdb   : > { %p16027_p5 = scmp.ne.s32.totalorder %s20245_s28, %s16026_s23  ;;  %p16033_p10 = scmp.lt.u32.totalorder %s16026_s23, %s20245_s28 }
  0xdd   : > { %p16029_p6 = pnand %p16027_p5, %p16442_p0 }
  0xdf   : > { %p16030_p9 = pneg %p16029_p6 }
  0xe1   : > { %p16035_p13 = pnand %p16033_p10, %p16030_p9 }
  0xe3   : > { %16038 = shalt.err (!%p16035_p13)
}
  0xe4   : > { %s16039_s6 = scalar_lea.vmem %s628_s16, 256  ;;  %p16047_p4 = scmp.lt.s32.totalorder %s628_s16, %s628_s16 }
  0xe5   : > { %p16040_p1 = scmp.ne.s32.totalorder %s628_s16, %s16039_s6  ;;  %p16048_p7 = scmp.lt.s32.totalorder %s16039_s6, %s16039_s6 }
  0xe7   : > { %p16042_p2 = pnand %p16040_p1, %p16442_p0  ;;  %p16049_p8 = por %p16048_p7, %p16047_p4 }
  0xe9   : > { %p16043_p3 = pneg %p16042_p2 }
  0xeb   : > { %p16050_p11 = pnand %p16049_p8, %p16043_p3 }
  0xed   : > { %16053 = shalt.err (!%p16050_p11)
}
  0xee   : > { %15757 = dma.hbm_to_vmem [thread:$0]  (!%p16428_p12), %s20245_s28, 256, %s628_s16, [#allocation10], %s20244_s5, %s20244_s5, %s20243_s17  }
  0xef   : > { %s16054_s25 = scalar_lea.hbm %s19488_s9, 576 }
  0xf0   : > { %p16055_p5 = scmp.ne.s32.totalorder %s19488_s9, %s16054_s25  ;;  %p16061_p10 = scmp.lt.u32.totalorder %s16054_s25, %s19488_s9 }
  0xf2   : > { %p16057_p6 = pnand %p16055_p5, %p16442_p0 }
  0xf4   : > { %p16058_p9 = pneg %p16057_p6 }
  0xf6   : > { %p16063_p13 = pnand %p16061_p10, %p16058_p9 }
  0xf8   : > { %16066 = shalt.err (!%p16063_p13)
}
  0xf9   : > { %s16067_s1 = scalar_lea.vmem %s660_s27, 576  ;;  %p16075_p4 = scmp.lt.s32.totalorder %s660_s27, %s660_s27 }
  0xfa   : > { %p16068_p1 = scmp.ne.s32.totalorder %s660_s27, %s16067_s1  ;;  %p16076_p7 = scmp.lt.s32.totalorder %s16067_s1, %s16067_s1 }
  0xfc   : > { %p16070_p2 = pnand %p16068_p1, %p16442_p0  ;;  %p16077_p8 = por %p16076_p7, %p16075_p4 }
  0xfe   : > { %p16071_p3 = pneg %p16070_p2 }
 0x100   : > { %p16078_p11 = pnand %p16077_p8, %p16071_p3 }
 0x102   : > { %16081 = shalt.err (!%p16078_p11)
}
 0x103   : > { %s16239_s17 = smov 64   ;;  %s16240_s5 = smov 4  }
 0x104   : > { %15763 = dma.hbm_to_vmem [thread:$0]  (!%p16428_p12), %s19488_s9, 576, %s660_s27, [#allocation13], %s16239_s17, %s16239_s17, %s16240_s5  }
 0x105   : > { %s16241_s13 = smov [#allocation17]   ;;  %s16242_s4 = smov [#allocation18]  }
 0x106   : > { %s713_s2 = sshll.u32 %s16241_s13, 4  ;;  %s727_s24 = sshll.u32 %s16242_s4, 4  ;;  %s714_s2 = int_to_ptr.vmem [resolvable:$true] %s713_s2  ;;  %s728_s24 = int_to_ptr.vmem [resolvable:$true] %s727_s24 }
 0x107   : > { %s16082_s21 = scalar_lea.hbm %s19499_s20, 16 }
 0x108   : > { %p16083_p5 = scmp.ne.s32.totalorder %s19499_s20, %s16082_s21  ;;  %p16089_p10 = scmp.lt.u32.totalorder %s16082_s21, %s19499_s20 }
 0x10a   : > { %p16085_p6 = pnand %p16083_p5, %p16442_p0 }
 0x10c   : > { %p16086_p9 = pneg %p16085_p6 }
 0x10e   : > { %p16091_p13 = pnand %p16089_p10, %p16086_p9 }
 0x110   : > { %16094 = shalt.err (!%p16091_p13)
}
 0x111   : > { %s16095_s27 = scalar_lea.vmem %s714_s2, 16  ;;  %s16102_s17 = scalar_lea.vmem %s714_s2, 32 }
 0x112   : > { %p16096_p1 = scmp.ne.s32.totalorder %s714_s2, %s16095_s27  ;;  %p16103_p4 = scmp.lt.s32.totalorder %s714_s2, %s714_s2 }
 0x113   : > { %p16104_p7 = scmp.lt.s32.totalorder %s16102_s17, %s16095_s27 }
 0x114   : > { %p16098_p2 = pnand %p16096_p1, %p16442_p0 }
 0x115   : > { %p16105_p8 = por %p16104_p7, %p16103_p4 }
 0x116   : > { %p16099_p3 = pneg %p16098_p2 }
 0x118   : > { %p16106_p11 = pnand %p16105_p8, %p16099_p3 }
 0x11a   : > { %16109 = shalt.err (!%p16106_p11)
}
 0x11b   : > { %15769 = dma.hbm_to_vmem [thread:$0]  (!%p16428_p12), %s19499_s20, 16, %s714_s2, [#allocation16]  }
 0x11c   : > { %s16110_s13 = scalar_lea.hbm %s19501_s22, 16 }
 0x11d   : > { %p16111_p5 = scmp.ne.s32.totalorder %s19501_s22, %s16110_s13  ;;  %p16117_p10 = scmp.lt.u32.totalorder %s16110_s13, %s19501_s22 }
 0x11f   : > { %p16113_p6 = pnand %p16111_p5, %p16442_p0 }
 0x121   : > { %p16114_p9 = pneg %p16113_p6 }
 0x123   : > { %p16119_p13 = pnand %p16117_p10, %p16114_p9 }
 0x125   : > { %16122 = shalt.err (!%p16119_p13)
}
 0x126   : > { %s16123_s23 = scalar_lea.vmem %s728_s24, 16  ;;  %s16130_s2 = scalar_lea.vmem %s728_s24, 32 }
 0x127   : > { %p16124_p1 = scmp.ne.s32.totalorder %s728_s24, %s16123_s23  ;;  %p16131_p4 = scmp.lt.s32.totalorder %s728_s24, %s728_s24 }
 0x128   : > { %p16132_p7 = scmp.lt.s32.totalorder %s16130_s2, %s16123_s23 }
 0x129   : > { %p16126_p2 = pnand %p16124_p1, %p16442_p0 }
 0x12a   : > { %p16133_p8 = por %p16132_p7, %p16131_p4 }
 0x12b   : > { %p16127_p3 = pneg %p16126_p2 }
 0x12d   : > { %p16134_p11 = pnand %p16133_p8, %p16127_p3 }
 0x12f   : > { %16137 = shalt.err (!%p16134_p11)
}
 0x130   : > { %15772 = dma.hbm_to_vmem [thread:$0]  (!%p16428_p12), %s19501_s22, 16, %s728_s24, [#allocation19]  }
 0x131   : > { %p20246_p5 = scmp.ne.s32.totalorder %s20231_s3, 0 }
 0x133   : > { %748 = sbr.rel (%p20246_p5) target bundleno = 10100 (0x2774), region = 112 }
 0x13a   : > { %p20247_p6 = scmp.eq.s32.totalorder %s16392_s14, 0 }
 0x13c   : > { %16183 = dma.done.wait (%p20247_p6), [#allocation4], 73728   ;;  %p20248_p0 = pmov %p20247_p6 }
 0x13e   : > { %16185 = vsyncadd (%p20248_p0), [#allocation4], 4294893568  ;;  %p20249_p9 = pmov %p20248_p0 }
 0x13f   : > { %p20250_p10 = pmov %p20248_p0 }
 0x140   : > { %16187 = dma.done.wait (%p20249_p9), [#allocation7], 25600  }
 0x141   : > { %16189 = vsyncadd (%p20250_p10), [#allocation7], 4294941696  ;;  %p20251_p13 = pmov %p20248_p0 }
 0x142   : > { %p20252_p12 = pmov %p20248_p0 }
 0x143   : > { %16191 = dma.done.wait (%p20251_p13), [#allocation10], 4352  }
 0x144   : > { %16193 = vsyncadd (%p20252_p12), [#allocation10], 4294962944  ;;  %p20253_p1 = pmov %p20248_p0 }
 0x145   : > { %p20254_p2 = pmov %p20248_p0 }
 0x146   : > { %16195 = dma.done.wait (%p20253_p1), [#allocation13], 2624  }
 0x147   : > { %16197 = vsyncadd (%p20254_p2), [#allocation13], 4294964672  ;;  %p20255_p3 = pmov %p20248_p0 }
 0x148   : > { %p20256_p4 = pmov %p20248_p0 }
 0x149   : > { %16199 = dma.done.wait (%p20255_p3), [#allocation16], 160  }
 0x14a   : > { %16201 = vsyncadd (%p20256_p4), [#allocation16], 4294967136  ;;  %p20257_p7 = pmov %p20248_p0 }
 0x14b   : > { %p20258_p8 = pmov %p20248_p0 }
 0x14c   : > { %16203 = dma.done.wait (%p20257_p7), [#allocation19], 16  }
 0x14d   : > { %16205 = vsyncadd (%p20258_p8), [#allocation19], 4294967280  ;;  %p847_p11 = scmp.lt.s32.totalorder %s16392_s14, 1  ;;  %v19535_v1 = vmov 0.0   ;;  %s20259_s27 = sld [smem:[#allocation427_spill]]  ;;  %vm867_vm0 = vcmask 1042432  }
 0x14e   : > { %936 = vmatprep.mubr.f32.mxu1 %v19535_v1  ;;  %1149 = vmatprep.mubr.f32.mxu0 %v19535_v1  ;;  %s20260_s26 = sld [smem:[#allocation434_spill]]  ;;  %v944_v6 = vld [vmem:[#allocation3 + $0x8] sm:$0xff]  ;;  %v946_v7 = vld [vmem:[#allocation3 + $0x18] sm:$0xff]  ;;  %vm863_vm1 = vcmask 23552   ;;  %v943_v8 = vld [vmem:[#allocation3] sm:$0xff]  ;;  %vm16245_vm2 = vmmov 0  }
 0x14f   : > { %s848_s3 = scalar_select %p847_p11, %s16392_s14, 1  ;;  %v945_v9 = vld [vmem:[#allocation3 + $0x10] sm:$0xff]  ;;  %v948_v10 = vld [vmem:[#allocation3 + $0x28] sm:$0xff]  ;;  %v16702_v11 = vpack.c.bf16 %v946_v7, %v944_v6  ;;  %v950_v12 = vld [vmem:[#allocation3 + $0x38] sm:$0xff]  ;;  %vm3216_vm3 = vcmask 64512   ;;  %vm3298_vm4 = vcmask 523264  }
 0x150   : > { %v16708_v13 = vpack.c.bf16 %v945_v9, %v943_v8  ;;  %v16712_v14 = vpack.c.bf16 %v950_v12, %v948_v10  ;;  %v947_v15 = vld [vmem:[#allocation3 + $0x20] sm:$0xff]  ;;  %v949_v16 = vld [vmem:[#allocation3 + $0x30] sm:$0xff]  ;;  %v952_v18 = vld [vmem:[#allocation3 + $0x48] sm:$0xff]  ;;  %vm4961_vm5 = vcmask 130048   ;;  %vm5047_vm6 = vcmask 1043456   ;;  %s20654_s7 = sld [smem:[#allocation436_spill]] }
 0x151   : > { %s11571_s30 = sshll.u32 %s848_s3, 3  ;;  %v954_v19 = vld [vmem:[#allocation3 + $0x58] sm:$0xff]  ;;  %v16724_v20 = vpack.c.bf16 %v949_v16, %v947_v15  ;;  %v951_v22 = vld [vmem:[#allocation3 + $0x40] sm:$0xff]  ;;  %v953_v23 = vld [vmem:[#allocation3 + $0x50] sm:$0xff]  ;;  %vm5043_vm7 = vcmask 31744   ;;  %s21256_s24 = sld [smem:[#allocation438_spill]] }
 0x152   : > { %v16730_v21 = vpack.c.bf16 %v954_v19, %v952_v18  ;;  %v956_v24 = vld [vmem:[#allocation3 + $0x68] sm:$0xff]  ;;  %v958_v25 = vld [vmem:[#allocation3 + $0x78] sm:$0xff]  ;;  %v16738_v26 = vpack.c.bf16 %v953_v23, %v951_v22  ;;  %v955_v28 = vld [vmem:[#allocation3 + $0x60] sm:$0xff]  ;;  %s21258_s13 = sld [smem:[#allocation439_spill]]  ;;  %s21259_s4 = sld [smem:[#allocation29_spill]]  ;;  %vm11127_vm8 = vcmask 261120  }
 0x153   : > { %s851_s17 = scalar_lea.vmem %s20259_s27, %s11571_s30  ;;  %v16741_v27 = vpack.c.bf16 %v958_v25, %v956_v24  ;;  %v957_v29 = vld [vmem:[#allocation3 + $0x70] sm:$0xff]  ;;  %v960_v30 = vld [vmem:[#allocation3 + $0x88] sm:$0xff]  ;;  %v962_v31 = vld [vmem:[#allocation3 + $0x98] sm:$0xff]  ;;  %s21202_s30 = sld [smem:[#allocation437_spill]]  ;;  %vm11201_vm9 = vcmask 32768  }
 0x154   : > { %v16686_v2 = vld [vmem:[%s851_s17] sm:$0x77]  ;;  %v11398_v5 = vld [vmem:[%s20260_s26 + $0x8] sm:$0xff]  ;;  %v11402_v17 = vld [vmem:[%s20260_s26 + $0x10] sm:$0xff]  ;;  %v16744_v32 = vpack.c.bf16 %v957_v29, %v955_v28  ;;  %v16750_v34 = vpack.c.bf16 %v962_v31, %v960_v30  ;;  %s21260_s2 = sld [smem:[#allocation34_spill]]  ;;  %s11568_s1 = sshll.u32 %s16392_s14, 4 }
 0x155   : > { %v860_v3 = vld [vmem:[%s20260_s26] sm:$0xff]  ;;  %v16693_v4 = vcombine.high %v16686_v2, %v16686_v2  ;;  %v11406_v33 = vld [vmem:[%s20260_s26 + $0x18] sm:$0xff]  ;;  %v964_v37 = vld [vmem:[#allocation3 + $0xa8] sm:$0xff]  ;;  %s21261_s5 = sld [smem:[#allocation440_spill]]  ;;  %s16247_s14 = smov [#allocation20]  }
 0x156   : > { %v959_v35 = vld [vmem:[#allocation3 + $0x80] sm:$0xff]  ;;  %v961_v36 = vld [vmem:[#allocation3 + $0x90] sm:$0xff]  ;;  %v966_v38 = vld [vmem:[#allocation3 + $0xb8] sm:$0xff]  ;;  %s16142_s19 = sshll.u32 %s16247_s14, 4  ;;  %s16143_s19 = int_to_ptr.vmem [resolvable:$false] %s16142_s19 }
 0x157   : > { %11395 = vmatprep.subr.msk.mxu1 %vm867_vm0, %v16693_v4  ;;  %11399 = vmatprep.subr.msk.mxu0 %vm867_vm0, %v16693_v4  ;;  %v16759_v39 = vpack.c.bf16 %v961_v36, %v959_v35  ;;  %v16762_v40 = vpack.c.bf16 %v966_v38, %v964_v37  ;;  %v963_v41 = vld [vmem:[#allocation3 + $0xa0] sm:$0xff]  ;;  %v965_v42 = vld [vmem:[#allocation3 + $0xb0] sm:$0xff]  ;;  %v968_v43 = vld [vmem:[#allocation3 + $0xc8] sm:$0xff]  ;;  %s21257_s27 = smov %s21256_s24  ;;  %s16144_s21 = scalar_lea.vmem %s16143_s19, 32 }
 0x158   : > { %11396 = vmatpush1.msk.msra.mxu1 %vm867_vm0, %v16686_v2  ;;  %11400 = vmatpush1.msk.msra.mxu0 %vm867_vm0, %v16686_v2  ;;  %v970_v44 = vld [vmem:[#allocation3 + $0xd8] sm:$0xff]  ;;  %v16765_v45 = vpack.c.bf16 %v965_v42, %v963_v41  ;;  %v967_v47 = vld [vmem:[#allocation3 + $0xc0] sm:$0xff]  ;;  %v969_v48 = vld [vmem:[#allocation3 + $0xd0] sm:$0xff] }
 0x159   : > { %11397 = vmatmul.mubr.msk.f32.vlgmr.msra.gmra.mrb[0].mxu1 %vm863_vm1, %v860_v3  ;;  %11401 = vmatmul.mubr.msk.f32.vlgmr.msra.gmra.mrb[0].mxu0 %vm863_vm1, %v11398_v5  ;;  %v16768_v46 = vpack.c.bf16 %v970_v44, %v968_v43  ;;  %v972_v49 = vld [vmem:[#allocation3 + $0xe8] sm:$0xff]  ;;  %v974_v50 = vld [vmem:[#allocation3 + $0xf8] sm:$0xff]  ;;  %v16771_v51 = vpack.c.bf16 %v969_v48, %v967_v47  ;;  %v971_v53 = vld [vmem:[#allocation3 + $0xe0] sm:$0xff] }
 0x15a   : > { %11403 = vmatprep.subr.msk.mxu0 %vm867_vm0, %v16693_v4  ;;  %1363 = vmatprep.mubr.f32.mxu0 %v19535_v1  ;;  %v16774_v52 = vpack.c.bf16 %v974_v50, %v972_v49  ;;  %v973_v54 = vld [vmem:[#allocation3 + $0xf0] sm:$0xff]  ;;  %v976_v55 = vld [vmem:[#allocation3 + $0x108] sm:$0xff]  ;;  %v978_v56 = vld [vmem:[#allocation3 + $0x118] sm:$0xff]  ;;  %p21263_p6 = scmp.ne.s32.totalorder %s21260_s2, 0 }
 0x15b   : > { %11404 = vmatpush1.msk.msra.mxu0 %vm867_vm0, %v16686_v2  ;;  %13128 = vmatprep.subr.bf16.mxu1 %v16702_v11  ;;  %20261 = vst [vmem:[#allocation36_spill] sm:$0xff] %v16771_v51  ;;  %v16777_v57 = vpack.c.bf16 %v973_v54, %v971_v53  ;;  %v16780_v58 = vpack.c.bf16 %v978_v56, %v976_v55  ;;  %v975_v59 = vld [vmem:[#allocation3 + $0x100] sm:$0xff]  ;;  %v977_v60 = vld [vmem:[#allocation3 + $0x110] sm:$0xff]  ;;  %v980_v61 = vld [vmem:[#allocation3 + $0x128] sm:$0xff]  ;;  %s21262_s16 = smov %s21261_s5  ;;  %s19437_s6 = scalar_lea.hbm %s21261_s5, %s11568_s1 }
 0x15c   : > { %13130 = vmatpush1.bf16.msra.mxu1 %v16708_v13  ;;  %11407 = vmatprep.subr.msk.mxu0 %vm867_vm0, %v16693_v4  ;;  %20262 = vst [vmem:[#allocation37_spill] sm:$0xff] %v16774_v52  ;;  %v982_v62 = vld [vmem:[#allocation3 + $0x138] sm:$0xff]  ;;  %v16783_v63 = vpack.c.bf16 %v977_v60, %v975_v59  ;;  %v979_v3 = vld [vmem:[#allocation3 + $0x120] sm:$0xff]  ;;  %v981_v5 = vld [vmem:[#allocation3 + $0x130] sm:$0xff] }
 0x15d   : > { %11405 = vmatmul.mubr.msk.f32.vlgmr.msra.gmra.mrb[2].mxu0 %vm863_vm1, %v11402_v17  ;;  %13132 = vmatprep.subr.bf16.mxu1 %v16712_v14  ;;  %20263 = vst [vmem:[#allocation38_spill] sm:$0xff] %v16777_v57  ;;  %20264 = vst [vmem:[#allocation39_spill] sm:$0xff] %v16780_v58  ;;  %v16786_v0 = vpack.c.bf16 %v982_v62, %v980_v61  ;;  %v984_v6 = vld [vmem:[#allocation3 + $0x148] sm:$0xff]  ;;  %v986_v7 = vld [vmem:[#allocation3 + $0x158] sm:$0xff]  ;;  %v16789_v8 = vpack.c.bf16 %v981_v5, %v979_v3 }
 0x15e   : > { %11408 = vmatpush1.msk.msra.mxu0 %vm867_vm0, %v16686_v2  ;;  %1577 = vmatprep.mubr.f32.mxu0 %v19535_v1  ;;  %20265 = vst [vmem:[#allocation40_spill] sm:$0xff] %v16783_v63  ;;  %v16792_v9 = vpack.c.bf16 %v986_v7, %v984_v6  ;;  %v983_v10 = vld [vmem:[#allocation3 + $0x140] sm:$0xff]  ;;  %v985_v12 = vld [vmem:[#allocation3 + $0x150] sm:$0xff]  ;;  %v988_v15 = vld [vmem:[#allocation3 + $0x168] sm:$0xff] }
 0x15f   : > { %11411 = vmatprep.subr.msk.mxu0 %vm867_vm0, %v16693_v4  ;;  %20266 = vst [vmem:[#allocation41_spill] sm:$0xff] %v16786_v0  ;;  %20267 = vst [vmem:[#allocation42_spill] sm:$0xff] %v16789_v8  ;;  %v990_v16 = vld [vmem:[#allocation3 + $0x178] sm:$0xff]  ;;  %v16795_v17 = vpack.c.bf16 %v985_v12, %v983_v10  ;;  %v987_v19 = vld [vmem:[#allocation3 + $0x160] sm:$0xff] }
 0x160   : > { %13134 = vmatpush1.bf16.msra.mxu1 %v16724_v20  ;;  %20268 = vst [vmem:[#allocation43_spill] sm:$0xff] %v16792_v9  ;;  %v16798_v18 = vpack.c.bf16 %v990_v16, %v988_v15  ;;  %v989_v22 = vld [vmem:[#allocation3 + $0x170] sm:$0xff]  ;;  %v992_v23 = vld [vmem:[#allocation3 + $0x188] sm:$0xff]  ;;  %v994_v24 = vld [vmem:[#allocation3 + $0x198] sm:$0xff] }
 0x161   : > { %13136 = vmatprep.subr.bf16.mxu1 %v16730_v21  ;;  %11409 = vmatmul.mubr.msk.f32.vlgmr.msra.gmra.mrb[4].mxu0 %vm863_vm1, %v11406_v33  ;;  %20269 = vst [vmem:[#allocation44_spill] sm:$0xff] %v16795_v17  ;;  %v16801_v25 = vpack.c.bf16 %v989_v22, %v987_v19  ;;  %v16804_v28 = vpack.c.bf16 %v994_v24, %v992_v23  ;;  %v991_v29 = vld [vmem:[#allocation3 + $0x180] sm:$0xff]  ;;  %v993_v30 = vld [vmem:[#allocation3 + $0x190] sm:$0xff]  ;;  %v996_v31 = vld [vmem:[#allocation3 + $0x1a8] sm:$0xff] }
 0x162   : > { %11412 = vmatpush1.msk.msra.mxu0 %vm867_vm0, %v16686_v2  ;;  %1791 = vmatprep.mubr.f32.mxu0 %v19535_v1  ;;  %20270 = vst [vmem:[#allocation45_spill] sm:$0xff] %v16798_v18  ;;  %v998_v33 = vld [vmem:[#allocation3 + $0x1b8] sm:$0xff]  ;;  %v16807_v35 = vpack.c.bf16 %v993_v30, %v991_v29  ;;  %v995_v37 = vld [vmem:[#allocation3 + $0x1a0] sm:$0xff]  ;;  %v997_v38 = vld [vmem:[#allocation3 + $0x1b0] sm:$0xff] }
 0x163   : > { %11415 = vmatprep.subr.msk.mxu0 %vm867_vm0, %v16693_v4  ;;  %20271 = vst [vmem:[#allocation46_spill] sm:$0xff] %v16801_v25  ;;  %20272 = vst [vmem:[#allocation47_spill] sm:$0xff] %v16804_v28  ;;  %v16810_v36 = vpack.c.bf16 %v998_v33, %v996_v31  ;;  %v1000_v41 = vld [vmem:[#allocation3 + $0x1c8] sm:$0xff]  ;;  %v1002_v42 = vld [vmem:[#allocation3 + $0x1d8] sm:$0xff]  ;;  %v16813_v43 = vpack.c.bf16 %v997_v38, %v995_v37 }
 0x164   : > { %13138 = vmatpush1.bf16.msra.mxu1 %v16738_v26  ;;  %20273 = vst [vmem:[#allocation48_spill] sm:$0xff] %v16807_v35  ;;  %v16816_v44 = vpack.c.bf16 %v1002_v42, %v1000_v41  ;;  %v999_v47 = vld [vmem:[#allocation3 + $0x1c0] sm:$0xff]  ;;  %v1001_v48 = vld [vmem:[#allocation3 + $0x1d0] sm:$0xff]  ;;  %v1004_v49 = vld [vmem:[#allocation3 + $0x1e8] sm:$0xff] }
 0x165   : > { %13140 = vmatprep.subr.bf16.mxu1 %v16741_v27  ;;  %20274 = vst [vmem:[#allocation49_spill] sm:$0xff] %v16810_v36  ;;  %20275 = vst [vmem:[#allocation50_spill] sm:$0xff] %v16813_v43  ;;  %v1006_v50 = vld [vmem:[#allocation3 + $0x1f8] sm:$0xff]  ;;  %v16819_v53 = vpack.c.bf16 %v1001_v48, %v999_v47  ;;  %v1003_v55 = vld [vmem:[#allocation3 + $0x1e0] sm:$0xff] }
 0x166   : > { %20276 = vst [vmem:[#allocation51_spill] sm:$0xff] %v16816_v44  ;;  %v16822_v54 = vpack.c.bf16 %v1006_v50, %v1004_v49  ;;  %v1005_v56 = vld [vmem:[#allocation3 + $0x1f0] sm:$0xff]  ;;  %v1158_v60 = vld [vmem:[#allocation3 + $0x208] sm:$0xff]  ;;  %v1160_v61 = vld [vmem:[#allocation3 + $0x218] sm:$0xff] }
 0x167   : > { %20277 = vst [vmem:[#allocation52_spill] sm:$0xff] %v16819_v53  ;;  %v16825_v59 = vpack.c.bf16 %v1005_v56, %v1003_v55  ;;  %v16829_v62 = vpack.c.bf16 %v1160_v61, %v1158_v60  ;;  %v11410_v3 = vld [vmem:[%s20260_s26 + $0x20] sm:$0xff]  ;;  %v11414_v5 = vld [vmem:[%s20260_s26 + $0x28] sm:$0xff]  ;;  %v1159_v7 = vld [vmem:[#allocation3 + $0x210] sm:$0xff] }
 0x168   : > { %13142 = vmatpush1.bf16.msra.mxu1 %v16744_v32  ;;  %20278 = vst [vmem:[#allocation53_spill] sm:$0xff] %v16822_v54  ;;  %11413 = vmatmul.mubr.msk.f32.vlgmr.msra.gmra.mrb[6].mxu0 %vm863_vm1, %v11410_v3  ;;  %v1157_v6 = vld [vmem:[#allocation3 + $0x200] sm:$0xff]  ;;  %v1162_v10 = vld [vmem:[#allocation3 + $0x228] sm:$0xff]  ;;  %v1164_v12 = vld [vmem:[#allocation3 + $0x238] sm:$0xff] }
 0x169   : > { %13144 = vmatprep.subr.bf16.mxu1 %v16750_v34  ;;  %20279 = vst [vmem:[#allocation54_spill] sm:$0xff] %v16825_v59  ;;  %20280 = vst [vmem:[#allocation55_spill] sm:$0xff] %v16829_v62  ;;  %11416 = vmatpush1.msk.msra.mxu0 %vm867_vm0, %v16686_v2  ;;  %v16850_v16 = vpack.c.bf16 %v1159_v7, %v1157_v6  ;;  %v16854_v23 = vpack.c.bf16 %v1164_v12, %v1162_v10  ;;  %v1161_v24 = vld [vmem:[#allocation3 + $0x220] sm:$0xff]  ;;  %v1163_v29 = vld [vmem:[#allocation3 + $0x230] sm:$0xff] }
 0x16a   : > { %2005 = vmatprep.mubr.f32.mxu0 %v19535_v1  ;;  %11419 = vmatprep.subr.msk.mxu0 %vm867_vm0, %v16693_v4  ;;  %v1166_v31 = vld [vmem:[#allocation3 + $0x248] sm:$0xff]  ;;  %v1168_v33 = vld [vmem:[#allocation3 + $0x258] sm:$0xff]  ;;  %v16857_v37 = vpack.c.bf16 %v1163_v29, %v1161_v24  ;;  %v1165_v42 = vld [vmem:[#allocation3 + $0x240] sm:$0xff] }
 0x16b   : > { %20281 = vst [vmem:[#allocation56_spill] sm:$0xff] %v16850_v16  ;;  %20282 = vst [vmem:[#allocation57_spill] sm:$0xff] %v16854_v23  ;;  %v16862_v41 = vpack.c.bf16 %v1168_v33, %v1166_v31  ;;  %v1167_v47 = vld [vmem:[#allocation3 + $0x250] sm:$0xff]  ;;  %v1170_v49 = vld [vmem:[#allocation3 + $0x268] sm:$0xff] }
 0x16c   : > { %13146 = vmatpush1.bf16.msra.mxu1 %v16759_v39  ;;  %11417 = vmatmul.mubr.msk.f32.vlgmr.msra.gmra.mrb[8].mxu0 %vm863_vm1, %v11414_v5  ;;  %20283 = vst [vmem:[#allocation58_spill] sm:$0xff] %v16857_v37  ;;  %v1172_v50 = vld [vmem:[#allocation3 + $0x278] sm:$0xff]  ;;  %v16867_v55 = vpack.c.bf16 %v1167_v47, %v1165_v42  ;;  %v1169_v60 = vld [vmem:[#allocation3 + $0x260] sm:$0xff]  ;;  %v1171_v61 = vld [vmem:[#allocation3 + $0x270] sm:$0xff] }
 0x16d   : > { %13148 = vmatprep.subr.bf16.mxu1 %v16762_v40  ;;  %11420 = vmatpush1.msk.msra.mxu0 %vm867_vm0, %v16686_v2  ;;  %20284 = vst [vmem:[#allocation59_spill] sm:$0xff] %v16862_v41  ;;  %v16870_v56 = vpack.c.bf16 %v1172_v50, %v1170_v49  ;;  %v1174_v3 = vld [vmem:[#allocation3 + $0x288] sm:$0xff]  ;;  %v1176_v5 = vld [vmem:[#allocation3 + $0x298] sm:$0xff]  ;;  %v16873_v6 = vpack.c.bf16 %v1171_v61, %v1169_v60  ;;  %v1173_v10 = vld [vmem:[#allocation3 + $0x280] sm:$0xff] }
 0x16e   : > { %2219 = vmatprep.mubr.f32.mxu0 %v19535_v1  ;;  %11423 = vmatprep.subr.msk.mxu0 %vm867_vm0, %v16693_v4  ;;  %20285 = vst [vmem:[#allocation60_spill] sm:$0xff] %v16867_v55  ;;  %v16876_v7 = vpack.c.bf16 %v1176_v5, %v1174_v3  ;;  %v1175_v12 = vld [vmem:[#allocation3 + $0x290] sm:$0xff]  ;;  %v1182_v33 = vld [vmem:[#allocation3 + $0x2c8] sm:$0xff]  ;;  %v1184_v42 = vld [vmem:[#allocation3 + $0x2d8] sm:$0xff] }
 0x16f   : > { %20286 = vst [vmem:[#allocation61_spill] sm:$0xff] %v16870_v56  ;;  %20287 = vst [vmem:[#allocation62_spill] sm:$0xff] %v16873_v6  ;;  %v16879_v24 = vpack.c.bf16 %v1175_v12, %v1173_v10  ;;  %v1179_v31 = vld [vmem:[#allocation3 + $0x2b0] sm:$0xff]  ;;  %v16888_v49 = vpack.c.bf16 %v1184_v42, %v1182_v33  ;;  %v1181_v50 = vld [vmem:[#allocation3 + $0x2c0] sm:$0xff] }
 0x170   : > { %13150 = vmatpush1.bf16.msra.mxu1 %v16765_v45  ;;  %20288 = vst [vmem:[#allocation63_spill] sm:$0xff] %v16876_v7  ;;  %v1183_v60 = vld [vmem:[#allocation3 + $0x2d0] sm:$0xff]  ;;  %v1186_v61 = vld [vmem:[#allocation3 + $0x2e8] sm:$0xff]  ;;  %v1188_v3 = vld [vmem:[#allocation3 + $0x2f8] sm:$0xff] }
 0x171   : > { %13152 = vmatprep.subr.bf16.mxu1 %v16768_v46  ;;  %20289 = vst [vmem:[#allocation64_spill] sm:$0xff] %v16879_v24  ;;  %20292 = vst [vmem:[#allocation67_spill] sm:$0xff] %v16888_v49  ;;  %v16891_v5 = vpack.c.bf16 %v1183_v60, %v1181_v50  ;;  %v16894_v10 = vpack.c.bf16 %v1188_v3, %v1186_v61  ;;  %v1185_v12 = vld [vmem:[#allocation3 + $0x2e0] sm:$0xff]  ;;  %v1191_v1 = vld [vmem:[#allocation3 + $0x310] sm:$0xff] }
 0x172   : > { %v1189_v42 = vld [vmem:[#allocation3 + $0x300] sm:$0xff]  ;;  %v1194_v50 = vld [vmem:[#allocation3 + $0x328] sm:$0xff]  ;;  %v1196_v60 = vld [vmem:[#allocation3 + $0x338] sm:$0xff] }
 0x173   : > { %20293 = vst [vmem:[#allocation68_spill] sm:$0xff] %v16891_v5  ;;  %20294 = vst [vmem:[#allocation69_spill] sm:$0xff] %v16894_v10  ;;  %v16903_v61 = vpack.c.bf16 %v1191_v1, %v1189_v42  ;;  %v16906_v3 = vpack.c.bf16 %v1196_v60, %v1194_v50  ;;  %v1202_v1 = vld [vmem:[#allocation3 + $0x368] sm:$0xff]  ;;  %v1204_v42 = vld [vmem:[#allocation3 + $0x378] sm:$0xff] }
 0x174   : > { %13154 = vmatpush1.bf16.msra.mxu1 %v16771_v51  ;;  %v16918_v60 = vpack.c.bf16 %v1204_v42, %v1202_v1  ;;  %v1210_v1 = vld [vmem:[#allocation3 + $0x3a8] sm:$0xff]  ;;  %v1212_v42 = vld [vmem:[#allocation3 + $0x3b8] sm:$0xff] }
 0x175   : > { %13156 = vmatprep.subr.bf16.mxu1 %v16774_v52  ;;  %20297 = vst [vmem:[#allocation72_spill] sm:$0xff] %v16903_v61  ;;  %20298 = vst [vmem:[#allocation73_spill] sm:$0xff] %v16906_v3  ;;  %v4723_v51 = vld [vmem:[#allocation9 + $0x58] sm:$0xff] }
 0x176   : > { %20302 = vst [vmem:[#allocation77_spill] sm:$0xff] %v16918_v60 }
 0x178   : > { %13158 = vmatpush1.bf16.msra.mxu1 %v16777_v57 }
 0x179   : > { %13160 = vmatprep.subr.bf16.mxu1 %v16780_v58  ;;  %v4643_v58 = vld [vmem:[#allocation9 + $0x28] sm:$0xff] }
 0x17c   : > { %13162 = vmatpush1.bf16.msra.mxu1 %v16783_v63 }
 0x17d   : > { %13164 = vmatprep.subr.bf16.mxu1 %v16786_v0 }
 0x180   : > { %13166 = vmatpush1.bf16.msra.mxu1 %v16789_v8 }
 0x181   : > { %13168 = vmatprep.subr.bf16.mxu1 %v16792_v9 }
 0x184   : > { %13170 = vmatpush1.bf16.msra.mxu1 %v16795_v17 }
 0x185   : > { %13172 = vmatprep.subr.bf16.mxu1 %v16798_v18 }
 0x188   : > { %13174 = vmatpush1.bf16.msra.mxu1 %v16801_v25  ;;  %v4404_v25 = vld [vmem:[#allocation6 + $0x1f8] sm:$0xff] }
 0x189   : > { %13176 = vmatprep.subr.bf16.mxu1 %v16804_v28 }
 0x18c   : > { %13178 = vmatpush1.bf16.msra.mxu1 %v16807_v35 }
 0x18d   : > { %13180 = vmatprep.subr.bf16.mxu1 %v16810_v36 }
 0x190   : > { %13182 = vmatpush1.bf16.msra.mxu1 %v16813_v43  ;;  %v4246_v43 = vld [vmem:[#allocation6 + $0x1b8] sm:$0xff] }
 0x191   : > { %13184 = vmatprep.subr.bf16.mxu1 %v16816_v44 }
 0x194   : > { %13186 = vmatpush1.bf16.msra.mxu1 %v16819_v53 }
 0x195   : > { %13188 = vmatprep.subr.bf16.mxu1 %v16822_v54 }
 0x198   : > { %13190 = vmatpush1.bf16.msra.mxu1 %v16825_v59  ;;  %v4088_v59 = vld [vmem:[#allocation6 + $0x178] sm:$0xff] }
 0x199   : > { %13192 = vmatprep.subr.bf16.mxu1 %v16829_v62 }
 0x22c   : > { %v938_v15 = vpop.f32.mrb[0].mxu1  ;;  %v16852_v19 = vpop.f32.mrb[0].mxu0 }
 0x22d   : > { %v940_v22 = vpop.f32.mrb[1].mxu1  ;;  %v1153_v30 = vpop.f32.mrb[1].mxu0 }
 0x22e   : > { %1071 = vmatprep.mubr.f32.mxu1 %v940_v22  ;;  %v1180_v22 = vld [vmem:[#allocation3 + $0x2b8] sm:$0xff] }
 0x22f   : > { %1072 = vmatmul.mubr.f32.vlgmr.msra.gmra.mrb[2].mxu1 %v938_v15  ;;  %v1178_v15 = vld [vmem:[#allocation3 + $0x2a8] sm:$0xff] }
 0x230   : > { %13194 = vmatpush1.bf16.msra.mxu1 %v16850_v16  ;;  %1285 = vmatprep.mubr.f32.mxu1 %v1153_v30  ;;  %v16859_v38 = vpop.f32.mrb[2].mxu0  ;;  %v16882_v29 = vpack.c.bf16 %v1180_v22, %v1178_v15  ;;  %v1177_v30 = vld [vmem:[#allocation3 + $0x2a0] sm:$0xff]  ;;  %v1187_v15 = vld [vmem:[#allocation3 + $0x2f0] sm:$0xff]  ;;  %v1190_v22 = vld [vmem:[#allocation3 + $0x308] sm:$0xff] }
 0x231   : > { %13196 = vmatprep.subr.bf16.mxu1 %v16854_v23  ;;  %v16864_v48 = vpop.f32.mrb[3].mxu0  ;;  %v16885_v47 = vpack.c.bf16 %v1179_v31, %v1177_v30  ;;  %v1192_v30 = vld [vmem:[#allocation3 + $0x318] sm:$0xff]  ;;  %v16897_v31 = vpack.c.bf16 %v1187_v15, %v1185_v12  ;;  %v1198_v12 = vld [vmem:[#allocation3 + $0x348] sm:$0xff] }
 0x232   : > { %20290 = vst [vmem:[#allocation65_spill] sm:$0xff] %v16882_v29  ;;  %v16900_v33 = vpack.c.bf16 %v1192_v30, %v1190_v22  ;;  %v1200_v15 = vld [vmem:[#allocation3 + $0x358] sm:$0xff] }
 0x233   : > { %20291 = vst [vmem:[#allocation66_spill] sm:$0xff] %v16885_v47  ;;  %20295 = vst [vmem:[#allocation70_spill] sm:$0xff] %v16897_v31  ;;  %v16912_v30 = vpack.c.bf16 %v1200_v15, %v1198_v12  ;;  %v11418_v15 = vld [vmem:[%s20260_s26 + $0x30] sm:$0xff] }
 0x234   : > { %13198 = vmatpush1.bf16.msra.mxu1 %v16857_v37  ;;  %20296 = vst [vmem:[#allocation71_spill] sm:$0xff] %v16900_v33  ;;  %11421 = vmatmul.mubr.msk.f32.vlgmr.msra.gmra.mrb[10].mxu0 %vm863_vm1, %v11418_v15  ;;  %v1214_v15 = vld [vmem:[#allocation3 + $0x3c8] sm:$0xff]  ;;  %v3930_v37 = vld [vmem:[#allocation6 + $0x138] sm:$0xff] }
 0x235   : > { %13200 = vmatprep.subr.bf16.mxu1 %v16862_v41  ;;  %20300 = vst [vmem:[#allocation75_spill] sm:$0xff] %v16912_v30  ;;  %11424 = vmatpush1.msk.msra.mxu0 %vm867_vm0, %v16686_v2 }
 0x236   : > { %11427 = vmatprep.subr.msk.mxu0 %vm867_vm0, %v16693_v4  ;;  %v1213_v4 = vld [vmem:[#allocation3 + $0x3c0] sm:$0xff] }
 0x238   : > { %13202 = vmatpush1.bf16.msra.mxu1 %v16867_v55 }
 0x239   : > { %13204 = vmatprep.subr.bf16.mxu1 %v16870_v56 }
 0x23c   : > { %13206 = vmatpush1.bf16.msra.mxu1 %v16873_v6  ;;  %v2458_v6 = vld [vmem:[#allocation3 + $0xe88] sm:$0xff] }
 0x23d   : > { %13208 = vmatprep.subr.bf16.mxu1 %v16876_v7  ;;  %v2796_v7 = vld [vmem:[#allocation8 + $0x10] sm:$0xff] }
 0x240   : > { %13210 = vmatpush1.bf16.msra.mxu1 %v16879_v24  ;;  %v2795_v24 = vld [vmem:[#allocation8 + $0x8] sm:$0xff] }
 0x241   : > { %13212 = vmatprep.subr.bf16.mxu1 %v16882_v29  ;;  %v2794_v29 = vld [vmem:[#allocation8] sm:$0xff] }
 0x244   : > { %13214 = vmatpush1.bf16.msra.mxu1 %v16885_v47  ;;  %v2811_v47 = vld [vmem:[#allocation8 + $0x88] sm:$0xff] }
 0x245   : > { %13216 = vmatprep.subr.bf16.mxu1 %v16888_v49  ;;  %v1193_v49 = vld [vmem:[#allocation3 + $0x320] sm:$0xff] }
 0x248   : > { %13218 = vmatpush1.bf16.msra.mxu1 %v16891_v5  ;;  %v1195_v5 = vld [vmem:[#allocation3 + $0x330] sm:$0xff] }
 0x249   : > { %13220 = vmatprep.subr.bf16.mxu1 %v16894_v10  ;;  %v16909_v22 = vpack.c.bf16 %v1195_v5, %v1193_v49  ;;  %v1197_v10 = vld [vmem:[#allocation3 + $0x340] sm:$0xff]  ;;  %v1206_v49 = vld [vmem:[#allocation3 + $0x388] sm:$0xff]  ;;  %v1208_v5 = vld [vmem:[#allocation3 + $0x398] sm:$0xff] }
 0x24b   : > { %20299 = vst [vmem:[#allocation74_spill] sm:$0xff] %v16909_v22 }
 0x24c   : > { %13222 = vmatpush1.bf16.msra.mxu1 %v16897_v31  ;;  %v1199_v31 = vld [vmem:[#allocation3 + $0x350] sm:$0xff] }
 0x24d   : > { %13224 = vmatprep.subr.bf16.mxu1 %v16900_v33  ;;  %v16915_v50 = vpack.c.bf16 %v1199_v31, %v1197_v10  ;;  %v1201_v33 = vld [vmem:[#allocation3 + $0x360] sm:$0xff]  ;;  %v16927_v10 = vpack.c.bf16 %v1208_v5, %v1206_v49  ;;  %v1211_v5 = vld [vmem:[#allocation3 + $0x3b0] sm:$0xff] }
 0x24e   : > { %v1205_v31 = vld [vmem:[#allocation3 + $0x380] sm:$0xff] }
 0x24f   : > { %20301 = vst [vmem:[#allocation76_spill] sm:$0xff] %v16915_v50  ;;  %20304 = vst [vmem:[#allocation79_spill] sm:$0xff] %v16927_v10  ;;  %v1209_v49 = vld [vmem:[#allocation3 + $0x3a0] sm:$0xff] }
 0x250   : > { %13226 = vmatpush1.bf16.msra.mxu1 %v16903_v61  ;;  %v1203_v61 = vld [vmem:[#allocation3 + $0x370] sm:$0xff] }
 0x251   : > { %13228 = vmatprep.subr.bf16.mxu1 %v16906_v3  ;;  %v16921_v12 = vpack.c.bf16 %v1203_v61, %v1201_v33  ;;  %v16939_v61 = vpack.c.bf16 %v1212_v42, %v1210_v1 }
 0x253   : > { %20303 = vst [vmem:[#allocation78_spill] sm:$0xff] %v16921_v12  ;;  %20307 = vst [vmem:[#allocation81_spill] sm:$0xff] %v16939_v61 }
 0x254   : > { %13230 = vmatpush1.bf16.msra.mxu1 %v16909_v22  ;;  %v16942_v22 = vpack.c.bf16 %v1211_v5, %v1209_v49  ;;  %v1372_v49 = vld [vmem:[#allocation3 + $0x408] sm:$0xff]  ;;  %v1374_v5 = vld [vmem:[#allocation3 + $0x418] sm:$0xff] }
 0x255   : > { %13232 = vmatprep.subr.bf16.mxu1 %v16912_v30  ;;  %v1207_v30 = vld [vmem:[#allocation3 + $0x390] sm:$0xff] }
 0x256   : > { %v16936_v33 = vpack.c.bf16 %v1207_v30, %v1205_v31  ;;  %20308 = vst [vmem:[#allocation82_spill] sm:$0xff] %v16942_v22  ;;  %v1218_v30 = vld [vmem:[#allocation3 + $0x3e8] sm:$0xff]  ;;  %v1220_v31 = vld [vmem:[#allocation3 + $0x3f8] sm:$0xff] }
 0x257   : > { %v16951_v42 = vpack.c.bf16 %v1220_v31, %v1218_v30 }
 0x258   : > { %13234 = vmatpush1.bf16.msra.mxu1 %v16915_v50  ;;  %v20305_v50 = vmov 0.0   ;;  %20306 = vst [vmem:[#allocation80_spill] sm:$0xff] %v16936_v33 }
 0x259   : > { %13236 = vmatprep.subr.bf16.mxu1 %v16918_v60  ;;  %2433 = vmatprep.mubr.f32.mxu0 %v20305_v50  ;;  %v1216_v60 = vld [vmem:[#allocation3 + $0x3d8] sm:$0xff]  ;;  %20311 = vst [vmem:[#allocation85_spill] sm:$0xff] %v16951_v42 }
 0x25a   : > { %v16945_v3 = vpack.c.bf16 %v1216_v60, %v1214_v15  ;;  %v16957_v15 = vpack.c.bf16 %v1374_v5, %v1372_v49  ;;  %v1380_v49 = vld [vmem:[#allocation3 + $0x448] sm:$0xff]  ;;  %v1382_v5 = vld [vmem:[#allocation3 + $0x458] sm:$0xff] }
 0x25c   : > { %13238 = vmatpush1.bf16.msra.mxu1 %v16921_v12  ;;  %20309 = vst [vmem:[#allocation83_spill] sm:$0xff] %v16945_v3  ;;  %v1215_v12 = vld [vmem:[#allocation3 + $0x3d0] sm:$0xff]  ;;  %20313 = vst [vmem:[#allocation87_spill] sm:$0xff] %v16957_v15 }
 0x25d   : > { %13240 = vmatprep.subr.bf16.mxu1 %v16927_v10  ;;  %v16948_v1 = vpack.c.bf16 %v1215_v12, %v1213_v4  ;;  %v1217_v10 = vld [vmem:[#allocation3 + $0x3e0] sm:$0xff]  ;;  %v16959_v12 = vpop.f32.mrb[4].mxu0  ;;  %v1376_v4 = vld [vmem:[#allocation3 + $0x428] sm:$0xff] }
 0x25e   : > { %v16964_v31 = vpop.f32.mrb[5].mxu0 }
 0x25f   : > { %20310 = vst [vmem:[#allocation84_spill] sm:$0xff] %v16948_v1 }
 0x260   : > { %13242 = vmatpush1.bf16.msra.mxu1 %v16936_v33  ;;  %v1219_v33 = vld [vmem:[#allocation3 + $0x3f0] sm:$0xff] }
 0x261   : > { %13244 = vmatprep.subr.bf16.mxu1 %v16939_v61  ;;  %v16954_v60 = vpack.c.bf16 %v1219_v33, %v1217_v10  ;;  %v1371_v61 = vld [vmem:[#allocation3 + $0x400] sm:$0xff] }
 0x262   : > { %v1375_v33 = vld [vmem:[#allocation3 + $0x420] sm:$0xff] }
 0x263   : > { %20312 = vst [vmem:[#allocation86_spill] sm:$0xff] %v16954_v60 }
 0x264   : > { %13246 = vmatpush1.bf16.msra.mxu1 %v16942_v22  ;;  %v1373_v22 = vld [vmem:[#allocation3 + $0x410] sm:$0xff] }
 0x265   : > { %13248 = vmatprep.subr.bf16.mxu1 %v16945_v3  ;;  %v1378_v3 = vld [vmem:[#allocation3 + $0x438] sm:$0xff]  ;;  %v16962_v30 = vpack.c.bf16 %v1373_v22, %v1371_v61  ;;  %v16975_v22 = vpack.c.bf16 %v1382_v5, %v1380_v49  ;;  %v1379_v61 = vld [vmem:[#allocation3 + $0x440] sm:$0xff] }
 0x266   : > { %v16967_v10 = vpack.c.bf16 %v1378_v3, %v1376_v4  ;;  %v1384_v3 = vld [vmem:[#allocation3 + $0x468] sm:$0xff]  ;;  %v1386_v4 = vld [vmem:[#allocation3 + $0x478] sm:$0xff] }
 0x267   : > { %20314 = vst [vmem:[#allocation88_spill] sm:$0xff] %v16962_v30  ;;  %20317 = vst [vmem:[#allocation91_spill] sm:$0xff] %v16975_v22 }
 0x268   : > { %13250 = vmatpush1.bf16.msra.mxu1 %v16948_v1  ;;  %20315 = vst [vmem:[#allocation89_spill] sm:$0xff] %v16967_v10 }
 0x269   : > { %13252 = vmatprep.subr.bf16.mxu1 %v16951_v42  ;;  %v1377_v42 = vld [vmem:[#allocation3 + $0x430] sm:$0xff] }
 0x26a   : > { %v16971_v1 = vpack.c.bf16 %v1377_v42, %v1375_v33  ;;  %v1383_v42 = vld [vmem:[#allocation3 + $0x460] sm:$0xff]  ;;  %v1385_v33 = vld [vmem:[#allocation3 + $0x470] sm:$0xff] }
 0x26b   : > { %v16984_v49 = vpack.c.bf16 %v1385_v33, %v1383_v42  ;;  %v1396_v42 = vld [vmem:[#allocation3 + $0x4c8] sm:$0xff]  ;;  %v1398_v33 = vld [vmem:[#allocation3 + $0x4d8] sm:$0xff] }
 0x26c   : > { %13254 = vmatpush1.bf16.msra.mxu1 %v16954_v60  ;;  %20316 = vst [vmem:[#allocation90_spill] sm:$0xff] %v16971_v1 }
 0x26d   : > { %13256 = vmatprep.subr.bf16.mxu1 %v16957_v15  ;;  %v1381_v15 = vld [vmem:[#allocation3 + $0x450] sm:$0xff]  ;;  %20320 = vst [vmem:[#allocation94_spill] sm:$0xff] %v16984_v49 }
 0x26e   : > { %v16978_v60 = vpack.c.bf16 %v1381_v15, %v1379_v61  ;;  %v1392_v15 = vld [vmem:[#allocation3 + $0x4a8] sm:$0xff]  ;;  %v1394_v61 = vld [vmem:[#allocation3 + $0x4b8] sm:$0xff] }
 0x26f   : > { %1286 = vmatmul.mubr.f32.vlgmr.msra.gmra.mrb[2].mxu1 %v16852_v19  ;;  %v16981_v19 = vpack.c.bf16 %v1386_v4, %v1384_v3  ;;  %v16993_v4 = vpack.c.bf16 %v1394_v61, %v1392_v15 }
 0x270   : > { %13258 = vmatpush1.bf16.msra.mxu1 %v16962_v30  ;;  %1499 = vmatprep.mubr.f32.mxu1 %v16864_v48  ;;  %20318 = vst [vmem:[#allocation92_spill] sm:$0xff] %v16978_v60  ;;  %v1388_v30 = vld [vmem:[#allocation3 + $0x488] sm:$0xff]  ;;  %v1390_v48 = vld [vmem:[#allocation3 + $0x498] sm:$0xff] }
 0x271   : > { %13260 = vmatprep.subr.bf16.mxu1 %v16967_v10  ;;  %20319 = vst [vmem:[#allocation93_spill] sm:$0xff] %v16981_v19  ;;  %v16987_v5 = vpack.c.bf16 %v1390_v48, %v1388_v30  ;;  %v1387_v10 = vld [vmem:[#allocation3 + $0x480] sm:$0xff]  ;;  %20323 = vst [vmem:[#allocation97_spill] sm:$0xff] %v16993_v4  ;;  %v16999_v48 = vpack.c.bf16 %v1398_v33, %v1396_v42 }
 0x273   : > { %20321 = vst [vmem:[#allocation95_spill] sm:$0xff] %v16987_v5  ;;  %20325 = vst [vmem:[#allocation99_spill] sm:$0xff] %v16999_v48 }
 0x274   : > { %13262 = vmatpush1.bf16.msra.mxu1 %v16971_v1  ;;  %v1389_v1 = vld [vmem:[#allocation3 + $0x490] sm:$0xff] }
 0x275   : > { %13264 = vmatprep.subr.bf16.mxu1 %v16975_v22  ;;  %v16990_v3 = vpack.c.bf16 %v1389_v1, %v1387_v10  ;;  %v1391_v22 = vld [vmem:[#allocation3 + $0x4a0] sm:$0xff]  ;;  %v1400_v1 = vld [vmem:[#allocation3 + $0x4e8] sm:$0xff]  ;;  %v1402_v10 = vld [vmem:[#allocation3 + $0x4f8] sm:$0xff] }
 0x276   : > { %v17005_v61 = vpack.c.bf16 %v1402_v10, %v1400_v1 }
 0x277   : > { %20322 = vst [vmem:[#allocation96_spill] sm:$0xff] %v16990_v3 }
 0x278   : > { %13266 = vmatpush1.bf16.msra.mxu1 %v16978_v60  ;;  %v1393_v60 = vld [vmem:[#allocation3 + $0x4b0] sm:$0xff]  ;;  %20327 = vst [vmem:[#allocation101_spill] sm:$0xff] %v17005_v61 }
 0x279   : > { %13268 = vmatprep.subr.bf16.mxu1 %v16981_v19  ;;  %v16996_v30 = vpack.c.bf16 %v1393_v60, %v1391_v22  ;;  %v1395_v19 = vld [vmem:[#allocation3 + $0x4c0] sm:$0xff]  ;;  %v1404_v60 = vld [vmem:[#allocation3 + $0x508] sm:$0xff]  ;;  %v1406_v22 = vld [vmem:[#allocation3 + $0x518] sm:$0xff] }
 0x27a   : > { %v17011_v33 = vpack.c.bf16 %v1406_v22, %v1404_v60 }
 0x27b   : > { %20324 = vst [vmem:[#allocation98_spill] sm:$0xff] %v16996_v30 }
 0x27c   : > { %13270 = vmatpush1.bf16.msra.mxu1 %v16984_v49  ;;  %v1397_v49 = vld [vmem:[#allocation3 + $0x4d0] sm:$0xff]  ;;  %20329 = vst [vmem:[#allocation103_spill] sm:$0xff] %v17011_v33 }
 0x27d   : > { %13272 = vmatprep.subr.bf16.mxu1 %v16987_v5  ;;  %v17002_v15 = vpack.c.bf16 %v1397_v49, %v1395_v19  ;;  %v1399_v5 = vld [vmem:[#allocation3 + $0x4e0] sm:$0xff]  ;;  %v1408_v19 = vld [vmem:[#allocation3 + $0x528] sm:$0xff]  ;;  %v1410_v49 = vld [vmem:[#allocation3 + $0x538] sm:$0xff] }
 0x27e   : > { %v17017_v10 = vpack.c.bf16 %v1410_v49, %v1408_v19 }
 0x27f   : > { %20326 = vst [vmem:[#allocation100_spill] sm:$0xff] %v17002_v15 }
 0x280   : > { %13274 = vmatpush1.bf16.msra.mxu1 %v16990_v3  ;;  %v1401_v3 = vld [vmem:[#allocation3 + $0x4f0] sm:$0xff]  ;;  %20331 = vst [vmem:[#allocation105_spill] sm:$0xff] %v17017_v10 }
 0x281   : > { %13276 = vmatprep.subr.bf16.mxu1 %v16993_v4  ;;  %v17008_v42 = vpack.c.bf16 %v1401_v3, %v1399_v5  ;;  %v1403_v4 = vld [vmem:[#allocation3 + $0x500] sm:$0xff]  ;;  %v1412_v5 = vld [vmem:[#allocation3 + $0x548] sm:$0xff]  ;;  %v1414_v3 = vld [vmem:[#allocation3 + $0x558] sm:$0xff] }
 0x282   : > { %v17023_v22 = vpack.c.bf16 %v1414_v3, %v1412_v5  ;;  %v11422_v3 = vld [vmem:[%s20260_s26 + $0x38] sm:$0xff] }
 0x283   : > { %20328 = vst [vmem:[#allocation102_spill] sm:$0xff] %v17008_v42  ;;  %11425 = vmatmul.mubr.msk.f32.vlgmr.msra.gmra.mrb[12].mxu0 %vm863_vm1, %v11422_v3 }
 0x284   : > { %13278 = vmatpush1.bf16.msra.mxu1 %v16996_v30  ;;  %v1405_v30 = vld [vmem:[#allocation3 + $0x510] sm:$0xff]  ;;  %20333 = vst [vmem:[#allocation107_spill] sm:$0xff] %v17023_v22  ;;  %11428 = vmatpush1.msk.msra.mxu0 %vm867_vm0, %v16686_v2 }
 0x285   : > { %13280 = vmatprep.subr.bf16.mxu1 %v16999_v48  ;;  %v17014_v1 = vpack.c.bf16 %v1405_v30, %v1403_v4  ;;  %v1407_v48 = vld [vmem:[#allocation3 + $0x520] sm:$0xff]  ;;  %v1416_v4 = vld [vmem:[#allocation3 + $0x568] sm:$0xff]  ;;  %v1418_v30 = vld [vmem:[#allocation3 + $0x578] sm:$0xff]  ;;  %2647 = vmatprep.mubr.f32.mxu0 %v20305_v50 }
 0x286   : > { %v17029_v49 = vpack.c.bf16 %v1418_v30, %v1416_v4  ;;  %v1424_v4 = vld [vmem:[#allocation3 + $0x5a8] sm:$0xff]  ;;  %v1426_v30 = vld [vmem:[#allocation3 + $0x5b8] sm:$0xff] }
 0x287   : > { %20330 = vst [vmem:[#allocation104_spill] sm:$0xff] %v17014_v1 }
 0x288   : > { %13282 = vmatpush1.bf16.msra.mxu1 %v17002_v15  ;;  %v1409_v15 = vld [vmem:[#allocation3 + $0x530] sm:$0xff]  ;;  %20335 = vst [vmem:[#allocation109_spill] sm:$0xff] %v17029_v49 }
 0x289   : > { %13284 = vmatprep.subr.bf16.mxu1 %v17005_v61  ;;  %v17020_v60 = vpack.c.bf16 %v1409_v15, %v1407_v48  ;;  %v1411_v61 = vld [vmem:[#allocation3 + $0x540] sm:$0xff]  ;;  %v1420_v48 = vld [vmem:[#allocation3 + $0x588] sm:$0xff]  ;;  %v1422_v15 = vld [vmem:[#allocation3 + $0x598] sm:$0xff] }
 0x28b   : > { %20332 = vst [vmem:[#allocation106_spill] sm:$0xff] %v17020_v60 }
 0x28c   : > { %13286 = vmatpush1.bf16.msra.mxu1 %v17008_v42  ;;  %v1413_v42 = vld [vmem:[#allocation3 + $0x550] sm:$0xff] }
 0x28d   : > { %13288 = vmatprep.subr.bf16.mxu1 %v17011_v33  ;;  %v17026_v19 = vpack.c.bf16 %v1413_v42, %v1411_v61  ;;  %v1415_v33 = vld [vmem:[#allocation3 + $0x560] sm:$0xff]  ;;  %v17038_v61 = vpack.c.bf16 %v1422_v15, %v1420_v48  ;;  %v1425_v15 = vld [vmem:[#allocation3 + $0x5b0] sm:$0xff] }
 0x28e   : > { %v1419_v42 = vld [vmem:[#allocation3 + $0x580] sm:$0xff] }
 0x28f   : > { %20334 = vst [vmem:[#allocation108_spill] sm:$0xff] %v17026_v19  ;;  %20337 = vst [vmem:[#allocation111_spill] sm:$0xff] %v17038_v61  ;;  %v1423_v48 = vld [vmem:[#allocation3 + $0x5a0] sm:$0xff] }
 0x290   : > { %13290 = vmatpush1.bf16.msra.mxu1 %v17014_v1  ;;  %v1417_v1 = vld [vmem:[#allocation3 + $0x570] sm:$0xff]  ;;  %v17051_v3 = vpack.c.bf16 %v1425_v15, %v1423_v48  ;;  %v1586_v48 = vld [vmem:[#allocation3 + $0x608] sm:$0xff]  ;;  %v1588_v15 = vld [vmem:[#allocation3 + $0x618] sm:$0xff] }
 0x291   : > { %13292 = vmatprep.subr.bf16.mxu1 %v17017_v10  ;;  %v17032_v5 = vpack.c.bf16 %v1417_v1, %v1415_v33  ;;  %v17048_v1 = vpack.c.bf16 %v1426_v30, %v1424_v4 }
 0x292   : > { %20340 = vst [vmem:[#allocation114_spill] sm:$0xff] %v17051_v3 }
 0x293   : > { %20336 = vst [vmem:[#allocation110_spill] sm:$0xff] %v17032_v5  ;;  %20339 = vst [vmem:[#allocation113_spill] sm:$0xff] %v17048_v1 }
 0x294   : > { %13294 = vmatpush1.bf16.msra.mxu1 %v17020_v60  ;;  %v1427_v60 = vld [vmem:[#allocation3 + $0x5c0] sm:$0xff] }
 0x295   : > { %13296 = vmatprep.subr.bf16.mxu1 %v17023_v22  ;;  %v1421_v22 = vld [vmem:[#allocation3 + $0x590] sm:$0xff] }
 0x296   : > { %v17045_v33 = vpack.c.bf16 %v1421_v22, %v1419_v42  ;;  %v1432_v22 = vld [vmem:[#allocation3 + $0x5e8] sm:$0xff]  ;;  %v1434_v42 = vld [vmem:[#allocation3 + $0x5f8] sm:$0xff] }
 0x297   : > { %v17060_v30 = vpack.c.bf16 %v1434_v42, %v1432_v22  ;;  %v17071_v42 = vpop.f32.mrb[6].mxu0 }
 0x298   : > { %13298 = vmatpush1.bf16.msra.mxu1 %v17026_v19  ;;  %20338 = vst [vmem:[#allocation112_spill] sm:$0xff] %v17045_v33  ;;  %v1430_v19 = vld [vmem:[#allocation3 + $0x5d8] sm:$0xff] }
 0x299   : > { %13300 = vmatprep.subr.bf16.mxu1 %v17029_v49  ;;  %v1428_v49 = vld [vmem:[#allocation3 + $0x5c8] sm:$0xff]  ;;  %20343 = vst [vmem:[#allocation117_spill] sm:$0xff] %v17060_v30 }
 0x29a   : > { %v17054_v2 = vpack.c.bf16 %v1430_v19, %v1428_v49  ;;  %v17066_v49 = vpack.c.bf16 %v1588_v15, %v1586_v48  ;;  %v1594_v48 = vld [vmem:[#allocation3 + $0x648] sm:$0xff]  ;;  %v1596_v15 = vld [vmem:[#allocation3 + $0x658] sm:$0xff] }
 0x29c   : > { %13302 = vmatpush1.bf16.msra.mxu1 %v17032_v5  ;;  %20341 = vst [vmem:[#allocation115_spill] sm:$0xff] %v17054_v2  ;;  %v1429_v5 = vld [vmem:[#allocation3 + $0x5d0] sm:$0xff]  ;;  %20345 = vst [vmem:[#allocation119_spill] sm:$0xff] %v17066_v49 }
 0x29d   : > { %13304 = vmatprep.subr.bf16.mxu1 %v17038_v61  ;;  %v17057_v4 = vpack.c.bf16 %v1429_v5, %v1427_v60  ;;  %v1431_v61 = vld [vmem:[#allocation3 + $0x5e0] sm:$0xff]  ;;  %v1590_v60 = vld [vmem:[#allocation3 + $0x628] sm:$0xff]  ;;  %v1592_v5 = vld [vmem:[#allocation3 + $0x638] sm:$0xff] }
 0x29f   : > { %20342 = vst [vmem:[#allocation116_spill] sm:$0xff] %v17057_v4 }
 0x2a0   : > { %13306 = vmatpush1.bf16.msra.mxu1 %v17045_v33  ;;  %v1433_v33 = vld [vmem:[#allocation3 + $0x5f0] sm:$0xff] }
 0x2a1   : > { %13308 = vmatprep.subr.bf16.mxu1 %v17048_v1  ;;  %v17063_v19 = vpack.c.bf16 %v1433_v33, %v1431_v61  ;;  %v1585_v1 = vld [vmem:[#allocation3 + $0x600] sm:$0xff]  ;;  %v1591_v33 = vld [vmem:[#allocation3 + $0x630] sm:$0xff] }
 0x2a2   : > { %v1589_v61 = vld [vmem:[#allocation3 + $0x620] sm:$0xff] }
 0x2a3   : > { %20344 = vst [vmem:[#allocation118_spill] sm:$0xff] %v17063_v19 }
 0x2a4   : > { %13310 = vmatpush1.bf16.msra.mxu1 %v17051_v3  ;;  %v1587_v3 = vld [vmem:[#allocation3 + $0x610] sm:$0xff] }
 0x2a5   : > { %13312 = vmatprep.subr.bf16.mxu1 %v17054_v2  ;;  %v17069_v22 = vpack.c.bf16 %v1587_v3, %v1585_v1  ;;  %v17074_v2 = vpack.c.bf16 %v1592_v5, %v1590_v60  ;;  %v17084_v1 = vpack.c.bf16 %v1596_v15, %v1594_v48  ;;  %v1593_v3 = vld [vmem:[#allocation3 + $0x640] sm:$0xff]  ;;  %v1595_v60 = vld [vmem:[#allocation3 + $0x650] sm:$0xff]  ;;  %v1598_v5 = vld [vmem:[#allocation3 + $0x668] sm:$0xff] }
 0x2a7   : > { %20346 = vst [vmem:[#allocation120_spill] sm:$0xff] %v17069_v22  ;;  %20347 = vst [vmem:[#allocation121_spill] sm:$0xff] %v17074_v2 }
 0x2a8   : > { %13314 = vmatpush1.bf16.msra.mxu1 %v17057_v4  ;;  %v17076_v4 = vpop.f32.mrb[7].mxu0  ;;  %20349 = vst [vmem:[#allocation123_spill] sm:$0xff] %v17084_v1 }
 0x2a9   : > { %13316 = vmatprep.subr.bf16.mxu1 %v17060_v30  ;;  %v17080_v30 = vpack.c.bf16 %v1591_v33, %v1589_v61  ;;  %v1597_v61 = vld [vmem:[#allocation3 + $0x660] sm:$0xff]  ;;  %v1599_v33 = vld [vmem:[#allocation3 + $0x670] sm:$0xff] }
 0x2aa   : > { %v17093_v48 = vpack.c.bf16 %v1599_v33, %v1597_v61  ;;  %v1610_v61 = vld [vmem:[#allocation3 + $0x6c8] sm:$0xff]  ;;  %v1612_v33 = vld [vmem:[#allocation3 + $0x6d8] sm:$0xff] }
 0x2ab   : > { %20348 = vst [vmem:[#allocation122_spill] sm:$0xff] %v17080_v30 }
 0x2ac   : > { %13318 = vmatpush1.bf16.msra.mxu1 %v17063_v19  ;;  %v17087_v19 = vpack.c.bf16 %v1595_v60, %v1593_v3  ;;  %20352 = vst [vmem:[#allocation126_spill] sm:$0xff] %v17093_v48  ;;  %v1606_v3 = vld [vmem:[#allocation3 + $0x6a8] sm:$0xff]  ;;  %v1608_v60 = vld [vmem:[#allocation3 + $0x6b8] sm:$0xff] }
 0x2ad   : > { %13320 = vmatprep.subr.bf16.mxu1 %v17066_v49  ;;  %v1600_v49 = vld [vmem:[#allocation3 + $0x678] sm:$0xff] }
 0x2ae   : > { %20350 = vst [vmem:[#allocation124_spill] sm:$0xff] %v17087_v19 }
 0x2af   : > { %1500 = vmatmul.mubr.f32.vlgmr.msra.gmra.mrb[2].mxu1 %v16859_v38  ;;  %v17090_v38 = vpack.c.bf16 %v1600_v49, %v1598_v5  ;;  %v17102_v5 = vpack.c.bf16 %v1608_v60, %v1606_v3 }
 0x2b0   : > { %13322 = vmatpush1.bf16.msra.mxu1 %v17069_v22  ;;  %1713 = vmatprep.mubr.f32.mxu1 %v16964_v31  ;;  %v1602_v22 = vld [vmem:[#allocation3 + $0x688] sm:$0xff]  ;;  %v1604_v31 = vld [vmem:[#allocation3 + $0x698] sm:$0xff] }
 0x2b1   : > { %13324 = vmatprep.subr.bf16.mxu1 %v17074_v2  ;;  %20351 = vst [vmem:[#allocation125_spill] sm:$0xff] %v17090_v38  ;;  %v17096_v15 = vpack.c.bf16 %v1604_v31, %v1602_v22  ;;  %v1601_v2 = vld [vmem:[#allocation3 + $0x680] sm:$0xff]  ;;  %20355 = vst [vmem:[#allocation129_spill] sm:$0xff] %v17102_v5  ;;  %v17108_v31 = vpack.c.bf16 %v1612_v33, %v1610_v61 }
 0x2b3   : > { %20353 = vst [vmem:[#allocation127_spill] sm:$0xff] %v17096_v15  ;;  %20357 = vst [vmem:[#allocation131_spill] sm:$0xff] %v17108_v31 }
 0x2b4   : > { %13326 = vmatpush1.bf16.msra.mxu1 %v17080_v30  ;;  %v1603_v30 = vld [vmem:[#allocation3 + $0x690] sm:$0xff] }
 0x2b5   : > { %13328 = vmatprep.subr.bf16.mxu1 %v17084_v1  ;;  %v17099_v49 = vpack.c.bf16 %v1603_v30, %v1601_v2  ;;  %v1605_v1 = vld [vmem:[#allocation3 + $0x6a0] sm:$0xff]  ;;  %v1614_v2 = vld [vmem:[#allocation3 + $0x6e8] sm:$0xff]  ;;  %v1616_v30 = vld [vmem:[#allocation3 + $0x6f8] sm:$0xff] }
 0x2b6   : > { %v17114_v60 = vpack.c.bf16 %v1616_v30, %v1614_v2 }
 0x2b7   : > { %20354 = vst [vmem:[#allocation128_spill] sm:$0xff] %v17099_v49 }
 0x2b8   : > { %13330 = vmatpush1.bf16.msra.mxu1 %v17087_v19  ;;  %v1607_v19 = vld [vmem:[#allocation3 + $0x6b0] sm:$0xff]  ;;  %20359 = vst [vmem:[#allocation133_spill] sm:$0xff] %v17114_v60 }
 0x2b9   : > { %13332 = vmatprep.subr.bf16.mxu1 %v17090_v38  ;;  %v17105_v22 = vpack.c.bf16 %v1607_v19, %v1605_v1  ;;  %v1609_v38 = vld [vmem:[#allocation3 + $0x6c0] sm:$0xff]  ;;  %v1618_v19 = vld [vmem:[#allocation3 + $0x708] sm:$0xff]  ;;  %v1620_v1 = vld [vmem:[#allocation3 + $0x718] sm:$0xff] }
 0x2ba   : > { %v17120_v33 = vpack.c.bf16 %v1620_v1, %v1618_v19 }
 0x2bb   : > { %20356 = vst [vmem:[#allocation130_spill] sm:$0xff] %v17105_v22 }
 0x2bc   : > { %13334 = vmatpush1.bf16.msra.mxu1 %v17093_v48  ;;  %v1611_v48 = vld [vmem:[#allocation3 + $0x6d0] sm:$0xff]  ;;  %20361 = vst [vmem:[#allocation135_spill] sm:$0xff] %v17120_v33 }
 0x2bd   : > { %13336 = vmatprep.subr.bf16.mxu1 %v17096_v15  ;;  %v17111_v3 = vpack.c.bf16 %v1611_v48, %v1609_v38  ;;  %v1613_v15 = vld [vmem:[#allocation3 + $0x6e0] sm:$0xff]  ;;  %v1622_v38 = vld [vmem:[#allocation3 + $0x728] sm:$0xff]  ;;  %v1624_v48 = vld [vmem:[#allocation3 + $0x738] sm:$0xff] }
 0x2be   : > { %v17126_v30 = vpack.c.bf16 %v1624_v48, %v1622_v38 }
 0x2bf   : > { %20358 = vst [vmem:[#allocation132_spill] sm:$0xff] %v17111_v3 }
 0x2c0   : > { %13338 = vmatpush1.bf16.msra.mxu1 %v17099_v49  ;;  %v1615_v49 = vld [vmem:[#allocation3 + $0x6f0] sm:$0xff]  ;;  %20363 = vst [vmem:[#allocation137_spill] sm:$0xff] %v17126_v30 }
 0x2c1   : > { %13340 = vmatprep.subr.bf16.mxu1 %v17102_v5  ;;  %v17117_v61 = vpack.c.bf16 %v1615_v49, %v1613_v15  ;;  %v1617_v5 = vld [vmem:[#allocation3 + $0x700] sm:$0xff]  ;;  %v1626_v15 = vld [vmem:[#allocation3 + $0x748] sm:$0xff]  ;;  %v1628_v49 = vld [vmem:[#allocation3 + $0x758] sm:$0xff] }
 0x2c2   : > { %v17132_v1 = vpack.c.bf16 %v1628_v49, %v1626_v15  ;;  %v11426_v15 = vld [vmem:[%s20260_s26 + $0x40] sm:$0xff] }
 0x2c3   : > { %20360 = vst [vmem:[#allocation134_spill] sm:$0xff] %v17117_v61  ;;  %11429 = vmatmul.mubr.msk.f32.vlgmr.msra.gmra.mrb[14].mxu0 %vm863_vm1, %v11426_v15  ;;  %v1644_v15 = vld [vmem:[#allocation3 + $0x7d8] sm:$0xff] }
 0x2c4   : > { %13342 = vmatpush1.bf16.msra.mxu1 %v17105_v22  ;;  %v1619_v22 = vld [vmem:[#allocation3 + $0x710] sm:$0xff]  ;;  %20365 = vst [vmem:[#allocation139_spill] sm:$0xff] %v17132_v1 }
 0x2c5   : > { %13344 = vmatprep.subr.bf16.mxu1 %v17108_v31  ;;  %v17123_v2 = vpack.c.bf16 %v1619_v22, %v1617_v5  ;;  %v1621_v31 = vld [vmem:[#allocation3 + $0x720] sm:$0xff]  ;;  %v1630_v5 = vld [vmem:[#allocation3 + $0x768] sm:$0xff]  ;;  %v1632_v22 = vld [vmem:[#allocation3 + $0x778] sm:$0xff] }
 0x2c6   : > { %v17138_v48 = vpack.c.bf16 %v1632_v22, %v1630_v5  ;;  %v1635_v5 = vld [vmem:[#allocation3 + $0x790] sm:$0xff]  ;;  %v1638_v22 = vld [vmem:[#allocation3 + $0x7a8] sm:$0xff] }
 0x2c7   : > { %20362 = vst [vmem:[#allocation136_spill] sm:$0xff] %v17123_v2 }
 0x2c8   : > { %13346 = vmatpush1.bf16.msra.mxu1 %v17111_v3  ;;  %v1623_v3 = vld [vmem:[#allocation3 + $0x730] sm:$0xff]  ;;  %20367 = vst [vmem:[#allocation141_spill] sm:$0xff] %v17138_v48 }
 0x2c9   : > { %13348 = vmatprep.subr.bf16.mxu1 %v17114_v60  ;;  %v17129_v19 = vpack.c.bf16 %v1623_v3, %v1621_v31  ;;  %v1625_v60 = vld [vmem:[#allocation3 + $0x740] sm:$0xff]  ;;  %v1634_v31 = vld [vmem:[#allocation3 + $0x788] sm:$0xff]  ;;  %v1636_v3 = vld [vmem:[#allocation3 + $0x798] sm:$0xff] }
 0x2cb   : > { %20364 = vst [vmem:[#allocation138_spill] sm:$0xff] %v17129_v19 }
 0x2cc   : > { %13350 = vmatpush1.bf16.msra.mxu1 %v17117_v61  ;;  %v1627_v61 = vld [vmem:[#allocation3 + $0x750] sm:$0xff] }
 0x2cd   : > { %13352 = vmatprep.subr.bf16.mxu1 %v17120_v33  ;;  %v17135_v38 = vpack.c.bf16 %v1627_v61, %v1625_v60  ;;  %v1629_v33 = vld [vmem:[#allocation3 + $0x760] sm:$0xff]  ;;  %v17148_v60 = vpack.c.bf16 %v1636_v3, %v1634_v31 }
 0x2ce   : > { %v1633_v61 = vld [vmem:[#allocation3 + $0x780] sm:$0xff] }
 0x2cf   : > { %20366 = vst [vmem:[#allocation140_spill] sm:$0xff] %v17135_v38  ;;  %20369 = vst [vmem:[#allocation143_spill] sm:$0xff] %v17148_v60 }
 0x2d0   : > { %13354 = vmatpush1.bf16.msra.mxu1 %v17123_v2  ;;  %v1631_v2 = vld [vmem:[#allocation3 + $0x770] sm:$0xff] }
 0x2d1   : > { %13356 = vmatprep.subr.bf16.mxu1 %v17126_v30  ;;  %v17144_v49 = vpack.c.bf16 %v1631_v2, %v1629_v33  ;;  %v1637_v33 = vld [vmem:[#allocation3 + $0x7a0] sm:$0xff]  ;;  %v1639_v2 = vld [vmem:[#allocation3 + $0x7b0] sm:$0xff] }
 0x2d2   : > { %v17157_v31 = vpack.c.bf16 %v1639_v2, %v1637_v33  ;;  %v1800_v33 = vld [vmem:[#allocation3 + $0x808] sm:$0xff]  ;;  %v1802_v2 = vld [vmem:[#allocation3 + $0x818] sm:$0xff] }
 0x2d3   : > { %20368 = vst [vmem:[#allocation142_spill] sm:$0xff] %v17144_v49 }
 0x2d4   : > { %13358 = vmatpush1.bf16.msra.mxu1 %v17129_v19  ;;  %v17151_v19 = vpack.c.bf16 %v1635_v5, %v1633_v61  ;;  %20372 = vst [vmem:[#allocation146_spill] sm:$0xff] %v17157_v31  ;;  %v1646_v61 = vld [vmem:[#allocation3 + $0x7e8] sm:$0xff]  ;;  %v1648_v5 = vld [vmem:[#allocation3 + $0x7f8] sm:$0xff] }
 0x2d5   : > { %13360 = vmatprep.subr.bf16.mxu1 %v17132_v1  ;;  %v1640_v1 = vld [vmem:[#allocation3 + $0x7b8] sm:$0xff] }
 0x2d6   : > { %20370 = vst [vmem:[#allocation144_spill] sm:$0xff] %v17151_v19  ;;  %v17154_v30 = vpack.c.bf16 %v1640_v1, %v1638_v22  ;;  %v17166_v22 = vpack.c.bf16 %v1648_v5, %v1646_v61  ;;  %v17177_v5 = vpop.f32.mrb[8].mxu0 }
 0x2d8   : > { %13362 = vmatpush1.bf16.msra.mxu1 %v17135_v38  ;;  %20371 = vst [vmem:[#allocation145_spill] sm:$0xff] %v17154_v30  ;;  %v1642_v38 = vld [vmem:[#allocation3 + $0x7c8] sm:$0xff]  ;;  %20375 = vst [vmem:[#allocation149_spill] sm:$0xff] %v17166_v22 }
 0x2d9   : > { %13364 = vmatprep.subr.bf16.mxu1 %v17138_v48  ;;  %v17160_v3 = vpack.c.bf16 %v1644_v15, %v1642_v38  ;;  %v1641_v48 = vld [vmem:[#allocation3 + $0x7c0] sm:$0xff]  ;;  %v17172_v15 = vpack.c.bf16 %v1802_v2, %v1800_v33  ;;  %v1808_v33 = vld [vmem:[#allocation3 + $0x848] sm:$0xff]  ;;  %v1810_v2 = vld [vmem:[#allocation3 + $0x858] sm:$0xff] }
 0x2db   : > { %20373 = vst [vmem:[#allocation147_spill] sm:$0xff] %v17160_v3  ;;  %20377 = vst [vmem:[#allocation151_spill] sm:$0xff] %v17172_v15 }
 0x2dc   : > { %13366 = vmatpush1.bf16.msra.mxu1 %v17144_v49  ;;  %v1643_v49 = vld [vmem:[#allocation3 + $0x7d0] sm:$0xff] }
 0x2dd   : > { %13368 = vmatprep.subr.bf16.mxu1 %v17148_v60  ;;  %v17163_v1 = vpack.c.bf16 %v1643_v49, %v1641_v48  ;;  %v1645_v60 = vld [vmem:[#allocation3 + $0x7e0] sm:$0xff]  ;;  %v1804_v48 = vld [vmem:[#allocation3 + $0x828] sm:$0xff]  ;;  %v1806_v49 = vld [vmem:[#allocation3 + $0x838] sm:$0xff] }
 0x2df   : > { %20374 = vst [vmem:[#allocation148_spill] sm:$0xff] %v17163_v1 }
 0x2e0   : > { %13370 = vmatpush1.bf16.msra.mxu1 %v17151_v19  ;;  %v1647_v19 = vld [vmem:[#allocation3 + $0x7f0] sm:$0xff] }
 0x2e1   : > { %13372 = vmatprep.subr.bf16.mxu1 %v17154_v30  ;;  %v17169_v38 = vpack.c.bf16 %v1647_v19, %v1645_v60  ;;  %v1799_v30 = vld [vmem:[#allocation3 + $0x800] sm:$0xff]  ;;  %v1805_v60 = vld [vmem:[#allocation3 + $0x830] sm:$0xff] }
 0x2e2   : > { %v1803_v19 = vld [vmem:[#allocation3 + $0x820] sm:$0xff] }
 0x2e3   : > { %20376 = vst [vmem:[#allocation150_spill] sm:$0xff] %v17169_v38 }
 0x2e4   : > { %13374 = vmatpush1.bf16.msra.mxu1 %v17157_v31  ;;  %v1801_v31 = vld [vmem:[#allocation3 + $0x810] sm:$0xff] }
 0x2e5   : > { %13376 = vmatprep.subr.bf16.mxu1 %v17160_v3  ;;  %v17175_v61 = vpack.c.bf16 %v1801_v31, %v1799_v30  ;;  %v17180_v3 = vpack.c.bf16 %v1806_v49, %v1804_v48  ;;  %v17190_v30 = vpack.c.bf16 %v1810_v2, %v1808_v33  ;;  %v1807_v31 = vld [vmem:[#allocation3 + $0x840] sm:$0xff]  ;;  %v1809_v48 = vld [vmem:[#allocation3 + $0x850] sm:$0xff]  ;;  %v1812_v49 = vld [vmem:[#allocation3 + $0x868] sm:$0xff] }
 0x2e7   : > { %20378 = vst [vmem:[#allocation152_spill] sm:$0xff] %v17175_v61  ;;  %20379 = vst [vmem:[#allocation153_spill] sm:$0xff] %v17180_v3 }
 0x2e8   : > { %13378 = vmatpush1.bf16.msra.mxu1 %v17163_v1  ;;  %v17182_v1 = vpop.f32.mrb[9].mxu0  ;;  %20381 = vst [vmem:[#allocation155_spill] sm:$0xff] %v17190_v30 }
 0x2e9   : > { %13380 = vmatprep.subr.bf16.mxu1 %v17166_v22  ;;  %v17186_v22 = vpack.c.bf16 %v1805_v60, %v1803_v19  ;;  %v1811_v19 = vld [vmem:[#allocation3 + $0x860] sm:$0xff]  ;;  %v1813_v60 = vld [vmem:[#allocation3 + $0x870] sm:$0xff] }
 0x2ea   : > { %v17199_v33 = vpack.c.bf16 %v1813_v60, %v1811_v19  ;;  %v1824_v19 = vld [vmem:[#allocation3 + $0x8c8] sm:$0xff]  ;;  %v1826_v60 = vld [vmem:[#allocation3 + $0x8d8] sm:$0xff] }
 0x2eb   : > { %20380 = vst [vmem:[#allocation154_spill] sm:$0xff] %v17186_v22 }
 0x2ec   : > { %13382 = vmatpush1.bf16.msra.mxu1 %v17169_v38  ;;  %v17193_v38 = vpack.c.bf16 %v1809_v48, %v1807_v31  ;;  %20384 = vst [vmem:[#allocation158_spill] sm:$0xff] %v17199_v33  ;;  %v1820_v31 = vld [vmem:[#allocation3 + $0x8a8] sm:$0xff]  ;;  %v1822_v48 = vld [vmem:[#allocation3 + $0x8b8] sm:$0xff] }
 0x2ed   : > { %13384 = vmatprep.subr.bf16.mxu1 %v17172_v15  ;;  %v1814_v15 = vld [vmem:[#allocation3 + $0x878] sm:$0xff] }
 0x2ee   : > { %20382 = vst [vmem:[#allocation156_spill] sm:$0xff] %v17193_v38 }
 0x2ef   : > { %1714 = vmatmul.mubr.f32.vlgmr.msra.gmra.mrb[2].mxu1 %v16959_v12  ;;  %v17196_v12 = vpack.c.bf16 %v1814_v15, %v1812_v49  ;;  %v17208_v49 = vpack.c.bf16 %v1822_v48, %v1820_v31 }
 0x2f0   : > { %13386 = vmatpush1.bf16.msra.mxu1 %v17175_v61  ;;  %1927 = vmatprep.mubr.f32.mxu1 %v17076_v4  ;;  %v1816_v61 = vld [vmem:[#allocation3 + $0x888] sm:$0xff]  ;;  %v1818_v4 = vld [vmem:[#allocation3 + $0x898] sm:$0xff] }
 0x2f1   : > { %13388 = vmatprep.subr.bf16.mxu1 %v17180_v3  ;;  %20383 = vst [vmem:[#allocation157_spill] sm:$0xff] %v17196_v12  ;;  %v17202_v2 = vpack.c.bf16 %v1818_v4, %v1816_v61  ;;  %v1815_v3 = vld [vmem:[#allocation3 + $0x880] sm:$0xff]  ;;  %20387 = vst [vmem:[#allocation161_spill] sm:$0xff] %v17208_v49  ;;  %v17214_v4 = vpack.c.bf16 %v1826_v60, %v1824_v19 }
 0x2f3   : > { %20385 = vst [vmem:[#allocation159_spill] sm:$0xff] %v17202_v2  ;;  %20389 = vst [vmem:[#allocation163_spill] sm:$0xff] %v17214_v4 }
 0x2f4   : > { %13390 = vmatpush1.bf16.msra.mxu1 %v17186_v22  ;;  %v1817_v22 = vld [vmem:[#allocation3 + $0x890] sm:$0xff] }
 0x2f5   : > { %13392 = vmatprep.subr.bf16.mxu1 %v17190_v30  ;;  %v17205_v15 = vpack.c.bf16 %v1817_v22, %v1815_v3  ;;  %v1819_v30 = vld [vmem:[#allocation3 + $0x8a0] sm:$0xff]  ;;  %v1828_v3 = vld [vmem:[#allocation3 + $0x8e8] sm:$0xff]  ;;  %v1830_v22 = vld [vmem:[#allocation3 + $0x8f8] sm:$0xff] }
 0x2f6   : > { %v17220_v48 = vpack.c.bf16 %v1830_v22, %v1828_v3 }
 0x2f7   : > { %20386 = vst [vmem:[#allocation160_spill] sm:$0xff] %v17205_v15 }
 0x2f8   : > { %13394 = vmatpush1.bf16.msra.mxu1 %v17193_v38  ;;  %v1821_v38 = vld [vmem:[#allocation3 + $0x8b0] sm:$0xff]  ;;  %20391 = vst [vmem:[#allocation165_spill] sm:$0xff] %v17220_v48 }
 0x2f9   : > { %13396 = vmatprep.subr.bf16.mxu1 %v17196_v12  ;;  %v17211_v61 = vpack.c.bf16 %v1821_v38, %v1819_v30  ;;  %v1823_v12 = vld [vmem:[#allocation3 + $0x8c0] sm:$0xff]  ;;  %v1832_v38 = vld [vmem:[#allocation3 + $0x908] sm:$0xff]  ;;  %v1834_v30 = vld [vmem:[#allocation3 + $0x918] sm:$0xff] }
 0x2fa   : > { %v17226_v60 = vpack.c.bf16 %v1834_v30, %v1832_v38 }
 0x2fb   : > { %20388 = vst [vmem:[#allocation162_spill] sm:$0xff] %v17211_v61 }
 0x2fc   : > { %13398 = vmatpush1.bf16.msra.mxu1 %v17199_v33  ;;  %v1825_v33 = vld [vmem:[#allocation3 + $0x8d0] sm:$0xff]  ;;  %20393 = vst [vmem:[#allocation167_spill] sm:$0xff] %v17226_v60 }
 0x2fd   : > { %13400 = vmatprep.subr.bf16.mxu1 %v17202_v2  ;;  %v17217_v31 = vpack.c.bf16 %v1825_v33, %v1823_v12  ;;  %v1827_v2 = vld [vmem:[#allocation3 + $0x8e0] sm:$0xff]  ;;  %v1836_v12 = vld [vmem:[#allocation3 + $0x928] sm:$0xff]  ;;  %v1838_v33 = vld [vmem:[#allocation3 + $0x938] sm:$0xff] }
 0x2fe   : > { %v17232_v22 = vpack.c.bf16 %v1838_v33, %v1836_v12 }
 0x2ff   : > { %20390 = vst [vmem:[#allocation164_spill] sm:$0xff] %v17217_v31 }
 0x300   : > { %13402 = vmatpush1.bf16.msra.mxu1 %v17205_v15  ;;  %v1829_v15 = vld [vmem:[#allocation3 + $0x8f0] sm:$0xff]  ;;  %20395 = vst [vmem:[#allocation169_spill] sm:$0xff] %v17232_v22 }
 0x301   : > { %13404 = vmatprep.subr.bf16.mxu1 %v17208_v49  ;;  %v17223_v19 = vpack.c.bf16 %v1829_v15, %v1827_v2  ;;  %v1831_v49 = vld [vmem:[#allocation3 + $0x900] sm:$0xff]  ;;  %v1840_v2 = vld [vmem:[#allocation3 + $0x948] sm:$0xff]  ;;  %v1842_v15 = vld [vmem:[#allocation3 + $0x958] sm:$0xff] }
 0x302   : > { %v17238_v30 = vpack.c.bf16 %v1842_v15, %v1840_v2 }
 0x303   : > { %20392 = vst [vmem:[#allocation166_spill] sm:$0xff] %v17223_v19 }
 0x304   : > { %13406 = vmatpush1.bf16.msra.mxu1 %v17211_v61  ;;  %v1833_v61 = vld [vmem:[#allocation3 + $0x910] sm:$0xff]  ;;  %20397 = vst [vmem:[#allocation171_spill] sm:$0xff] %v17238_v30 }
 0x305   : > { %13408 = vmatprep.subr.bf16.mxu1 %v17214_v4  ;;  %v17229_v3 = vpack.c.bf16 %v1833_v61, %v1831_v49  ;;  %v1835_v4 = vld [vmem:[#allocation3 + $0x920] sm:$0xff]  ;;  %v1844_v49 = vld [vmem:[#allocation3 + $0x968] sm:$0xff]  ;;  %v1846_v61 = vld [vmem:[#allocation3 + $0x978] sm:$0xff] }
 0x306   : > { %v17244_v33 = vpack.c.bf16 %v1846_v61, %v1844_v49 }
 0x307   : > { %20394 = vst [vmem:[#allocation168_spill] sm:$0xff] %v17229_v3 }
 0x308   : > { %13410 = vmatpush1.bf16.msra.mxu1 %v17217_v31  ;;  %v1837_v31 = vld [vmem:[#allocation3 + $0x930] sm:$0xff]  ;;  %20399 = vst [vmem:[#allocation173_spill] sm:$0xff] %v17244_v33 }
 0x309   : > { %13412 = vmatprep.subr.bf16.mxu1 %v17220_v48  ;;  %v17235_v38 = vpack.c.bf16 %v1837_v31, %v1835_v4  ;;  %v1839_v48 = vld [vmem:[#allocation3 + $0x940] sm:$0xff]  ;;  %v1848_v4 = vld [vmem:[#allocation3 + $0x988] sm:$0xff]  ;;  %v1850_v31 = vld [vmem:[#allocation3 + $0x998] sm:$0xff] }
 0x30a   : > { %v17250_v15 = vpack.c.bf16 %v1850_v31, %v1848_v4 }
 0x30b   : > { %20396 = vst [vmem:[#allocation170_spill] sm:$0xff] %v17235_v38 }
 0x30c   : > { %13414 = vmatpush1.bf16.msra.mxu1 %v17223_v19  ;;  %v1841_v19 = vld [vmem:[#allocation3 + $0x950] sm:$0xff]  ;;  %20401 = vst [vmem:[#allocation175_spill] sm:$0xff] %v17250_v15 }
 0x30d   : > { %13416 = vmatprep.subr.bf16.mxu1 %v17226_v60  ;;  %v17241_v12 = vpack.c.bf16 %v1841_v19, %v1839_v48  ;;  %v1843_v60 = vld [vmem:[#allocation3 + $0x960] sm:$0xff]  ;;  %v1852_v48 = vld [vmem:[#allocation3 + $0x9a8] sm:$0xff]  ;;  %v1854_v19 = vld [vmem:[#allocation3 + $0x9b8] sm:$0xff] }
 0x30e   : > { %v17256_v61 = vpack.c.bf16 %v1854_v19, %v1852_v48 }
 0x30f   : > { %20398 = vst [vmem:[#allocation172_spill] sm:$0xff] %v17241_v12 }
 0x310   : > { %13418 = vmatpush1.bf16.msra.mxu1 %v17229_v3  ;;  %v1845_v3 = vld [vmem:[#allocation3 + $0x970] sm:$0xff]  ;;  %20403 = vst [vmem:[#allocation177_spill] sm:$0xff] %v17256_v61 }
 0x311   : > { %13420 = vmatprep.subr.bf16.mxu1 %v17232_v22  ;;  %v17247_v2 = vpack.c.bf16 %v1845_v3, %v1843_v60  ;;  %v1847_v22 = vld [vmem:[#allocation3 + $0x980] sm:$0xff]  ;;  %v1856_v60 = vld [vmem:[#allocation3 + $0x9c8] sm:$0xff]  ;;  %v1858_v3 = vld [vmem:[#allocation3 + $0x9d8] sm:$0xff] }
 0x312   : > { %v17262_v31 = vpack.c.bf16 %v1858_v3, %v1856_v60 }
 0x313   : > { %20400 = vst [vmem:[#allocation174_spill] sm:$0xff] %v17247_v2 }
 0x314   : > { %13422 = vmatpush1.bf16.msra.mxu1 %v17235_v38  ;;  %v1849_v38 = vld [vmem:[#allocation3 + $0x990] sm:$0xff]  ;;  %20405 = vst [vmem:[#allocation179_spill] sm:$0xff] %v17262_v31 }
 0x315   : > { %13424 = vmatprep.subr.bf16.mxu1 %v17238_v30  ;;  %v17253_v49 = vpack.c.bf16 %v1849_v38, %v1847_v22  ;;  %v1851_v30 = vld [vmem:[#allocation3 + $0x9a0] sm:$0xff]  ;;  %v1860_v22 = vld [vmem:[#allocation3 + $0x9e8] sm:$0xff]  ;;  %v1862_v38 = vld [vmem:[#allocation3 + $0x9f8] sm:$0xff] }
 0x316   : > { %v17268_v19 = vpack.c.bf16 %v1862_v38, %v1860_v22  ;;  %v17279_v38 = vpop.f32.mrb[10].mxu0 }
 0x317   : > { %20402 = vst [vmem:[#allocation176_spill] sm:$0xff] %v17253_v49 }
 0x318   : > { %13426 = vmatpush1.bf16.msra.mxu1 %v17241_v12  ;;  %v1853_v12 = vld [vmem:[#allocation3 + $0x9b0] sm:$0xff]  ;;  %20407 = vst [vmem:[#allocation181_spill] sm:$0xff] %v17268_v19 }
 0x319   : > { %13428 = vmatprep.subr.bf16.mxu1 %v17244_v33  ;;  %v17259_v4 = vpack.c.bf16 %v1853_v12, %v1851_v30  ;;  %v1855_v33 = vld [vmem:[#allocation3 + $0x9c0] sm:$0xff]  ;;  %v2014_v30 = vld [vmem:[#allocation3 + $0xa08] sm:$0xff]  ;;  %v2016_v12 = vld [vmem:[#allocation3 + $0xa18] sm:$0xff] }
 0x31a   : > { %v17274_v3 = vpack.c.bf16 %v2016_v12, %v2014_v30  ;;  %v2022_v30 = vld [vmem:[#allocation3 + $0xa48] sm:$0xff]  ;;  %v2024_v12 = vld [vmem:[#allocation3 + $0xa58] sm:$0xff] }
 0x31b   : > { %20404 = vst [vmem:[#allocation178_spill] sm:$0xff] %v17259_v4 }
 0x31c   : > { %13430 = vmatpush1.bf16.msra.mxu1 %v17247_v2  ;;  %v1857_v2 = vld [vmem:[#allocation3 + $0x9d0] sm:$0xff]  ;;  %20409 = vst [vmem:[#allocation183_spill] sm:$0xff] %v17274_v3 }
 0x31d   : > { %13432 = vmatprep.subr.bf16.mxu1 %v17250_v15  ;;  %v17265_v48 = vpack.c.bf16 %v1857_v2, %v1855_v33  ;;  %v1859_v15 = vld [vmem:[#allocation3 + $0x9e0] sm:$0xff]  ;;  %v2018_v33 = vld [vmem:[#allocation3 + $0xa28] sm:$0xff]  ;;  %v2020_v2 = vld [vmem:[#allocation3 + $0xa38] sm:$0xff] }
 0x31f   : > { %20406 = vst [vmem:[#allocation180_spill] sm:$0xff] %v17265_v48 }
 0x320   : > { %13434 = vmatpush1.bf16.msra.mxu1 %v17253_v49  ;;  %v1861_v49 = vld [vmem:[#allocation3 + $0x9f0] sm:$0xff] }
 0x321   : > { %13436 = vmatprep.subr.bf16.mxu1 %v17256_v61  ;;  %v17271_v60 = vpack.c.bf16 %v1861_v49, %v1859_v15  ;;  %v2013_v61 = vld [vmem:[#allocation3 + $0xa00] sm:$0xff]  ;;  %v2019_v49 = vld [vmem:[#allocation3 + $0xa30] sm:$0xff] }
 0x322   : > { %v2017_v15 = vld [vmem:[#allocation3 + $0xa20] sm:$0xff] }
 0x323   : > { %20408 = vst [vmem:[#allocation182_spill] sm:$0xff] %v17271_v60 }
 0x324   : > { %13438 = vmatpush1.bf16.msra.mxu1 %v17259_v4  ;;  %v2015_v4 = vld [vmem:[#allocation3 + $0xa10] sm:$0xff] }
 0x325   : > { %13440 = vmatprep.subr.bf16.mxu1 %v17262_v31  ;;  %v17277_v22 = vpack.c.bf16 %v2015_v4, %v2013_v61  ;;  %v17282_v31 = vpack.c.bf16 %v2020_v2, %v2018_v33  ;;  %v17292_v61 = vpack.c.bf16 %v2024_v12, %v2022_v30  ;;  %v2021_v4 = vld [vmem:[#allocation3 + $0xa40] sm:$0xff]  ;;  %v2023_v33 = vld [vmem:[#allocation3 + $0xa50] sm:$0xff]  ;;  %v2026_v2 = vld [vmem:[#allocation3 + $0xa68] sm:$0xff] }
 0x327   : > { %20410 = vst [vmem:[#allocation184_spill] sm:$0xff] %v17277_v22  ;;  %20411 = vst [vmem:[#allocation185_spill] sm:$0xff] %v17282_v31 }
 0x328   : > { %13442 = vmatpush1.bf16.msra.mxu1 %v17265_v48  ;;  %v17284_v48 = vpop.f32.mrb[11].mxu0  ;;  %20413 = vst [vmem:[#allocation187_spill] sm:$0xff] %v17292_v61 }
 0x329   : > { %13444 = vmatprep.subr.bf16.mxu1 %v17268_v19  ;;  %v17288_v19 = vpack.c.bf16 %v2019_v49, %v2017_v15  ;;  %v2025_v15 = vld [vmem:[#allocation3 + $0xa60] sm:$0xff]  ;;  %v2027_v49 = vld [vmem:[#allocation3 + $0xa70] sm:$0xff] }
 0x32a   : > { %v17301_v30 = vpack.c.bf16 %v2027_v49, %v2025_v15  ;;  %v2038_v15 = vld [vmem:[#allocation3 + $0xac8] sm:$0xff]  ;;  %v2040_v49 = vld [vmem:[#allocation3 + $0xad8] sm:$0xff] }
 0x32b   : > { %20412 = vst [vmem:[#allocation186_spill] sm:$0xff] %v17288_v19 }
 0x32c   : > { %13446 = vmatpush1.bf16.msra.mxu1 %v17271_v60  ;;  %v17295_v60 = vpack.c.bf16 %v2023_v33, %v2021_v4  ;;  %20416 = vst [vmem:[#allocation190_spill] sm:$0xff] %v17301_v30  ;;  %v2034_v4 = vld [vmem:[#allocation3 + $0xaa8] sm:$0xff]  ;;  %v2036_v33 = vld [vmem:[#allocation3 + $0xab8] sm:$0xff] }
 0x32d   : > { %13448 = vmatprep.subr.bf16.mxu1 %v17274_v3  ;;  %v2028_v3 = vld [vmem:[#allocation3 + $0xa78] sm:$0xff] }
 0x32e   : > { %20414 = vst [vmem:[#allocation188_spill] sm:$0xff] %v17295_v60 }
 0x32f   : > { %1928 = vmatmul.mubr.f32.vlgmr.msra.gmra.mrb[2].mxu1 %v17071_v42  ;;  %v17298_v42 = vpack.c.bf16 %v2028_v3, %v2026_v2  ;;  %v17310_v2 = vpack.c.bf16 %v2036_v33, %v2034_v4 }
 0x330   : > { %13450 = vmatpush1.bf16.msra.mxu1 %v17277_v22  ;;  %2141 = vmatprep.mubr.f32.mxu1 %v17182_v1  ;;  %v2030_v22 = vld [vmem:[#allocation3 + $0xa88] sm:$0xff]  ;;  %v2032_v1 = vld [vmem:[#allocation3 + $0xa98] sm:$0xff] }
 0x331   : > { %13452 = vmatprep.subr.bf16.mxu1 %v17282_v31  ;;  %20415 = vst [vmem:[#allocation189_spill] sm:$0xff] %v17298_v42  ;;  %v17304_v12 = vpack.c.bf16 %v2032_v1, %v2030_v22  ;;  %v2029_v31 = vld [vmem:[#allocation3 + $0xa80] sm:$0xff]  ;;  %20419 = vst [vmem:[#allocation193_spill] sm:$0xff] %v17310_v2  ;;  %v17316_v1 = vpack.c.bf16 %v2040_v49, %v2038_v15 }
 0x333   : > { %20417 = vst [vmem:[#allocation191_spill] sm:$0xff] %v17304_v12  ;;  %20421 = vst [vmem:[#allocation195_spill] sm:$0xff] %v17316_v1 }
 0x334   : > { %13454 = vmatpush1.bf16.msra.mxu1 %v17288_v19  ;;  %v2031_v19 = vld [vmem:[#allocation3 + $0xa90] sm:$0xff] }
 0x335   : > { %13456 = vmatprep.subr.bf16.mxu1 %v17292_v61  ;;  %v17307_v3 = vpack.c.bf16 %v2031_v19, %v2029_v31  ;;  %v2033_v61 = vld [vmem:[#allocation3 + $0xaa0] sm:$0xff]  ;;  %v2042_v31 = vld [vmem:[#allocation3 + $0xae8] sm:$0xff]  ;;  %v2044_v19 = vld [vmem:[#allocation3 + $0xaf8] sm:$0xff] }
 0x336   : > { %v17322_v33 = vpack.c.bf16 %v2044_v19, %v2042_v31 }
 0x337   : > { %20418 = vst [vmem:[#allocation192_spill] sm:$0xff] %v17307_v3 }
 0x338   : > { %13458 = vmatpush1.bf16.msra.mxu1 %v17295_v60  ;;  %v2035_v60 = vld [vmem:[#allocation3 + $0xab0] sm:$0xff]  ;;  %20423 = vst [vmem:[#allocation197_spill] sm:$0xff] %v17322_v33 }
 0x339   : > { %13460 = vmatprep.subr.bf16.mxu1 %v17298_v42  ;;  %v17313_v22 = vpack.c.bf16 %v2035_v60, %v2033_v61  ;;  %v2037_v42 = vld [vmem:[#allocation3 + $0xac0] sm:$0xff]  ;;  %v2046_v60 = vld [vmem:[#allocation3 + $0xb08] sm:$0xff]  ;;  %v2048_v61 = vld [vmem:[#allocation3 + $0xb18] sm:$0xff] }
 0x33a   : > { %v17328_v49 = vpack.c.bf16 %v2048_v61, %v2046_v60 }
 0x33b   : > { %20420 = vst [vmem:[#allocation194_spill] sm:$0xff] %v17313_v22 }
 0x33c   : > { %13462 = vmatpush1.bf16.msra.mxu1 %v17301_v30  ;;  %v2039_v30 = vld [vmem:[#allocation3 + $0xad0] sm:$0xff]  ;;  %20425 = vst [vmem:[#allocation199_spill] sm:$0xff] %v17328_v49 }
 0x33d   : > { %13464 = vmatprep.subr.bf16.mxu1 %v17304_v12  ;;  %v17319_v4 = vpack.c.bf16 %v2039_v30, %v2037_v42  ;;  %v2041_v12 = vld [vmem:[#allocation3 + $0xae0] sm:$0xff]  ;;  %v2050_v42 = vld [vmem:[#allocation3 + $0xb28] sm:$0xff]  ;;  %v2052_v30 = vld [vmem:[#allocation3 + $0xb38] sm:$0xff] }
 0x33e   : > { %v17334_v19 = vpack.c.bf16 %v2052_v30, %v2050_v42 }
 0x33f   : > { %20422 = vst [vmem:[#allocation196_spill] sm:$0xff] %v17319_v4 }
 0x340   : > { %13466 = vmatpush1.bf16.msra.mxu1 %v17307_v3  ;;  %v2043_v3 = vld [vmem:[#allocation3 + $0xaf0] sm:$0xff]  ;;  %20427 = vst [vmem:[#allocation201_spill] sm:$0xff] %v17334_v19 }
 0x341   : > { %13468 = vmatprep.subr.bf16.mxu1 %v17310_v2  ;;  %v17325_v15 = vpack.c.bf16 %v2043_v3, %v2041_v12  ;;  %v2045_v2 = vld [vmem:[#allocation3 + $0xb00] sm:$0xff]  ;;  %v2054_v12 = vld [vmem:[#allocation3 + $0xb48] sm:$0xff]  ;;  %v2056_v3 = vld [vmem:[#allocation3 + $0xb58] sm:$0xff] }
 0x342   : > { %v17340_v61 = vpack.c.bf16 %v2056_v3, %v2054_v12 }
 0x343   : > { %20424 = vst [vmem:[#allocation198_spill] sm:$0xff] %v17325_v15 }
 0x344   : > { %13470 = vmatpush1.bf16.msra.mxu1 %v17313_v22  ;;  %v2047_v22 = vld [vmem:[#allocation3 + $0xb10] sm:$0xff]  ;;  %20429 = vst [vmem:[#allocation203_spill] sm:$0xff] %v17340_v61 }
 0x345   : > { %13472 = vmatprep.subr.bf16.mxu1 %v17316_v1  ;;  %v17331_v31 = vpack.c.bf16 %v2047_v22, %v2045_v2  ;;  %v2049_v1 = vld [vmem:[#allocation3 + $0xb20] sm:$0xff]  ;;  %v2058_v2 = vld [vmem:[#allocation3 + $0xb68] sm:$0xff]  ;;  %v2060_v22 = vld [vmem:[#allocation3 + $0xb78] sm:$0xff] }
 0x346   : > { %v17346_v30 = vpack.c.bf16 %v2060_v22, %v2058_v2 }
 0x347   : > { %20426 = vst [vmem:[#allocation200_spill] sm:$0xff] %v17331_v31 }
 0x348   : > { %13474 = vmatpush1.bf16.msra.mxu1 %v17319_v4  ;;  %v2051_v4 = vld [vmem:[#allocation3 + $0xb30] sm:$0xff]  ;;  %20431 = vst [vmem:[#allocation205_spill] sm:$0xff] %v17346_v30 }
 0x349   : > { %13476 = vmatprep.subr.bf16.mxu1 %v17322_v33  ;;  %v17337_v60 = vpack.c.bf16 %v2051_v4, %v2049_v1  ;;  %v2053_v33 = vld [vmem:[#allocation3 + $0xb40] sm:$0xff]  ;;  %v2062_v1 = vld [vmem:[#allocation3 + $0xb88] sm:$0xff]  ;;  %v2064_v4 = vld [vmem:[#allocation3 + $0xb98] sm:$0xff] }
 0x34a   : > { %v17352_v3 = vpack.c.bf16 %v2064_v4, %v2062_v1 }
 0x34b   : > { %20428 = vst [vmem:[#allocation202_spill] sm:$0xff] %v17337_v60 }
 0x34c   : > { %13478 = vmatpush1.bf16.msra.mxu1 %v17325_v15  ;;  %v2055_v15 = vld [vmem:[#allocation3 + $0xb50] sm:$0xff]  ;;  %20433 = vst [vmem:[#allocation207_spill] sm:$0xff] %v17352_v3 }
 0x34d   : > { %13480 = vmatprep.subr.bf16.mxu1 %v17328_v49  ;;  %v17343_v42 = vpack.c.bf16 %v2055_v15, %v2053_v33  ;;  %v2057_v49 = vld [vmem:[#allocation3 + $0xb60] sm:$0xff]  ;;  %v2066_v33 = vld [vmem:[#allocation3 + $0xba8] sm:$0xff]  ;;  %v2068_v15 = vld [vmem:[#allocation3 + $0xbb8] sm:$0xff] }
 0x34e   : > { %v17358_v22 = vpack.c.bf16 %v2068_v15, %v2066_v33 }
 0x34f   : > { %20430 = vst [vmem:[#allocation204_spill] sm:$0xff] %v17343_v42 }
 0x350   : > { %13482 = vmatpush1.bf16.msra.mxu1 %v17331_v31  ;;  %v2059_v31 = vld [vmem:[#allocation3 + $0xb70] sm:$0xff]  ;;  %20435 = vst [vmem:[#allocation209_spill] sm:$0xff] %v17358_v22 }
 0x351   : > { %13484 = vmatprep.subr.bf16.mxu1 %v17334_v19  ;;  %v17349_v12 = vpack.c.bf16 %v2059_v31, %v2057_v49  ;;  %v2061_v19 = vld [vmem:[#allocation3 + $0xb80] sm:$0xff]  ;;  %v2070_v49 = vld [vmem:[#allocation3 + $0xbc8] sm:$0xff]  ;;  %v2072_v31 = vld [vmem:[#allocation3 + $0xbd8] sm:$0xff] }
 0x352   : > { %v17364_v4 = vpack.c.bf16 %v2072_v31, %v2070_v49 }
 0x353   : > { %20432 = vst [vmem:[#allocation206_spill] sm:$0xff] %v17349_v12 }
 0x354   : > { %13486 = vmatpush1.bf16.msra.mxu1 %v17337_v60  ;;  %v2063_v60 = vld [vmem:[#allocation3 + $0xb90] sm:$0xff]  ;;  %20437 = vst [vmem:[#allocation211_spill] sm:$0xff] %v17364_v4 }
 0x355   : > { %13488 = vmatprep.subr.bf16.mxu1 %v17340_v61  ;;  %v17355_v2 = vpack.c.bf16 %v2063_v60, %v2061_v19  ;;  %v2065_v61 = vld [vmem:[#allocation3 + $0xba0] sm:$0xff]  ;;  %v2074_v19 = vld [vmem:[#allocation3 + $0xbe8] sm:$0xff]  ;;  %v2076_v60 = vld [vmem:[#allocation3 + $0xbf8] sm:$0xff] }
 0x356   : > { %v17370_v15 = vpack.c.bf16 %v2076_v60, %v2074_v19  ;;  %v17381_v60 = vpop.f32.mrb[12].mxu0 }
 0x357   : > { %20434 = vst [vmem:[#allocation208_spill] sm:$0xff] %v17355_v2 }
 0x358   : > { %13490 = vmatpush1.bf16.msra.mxu1 %v17343_v42  ;;  %v2067_v42 = vld [vmem:[#allocation3 + $0xbb0] sm:$0xff]  ;;  %20439 = vst [vmem:[#allocation213_spill] sm:$0xff] %v17370_v15 }
 0x359   : > { %13492 = vmatprep.subr.bf16.mxu1 %v17346_v30  ;;  %v17361_v1 = vpack.c.bf16 %v2067_v42, %v2065_v61  ;;  %v2069_v30 = vld [vmem:[#allocation3 + $0xbc0] sm:$0xff]  ;;  %v2228_v61 = vld [vmem:[#allocation3 + $0xc08] sm:$0xff]  ;;  %v2230_v42 = vld [vmem:[#allocation3 + $0xc18] sm:$0xff] }
 0x35a   : > { %v17376_v31 = vpack.c.bf16 %v2230_v42, %v2228_v61  ;;  %v2236_v61 = vld [vmem:[#allocation3 + $0xc48] sm:$0xff]  ;;  %v2238_v42 = vld [vmem:[#allocation3 + $0xc58] sm:$0xff] }
 0x35b   : > { %20436 = vst [vmem:[#allocation210_spill] sm:$0xff] %v17361_v1 }
 0x35c   : > { %13494 = vmatpush1.bf16.msra.mxu1 %v17349_v12  ;;  %v2071_v12 = vld [vmem:[#allocation3 + $0xbd0] sm:$0xff]  ;;  %20441 = vst [vmem:[#allocation215_spill] sm:$0xff] %v17376_v31 }
 0x35d   : > { %13496 = vmatprep.subr.bf16.mxu1 %v17352_v3  ;;  %v17367_v33 = vpack.c.bf16 %v2071_v12, %v2069_v30  ;;  %v2073_v3 = vld [vmem:[#allocation3 + $0xbe0] sm:$0xff]  ;;  %v2232_v30 = vld [vmem:[#allocation3 + $0xc28] sm:$0xff]  ;;  %v2234_v12 = vld [vmem:[#allocation3 + $0xc38] sm:$0xff] }
 0x35f   : > { %20438 = vst [vmem:[#allocation212_spill] sm:$0xff] %v17367_v33 }
 0x360   : > { %13498 = vmatpush1.bf16.msra.mxu1 %v17355_v2  ;;  %v2075_v2 = vld [vmem:[#allocation3 + $0xbf0] sm:$0xff] }
 0x361   : > { %13500 = vmatprep.subr.bf16.mxu1 %v17358_v22  ;;  %v17373_v49 = vpack.c.bf16 %v2075_v2, %v2073_v3  ;;  %v2227_v22 = vld [vmem:[#allocation3 + $0xc00] sm:$0xff]  ;;  %v2233_v2 = vld [vmem:[#allocation3 + $0xc30] sm:$0xff] }
 0x362   : > { %v2231_v3 = vld [vmem:[#allocation3 + $0xc20] sm:$0xff] }
 0x363   : > { %20440 = vst [vmem:[#allocation214_spill] sm:$0xff] %v17373_v49 }
 0x364   : > { %13502 = vmatpush1.bf16.msra.mxu1 %v17361_v1  ;;  %v2229_v1 = vld [vmem:[#allocation3 + $0xc10] sm:$0xff] }
 0x365   : > { %13504 = vmatprep.subr.bf16.mxu1 %v17364_v4  ;;  %v17379_v19 = vpack.c.bf16 %v2229_v1, %v2227_v22  ;;  %v17384_v4 = vpack.c.bf16 %v2234_v12, %v2232_v30  ;;  %v17394_v22 = vpack.c.bf16 %v2238_v42, %v2236_v61  ;;  %v2235_v1 = vld [vmem:[#allocation3 + $0xc40] sm:$0xff]  ;;  %v2237_v30 = vld [vmem:[#allocation3 + $0xc50] sm:$0xff]  ;;  %v2240_v12 = vld [vmem:[#allocation3 + $0xc68] sm:$0xff] }
 0x367   : > { %20442 = vst [vmem:[#allocation216_spill] sm:$0xff] %v17379_v19  ;;  %20443 = vst [vmem:[#allocation217_spill] sm:$0xff] %v17384_v4 }
 0x368   : > { %13506 = vmatpush1.bf16.msra.mxu1 %v17367_v33  ;;  %v17386_v33 = vpop.f32.mrb[13].mxu0  ;;  %20445 = vst [vmem:[#allocation219_spill] sm:$0xff] %v17394_v22 }
 0x369   : > { %13508 = vmatprep.subr.bf16.mxu1 %v17370_v15  ;;  %v17390_v15 = vpack.c.bf16 %v2233_v2, %v2231_v3  ;;  %v2239_v3 = vld [vmem:[#allocation3 + $0xc60] sm:$0xff]  ;;  %v2241_v2 = vld [vmem:[#allocation3 + $0xc70] sm:$0xff] }
 0x36a   : > { %v17403_v61 = vpack.c.bf16 %v2241_v2, %v2239_v3  ;;  %v2252_v3 = vld [vmem:[#allocation3 + $0xcc8] sm:$0xff]  ;;  %v2254_v2 = vld [vmem:[#allocation3 + $0xcd8] sm:$0xff] }
 0x36b   : > { %20444 = vst [vmem:[#allocation218_spill] sm:$0xff] %v17390_v15 }
 0x36c   : > { %13510 = vmatpush1.bf16.msra.mxu1 %v17373_v49  ;;  %v17397_v49 = vpack.c.bf16 %v2237_v30, %v2235_v1  ;;  %20448 = vst [vmem:[#allocation222_spill] sm:$0xff] %v17403_v61  ;;  %v2248_v1 = vld [vmem:[#allocation3 + $0xca8] sm:$0xff]  ;;  %v2250_v30 = vld [vmem:[#allocation3 + $0xcb8] sm:$0xff] }
 0x36d   : > { %13512 = vmatprep.subr.bf16.mxu1 %v17376_v31  ;;  %v2242_v31 = vld [vmem:[#allocation3 + $0xc78] sm:$0xff] }
 0x36e   : > { %20446 = vst [vmem:[#allocation220_spill] sm:$0xff] %v17397_v49 }
 0x36f   : > { %2142 = vmatmul.mubr.f32.vlgmr.msra.gmra.mrb[2].mxu1 %v17177_v5  ;;  %v17400_v5 = vpack.c.bf16 %v2242_v31, %v2240_v12  ;;  %v17412_v12 = vpack.c.bf16 %v2250_v30, %v2248_v1 }
 0x370   : > { %13514 = vmatpush1.bf16.msra.mxu1 %v17379_v19  ;;  %2355 = vmatprep.mubr.f32.mxu1 %v17284_v48  ;;  %v2244_v19 = vld [vmem:[#allocation3 + $0xc88] sm:$0xff]  ;;  %v2246_v48 = vld [vmem:[#allocation3 + $0xc98] sm:$0xff] }
 0x371   : > { %13516 = vmatprep.subr.bf16.mxu1 %v17384_v4  ;;  %20447 = vst [vmem:[#allocation221_spill] sm:$0xff] %v17400_v5  ;;  %v17406_v42 = vpack.c.bf16 %v2246_v48, %v2244_v19  ;;  %v2243_v4 = vld [vmem:[#allocation3 + $0xc80] sm:$0xff]  ;;  %20451 = vst [vmem:[#allocation225_spill] sm:$0xff] %v17412_v12  ;;  %v17418_v48 = vpack.c.bf16 %v2254_v2, %v2252_v3 }
 0x373   : > { %20449 = vst [vmem:[#allocation223_spill] sm:$0xff] %v17406_v42  ;;  %20453 = vst [vmem:[#allocation227_spill] sm:$0xff] %v17418_v48 }
 0x374   : > { %13518 = vmatpush1.bf16.msra.mxu1 %v17390_v15  ;;  %v2245_v15 = vld [vmem:[#allocation3 + $0xc90] sm:$0xff] }
 0x375   : > { %13520 = vmatprep.subr.bf16.mxu1 %v17394_v22  ;;  %v17409_v31 = vpack.c.bf16 %v2245_v15, %v2243_v4  ;;  %v2247_v22 = vld [vmem:[#allocation3 + $0xca0] sm:$0xff]  ;;  %v2256_v4 = vld [vmem:[#allocation3 + $0xce8] sm:$0xff]  ;;  %v2258_v15 = vld [vmem:[#allocation3 + $0xcf8] sm:$0xff] }
 0x376   : > { %v17424_v30 = vpack.c.bf16 %v2258_v15, %v2256_v4 }
 0x377   : > { %20450 = vst [vmem:[#allocation224_spill] sm:$0xff] %v17409_v31 }
 0x378   : > { %13522 = vmatpush1.bf16.msra.mxu1 %v17397_v49  ;;  %v2249_v49 = vld [vmem:[#allocation3 + $0xcb0] sm:$0xff]  ;;  %20455 = vst [vmem:[#allocation229_spill] sm:$0xff] %v17424_v30 }
 0x379   : > { %13524 = vmatprep.subr.bf16.mxu1 %v17400_v5  ;;  %v17415_v19 = vpack.c.bf16 %v2249_v49, %v2247_v22  ;;  %v2251_v5 = vld [vmem:[#allocation3 + $0xcc0] sm:$0xff]  ;;  %v2260_v49 = vld [vmem:[#allocation3 + $0xd08] sm:$0xff]  ;;  %v2262_v22 = vld [vmem:[#allocation3 + $0xd18] sm:$0xff] }
 0x37a   : > { %v17430_v2 = vpack.c.bf16 %v2262_v22, %v2260_v49 }
 0x37b   : > { %20452 = vst [vmem:[#allocation226_spill] sm:$0xff] %v17415_v19 }
 0x37c   : > { %13526 = vmatpush1.bf16.msra.mxu1 %v17403_v61  ;;  %v2253_v61 = vld [vmem:[#allocation3 + $0xcd0] sm:$0xff]  ;;  %20457 = vst [vmem:[#allocation231_spill] sm:$0xff] %v17430_v2 }
 0x37d   : > { %13528 = vmatprep.subr.bf16.mxu1 %v17406_v42  ;;  %v17421_v1 = vpack.c.bf16 %v2253_v61, %v2251_v5  ;;  %v2255_v42 = vld [vmem:[#allocation3 + $0xce0] sm:$0xff]  ;;  %v2264_v5 = vld [vmem:[#allocation3 + $0xd28] sm:$0xff]  ;;  %v2266_v61 = vld [vmem:[#allocation3 + $0xd38] sm:$0xff] }
 0x37e   : > { %v17436_v15 = vpack.c.bf16 %v2266_v61, %v2264_v5 }
 0x37f   : > { %20454 = vst [vmem:[#allocation228_spill] sm:$0xff] %v17421_v1 }
 0x380   : > { %13530 = vmatpush1.bf16.msra.mxu1 %v17409_v31  ;;  %v2257_v31 = vld [vmem:[#allocation3 + $0xcf0] sm:$0xff]  ;;  %20459 = vst [vmem:[#allocation233_spill] sm:$0xff] %v17436_v15 }
 0x381   : > { %13532 = vmatprep.subr.bf16.mxu1 %v17412_v12  ;;  %v17427_v3 = vpack.c.bf16 %v2257_v31, %v2255_v42  ;;  %v2259_v12 = vld [vmem:[#allocation3 + $0xd00] sm:$0xff]  ;;  %v2268_v42 = vld [vmem:[#allocation3 + $0xd48] sm:$0xff]  ;;  %v2270_v31 = vld [vmem:[#allocation3 + $0xd58] sm:$0xff] }
 0x382   : > { %v17442_v22 = vpack.c.bf16 %v2270_v31, %v2268_v42 }
 0x383   : > { %20456 = vst [vmem:[#allocation230_spill] sm:$0xff] %v17427_v3 }
 0x384   : > { %13534 = vmatpush1.bf16.msra.mxu1 %v17415_v19  ;;  %v2261_v19 = vld [vmem:[#allocation3 + $0xd10] sm:$0xff]  ;;  %20461 = vst [vmem:[#allocation235_spill] sm:$0xff] %v17442_v22 }
 0x385   : > { %13536 = vmatprep.subr.bf16.mxu1 %v17418_v48  ;;  %v17433_v4 = vpack.c.bf16 %v2261_v19, %v2259_v12  ;;  %v2263_v48 = vld [vmem:[#allocation3 + $0xd20] sm:$0xff]  ;;  %v2272_v12 = vld [vmem:[#allocation3 + $0xd68] sm:$0xff]  ;;  %v2274_v19 = vld [vmem:[#allocation3 + $0xd78] sm:$0xff] }
 0x386   : > { %v17448_v61 = vpack.c.bf16 %v2274_v19, %v2272_v12 }
 0x387   : > { %20458 = vst [vmem:[#allocation232_spill] sm:$0xff] %v17433_v4 }
 0x388   : > { %13538 = vmatpush1.bf16.msra.mxu1 %v17421_v1  ;;  %v2265_v1 = vld [vmem:[#allocation3 + $0xd30] sm:$0xff]  ;;  %20463 = vst [vmem:[#allocation237_spill] sm:$0xff] %v17448_v61 }
 0x389   : > { %13540 = vmatprep.subr.bf16.mxu1 %v17424_v30  ;;  %v17439_v49 = vpack.c.bf16 %v2265_v1, %v2263_v48  ;;  %v2267_v30 = vld [vmem:[#allocation3 + $0xd40] sm:$0xff]  ;;  %v2276_v48 = vld [vmem:[#allocation3 + $0xd88] sm:$0xff]  ;;  %v2278_v1 = vld [vmem:[#allocation3 + $0xd98] sm:$0xff] }
 0x38a   : > { %v17454_v31 = vpack.c.bf16 %v2278_v1, %v2276_v48 }
 0x38b   : > { %20460 = vst [vmem:[#allocation234_spill] sm:$0xff] %v17439_v49 }
 0x38c   : > { %13542 = vmatpush1.bf16.msra.mxu1 %v17427_v3  ;;  %v2269_v3 = vld [vmem:[#allocation3 + $0xd50] sm:$0xff]  ;;  %20465 = vst [vmem:[#allocation239_spill] sm:$0xff] %v17454_v31 }
 0x38d   : > { %13544 = vmatprep.subr.bf16.mxu1 %v17430_v2  ;;  %v17445_v5 = vpack.c.bf16 %v2269_v3, %v2267_v30  ;;  %v2271_v2 = vld [vmem:[#allocation3 + $0xd60] sm:$0xff]  ;;  %v2280_v30 = vld [vmem:[#allocation3 + $0xda8] sm:$0xff]  ;;  %v2282_v3 = vld [vmem:[#allocation3 + $0xdb8] sm:$0xff] }
 0x38e   : > { %v17460_v19 = vpack.c.bf16 %v2282_v3, %v2280_v30 }
 0x38f   : > { %20462 = vst [vmem:[#allocation236_spill] sm:$0xff] %v17445_v5 }
 0x390   : > { %13546 = vmatpush1.bf16.msra.mxu1 %v17433_v4  ;;  %v2273_v4 = vld [vmem:[#allocation3 + $0xd70] sm:$0xff]  ;;  %20467 = vst [vmem:[#allocation241_spill] sm:$0xff] %v17460_v19 }
 0x391   : > { %13548 = vmatprep.subr.bf16.mxu1 %v17436_v15  ;;  %v17451_v42 = vpack.c.bf16 %v2273_v4, %v2271_v2  ;;  %v2275_v15 = vld [vmem:[#allocation3 + $0xd80] sm:$0xff]  ;;  %v2284_v2 = vld [vmem:[#allocation3 + $0xdc8] sm:$0xff]  ;;  %v2286_v4 = vld [vmem:[#allocation3 + $0xdd8] sm:$0xff] }
 0x392   : > { %v17466_v1 = vpack.c.bf16 %v2286_v4, %v2284_v2 }
 0x393   : > { %20464 = vst [vmem:[#allocation238_spill] sm:$0xff] %v17451_v42 }
 0x394   : > { %13550 = vmatpush1.bf16.msra.mxu1 %v17439_v49  ;;  %v2277_v49 = vld [vmem:[#allocation3 + $0xd90] sm:$0xff]  ;;  %20469 = vst [vmem:[#allocation243_spill] sm:$0xff] %v17466_v1 }
 0x395   : > { %13552 = vmatprep.subr.bf16.mxu1 %v17442_v22  ;;  %v17457_v12 = vpack.c.bf16 %v2277_v49, %v2275_v15  ;;  %v2279_v22 = vld [vmem:[#allocation3 + $0xda0] sm:$0xff]  ;;  %v2288_v15 = vld [vmem:[#allocation3 + $0xde8] sm:$0xff]  ;;  %v2290_v49 = vld [vmem:[#allocation3 + $0xdf8] sm:$0xff] }
 0x396   : > { %v17472_v3 = vpack.c.bf16 %v2290_v49, %v2288_v15  ;;  %v17480_v10 = vpop.f32.mrb[14].mxu0 }
 0x397   : > { %20466 = vst [vmem:[#allocation240_spill] sm:$0xff] %v17457_v12  ;;  %v17485_v49 = vpop.f32.mrb[15].mxu0 }
 0x398   : > { %13554 = vmatpush1.bf16.msra.mxu1 %v17445_v5  ;;  %v2281_v5 = vld [vmem:[#allocation3 + $0xdb0] sm:$0xff]  ;;  %20471 = vst [vmem:[#allocation245_spill] sm:$0xff] %v17472_v3 }
 0x399   : > { %13556 = vmatprep.subr.bf16.mxu1 %v17448_v61  ;;  %v17463_v48 = vpack.c.bf16 %v2281_v5, %v2279_v22  ;;  %v2283_v61 = vld [vmem:[#allocation3 + $0xdc0] sm:$0xff]  ;;  %v2442_v22 = vld [vmem:[#allocation3 + $0xe08] sm:$0xff]  ;;  %v2444_v5 = vld [vmem:[#allocation3 + $0xe18] sm:$0xff] }
 0x39a   : > { %v17478_v4 = vpack.c.bf16 %v2444_v5, %v2442_v22  ;;  %v2450_v22 = vld [vmem:[#allocation3 + $0xe48] sm:$0xff]  ;;  %v2452_v5 = vld [vmem:[#allocation3 + $0xe58] sm:$0xff] }
 0x39b   : > { %20468 = vst [vmem:[#allocation242_spill] sm:$0xff] %v17463_v48 }
 0x39c   : > { %13558 = vmatpush1.bf16.msra.mxu1 %v17451_v42  ;;  %v2285_v42 = vld [vmem:[#allocation3 + $0xdd0] sm:$0xff]  ;;  %20473 = vst [vmem:[#allocation247_spill] sm:$0xff] %v17478_v4 }
 0x39d   : > { %13560 = vmatprep.subr.bf16.mxu1 %v17454_v31  ;;  %v17469_v30 = vpack.c.bf16 %v2285_v42, %v2283_v61  ;;  %v2287_v31 = vld [vmem:[#allocation3 + $0xde0] sm:$0xff]  ;;  %v2446_v61 = vld [vmem:[#allocation3 + $0xe28] sm:$0xff]  ;;  %v2448_v42 = vld [vmem:[#allocation3 + $0xe38] sm:$0xff] }
 0x39f   : > { %20470 = vst [vmem:[#allocation244_spill] sm:$0xff] %v17469_v30 }
 0x3a0   : > { %13562 = vmatpush1.bf16.msra.mxu1 %v17457_v12  ;;  %v2289_v12 = vld [vmem:[#allocation3 + $0xdf0] sm:$0xff] }
 0x3a1   : > { %13564 = vmatprep.subr.bf16.mxu1 %v17460_v19  ;;  %v17475_v2 = vpack.c.bf16 %v2289_v12, %v2287_v31  ;;  %v2441_v19 = vld [vmem:[#allocation3 + $0xe00] sm:$0xff]  ;;  %v17488_v31 = vpack.c.bf16 %v2448_v42, %v2446_v61  ;;  %v17499_v61 = vpack.c.bf16 %v2452_v5, %v2450_v22  ;;  %v2454_v42 = vld [vmem:[#allocation3 + $0xe68] sm:$0xff] }
 0x3a2   : > { %v2445_v12 = vld [vmem:[#allocation3 + $0xe20] sm:$0xff] }
 0x3a3   : > { %20472 = vst [vmem:[#allocation246_spill] sm:$0xff] %v17475_v2  ;;  %20475 = vst [vmem:[#allocation249_spill] sm:$0xff] %v17488_v31  ;;  %v2453_v5 = vld [vmem:[#allocation3 + $0xe60] sm:$0xff] }
 0x3a4   : > { %13566 = vmatpush1.bf16.msra.mxu1 %v17463_v48  ;;  %v2443_v48 = vld [vmem:[#allocation3 + $0xe10] sm:$0xff]  ;;  %20477 = vst [vmem:[#allocation251_spill] sm:$0xff] %v17499_v61 }
 0x3a5   : > { %13568 = vmatprep.subr.bf16.mxu1 %v17466_v1  ;;  %v17483_v15 = vpack.c.bf16 %v2443_v48, %v2441_v19  ;;  %v2449_v48 = vld [vmem:[#allocation3 + $0xe40] sm:$0xff]  ;;  %v16244_v1 = vmov 0  }
 0x3a6   : > { %15851 = vset.pattern.permute.xlu0 %v16244_v1  ;;  %15852 = vset.pattern.permute.xlu1 %v16244_v1  ;;  %v2812_v1 = vld [vmem:[#allocation8 + $0x90] sm:$0xff] }
 0x3a7   : > { %20474 = vst [vmem:[#allocation248_spill] sm:$0xff] %v17483_v15 }
 0x3a8   : > { %13570 = vmatpush1.bf16.msra.mxu1 %v17469_v30  ;;  %v853_v30 = vld [vmem:[%s19487_s8] sm:$0xff] }
 0x3a9   : > { %13572 = vmatprep.subr.bf16.mxu1 %v17472_v3  ;;  %v2447_v3 = vld [vmem:[#allocation3 + $0xe30] sm:$0xff]  ;;  %856 = vperm.xlu0 %15851, %v853_v30  }
 0x3aa   : > { %v17495_v19 = vpack.c.bf16 %v2447_v3, %v2445_v12  ;;  %v3208_v3 = vld [vmem:[%s19489_s10] sm:$0xf] }
 0x3ac   : > { %13574 = vmatpush1.bf16.msra.mxu1 %v17475_v2  ;;  %20476 = vst [vmem:[#allocation250_spill] sm:$0xff] %v17495_v19  ;;  %v2451_v2 = vld [vmem:[#allocation3 + $0xe50] sm:$0xff] }
 0x3ad   : > { %13576 = vmatprep.subr.bf16.mxu1 %v17478_v4  ;;  %v2456_v4 = vld [vmem:[#allocation3 + $0xe78] sm:$0xff]  ;;  %v17509_v22 = vpack.c.bf16 %v2451_v2, %v2449_v48  ;;  %3211 = vperm.xlu0 %15851, %v3208_v3  }
 0x3ae   : > { %v17512_v30 = vpack.c.bf16 %v2456_v4, %v2454_v42  ;;  %v7838_v2 = vld [vmem:[%s19494_s15] sm:$0xf] }
 0x3af   : > { %2356 = vmatmul.mubr.f32.vlgmr.msra.gmra.mrb[2].mxu1 %v17279_v38  ;;  %v2810_v38 = vld [vmem:[#allocation8 + $0x80] sm:$0xff]  ;;  %20480 = vst [vmem:[#allocation254_spill] sm:$0xff] %v17509_v22 }
 0x3b0   : > { %13578 = vmatpush1.bf16.msra.mxu1 %v17483_v15  ;;  %2569 = vmatprep.mubr.f32.mxu1 %v17386_v33  ;;  %v17504_v12 = vpack.c.bf16 %v2811_v47, %v2810_v38  ;;  %v17506_v33 = vpack.c.bf16 %v2795_v24, %v2794_v29  ;;  %20481 = vst [vmem:[#allocation255_spill] sm:$0xff] %v17512_v30  ;;  %v2813_v15 = vld [vmem:[#allocation8 + $0x98] sm:$0xff]  ;;  %v2457_v42 = vld [vmem:[#allocation3 + $0xe80] sm:$0xff]  ;;  %v2459_v38 = vld [vmem:[#allocation3 + $0xe90] sm:$0xff] }
 0x3b1   : > { %13580 = vmatprep.subr.bf16.mxu1 %v17488_v31  ;;  %v2455_v31 = vld [vmem:[#allocation3 + $0xe70] sm:$0xff]  ;;  %v2460_v47 = vld [vmem:[#allocation3 + $0xe98] sm:$0xff]  ;;  %v17516_v24 = vpack.c.bf16 %v2813_v15, %v2812_v1  ;;  %v2814_v15 = vld [vmem:[#allocation8 + $0xa0] sm:$0xff]  ;;  %7841 = vperm.xlu0 %15851, %v7838_v2  }
 0x3b2   : > { %20478 = vst [vmem:[#allocation252_spill] sm:$0xff] %v17504_v12  ;;  %20479 = vst [vmem:[#allocation253_spill] sm:$0xff] %v17506_v33  ;;  %13704 = vmatprep.subr.bf16.mxu0 %v17504_v12  ;;  %v2797_v29 = vld [vmem:[#allocation8 + $0x18] sm:$0xff]  ;;  %v17524_v4 = vpack.c.bf16 %v2455_v31, %v2453_v5  ;;  %v17528_v3 = vpack.c.bf16 %v2460_v47, %v2458_v6  ;;  %v2815_v1 = vld [vmem:[#allocation8 + $0xa8] sm:$0xff]  ;;  %v17539_v6 = vpack.c.bf16 %v2459_v38, %v2457_v42 }
 0x3b3   : > { %13706 = vmatpush3.bf16.msra.mxu0 %v17506_v33  ;;  %20482 = vst [vmem:[#allocation256_spill] sm:$0xff] %v17516_v24  ;;  %v17521_v48 = vpack.c.bf16 %v2797_v29, %v2796_v7  ;;  %v2798_v33 = vld [vmem:[#allocation8 + $0x20] sm:$0xff]  ;;  %v2462_v12 = vld [vmem:[#allocation3 + $0xea8] sm:$0xff]  ;;  %v17531_v7 = vpack.c.bf16 %v2815_v1, %v2814_v15  ;;  %v2816_v15 = vld [vmem:[#allocation8 + $0xb0] sm:$0xff] }
 0x3b4   : > { %13582 = vmatpush1.bf16.msra.mxu1 %v17495_v19  ;;  %20484 = vst [vmem:[#allocation258_spill] sm:$0xff] %v17524_v4  ;;  %13708 = vmatprep.subr.bf16.mxu0 %v17516_v24  ;;  %20485 = vst [vmem:[#allocation259_spill] sm:$0xff] %v17528_v3  ;;  %v2799_v31 = vld [vmem:[#allocation8 + $0x28] sm:$0xff]  ;;  %v2461_v47 = vld [vmem:[#allocation3 + $0xea0] sm:$0xff] }
 0x3b5   : > { %13584 = vmatprep.subr.bf16.mxu1 %v17499_v61  ;;  %20483 = vst [vmem:[#allocation257_spill] sm:$0xff] %v17521_v48  ;;  %v2464_v61 = vld [vmem:[#allocation3 + $0xeb8] sm:$0xff]  ;;  %20486 = vst [vmem:[#allocation260_spill] sm:$0xff] %v17531_v7  ;;  %v11499_v5 = vld [vmem:[%s19494_s15 + $0x8] sm:$0xf]  ;;  %v17536_v29 = vpack.c.bf16 %v2799_v31, %v2798_v33 }
 0x3b6   : > { %20488 = vst [vmem:[#allocation262_spill] sm:$0xff] %v17539_v6  ;;  %v2463_v24 = vld [vmem:[#allocation3 + $0xeb0] sm:$0xff]  ;;  %v17543_v2 = vpack.c.bf16 %v2464_v61, %v2462_v12  ;;  %v2817_v1 = vld [vmem:[#allocation8 + $0xb8] sm:$0xff]  ;;  %8013 = vperm.xlu0 %15851, %v11499_v5   ;;  %v2465_v12 = vld [vmem:[#allocation3 + $0xec0] sm:$0xff] }
 0x3b7   : > { %13710 = vmatpush3.bf16.msra.mxu0 %v17521_v48  ;;  %20487 = vst [vmem:[#allocation261_spill] sm:$0xff] %v17536_v29  ;;  %v2800_v48 = vld [vmem:[#allocation8 + $0x30] sm:$0xff]  ;;  %v17546_v33 = vpack.c.bf16 %v2817_v1, %v2816_v15  ;;  %v2801_v42 = vld [vmem:[#allocation8 + $0x38] sm:$0xff]  ;;  %v17554_v61 = vpack.c.bf16 %v2463_v24, %v2461_v47  ;;  %v2818_v15 = vld [vmem:[#allocation8 + $0xc0] sm:$0xff] }
 0x3b8   : > { %13586 = vmatpush1.bf16.msra.mxu1 %v17509_v22  ;;  %13712 = vmatprep.subr.bf16.mxu0 %v17531_v7  ;;  %20489 = vst [vmem:[#allocation263_spill] sm:$0xff] %v17543_v2  ;;  %v2468_v22 = vld [vmem:[#allocation3 + $0xed8] sm:$0xff]  ;;  %v11501_v38 = vld [vmem:[%s19494_s15 + $0x10] sm:$0xf]  ;;  %v17551_v31 = vpack.c.bf16 %v2801_v42, %v2800_v48 }
 0x3b9   : > { %13588 = vmatprep.subr.bf16.mxu1 %v17512_v30  ;;  %v2466_v30 = vld [vmem:[#allocation3 + $0xec8] sm:$0xff]  ;;  %20490 = vst [vmem:[#allocation264_spill] sm:$0xff] %v17546_v33  ;;  %20492 = vst [vmem:[#allocation266_spill] sm:$0xff] %v17554_v61  ;;  %v2467_v7 = vld [vmem:[#allocation3 + $0xed0] sm:$0xff] }
 0x3ba   : > { %20491 = vst [vmem:[#allocation265_spill] sm:$0xff] %v17551_v31  ;;  %v17558_v5 = vpack.c.bf16 %v2468_v22, %v2466_v30  ;;  %v2819_v1 = vld [vmem:[#allocation8 + $0xc8] sm:$0xff]  ;;  %8177 = vperm.xlu0 %15851, %v11501_v38   ;;  %v11503_v47 = vld [vmem:[%s19494_s15 + $0x18] sm:$0xf]  ;;  %v17569_v22 = vpack.c.bf16 %v2467_v7, %v2465_v12  ;;  %v2469_v30 = vld [vmem:[#allocation3 + $0xee0] sm:$0xff] }
 0x3bb   : > { %13714 = vmatpush3.bf16.msra.mxu0 %v17536_v29  ;;  %v2802_v29 = vld [vmem:[#allocation8 + $0x40] sm:$0xff]  ;;  %v17561_v48 = vpack.c.bf16 %v2819_v1, %v2818_v15  ;;  %v2803_v24 = vld [vmem:[#allocation8 + $0x48] sm:$0xff]  ;;  %v2820_v15 = vld [vmem:[#allocation8 + $0xd0] sm:$0xff] }
 0x3bc   : > { %13590 = vmatpush1.bf16.msra.mxu1 %v17524_v4  ;;  %13716 = vmatprep.subr.bf16.mxu0 %v17546_v33  ;;  %20493 = vst [vmem:[#allocation267_spill] sm:$0xff] %v17558_v5  ;;  %v2472_v4 = vld [vmem:[#allocation3 + $0xef8] sm:$0xff]  ;;  %v17566_v42 = vpack.c.bf16 %v2803_v24, %v2802_v29  ;;  %20496 = vst [vmem:[#allocation270_spill] sm:$0xff] %v17569_v22  ;;  %v2471_v33 = vld [vmem:[#allocation3 + $0xef0] sm:$0xff] }
 0x3bd   : > { %13592 = vmatprep.subr.bf16.mxu1 %v17528_v3  ;;  %v2470_v3 = vld [vmem:[#allocation3 + $0xee8] sm:$0xff]  ;;  %20494 = vst [vmem:[#allocation268_spill] sm:$0xff] %v17561_v48  ;;  %v2821_v1 = vld [vmem:[#allocation8 + $0xd8] sm:$0xff] }
 0x3be   : > { %20495 = vst [vmem:[#allocation269_spill] sm:$0xff] %v17566_v42  ;;  %v17573_v38 = vpack.c.bf16 %v2472_v4, %v2470_v3  ;;  %8341 = vperm.xlu0 %15851, %v11503_v47   ;;  %v17576_v29 = vpack.c.bf16 %v2821_v1, %v2820_v15  ;;  %v2805_v7 = vld [vmem:[#allocation8 + $0x58] sm:$0xff]  ;;  %v17584_v4 = vpack.c.bf16 %v2471_v33, %v2469_v30  ;;  %v2473_v3 = vld [vmem:[#allocation3 + $0xf00] sm:$0xff]  ;;  %v2823_v1 = vld [vmem:[#allocation8 + $0xe8] sm:$0xff] }
 0x3bf   : > { %13718 = vmatpush3.bf16.msra.mxu0 %v17551_v31  ;;  %v2804_v31 = vld [vmem:[#allocation8 + $0x50] sm:$0xff]  ;;  %v11505_v12 = vld [vmem:[%s19494_s15 + $0x20] sm:$0xf]  ;;  %v2807_v33 = vld [vmem:[#allocation8 + $0x68] sm:$0xff] }
 0x3c0   : > { %13594 = vmatpush1.bf16.msra.mxu1 %v17539_v6  ;;  %13720 = vmatprep.subr.bf16.mxu0 %v17561_v48  ;;  %20497 = vst [vmem:[#allocation271_spill] sm:$0xff] %v17573_v38  ;;  %v2476_v6 = vld [vmem:[#allocation3 + $0xf18] sm:$0xff]  ;;  %20498 = vst [vmem:[#allocation272_spill] sm:$0xff] %v17576_v29  ;;  %v17581_v24 = vpack.c.bf16 %v2805_v7, %v2804_v31  ;;  %v2475_v48 = vld [vmem:[#allocation3 + $0xf10] sm:$0xff] }
 0x3c1   : > { %13596 = vmatprep.subr.bf16.mxu1 %v17543_v2  ;;  %v2474_v2 = vld [vmem:[#allocation3 + $0xf08] sm:$0xff]  ;;  %20500 = vst [vmem:[#allocation274_spill] sm:$0xff] %v17584_v4  ;;  %v2822_v15 = vld [vmem:[#allocation8 + $0xe0] sm:$0xff]  ;;  %v3772_v19 = vld [vmem:[#allocation6 + $0xf8] sm:$0xff] }
 0x3c2   : > { %20499 = vst [vmem:[#allocation273_spill] sm:$0xff] %v17581_v24  ;;  %v17588_v47 = vpack.c.bf16 %v2476_v6, %v2474_v2  ;;  %8505 = vperm.xlu0 %15851, %v11505_v12   ;;  %v17591_v31 = vpack.c.bf16 %v2823_v1, %v2822_v15  ;;  %v8868_v30 = vld [vmem:[%s19497_s18] sm:$0xff]  ;;  %v17599_v6 = vpack.c.bf16 %v2475_v48, %v2473_v3  ;;  %v2479_v15 = vld [vmem:[#allocation3 + $0xf30] sm:$0xff]  ;;  %v2482_v1 = vld [vmem:[#allocation3 + $0xf48] sm:$0xff] }
 0x3c3   : > { %13722 = vmatpush3.bf16.msra.mxu0 %v17566_v42  ;;  %v2806_v42 = vld [vmem:[#allocation8 + $0x60] sm:$0xff] }
 0x3c4   : > { %13598 = vmatpush1.bf16.msra.mxu1 %v17554_v61  ;;  %13724 = vmatprep.subr.bf16.mxu0 %v17576_v29  ;;  %20501 = vst [vmem:[#allocation275_spill] sm:$0xff] %v17588_v47  ;;  %v2480_v61 = vld [vmem:[#allocation3 + $0xf38] sm:$0xff]  ;;  %20502 = vst [vmem:[#allocation276_spill] sm:$0xff] %v17591_v31  ;;  %v17596_v7 = vpack.c.bf16 %v2807_v33, %v2806_v42  ;;  %v2477_v12 = vld [vmem:[#allocation3 + $0xf20] sm:$0xff] }
 0x3c5   : > { %13600 = vmatprep.subr.bf16.mxu1 %v17558_v5  ;;  %v2478_v5 = vld [vmem:[#allocation3 + $0xf28] sm:$0xff]  ;;  %20504 = vst [vmem:[#allocation278_spill] sm:$0xff] %v17599_v6  ;;  %v17607_v42 = vpack.c.bf16 %v2479_v15, %v2477_v12  ;;  %v2481_v3 = vld [vmem:[#allocation3 + $0xf40] sm:$0xff]  ;;  %v2483_v33 = vld [vmem:[#allocation3 + $0xf50] sm:$0xff] }
 0x3c6   : > { %20503 = vst [vmem:[#allocation277_spill] sm:$0xff] %v17596_v7  ;;  %v17603_v2 = vpack.c.bf16 %v2480_v61, %v2478_v5  ;;  %8871 = vperm.xlu0 %15851, %v8868_v30   ;;  %v2488_v61 = vld [vmem:[#allocation3 + $0xf78] sm:$0xff]  ;;  %v17613_v5 = vpack.c.bf16 %v2483_v33, %v2481_v3  ;;  %v2487_v29 = vld [vmem:[#allocation3 + $0xf70] sm:$0xff]  ;;  %v2490_v12 = vld [vmem:[#allocation3 + $0xf88] sm:$0xff] }
 0x3c7   : > { %13726 = vmatpush3.bf16.msra.mxu0 %v17581_v24  ;;  %v2484_v24 = vld [vmem:[#allocation3 + $0xf58] sm:$0xff]  ;;  %20506 = vst [vmem:[#allocation280_spill] sm:$0xff] %v17607_v42  ;;  %v2494_v3 = vld [vmem:[#allocation3 + $0xfa8] sm:$0xff] }
 0x3c8   : > { %13602 = vmatpush1.bf16.msra.mxu1 %v17569_v22  ;;  %13728 = vmatprep.subr.bf16.mxu0 %v17591_v31  ;;  %20505 = vst [vmem:[#allocation279_spill] sm:$0xff] %v17603_v2  ;;  %v17610_v48 = vpack.c.bf16 %v2484_v24, %v2482_v1  ;;  %v2486_v31 = vld [vmem:[#allocation3 + $0xf68] sm:$0xff]  ;;  %20508 = vst [vmem:[#allocation282_spill] sm:$0xff] %v17613_v5  ;;  %v2492_v15 = vld [vmem:[#allocation3 + $0xf98] sm:$0xff] }
 0x3c9   : > { %13604 = vmatprep.subr.bf16.mxu1 %v17573_v38  ;;  %v17616_v30 = vpack.c.bf16 %v2488_v61, %v2486_v31  ;;  %v17622_v1 = vpack.c.bf16 %v2492_v15, %v2490_v12  ;;  %v2496_v33 = vld [vmem:[#allocation3 + $0xfb8] sm:$0xff] }
 0x3ca   : > { %20507 = vst [vmem:[#allocation281_spill] sm:$0xff] %v17610_v48  ;;  %v17628_v61 = vpack.c.bf16 %v2496_v33, %v2494_v3 }
 0x3cb   : > { %13730 = vmatpush3.bf16.msra.mxu0 %v17596_v7  ;;  %20509 = vst [vmem:[#allocation283_spill] sm:$0xff] %v17616_v30  ;;  %v2485_v7 = vld [vmem:[#allocation3 + $0xf60] sm:$0xff]  ;;  %20511 = vst [vmem:[#allocation285_spill] sm:$0xff] %v17622_v1 }
 0x3cc   : > { %13606 = vmatpush1.bf16.msra.mxu1 %v17584_v4  ;;  %v17619_v24 = vpack.c.bf16 %v2487_v29, %v2485_v7  ;;  %20513 = vst [vmem:[#allocation287_spill] sm:$0xff] %v17628_v61  ;;  %v2498_v29 = vld [vmem:[#allocation3 + $0xfc8] sm:$0xff]  ;;  %v2500_v7 = vld [vmem:[#allocation3 + $0xfd8] sm:$0xff] }
 0x3cd   : > { %13608 = vmatprep.subr.bf16.mxu1 %v17588_v47  ;;  %v17634_v15 = vpack.c.bf16 %v2500_v7, %v2498_v29  ;;  %v3614_v47 = vld [vmem:[#allocation6 + $0xb8] sm:$0xff] }
 0x3ce   : > { %20510 = vst [vmem:[#allocation284_spill] sm:$0xff] %v17619_v24 }
 0x3cf   : > { %20515 = vst [vmem:[#allocation289_spill] sm:$0xff] %v17634_v15 }
 0x3d0   : > { %13610 = vmatpush1.bf16.msra.mxu1 %v17599_v6 }
 0x3d1   : > { %13612 = vmatprep.subr.bf16.mxu1 %v17603_v2  ;;  %v2489_v2 = vld [vmem:[#allocation3 + $0xf80] sm:$0xff] }
 0x3d4   : > { %13614 = vmatpush1.bf16.msra.mxu1 %v17607_v42  ;;  %v2491_v42 = vld [vmem:[#allocation3 + $0xf90] sm:$0xff] }
 0x3d5   : > { %13616 = vmatprep.subr.bf16.mxu1 %v17610_v48  ;;  %v17625_v31 = vpack.c.bf16 %v2491_v42, %v2489_v2  ;;  %v2493_v48 = vld [vmem:[#allocation3 + $0xfa0] sm:$0xff]  ;;  %v2502_v2 = vld [vmem:[#allocation3 + $0xfe8] sm:$0xff]  ;;  %v2504_v42 = vld [vmem:[#allocation3 + $0xff8] sm:$0xff] }
 0x3d6   : > { %v17640_v33 = vpack.c.bf16 %v2504_v42, %v2502_v2 }
 0x3d7   : > { %20512 = vst [vmem:[#allocation286_spill] sm:$0xff] %v17625_v31 }
 0x3d8   : > { %13618 = vmatpush1.bf16.msra.mxu1 %v17613_v5  ;;  %v2495_v5 = vld [vmem:[#allocation3 + $0xfb0] sm:$0xff]  ;;  %20517 = vst [vmem:[#allocation291_spill] sm:$0xff] %v17640_v33 }
 0x3d9   : > { %13620 = vmatprep.subr.bf16.mxu1 %v17616_v30  ;;  %v17631_v12 = vpack.c.bf16 %v2495_v5, %v2493_v48  ;;  %v2497_v30 = vld [vmem:[#allocation3 + $0xfc0] sm:$0xff]  ;;  %v2656_v48 = vld [vmem:[#allocation3 + $0x1008] sm:$0xff]  ;;  %v2658_v5 = vld [vmem:[#allocation3 + $0x1018] sm:$0xff] }
 0x3da   : > { %v17646_v7 = vpack.c.bf16 %v2658_v5, %v2656_v48  ;;  %v2665_v5 = vld [vmem:[#allocation3 + $0x1050] sm:$0xff] }
 0x3db   : > { %20514 = vst [vmem:[#allocation288_spill] sm:$0xff] %v17631_v12 }
 0x3dc   : > { %13622 = vmatpush1.bf16.msra.mxu1 %v17619_v24  ;;  %v2499_v24 = vld [vmem:[#allocation3 + $0xfd0] sm:$0xff]  ;;  %20519 = vst [vmem:[#allocation293_spill] sm:$0xff] %v17646_v7 }
 0x3dd   : > { %13624 = vmatprep.subr.bf16.mxu1 %v17622_v1  ;;  %v17637_v3 = vpack.c.bf16 %v2499_v24, %v2497_v30  ;;  %v2501_v1 = vld [vmem:[#allocation3 + $0xfe0] sm:$0xff]  ;;  %v2660_v30 = vld [vmem:[#allocation3 + $0x1028] sm:$0xff]  ;;  %v2662_v24 = vld [vmem:[#allocation3 + $0x1038] sm:$0xff] }
 0x3de   : > { %v17652_v42 = vpack.c.bf16 %v2662_v24, %v2660_v30  ;;  %v2668_v30 = vld [vmem:[#allocation3 + $0x1068] sm:$0xff]  ;;  %v2670_v24 = vld [vmem:[#allocation3 + $0x1078] sm:$0xff] }
 0x3df   : > { %20516 = vst [vmem:[#allocation290_spill] sm:$0xff] %v17637_v3 }
 0x3e0   : > { %13626 = vmatpush1.bf16.msra.mxu1 %v17625_v31  ;;  %v2503_v31 = vld [vmem:[#allocation3 + $0xff0] sm:$0xff]  ;;  %20521 = vst [vmem:[#allocation295_spill] sm:$0xff] %v17652_v42 }
 0x3e1   : > { %13628 = vmatprep.subr.bf16.mxu1 %v17628_v61  ;;  %v17643_v29 = vpack.c.bf16 %v2503_v31, %v2501_v1  ;;  %v2655_v61 = vld [vmem:[#allocation3 + $0x1000] sm:$0xff]  ;;  %v2664_v1 = vld [vmem:[#allocation3 + $0x1048] sm:$0xff]  ;;  %v2666_v31 = vld [vmem:[#allocation3 + $0x1058] sm:$0xff] }
 0x3e3   : > { %20518 = vst [vmem:[#allocation292_spill] sm:$0xff] %v17643_v29 }
 0x3e4   : > { %13630 = vmatpush1.bf16.msra.mxu1 %v17631_v12  ;;  %v2657_v12 = vld [vmem:[#allocation3 + $0x1010] sm:$0xff] }
 0x3e5   : > { %13632 = vmatprep.subr.bf16.mxu1 %v17634_v15  ;;  %v17649_v2 = vpack.c.bf16 %v2657_v12, %v2655_v61  ;;  %v2659_v15 = vld [vmem:[#allocation3 + $0x1020] sm:$0xff]  ;;  %v17660_v61 = vpack.c.bf16 %v2666_v31, %v2664_v1 }
 0x3e6   : > { %v2663_v12 = vld [vmem:[#allocation3 + $0x1040] sm:$0xff] }
 0x3e7   : > { %20520 = vst [vmem:[#allocation294_spill] sm:$0xff] %v17649_v2  ;;  %20523 = vst [vmem:[#allocation297_spill] sm:$0xff] %v17660_v61 }
 0x3e8   : > { %13634 = vmatpush1.bf16.msra.mxu1 %v17637_v3  ;;  %v2661_v3 = vld [vmem:[#allocation3 + $0x1030] sm:$0xff] }
 0x3e9   : > { %13636 = vmatprep.subr.bf16.mxu1 %v17640_v33  ;;  %v17656_v48 = vpack.c.bf16 %v2661_v3, %v2659_v15  ;;  %v2667_v15 = vld [vmem:[#allocation3 + $0x1060] sm:$0xff]  ;;  %v2669_v3 = vld [vmem:[#allocation3 + $0x1070] sm:$0xff] }
 0x3ea   : > { %v17669_v1 = vpack.c.bf16 %v2669_v3, %v2667_v15  ;;  %v2680_v15 = vld [vmem:[#allocation3 + $0x10c8] sm:$0xff]  ;;  %v2682_v3 = vld [vmem:[#allocation3 + $0x10d8] sm:$0xff]  ;;  %v3215_v33 = vld [vmem:[#allocation14] sm:$0xf] }
 0x3eb   : > { %20522 = vst [vmem:[#allocation296_spill] sm:$0xff] %v17656_v48 }
 0x3ec   : > { %13638 = vmatpush1.bf16.msra.mxu1 %v17643_v29  ;;  %20526 = vst [vmem:[#allocation300_spill] sm:$0xff] %v17669_v1  ;;  %v2904_v29 = vld [vmem:[#allocation8 + $0x138] sm:$0xff] }
 0x3ed   : > { %13640 = vmatprep.subr.bf16.mxu1 %v17646_v7  ;;  %v17663_v7 = vpack.c.bf16 %v2665_v5, %v2663_v12  ;;  %v2676_v12 = vld [vmem:[#allocation3 + $0x10a8] sm:$0xff]  ;;  %v2678_v5 = vld [vmem:[#allocation3 + $0x10b8] sm:$0xff] }
 0x3ef   : > { %2570 = vmatmul.mubr.f32.vlgmr.msra.gmra.mrb[2].mxu1 %v17381_v60  ;;  %20524 = vst [vmem:[#allocation298_spill] sm:$0xff] %v17663_v7  ;;  %v17666_v60 = vpack.c.bf16 %v2670_v24, %v2668_v30  ;;  %v17678_v24 = vpack.c.bf16 %v2678_v5, %v2676_v12 }
 0x3f0   : > { %13642 = vmatpush1.bf16.msra.mxu1 %v17649_v2  ;;  %2783 = vmatprep.mubr.f32.mxu1 %v17485_v49  ;;  %v2672_v2 = vld [vmem:[#allocation3 + $0x1088] sm:$0xff]  ;;  %v2674_v49 = vld [vmem:[#allocation3 + $0x1098] sm:$0xff] }
 0x3f1   : > { %13644 = vmatprep.subr.bf16.mxu1 %v17652_v42  ;;  %20525 = vst [vmem:[#allocation299_spill] sm:$0xff] %v17666_v60  ;;  %v17672_v31 = vpack.c.bf16 %v2674_v49, %v2672_v2  ;;  %v2671_v42 = vld [vmem:[#allocation3 + $0x1080] sm:$0xff]  ;;  %20529 = vst [vmem:[#allocation303_spill] sm:$0xff] %v17678_v24  ;;  %v17684_v49 = vpack.c.bf16 %v2682_v3, %v2680_v15 }
 0x3f3   : > { %20527 = vst [vmem:[#allocation301_spill] sm:$0xff] %v17672_v31  ;;  %20531 = vst [vmem:[#allocation305_spill] sm:$0xff] %v17684_v49 }
 0x3f4   : > { %13646 = vmatpush1.bf16.msra.mxu1 %v17656_v48  ;;  %v2673_v48 = vld [vmem:[#allocation3 + $0x1090] sm:$0xff] }
 0x3f5   : > { %13648 = vmatprep.subr.bf16.mxu1 %v17660_v61  ;;  %v17675_v30 = vpack.c.bf16 %v2673_v48, %v2671_v42  ;;  %v2675_v61 = vld [vmem:[#allocation3 + $0x10a0] sm:$0xff]  ;;  %v2684_v42 = vld [vmem:[#allocation3 + $0x10e8] sm:$0xff]  ;;  %v2686_v48 = vld [vmem:[#allocation3 + $0x10f8] sm:$0xff] }
 0x3f6   : > { %v17690_v5 = vpack.c.bf16 %v2686_v48, %v2684_v42 }
 0x3f7   : > { %20528 = vst [vmem:[#allocation302_spill] sm:$0xff] %v17675_v30 }
 0x3f8   : > { %13650 = vmatpush1.bf16.msra.mxu1 %v17663_v7  ;;  %v2677_v7 = vld [vmem:[#allocation3 + $0x10b0] sm:$0xff]  ;;  %20533 = vst [vmem:[#allocation307_spill] sm:$0xff] %v17690_v5 }
 0x3f9   : > { %13652 = vmatprep.subr.bf16.mxu1 %v17666_v60  ;;  %v17681_v2 = vpack.c.bf16 %v2677_v7, %v2675_v61  ;;  %v2679_v60 = vld [vmem:[#allocation3 + $0x10c0] sm:$0xff]  ;;  %v2688_v7 = vld [vmem:[#allocation3 + $0x1108] sm:$0xff]  ;;  %v2690_v61 = vld [vmem:[#allocation3 + $0x1118] sm:$0xff] }
 0x3fa   : > { %v17696_v3 = vpack.c.bf16 %v2690_v61, %v2688_v7 }
 0x3fb   : > { %20530 = vst [vmem:[#allocation304_spill] sm:$0xff] %v17681_v2 }
 0x3fc   : > { %13654 = vmatpush1.bf16.msra.mxu1 %v17669_v1  ;;  %v2681_v1 = vld [vmem:[#allocation3 + $0x10d0] sm:$0xff]  ;;  %20535 = vst [vmem:[#allocation309_spill] sm:$0xff] %v17696_v3 }
 0x3fd   : > { %13656 = vmatprep.subr.bf16.mxu1 %v17672_v31  ;;  %v17687_v12 = vpack.c.bf16 %v2681_v1, %v2679_v60  ;;  %v2683_v31 = vld [vmem:[#allocation3 + $0x10e0] sm:$0xff]  ;;  %v2692_v60 = vld [vmem:[#allocation3 + $0x1128] sm:$0xff]  ;;  %v2694_v1 = vld [vmem:[#allocation3 + $0x1138] sm:$0xff] }
 0x3fe   : > { %v17702_v48 = vpack.c.bf16 %v2694_v1, %v2692_v60 }
 0x3ff   : > { %20532 = vst [vmem:[#allocation306_spill] sm:$0xff] %v17687_v12 }
 0x400   : > { %13658 = vmatpush1.bf16.msra.mxu1 %v17675_v30  ;;  %v2685_v30 = vld [vmem:[#allocation3 + $0x10f0] sm:$0xff]  ;;  %20537 = vst [vmem:[#allocation311_spill] sm:$0xff] %v17702_v48 }
 0x401   : > { %13660 = vmatprep.subr.bf16.mxu1 %v17678_v24  ;;  %v17693_v15 = vpack.c.bf16 %v2685_v30, %v2683_v31  ;;  %v2687_v24 = vld [vmem:[#allocation3 + $0x1100] sm:$0xff]  ;;  %v2696_v31 = vld [vmem:[#allocation3 + $0x1148] sm:$0xff]  ;;  %v2698_v30 = vld [vmem:[#allocation3 + $0x1158] sm:$0xff] }
 0x402   : > { %v17708_v61 = vpack.c.bf16 %v2698_v30, %v2696_v31 }
 0x403   : > { %20534 = vst [vmem:[#allocation308_spill] sm:$0xff] %v17693_v15 }
 0x404   : > { %13662 = vmatpush1.bf16.msra.mxu1 %v17681_v2  ;;  %v2689_v2 = vld [vmem:[#allocation3 + $0x1110] sm:$0xff]  ;;  %20539 = vst [vmem:[#allocation313_spill] sm:$0xff] %v17708_v61 }
 0x405   : > { %13664 = vmatprep.subr.bf16.mxu1 %v17684_v49  ;;  %v17699_v42 = vpack.c.bf16 %v2689_v2, %v2687_v24  ;;  %v2691_v49 = vld [vmem:[#allocation3 + $0x1120] sm:$0xff]  ;;  %v2700_v24 = vld [vmem:[#allocation3 + $0x1168] sm:$0xff]  ;;  %v2702_v2 = vld [vmem:[#allocation3 + $0x1178] sm:$0xff] }
 0x406   : > { %v17714_v1 = vpack.c.bf16 %v2702_v2, %v2700_v24 }
 0x407   : > { %20536 = vst [vmem:[#allocation310_spill] sm:$0xff] %v17699_v42 }
 0x408   : > { %13666 = vmatpush1.bf16.msra.mxu1 %v17687_v12  ;;  %v2693_v12 = vld [vmem:[#allocation3 + $0x1130] sm:$0xff]  ;;  %20541 = vst [vmem:[#allocation315_spill] sm:$0xff] %v17714_v1 }
 0x409   : > { %13668 = vmatprep.subr.bf16.mxu1 %v17690_v5  ;;  %v17705_v7 = vpack.c.bf16 %v2693_v12, %v2691_v49  ;;  %v2695_v5 = vld [vmem:[#allocation3 + $0x1140] sm:$0xff]  ;;  %v2704_v49 = vld [vmem:[#allocation3 + $0x1188] sm:$0xff]  ;;  %v2706_v12 = vld [vmem:[#allocation3 + $0x1198] sm:$0xff] }
 0x40a   : > { %v17720_v30 = vpack.c.bf16 %v2706_v12, %v2704_v49 }
 0x40b   : > { %20538 = vst [vmem:[#allocation312_spill] sm:$0xff] %v17705_v7 }
 0x40c   : > { %13670 = vmatpush1.bf16.msra.mxu1 %v17693_v15  ;;  %v2697_v15 = vld [vmem:[#allocation3 + $0x1150] sm:$0xff]  ;;  %20543 = vst [vmem:[#allocation317_spill] sm:$0xff] %v17720_v30 }
 0x40d   : > { %13672 = vmatprep.subr.bf16.mxu1 %v17696_v3  ;;  %v17711_v60 = vpack.c.bf16 %v2697_v15, %v2695_v5  ;;  %v2699_v3 = vld [vmem:[#allocation3 + $0x1160] sm:$0xff]  ;;  %v2708_v5 = vld [vmem:[#allocation3 + $0x11a8] sm:$0xff]  ;;  %v2710_v15 = vld [vmem:[#allocation3 + $0x11b8] sm:$0xff] }
 0x40e   : > { %v17726_v2 = vpack.c.bf16 %v2710_v15, %v2708_v5 }
 0x40f   : > { %20540 = vst [vmem:[#allocation314_spill] sm:$0xff] %v17711_v60 }
 0x410   : > { %13674 = vmatpush1.bf16.msra.mxu1 %v17699_v42  ;;  %v2701_v42 = vld [vmem:[#allocation3 + $0x1170] sm:$0xff]  ;;  %20545 = vst [vmem:[#allocation319_spill] sm:$0xff] %v17726_v2 }
 0x411   : > { %13676 = vmatprep.subr.bf16.mxu1 %v17702_v48  ;;  %v17717_v31 = vpack.c.bf16 %v2701_v42, %v2699_v3  ;;  %v2703_v48 = vld [vmem:[#allocation3 + $0x1180] sm:$0xff]  ;;  %v2712_v3 = vld [vmem:[#allocation3 + $0x11c8] sm:$0xff]  ;;  %v2714_v42 = vld [vmem:[#allocation3 + $0x11d8] sm:$0xff] }
 0x412   : > { %v17732_v12 = vpack.c.bf16 %v2714_v42, %v2712_v3  ;;  %v2808_v3 = vld [vmem:[#allocation8 + $0x70] sm:$0xff]  ;;  %v2809_v42 = vld [vmem:[#allocation8 + $0x78] sm:$0xff] }
 0x413   : > { %20542 = vst [vmem:[#allocation316_spill] sm:$0xff] %v17717_v31 }
 0x414   : > { %13678 = vmatpush1.bf16.msra.mxu1 %v17705_v7  ;;  %v2705_v7 = vld [vmem:[#allocation3 + $0x1190] sm:$0xff]  ;;  %20547 = vst [vmem:[#allocation321_spill] sm:$0xff] %v17732_v12 }
 0x415   : > { %13680 = vmatprep.subr.bf16.mxu1 %v17708_v61  ;;  %v17723_v24 = vpack.c.bf16 %v2705_v7, %v2703_v48  ;;  %v2707_v61 = vld [vmem:[#allocation3 + $0x11a0] sm:$0xff]  ;;  %v2716_v48 = vld [vmem:[#allocation3 + $0x11e8] sm:$0xff]  ;;  %v2718_v7 = vld [vmem:[#allocation3 + $0x11f8] sm:$0xff] }
 0x416   : > { %v17738_v15 = vpack.c.bf16 %v2718_v7, %v2716_v48  ;;  %v17749_v48 = vpack.c.bf16 %v2809_v42, %v2808_v3  ;;  %v2916_v3 = vld [vmem:[#allocation8 + $0x198] sm:$0xff] }
 0x417   : > { %20544 = vst [vmem:[#allocation318_spill] sm:$0xff] %v17723_v24 }
 0x418   : > { %13682 = vmatpush1.bf16.msra.mxu1 %v17711_v60  ;;  %v2709_v60 = vld [vmem:[#allocation3 + $0x11b0] sm:$0xff]  ;;  %20549 = vst [vmem:[#allocation323_spill] sm:$0xff] %v17738_v15  ;;  %20552 = vst [vmem:[#allocation326_spill] sm:$0xff] %v17749_v48 }
 0x419   : > { %13684 = vmatprep.subr.bf16.mxu1 %v17714_v1  ;;  %v17729_v49 = vpack.c.bf16 %v2709_v60, %v2707_v61  ;;  %v2711_v1 = vld [vmem:[#allocation3 + $0x11c0] sm:$0xff]  ;;  %v2824_v60 = vld [vmem:[#allocation8 + $0xf0] sm:$0xff] }
 0x41b   : > { %20546 = vst [vmem:[#allocation320_spill] sm:$0xff] %v17729_v49 }
 0x41c   : > { %13686 = vmatpush1.bf16.msra.mxu1 %v17717_v31  ;;  %v2713_v31 = vld [vmem:[#allocation3 + $0x11d0] sm:$0xff] }
 0x41d   : > { %13688 = vmatprep.subr.bf16.mxu1 %v17720_v30  ;;  %v17735_v5 = vpack.c.bf16 %v2713_v31, %v2711_v1  ;;  %v2715_v30 = vld [vmem:[#allocation3 + $0x11e0] sm:$0xff]  ;;  %v2825_v1 = vld [vmem:[#allocation8 + $0xf8] sm:$0xff] }
 0x41e   : > { %v17747_v31 = vpack.c.bf16 %v2825_v1, %v2824_v60  ;;  %v2897_v60 = vld [vmem:[#allocation8 + $0x100] sm:$0xff]  ;;  %v2898_v1 = vld [vmem:[#allocation8 + $0x108] sm:$0xff] }
 0x41f   : > { %20548 = vst [vmem:[#allocation322_spill] sm:$0xff] %v17735_v5 }
 0x420   : > { %13690 = vmatpush1.bf16.msra.mxu1 %v17723_v24  ;;  %v2717_v24 = vld [vmem:[#allocation3 + $0x11f0] sm:$0xff]  ;;  %20551 = vst [vmem:[#allocation325_spill] sm:$0xff] %v17747_v31  ;;  %13732 = vmatprep.subr.bf16.mxu0 %v17747_v31  ;;  %v17758_v31 = vpack.c.bf16 %v2898_v1, %v2897_v60  ;;  %v2920_v60 = vld [vmem:[#allocation8 + $0x1b8] sm:$0xff] }
 0x421   : > { %13692 = vmatprep.subr.bf16.mxu1 %v17726_v2  ;;  %v17741_v61 = vpack.c.bf16 %v2717_v24, %v2715_v30  ;;  %13734 = vmatpush3.bf16.msra.mxu0 %v17749_v48  ;;  %v2913_v30 = vld [vmem:[#allocation8 + $0x180] sm:$0xff]  ;;  %v2914_v24 = vld [vmem:[#allocation8 + $0x188] sm:$0xff] }
 0x422   : > { %v17753_v7 = vpack.c.bf16 %v2914_v24, %v2913_v30  ;;  %20554 = vst [vmem:[#allocation328_spill] sm:$0xff] %v17758_v31  ;;  %v2899_v30 = vld [vmem:[#allocation8 + $0x110] sm:$0xff]  ;;  %v2900_v24 = vld [vmem:[#allocation8 + $0x118] sm:$0xff] }
 0x423   : > { %20550 = vst [vmem:[#allocation324_spill] sm:$0xff] %v17741_v61 }
 0x424   : > { %13694 = vmatpush1.bf16.msra.mxu1 %v17729_v49  ;;  %20553 = vst [vmem:[#allocation327_spill] sm:$0xff] %v17753_v7  ;;  %13736 = vmatprep.subr.bf16.mxu0 %v17753_v7  ;;  %v2915_v49 = vld [vmem:[#allocation8 + $0x190] sm:$0xff]  ;;  %v2917_v7 = vld [vmem:[#allocation8 + $0x1a0] sm:$0xff] }
 0x425   : > { %13696 = vmatprep.subr.bf16.mxu1 %v17732_v12  ;;  %v17762_v2 = vpack.c.bf16 %v2916_v3, %v2915_v49  ;;  %v2901_v49 = vld [vmem:[#allocation8 + $0x120] sm:$0xff] }
 0x427   : > { %20555 = vst [vmem:[#allocation329_spill] sm:$0xff] %v17762_v2 }
 0x428   : > { %13698 = vmatpush1.bf16.msra.mxu1 %v17735_v5 }
 0x429   : > { %13700 = vmatprep.subr.bf16.mxu1 %v17738_v15 }
 0x42c   : > { %13702 = vmatpush1.bf16.msra.mxu1 %v17741_v61 }
 0x42f   : > { %2784 = vmatmul.mubr.f32.vlgmr.msra.gmra.mrb[2].mxu1 %v17480_v10  ;;  %v857_v10 = vpop.permute.xlu0 %856 }
 0x430   : > { %6471 = vmatprep.mubr.f32.mxu1 %v20305_v50 }
 0x502   : > { %v2785_v61 = vpop.f32.mrb[2].mxu1 }
 0x503   : > { %v15580_v15 = vadd.f32 %v2785_v61, %v857_v10  ;;  %v2787_v5 = vpop.f32.mrb[3].mxu1  ;;  %v2918_v61 = vld [vmem:[#allocation8 + $0x1a8] sm:$0xff] }
 0x504   : > { %v15581_v12 = vadd.f32 %v2787_v5, %v857_v10  ;;  %v17771_v5 = vpack.c.bf16 %v2918_v61, %v2917_v7  ;;  %v2919_v10 = vld [vmem:[#allocation8 + $0x1b0] sm:$0xff] }
 0x505   : > { %v17760_v48 = vmax.f32 %v15580_v15, 0.0  ;;  %v2902_v15 = vld [vmem:[#allocation8 + $0x128] sm:$0xff]  ;;  %v17777_v3 = vpack.c.bf16 %v2920_v60, %v2919_v10 }
 0x506   : > { %v17756_v42 = vmax.f32 %v15581_v12, 0.0  ;;  %v17768_v12 = vpack.c.bf16 %v2900_v24, %v2899_v30  ;;  %20557 = vst [vmem:[#allocation331_spill] sm:$0xff] %v17771_v5  ;;  %v17774_v1 = vpack.c.bf16 %v2902_v15, %v2901_v49  ;;  %v2921_v30 = vld [vmem:[#allocation8 + $0x1c0] sm:$0xff]  ;;  %v2922_v24 = vld [vmem:[#allocation8 + $0x1c8] sm:$0xff]  ;;  %v2923_v49 = vld [vmem:[#allocation8 + $0x1d0] sm:$0xff] }
 0x507   : > { %20559 = vst [vmem:[#allocation333_spill] sm:$0xff] %v17777_v3  ;;  %v17783_v61 = vpack.c.bf16 %v2922_v24, %v2921_v30  ;;  %v2924_v15 = vld [vmem:[#allocation8 + $0x1d8] sm:$0xff] }
 0x508   : > { %2890 = vmatprep.mubr.f32.mxu0 %v17756_v42  ;;  %20556 = vst [vmem:[#allocation330_spill] sm:$0xff] %v17768_v12  ;;  %20558 = vst [vmem:[#allocation332_spill] sm:$0xff] %v17774_v1  ;;  %v17789_v60 = vpack.c.bf16 %v2924_v15, %v2923_v49 }
 0x509   : > { %2891 = vmatmul.mubr.f32.vlgmr.msra.gmra.mrb[16].mxu0 %v17760_v48  ;;  %20561 = vst [vmem:[#allocation335_spill] sm:$0xff] %v17783_v61 }
 0x50a   : > { %13738 = vmatpush3.bf16.msra.mxu0 %v17758_v31  ;;  %2993 = vmatprep.mubr.f32.mxu0 %v17756_v42  ;;  %v2903_v31 = vld [vmem:[#allocation8 + $0x130] sm:$0xff]  ;;  %20563 = vst [vmem:[#allocation337_spill] sm:$0xff] %v17789_v60 }
 0x50b   : > { %13740 = vmatprep.subr.bf16.mxu0 %v17762_v2  ;;  %v17780_v7 = vpack.c.bf16 %v2904_v29, %v2903_v31  ;;  %v2905_v2 = vld [vmem:[#allocation8 + $0x140] sm:$0xff]  ;;  %v2926_v31 = vld [vmem:[#allocation8 + $0x1e8] sm:$0xff] }
 0x50c   : > { %v2925_v29 = vld [vmem:[#allocation8 + $0x1e0] sm:$0xff] }
 0x50d   : > { %20560 = vst [vmem:[#allocation334_spill] sm:$0xff] %v17780_v7  ;;  %v17795_v24 = vpack.c.bf16 %v2926_v31, %v2925_v29 }
 0x50e   : > { %13742 = vmatpush3.bf16.msra.mxu0 %v17768_v12  ;;  %v2906_v12 = vld [vmem:[#allocation8 + $0x148] sm:$0xff] }
 0x50f   : > { %13744 = vmatprep.subr.bf16.mxu0 %v17771_v5  ;;  %v17786_v10 = vpack.c.bf16 %v2906_v12, %v2905_v2  ;;  %v2907_v5 = vld [vmem:[#allocation8 + $0x150] sm:$0xff]  ;;  %20565 = vst [vmem:[#allocation339_spill] sm:$0xff] %v17795_v24  ;;  %v2928_v12 = vld [vmem:[#allocation8 + $0x1f8] sm:$0xff] }
 0x510   : > { %v2927_v2 = vld [vmem:[#allocation8 + $0x1f0] sm:$0xff] }
 0x511   : > { %20562 = vst [vmem:[#allocation336_spill] sm:$0xff] %v17786_v10  ;;  %v17801_v15 = vpack.c.bf16 %v2928_v12, %v2927_v2 }
 0x512   : > { %13746 = vmatpush3.bf16.msra.mxu0 %v17774_v1  ;;  %v2908_v1 = vld [vmem:[#allocation8 + $0x158] sm:$0xff] }
 0x513   : > { %13748 = vmatprep.subr.bf16.mxu0 %v17777_v3  ;;  %v17792_v30 = vpack.c.bf16 %v2908_v1, %v2907_v5  ;;  %v2909_v3 = vld [vmem:[#allocation8 + $0x160] sm:$0xff]  ;;  %20567 = vst [vmem:[#allocation341_spill] sm:$0xff] %v17801_v15  ;;  %v3017_v1 = vld [vmem:[#allocation8 + $0x288] sm:$0xff] }
 0x514   : > { %v3016_v5 = vld [vmem:[#allocation8 + $0x280] sm:$0xff] }
 0x515   : > { %20564 = vst [vmem:[#allocation338_spill] sm:$0xff] %v17792_v30  ;;  %v17807_v31 = vpack.c.bf16 %v3017_v1, %v3016_v5  ;;  %v3005_v1 = vld [vmem:[#allocation8 + $0x228] sm:$0xff] }
 0x516   : > { %13750 = vmatpush3.bf16.msra.mxu0 %v17780_v7  ;;  %v2910_v7 = vld [vmem:[#allocation8 + $0x168] sm:$0xff] }
 0x517   : > { %13752 = vmatprep.subr.bf16.mxu0 %v17783_v61  ;;  %v17798_v49 = vpack.c.bf16 %v2910_v7, %v2909_v3  ;;  %v2911_v61 = vld [vmem:[#allocation8 + $0x170] sm:$0xff]  ;;  %20569 = vst [vmem:[#allocation343_spill] sm:$0xff] %v17807_v31  ;;  %v3019_v7 = vld [vmem:[#allocation8 + $0x298] sm:$0xff] }
 0x518   : > { %v3018_v3 = vld [vmem:[#allocation8 + $0x290] sm:$0xff] }
 0x519   : > { %20566 = vst [vmem:[#allocation340_spill] sm:$0xff] %v17798_v49  ;;  %v17813_v12 = vpack.c.bf16 %v3019_v7, %v3018_v3  ;;  %v3022_v3 = vld [vmem:[#allocation8 + $0x2b0] sm:$0xff]  ;;  %v3023_v7 = vld [vmem:[#allocation8 + $0x2b8] sm:$0xff] }
 0x51a   : > { %13754 = vmatpush3.bf16.msra.mxu0 %v17786_v10  ;;  %v2912_v10 = vld [vmem:[#allocation8 + $0x178] sm:$0xff] }
 0x51b   : > { %13756 = vmatprep.subr.bf16.mxu0 %v17789_v60  ;;  %v17804_v29 = vpack.c.bf16 %v2912_v10, %v2911_v61  ;;  %v3000_v60 = vld [vmem:[#allocation8 + $0x200] sm:$0xff]  ;;  %20571 = vst [vmem:[#allocation345_spill] sm:$0xff] %v17813_v12  ;;  %v3021_v10 = vld [vmem:[#allocation8 + $0x2a8] sm:$0xff] }
 0x51c   : > { %v3020_v61 = vld [vmem:[#allocation8 + $0x2a0] sm:$0xff] }
 0x51d   : > { %20568 = vst [vmem:[#allocation342_spill] sm:$0xff] %v17804_v29 }
 0x51e   : > { %13758 = vmatpush3.bf16.msra.mxu0 %v17792_v30  ;;  %v3001_v30 = vld [vmem:[#allocation8 + $0x208] sm:$0xff] }
 0x51f   : > { %13760 = vmatprep.subr.bf16.mxu0 %v17795_v24  ;;  %v17810_v2 = vpack.c.bf16 %v3001_v30, %v3000_v60  ;;  %v3002_v24 = vld [vmem:[#allocation8 + $0x210] sm:$0xff]  ;;  %v17821_v60 = vpack.c.bf16 %v3021_v10, %v3020_v61  ;;  %v3004_v30 = vld [vmem:[#allocation8 + $0x220] sm:$0xff] }
 0x521   : > { %20570 = vst [vmem:[#allocation344_spill] sm:$0xff] %v17810_v2  ;;  %20573 = vst [vmem:[#allocation347_spill] sm:$0xff] %v17821_v60 }
 0x522   : > { %13762 = vmatpush3.bf16.msra.mxu0 %v17798_v49  ;;  %v3003_v49 = vld [vmem:[#allocation8 + $0x218] sm:$0xff] }
 0x523   : > { %13764 = vmatprep.subr.bf16.mxu0 %v17801_v15  ;;  %v17818_v5 = vpack.c.bf16 %v3003_v49, %v3002_v24  ;;  %v17827_v15 = vpack.c.bf16 %v3023_v7, %v3022_v3  ;;  %v3024_v24 = vld [vmem:[#allocation8 + $0x2c0] sm:$0xff]  ;;  %v3025_v49 = vld [vmem:[#allocation8 + $0x2c8] sm:$0xff] }
 0x524   : > { %v17833_v10 = vpack.c.bf16 %v3025_v49, %v3024_v24 }
 0x525   : > { %20572 = vst [vmem:[#allocation346_spill] sm:$0xff] %v17818_v5  ;;  %20575 = vst [vmem:[#allocation349_spill] sm:$0xff] %v17827_v15 }
 0x526   : > { %13766 = vmatpush3.bf16.msra.mxu0 %v17804_v29  ;;  %v17824_v29 = vpack.c.bf16 %v3005_v1, %v3004_v30  ;;  %20577 = vst [vmem:[#allocation351_spill] sm:$0xff] %v17833_v10  ;;  %v3026_v30 = vld [vmem:[#allocation8 + $0x2d0] sm:$0xff]  ;;  %v3027_v1 = vld [vmem:[#allocation8 + $0x2d8] sm:$0xff] }
 0x527   : > { %13768 = vmatprep.subr.bf16.mxu0 %v17807_v31  ;;  %v3007_v31 = vld [vmem:[#allocation8 + $0x238] sm:$0xff]  ;;  %v17839_v7 = vpack.c.bf16 %v3027_v1, %v3026_v30 }
 0x528   : > { %20574 = vst [vmem:[#allocation348_spill] sm:$0xff] %v17824_v29 }
 0x529   : > { %2994 = vmatmul.mubr.f32.vlgmr.msra.gmra.mrb[18].mxu0 %v17760_v48  ;;  %20579 = vst [vmem:[#allocation353_spill] sm:$0xff] %v17839_v7 }
 0x52a   : > { %13770 = vmatpush3.bf16.msra.mxu0 %v17810_v2  ;;  %3096 = vmatprep.mubr.f32.mxu0 %v17756_v42  ;;  %v3006_v2 = vld [vmem:[#allocation8 + $0x230] sm:$0xff] }
 0x52b   : > { %13772 = vmatprep.subr.bf16.mxu0 %v17813_v12  ;;  %v17830_v61 = vpack.c.bf16 %v3007_v31, %v3006_v2  ;;  %v3008_v12 = vld [vmem:[#allocation8 + $0x240] sm:$0xff]  ;;  %v3029_v2 = vld [vmem:[#allocation8 + $0x2e8] sm:$0xff] }
 0x52c   : > { %v3028_v31 = vld [vmem:[#allocation8 + $0x2e0] sm:$0xff] }
 0x52d   : > { %20576 = vst [vmem:[#allocation350_spill] sm:$0xff] %v17830_v61  ;;  %v17845_v49 = vpack.c.bf16 %v3029_v2, %v3028_v31 }
 0x52e   : > { %13774 = vmatpush3.bf16.msra.mxu0 %v17818_v5  ;;  %v3009_v5 = vld [vmem:[#allocation8 + $0x248] sm:$0xff] }
 0x52f   : > { %13776 = vmatprep.subr.bf16.mxu0 %v17821_v60  ;;  %v17836_v3 = vpack.c.bf16 %v3009_v5, %v3008_v12  ;;  %v3010_v60 = vld [vmem:[#allocation8 + $0x250] sm:$0xff]  ;;  %20581 = vst [vmem:[#allocation355_spill] sm:$0xff] %v17845_v49  ;;  %v3031_v5 = vld [vmem:[#allocation8 + $0x2f8] sm:$0xff] }
 0x530   : > { %v3030_v12 = vld [vmem:[#allocation8 + $0x2f0] sm:$0xff] }
 0x531   : > { %20578 = vst [vmem:[#allocation352_spill] sm:$0xff] %v17836_v3  ;;  %v17851_v1 = vpack.c.bf16 %v3031_v5, %v3030_v12 }
 0x532   : > { %13778 = vmatpush3.bf16.msra.mxu0 %v17824_v29  ;;  %v3011_v29 = vld [vmem:[#allocation8 + $0x258] sm:$0xff] }
 0x533   : > { %13780 = vmatprep.subr.bf16.mxu0 %v17827_v15  ;;  %v17842_v24 = vpack.c.bf16 %v3011_v29, %v3010_v60  ;;  %v3012_v15 = vld [vmem:[#allocation8 + $0x260] sm:$0xff]  ;;  %20583 = vst [vmem:[#allocation357_spill] sm:$0xff] %v17851_v1  ;;  %v3120_v60 = vld [vmem:[#allocation8 + $0x388] sm:$0xff] }
 0x534   : > { %v3119_v29 = vld [vmem:[#allocation8 + $0x380] sm:$0xff] }
 0x535   : > { %20580 = vst [vmem:[#allocation354_spill] sm:$0xff] %v17842_v24  ;;  %v17857_v2 = vpack.c.bf16 %v3120_v60, %v3119_v29  ;;  %v3108_v60 = vld [vmem:[#allocation8 + $0x328] sm:$0xff] }
 0x536   : > { %13782 = vmatpush3.bf16.msra.mxu0 %v17830_v61  ;;  %v3013_v61 = vld [vmem:[#allocation8 + $0x268] sm:$0xff] }
 0x537   : > { %13784 = vmatprep.subr.bf16.mxu0 %v17833_v10  ;;  %v17848_v30 = vpack.c.bf16 %v3013_v61, %v3012_v15  ;;  %v3014_v10 = vld [vmem:[#allocation8 + $0x270] sm:$0xff]  ;;  %20585 = vst [vmem:[#allocation359_spill] sm:$0xff] %v17857_v2  ;;  %v3122_v61 = vld [vmem:[#allocation8 + $0x398] sm:$0xff] }
 0x538   : > { %v3121_v15 = vld [vmem:[#allocation8 + $0x390] sm:$0xff] }
 0x539   : > { %20582 = vst [vmem:[#allocation356_spill] sm:$0xff] %v17848_v30  ;;  %v17863_v5 = vpack.c.bf16 %v3122_v61, %v3121_v15  ;;  %v3125_v15 = vld [vmem:[#allocation8 + $0x3b0] sm:$0xff]  ;;  %v3126_v61 = vld [vmem:[#allocation8 + $0x3b8] sm:$0xff] }
 0x53a   : > { %13786 = vmatpush3.bf16.msra.mxu0 %v17836_v3  ;;  %v3015_v3 = vld [vmem:[#allocation8 + $0x278] sm:$0xff] }
 0x53b   : > { %13788 = vmatprep.subr.bf16.mxu0 %v17839_v7  ;;  %v17854_v31 = vpack.c.bf16 %v3015_v3, %v3014_v10  ;;  %v3103_v7 = vld [vmem:[#allocation8 + $0x300] sm:$0xff]  ;;  %20587 = vst [vmem:[#allocation361_spill] sm:$0xff] %v17863_v5  ;;  %v3124_v3 = vld [vmem:[#allocation8 + $0x3a8] sm:$0xff] }
 0x53c   : > { %v3123_v10 = vld [vmem:[#allocation8 + $0x3a0] sm:$0xff] }
 0x53d   : > { %20584 = vst [vmem:[#allocation358_spill] sm:$0xff] %v17854_v31 }
 0x53e   : > { %13790 = vmatpush3.bf16.msra.mxu0 %v17842_v24  ;;  %v3104_v24 = vld [vmem:[#allocation8 + $0x308] sm:$0xff] }
 0x53f   : > { %13792 = vmatprep.subr.bf16.mxu0 %v17845_v49  ;;  %v17860_v12 = vpack.c.bf16 %v3104_v24, %v3103_v7  ;;  %v3105_v49 = vld [vmem:[#allocation8 + $0x310] sm:$0xff]  ;;  %v17871_v7 = vpack.c.bf16 %v3124_v3, %v3123_v10  ;;  %v3107_v24 = vld [vmem:[#allocation8 + $0x320] sm:$0xff] }
 0x541   : > { %20586 = vst [vmem:[#allocation360_spill] sm:$0xff] %v17860_v12  ;;  %20589 = vst [vmem:[#allocation363_spill] sm:$0xff] %v17871_v7 }
 0x542   : > { %13794 = vmatpush3.bf16.msra.mxu0 %v17848_v30  ;;  %v3106_v30 = vld [vmem:[#allocation8 + $0x318] sm:$0xff] }
 0x543   : > { %13796 = vmatprep.subr.bf16.mxu0 %v17851_v1  ;;  %v17868_v29 = vpack.c.bf16 %v3106_v30, %v3105_v49  ;;  %v3127_v49 = vld [vmem:[#allocation8 + $0x3c0] sm:$0xff]  ;;  %v3128_v30 = vld [vmem:[#allocation8 + $0x3c8] sm:$0xff] }
 0x544   : > { %v17883_v3 = vpack.c.bf16 %v3128_v30, %v3127_v49 }
 0x545   : > { %20588 = vst [vmem:[#allocation362_spill] sm:$0xff] %v17868_v29 }
 0x546   : > { %13798 = vmatpush3.bf16.msra.mxu0 %v17854_v31  ;;  %v17877_v31 = vpack.c.bf16 %v3126_v61, %v3125_v15  ;;  %20593 = vst [vmem:[#allocation367_spill] sm:$0xff] %v17883_v3 }
 0x547   : > { %13800 = vmatprep.subr.bf16.mxu0 %v17857_v2  ;;  %v17874_v2 = vpack.c.bf16 %v3108_v60, %v3107_v24  ;;  %v3129_v24 = vld [vmem:[#allocation8 + $0x3d0] sm:$0xff]  ;;  %v3130_v60 = vld [vmem:[#allocation8 + $0x3d8] sm:$0xff] }
 0x548   : > { %20591 = vst [vmem:[#allocation365_spill] sm:$0xff] %v17877_v31  ;;  %v17889_v61 = vpack.c.bf16 %v3130_v60, %v3129_v24 }
 0x549   : > { %3097 = vmatmul.mubr.f32.vlgmr.msra.gmra.mrb[20].mxu0 %v17760_v48  ;;  %20590 = vst [vmem:[#allocation364_spill] sm:$0xff] %v17874_v2 }
 0x54a   : > { %13802 = vmatpush3.bf16.msra.mxu0 %v17860_v12  ;;  %3199 = vmatprep.mubr.f32.mxu0 %v17756_v42  ;;  %v3109_v12 = vld [vmem:[#allocation8 + $0x330] sm:$0xff]  ;;  %v3110_v42 = vld [vmem:[#allocation8 + $0x338] sm:$0xff]  ;;  %20595 = vst [vmem:[#allocation369_spill] sm:$0xff] %v17889_v61 }
 0x54b   : > { %13804 = vmatprep.subr.bf16.mxu0 %v17863_v5  ;;  %v17880_v10 = vpack.c.bf16 %v3110_v42, %v3109_v12  ;;  %v3111_v5 = vld [vmem:[#allocation8 + $0x340] sm:$0xff]  ;;  %v3132_v42 = vld [vmem:[#allocation8 + $0x3e8] sm:$0xff] }
 0x54c   : > { %v3131_v12 = vld [vmem:[#allocation8 + $0x3e0] sm:$0xff] }
 0x54d   : > { %20592 = vst [vmem:[#allocation366_spill] sm:$0xff] %v17880_v10  ;;  %v17895_v30 = vpack.c.bf16 %v3132_v42, %v3131_v12 }
 0x54e   : > { %13806 = vmatpush3.bf16.msra.mxu0 %v17868_v29  ;;  %v3112_v29 = vld [vmem:[#allocation8 + $0x348] sm:$0xff] }
 0x54f   : > { %13808 = vmatprep.subr.bf16.mxu0 %v17871_v7  ;;  %v17886_v15 = vpack.c.bf16 %v3112_v29, %v3111_v5  ;;  %v3113_v7 = vld [vmem:[#allocation8 + $0x350] sm:$0xff]  ;;  %20597 = vst [vmem:[#allocation371_spill] sm:$0xff] %v17895_v30  ;;  %v3134_v29 = vld [vmem:[#allocation8 + $0x3f8] sm:$0xff] }
 0x550   : > { %v3133_v5 = vld [vmem:[#allocation8 + $0x3f0] sm:$0xff] }
 0x551   : > { %20594 = vst [vmem:[#allocation368_spill] sm:$0xff] %v17886_v15  ;;  %v17901_v60 = vpack.c.bf16 %v3134_v29, %v3133_v5 }
 0x552   : > { %13810 = vmatpush3.bf16.msra.mxu0 %v17874_v2  ;;  %v3114_v2 = vld [vmem:[#allocation8 + $0x358] sm:$0xff] }
 0x553   : > { %13812 = vmatprep.subr.bf16.mxu0 %v17877_v31  ;;  %v17892_v49 = vpack.c.bf16 %v3114_v2, %v3113_v7  ;;  %v3115_v31 = vld [vmem:[#allocation8 + $0x360] sm:$0xff]  ;;  %20599 = vst [vmem:[#allocation373_spill] sm:$0xff] %v17901_v60 }
 0x555   : > { %20596 = vst [vmem:[#allocation370_spill] sm:$0xff] %v17892_v49 }
 0x556   : > { %13814 = vmatpush3.bf16.msra.mxu0 %v17880_v10  ;;  %v3116_v10 = vld [vmem:[#allocation8 + $0x368] sm:$0xff] }
 0x557   : > { %13816 = vmatprep.subr.bf16.mxu0 %v17883_v3  ;;  %v17898_v24 = vpack.c.bf16 %v3116_v10, %v3115_v31  ;;  %v3117_v3 = vld [vmem:[#allocation8 + $0x370] sm:$0xff] }
 0x559   : > { %20598 = vst [vmem:[#allocation372_spill] sm:$0xff] %v17898_v24 }
 0x55a   : > { %13818 = vmatpush3.bf16.msra.mxu0 %v17886_v15  ;;  %v3118_v15 = vld [vmem:[#allocation8 + $0x378] sm:$0xff] }
 0x55b   : > { %13820 = vmatprep.subr.bf16.mxu0 %v17889_v61  ;;  %v17904_v2 = vpack.c.bf16 %v3118_v15, %v3117_v3  ;;  %v3291_v61 = vld [vmem:[#allocation6 + $0x8] sm:$0xff] }
 0x55d   : > { %20600 = vst [vmem:[#allocation374_spill] sm:$0xff] %v17904_v2 }
 0x55e   : > { %13822 = vmatpush3.bf16.msra.mxu0 %v17892_v49  ;;  %v3290_v49 = vld [vmem:[#allocation6] sm:$0xff] }
 0x55f   : > { %13824 = vmatprep.subr.bf16.mxu0 %v17895_v30  ;;  %v17914_v6 = vpack.c.bf16 %v3291_v61, %v3290_v49  ;;  %v3294_v61 = vld [vmem:[#allocation6 + $0x20] sm:$0xff]  ;;  %v3295_v49 = vld [vmem:[#allocation6 + $0x28] sm:$0xff] }
 0x561   : > { %20601 = vst [vmem:[#allocation375_spill] sm:$0xff] %v17914_v6 }
 0x562   : > { %13826 = vmatpush3.bf16.msra.mxu0 %v17898_v24 }
 0x563   : > { %13828 = vmatprep.subr.bf16.mxu0 %v17901_v60 }
 0x566   : > { %13830 = vmatpush3.bf16.msra.mxu0 %v17904_v2 }
 0x567   : > { %12253 = vmatprep.subr.mxu0 %v20305_v50 }
 0x569   : > { %3200 = vmatmul.mubr.f32.vlgmr.msra.gmra.mrb[22].mxu0 %v17760_v48 }
 0x56a   : > { %12255 = vmatprep.mubr.msk.f32.mxu0 %vm16245_vm2, %v20305_v50 }
 0x5dc   : > { %v11604_v31 = vpop.f32.mrb[16].mxu0 }
 0x5dd   : > { %v11605_v7 = vpop.f32.mrb[17].mxu0 }
 0x5de   : > { %v11606_v10 = vadd.f32 %v11605_v7, %v11604_v31  ;;  %v3292_v31 = vld [vmem:[#allocation6 + $0x10] sm:$0xff]  ;;  %v3293_v7 = vld [vmem:[#allocation6 + $0x18] sm:$0xff] }
 0x5fc   : > { %v11639_v12 = vpop.f32.mrb[18].mxu0 }
 0x5fd   : > { %v11640_v42 = vpop.f32.mrb[19].mxu0 }
 0x5fe   : > { %v11641_v5 = vadd.f32 %v11640_v42, %v11639_v12  ;;  %v3449_v12 = vld [vmem:[#allocation6 + $0x40] sm:$0xff]  ;;  %v3450_v42 = vld [vmem:[#allocation6 + $0x48] sm:$0xff] }
 0x600   : > { %v3205_v3 = vmax.f32 %v11606_v10, %v11641_v5  ;;  %v20165_v10 = vmov 0.0|0.0  }
 0x61c   : > { %v11674_v15 = vpop.f32.mrb[20].mxu0 }
 0x61d   : > { %v11675_v29 = vpop.f32.mrb[21].mxu0 }
 0x61e   : > { %v11676_v60 = vadd.f32 %v11675_v29, %v11674_v15  ;;  %v3374_v15 = vld [vmem:[#allocation14 + $0x4] sm:$0xf]  ;;  %v17939_v29 = vpack.c.bf16 %v3450_v42, %v3449_v12  ;;  %v3456_v12 = vld [vmem:[#allocation6 + $0x78] sm:$0xff] }
 0x620   : > { %20605 = vst [vmem:[#allocation379_spill] sm:$0xff] %v17939_v29 }
 0x63c   : > { %v11709_v24 = vpop.f32.mrb[22].mxu0 }
 0x63d   : > { %v11710_v2 = vpop.f32.mrb[23].mxu0 }
 0x63e   : > { %v11711_v30 = vadd.f32 %v11710_v2, %v11709_v24  ;;  %v17920_v24 = vpack.c.bf16 %v3293_v7, %v3292_v31  ;;  %v3452_v31 = vld [vmem:[#allocation6 + $0x58] sm:$0xff] }
 0x640   : > { %v3206_v48 = vmax.f32 %v11676_v60, %v11711_v30  ;;  %20602 = vst [vmem:[#allocation376_spill] sm:$0xff] %v17920_v24  ;;  %v17926_v30 = vpack.c.bf16 %v3295_v49, %v3294_v61  ;;  %v3297_v60 = vld [vmem:[#allocation6 + $0x38] sm:$0xff]  ;;  %v3453_v61 = vld [vmem:[#allocation6 + $0x60] sm:$0xff]  ;;  %v3454_v49 = vld [vmem:[#allocation6 + $0x68] sm:$0xff] }
 0x642   : > { %v17912_v1 = vmax.f32 %v3205_v3, %v3206_v48  ;;  %20603 = vst [vmem:[#allocation377_spill] sm:$0xff] %v17926_v30  ;;  %v3451_v48 = vld [vmem:[#allocation6 + $0x50] sm:$0xff] }
 0x643   : > { %v17944_v7 = vpack.c.bf16 %v3452_v31, %v3451_v48  ;;  %v3532_v31 = vld [vmem:[#allocation14 + $0x8] sm:$0xf] }
 0x644   : > { %12254 = vmatpush3.msra.mxu0 %v17912_v1 }
 0x645   : > { %12256 = vmatmul.mubr.msk.f32.vlgmr.msra.gmra.mrb[24].mxu0 %vm3216_vm3, %v3215_v33  ;;  %13831 = vmatprep.subr.bf16.mxu0 %v20165_v10  ;;  %v3296_v33 = vld [vmem:[#allocation6 + $0x30] sm:$0xff]  ;;  %20606 = vst [vmem:[#allocation380_spill] sm:$0xff] %v17944_v7 }
 0x646   : > { %13833 = vmatpush3.bf16.msra.mxu0 %v17914_v6  ;;  %12274 = vmatprep.mubr.msk.f32.mxu0 %vm16245_vm2, %v20305_v50  ;;  %v17930_v2 = vpack.c.bf16 %v3297_v60, %v3296_v33  ;;  %v17950_v33 = vpack.c.bf16 %v3454_v49, %v3453_v61  ;;  %v3455_v60 = vld [vmem:[#allocation6 + $0x70] sm:$0xff] }
 0x647   : > { %13834 = vmatprep.subr.bf16.mxu0 %v20165_v10  ;;  %v17954_v42 = vpack.c.bf16 %v3456_v12, %v3455_v60  ;;  %v3609_v49 = vld [vmem:[#allocation6 + $0x90] sm:$0xff]  ;;  %v3610_v60 = vld [vmem:[#allocation6 + $0x98] sm:$0xff] }
 0x648   : > { %20604 = vst [vmem:[#allocation378_spill] sm:$0xff] %v17930_v2  ;;  %20607 = vst [vmem:[#allocation381_spill] sm:$0xff] %v17950_v33  ;;  %v17968_v12 = vpack.c.bf16 %v3610_v60, %v3609_v49  ;;  %v3765_v49 = vld [vmem:[#allocation6 + $0xc0] sm:$0xff]  ;;  %v3766_v60 = vld [vmem:[#allocation6 + $0xc8] sm:$0xff] }
 0x649   : > { %20608 = vst [vmem:[#allocation382_spill] sm:$0xff] %v17954_v42 }
 0x64a   : > { %13836 = vmatpush3.bf16.msra.mxu0 %v17920_v24  ;;  %20610 = vst [vmem:[#allocation384_spill] sm:$0xff] %v17968_v12 }
 0x64b   : > { %13837 = vmatprep.subr.bf16.mxu0 %v20165_v10 }
 0x64e   : > { %13839 = vmatpush3.bf16.msra.mxu0 %v17926_v30 }
 0x64f   : > { %13840 = vmatprep.subr.bf16.mxu0 %v20165_v10 }
 0x652   : > { %13842 = vmatpush3.bf16.msra.mxu0 %v17930_v2 }
 0x653   : > { %12277 = vmatprep.subr.mxu0 %v20305_v50 }
 0x718   : > { %v3286_v5 = vpop.f32.mrb[24].mxu0 }
 0x719   : > { %v12257_v3 = vpop.f32.mrb[25].mxu0  ;;  %12275 = vmatmul.mubr.msk.f32.vlgmr.msra.gmra.mrb[26].mxu0 %vm3298_vm4, %v3286_v5  ;;  %v3607_v5 = vld [vmem:[#allocation6 + $0x80] sm:$0xff] }
 0x71a   : > { %12278 = vmatpush3.msra.mxu0 %v17912_v1  ;;  %12279 = vmatprep.mubr.msk.f32.mxu0 %vm16245_vm2, %v20305_v50  ;;  %v3608_v3 = vld [vmem:[#allocation6 + $0x88] sm:$0xff] }
 0x71b   : > { %13843 = vmatprep.subr.bf16.mxu0 %v20165_v10  ;;  %v17963_v61 = vpack.c.bf16 %v3608_v3, %v3607_v5  ;;  %v3613_v3 = vld [vmem:[#allocation6 + $0xb0] sm:$0xff] }
 0x71d   : > { %12280 = vmatmul.mubr.msk.f32.vlgmr.msra.gmra.mrb[28].mxu0 %vm3216_vm3, %v3374_v15  ;;  %20609 = vst [vmem:[#allocation383_spill] sm:$0xff] %v17963_v61 }
 0x71e   : > { %13845 = vmatpush3.bf16.msra.mxu0 %v17939_v29  ;;  %12298 = vmatprep.mubr.msk.f32.mxu0 %vm16245_vm2, %v20305_v50 }
 0x71f   : > { %13846 = vmatprep.subr.bf16.mxu0 %v20165_v10 }
 0x722   : > { %13848 = vmatpush3.bf16.msra.mxu0 %v17944_v7 }
 0x723   : > { %13849 = vmatprep.subr.bf16.mxu0 %v20165_v10 }
 0x726   : > { %13851 = vmatpush3.bf16.msra.mxu0 %v17950_v33 }
 0x727   : > { %13852 = vmatprep.subr.bf16.mxu0 %v20165_v10 }
 0x72a   : > { %13854 = vmatpush3.bf16.msra.mxu0 %v17954_v42 }
 0x72b   : > { %12301 = vmatprep.subr.mxu0 %v20305_v50 }
 0x7f0   : > { %v3444_v15 = vpop.f32.mrb[28].mxu0 }
 0x7f1   : > { %v12281_v48 = vpop.f32.mrb[29].mxu0  ;;  %12299 = vmatmul.mubr.msk.f32.vlgmr.msra.gmra.mrb[26].mxu0 %vm3298_vm4, %v3444_v15  ;;  %v3611_v15 = vld [vmem:[#allocation6 + $0xa0] sm:$0xff] }
 0x7f2   : > { %12302 = vmatpush3.msra.mxu0 %v17912_v1  ;;  %12303 = vmatprep.mubr.msk.f32.mxu0 %vm16245_vm2, %v20305_v50  ;;  %v3612_v48 = vld [vmem:[#allocation6 + $0xa8] sm:$0xff] }
 0x7f3   : > { %13855 = vmatprep.subr.bf16.mxu0 %v20165_v10  ;;  %v17974_v5 = vpack.c.bf16 %v3612_v48, %v3611_v15  ;;  %v3690_v15 = vld [vmem:[#allocation14 + $0xc] sm:$0xf]  ;;  %v3767_v48 = vld [vmem:[#allocation6 + $0xd0] sm:$0xff] }
 0x7f5   : > { %12304 = vmatmul.mubr.msk.f32.vlgmr.msra.gmra.mrb[30].mxu0 %vm3216_vm3, %v3532_v31  ;;  %20611 = vst [vmem:[#allocation385_spill] sm:$0xff] %v17974_v5  ;;  %v17978_v31 = vpack.c.bf16 %v3614_v47, %v3613_v3  ;;  %v17987_v47 = vpack.c.bf16 %v3766_v60, %v3765_v49  ;;  %v3768_v3 = vld [vmem:[#allocation6 + $0xd8] sm:$0xff]  ;;  %v3771_v60 = vld [vmem:[#allocation6 + $0xf0] sm:$0xff] }
 0x7f6   : > { %13857 = vmatpush3.bf16.msra.mxu0 %v17963_v61  ;;  %12322 = vmatprep.mubr.msk.f32.mxu0 %vm16245_vm2, %v20305_v50  ;;  %v17992_v22 = vpack.c.bf16 %v3768_v3, %v3767_v48  ;;  %v3923_v48 = vld [vmem:[#allocation6 + $0x100] sm:$0xff]  ;;  %v3924_v3 = vld [vmem:[#allocation6 + $0x108] sm:$0xff] }
 0x7f7   : > { %13858 = vmatprep.subr.bf16.mxu0 %v20165_v10  ;;  %20612 = vst [vmem:[#allocation386_spill] sm:$0xff] %v17978_v31  ;;  %20613 = vst [vmem:[#allocation387_spill] sm:$0xff] %v17987_v47 }
 0x7f8   : > { %20614 = vst [vmem:[#allocation388_spill] sm:$0xff] %v17992_v22 }
 0x7fa   : > { %13860 = vmatpush3.bf16.msra.mxu0 %v17968_v12 }
 0x7fb   : > { %13861 = vmatprep.subr.bf16.mxu0 %v20165_v10 }
 0x7fe   : > { %13863 = vmatpush3.bf16.msra.mxu0 %v17974_v5 }
 0x7ff   : > { %13864 = vmatprep.subr.bf16.mxu0 %v20165_v10 }
 0x802   : > { %13866 = vmatpush3.bf16.msra.mxu0 %v17978_v31 }
 0x803   : > { %12325 = vmatprep.subr.mxu0 %v20305_v50 }
 0x8c8   : > { %v3602_v4 = vpop.f32.mrb[30].mxu0 }
 0x8c9   : > { %v12305_v38 = vpop.f32.mrb[31].mxu0  ;;  %12323 = vmatmul.mubr.msk.f32.vlgmr.msra.gmra.mrb[26].mxu0 %vm3298_vm4, %v3602_v4  ;;  %v3770_v4 = vld [vmem:[#allocation6 + $0xe8] sm:$0xff] }
 0x8ca   : > { %12326 = vmatpush3.msra.mxu0 %v17912_v1  ;;  %12327 = vmatprep.mubr.msk.f32.mxu0 %vm16245_vm2, %v20305_v50  ;;  %v3769_v38 = vld [vmem:[#allocation6 + $0xe0] sm:$0xff] }
 0x8cb   : > { %13867 = vmatprep.subr.bf16.mxu0 %v20165_v10  ;;  %v17998_v49 = vpack.c.bf16 %v3770_v4, %v3769_v38  ;;  %v3848_v38 = vld [vmem:[#allocation14 + $0x10] sm:$0xf]  ;;  %v3925_v4 = vld [vmem:[#allocation6 + $0x110] sm:$0xff] }
 0x8cd   : > { %12328 = vmatmul.mubr.msk.f32.vlgmr.msra.gmra.mrb[32].mxu0 %vm3216_vm3, %v3690_v15  ;;  %20615 = vst [vmem:[#allocation389_spill] sm:$0xff] %v17998_v49  ;;  %v18002_v15 = vpack.c.bf16 %v3772_v19, %v3771_v60  ;;  %v18011_v19 = vpack.c.bf16 %v3924_v3, %v3923_v48  ;;  %v3926_v60 = vld [vmem:[#allocation6 + $0x118] sm:$0xff]  ;;  %v3929_v3 = vld [vmem:[#allocation6 + $0x130] sm:$0xff] }
 0x8ce   : > { %13869 = vmatpush3.bf16.msra.mxu0 %v17987_v47  ;;  %12346 = vmatprep.mubr.msk.f32.mxu0 %vm16245_vm2, %v20305_v50  ;;  %v18016_v41 = vpack.c.bf16 %v3926_v60, %v3925_v4  ;;  %v4081_v4 = vld [vmem:[#allocation6 + $0x140] sm:$0xff]  ;;  %v4082_v60 = vld [vmem:[#allocation6 + $0x148] sm:$0xff] }
 0x8cf   : > { %13870 = vmatprep.subr.bf16.mxu0 %v20165_v10  ;;  %20616 = vst [vmem:[#allocation390_spill] sm:$0xff] %v18002_v15  ;;  %20617 = vst [vmem:[#allocation391_spill] sm:$0xff] %v18011_v19 }
 0x8d0   : > { %20618 = vst [vmem:[#allocation392_spill] sm:$0xff] %v18016_v41 }
 0x8d2   : > { %13872 = vmatpush3.bf16.msra.mxu0 %v17992_v22 }
 0x8d3   : > { %13873 = vmatprep.subr.bf16.mxu0 %v20165_v10 }
 0x8d6   : > { %13875 = vmatpush3.bf16.msra.mxu0 %v17998_v49 }
 0x8d7   : > { %13876 = vmatprep.subr.bf16.mxu0 %v20165_v10 }
 0x8da   : > { %13878 = vmatpush3.bf16.msra.mxu0 %v18002_v15 }
 0x8db   : > { %12349 = vmatprep.subr.mxu0 %v20305_v50 }
 0x9a0   : > { %v3760_v56 = vpop.f32.mrb[32].mxu0 }
 0x9a1   : > { %v12329_v55 = vpop.f32.mrb[33].mxu0  ;;  %12347 = vmatmul.mubr.msk.f32.vlgmr.msra.gmra.mrb[26].mxu0 %vm3298_vm4, %v3760_v56  ;;  %v3928_v56 = vld [vmem:[#allocation6 + $0x128] sm:$0xff] }
 0x9a2   : > { %12350 = vmatpush3.msra.mxu0 %v17912_v1  ;;  %12351 = vmatprep.mubr.msk.f32.mxu0 %vm16245_vm2, %v20305_v50  ;;  %v3927_v55 = vld [vmem:[#allocation6 + $0x120] sm:$0xff] }
 0x9a3   : > { %13879 = vmatprep.subr.bf16.mxu0 %v20165_v10  ;;  %v18022_v48 = vpack.c.bf16 %v3928_v56, %v3927_v55  ;;  %v4006_v55 = vld [vmem:[#allocation14 + $0x14] sm:$0xf]  ;;  %v4083_v56 = vld [vmem:[#allocation6 + $0x150] sm:$0xff] }
 0x9a5   : > { %12352 = vmatmul.mubr.msk.f32.vlgmr.msra.gmra.mrb[34].mxu0 %vm3216_vm3, %v3848_v38  ;;  %20619 = vst [vmem:[#allocation393_spill] sm:$0xff] %v18022_v48  ;;  %v18026_v38 = vpack.c.bf16 %v3930_v37, %v3929_v3  ;;  %v18035_v37 = vpack.c.bf16 %v4082_v60, %v4081_v4  ;;  %v4084_v3 = vld [vmem:[#allocation6 + $0x158] sm:$0xff]  ;;  %v4087_v60 = vld [vmem:[#allocation6 + $0x170] sm:$0xff] }
 0x9a6   : > { %13881 = vmatpush3.bf16.msra.mxu0 %v18011_v19  ;;  %12370 = vmatprep.mubr.msk.f32.mxu0 %vm16245_vm2, %v20305_v50  ;;  %v18040_v62 = vpack.c.bf16 %v4084_v3, %v4083_v56  ;;  %v4239_v56 = vld [vmem:[#allocation6 + $0x180] sm:$0xff]  ;;  %v4240_v3 = vld [vmem:[#allocation6 + $0x188] sm:$0xff] }
 0x9a7   : > { %13882 = vmatprep.subr.bf16.mxu0 %v20165_v10  ;;  %20620 = vst [vmem:[#allocation394_spill] sm:$0xff] %v18026_v38  ;;  %20621 = vst [vmem:[#allocation395_spill] sm:$0xff] %v18035_v37 }
 0x9a8   : > { %20622 = vst [vmem:[#allocation396_spill] sm:$0xff] %v18040_v62 }
 0x9aa   : > { %13884 = vmatpush3.bf16.msra.mxu0 %v18016_v41 }
 0x9ab   : > { %13885 = vmatprep.subr.bf16.mxu0 %v20165_v10 }
 0x9ae   : > { %13887 = vmatpush3.bf16.msra.mxu0 %v18022_v48 }
 0x9af   : > { %13888 = vmatprep.subr.bf16.mxu0 %v20165_v10 }
 0x9b2   : > { %13890 = vmatpush3.bf16.msra.mxu0 %v18026_v38 }
 0x9b3   : > { %12373 = vmatprep.subr.mxu0 %v20305_v50 }
 0xa78   : > { %v3918_v23 = vpop.f32.mrb[34].mxu0 }
 0xa79   : > { %v12353_v16 = vpop.f32.mrb[35].mxu0  ;;  %12371 = vmatmul.mubr.msk.f32.vlgmr.msra.gmra.mrb[26].mxu0 %vm3298_vm4, %v3918_v23  ;;  %v4086_v23 = vld [vmem:[#allocation6 + $0x168] sm:$0xff] }
 0xa7a   : > { %12374 = vmatpush3.msra.mxu0 %v17912_v1  ;;  %12375 = vmatprep.mubr.msk.f32.mxu0 %vm16245_vm2, %v20305_v50  ;;  %v4085_v16 = vld [vmem:[#allocation6 + $0x160] sm:$0xff] }
 0xa7b   : > { %13891 = vmatprep.subr.bf16.mxu0 %v20165_v10  ;;  %v18046_v4 = vpack.c.bf16 %v4086_v23, %v4085_v16  ;;  %v4164_v16 = vld [vmem:[#allocation14 + $0x18] sm:$0xf]  ;;  %v4241_v23 = vld [vmem:[#allocation6 + $0x190] sm:$0xff] }
 0xa7d   : > { %12376 = vmatmul.mubr.msk.f32.vlgmr.msra.gmra.mrb[36].mxu0 %vm3216_vm3, %v4006_v55  ;;  %20623 = vst [vmem:[#allocation397_spill] sm:$0xff] %v18046_v4  ;;  %v18050_v55 = vpack.c.bf16 %v4088_v59, %v4087_v60  ;;  %v18059_v59 = vpack.c.bf16 %v4240_v3, %v4239_v56  ;;  %v4242_v60 = vld [vmem:[#allocation6 + $0x198] sm:$0xff]  ;;  %v4245_v3 = vld [vmem:[#allocation6 + $0x1b0] sm:$0xff] }
 0xa7e   : > { %13893 = vmatpush3.bf16.msra.mxu0 %v18035_v37  ;;  %12394 = vmatprep.mubr.msk.f32.mxu0 %vm16245_vm2, %v20305_v50  ;;  %v18064_v44 = vpack.c.bf16 %v4242_v60, %v4241_v23  ;;  %v4397_v23 = vld [vmem:[#allocation6 + $0x1c0] sm:$0xff]  ;;  %v4398_v60 = vld [vmem:[#allocation6 + $0x1c8] sm:$0xff] }
 0xa7f   : > { %13894 = vmatprep.subr.bf16.mxu0 %v20165_v10  ;;  %20624 = vst [vmem:[#allocation398_spill] sm:$0xff] %v18050_v55  ;;  %20625 = vst [vmem:[#allocation399_spill] sm:$0xff] %v18059_v59 }
 0xa80   : > { %20626 = vst [vmem:[#allocation400_spill] sm:$0xff] %v18064_v44 }
 0xa82   : > { %13896 = vmatpush3.bf16.msra.mxu0 %v18040_v62 }
 0xa83   : > { %13897 = vmatprep.subr.bf16.mxu0 %v20165_v10 }
 0xa86   : > { %13899 = vmatpush3.bf16.msra.mxu0 %v18046_v4 }
 0xa87   : > { %13900 = vmatprep.subr.bf16.mxu0 %v20165_v10 }
 0xa8a   : > { %13902 = vmatpush3.bf16.msra.mxu0 %v18050_v55 }
 0xa8b   : > { %12397 = vmatprep.subr.mxu0 %v20305_v50 }
 0xb50   : > { %v4076_v54 = vpop.f32.mrb[36].mxu0 }
 0xb51   : > { %v12377_v53 = vpop.f32.mrb[37].mxu0  ;;  %12395 = vmatmul.mubr.msk.f32.vlgmr.msra.gmra.mrb[26].mxu0 %vm3298_vm4, %v4076_v54  ;;  %v4244_v54 = vld [vmem:[#allocation6 + $0x1a8] sm:$0xff] }
 0xb52   : > { %12398 = vmatpush3.msra.mxu0 %v17912_v1  ;;  %12399 = vmatprep.mubr.msk.f32.mxu0 %vm16245_vm2, %v20305_v50  ;;  %v4243_v53 = vld [vmem:[#allocation6 + $0x1a0] sm:$0xff] }
 0xb53   : > { %13903 = vmatprep.subr.bf16.mxu0 %v20165_v10  ;;  %v18070_v56 = vpack.c.bf16 %v4244_v54, %v4243_v53  ;;  %v4322_v53 = vld [vmem:[#allocation14 + $0x1c] sm:$0xf]  ;;  %v4399_v54 = vld [vmem:[#allocation6 + $0x1d0] sm:$0xff] }
 0xb55   : > { %12400 = vmatmul.mubr.msk.f32.vlgmr.msra.gmra.mrb[38].mxu0 %vm3216_vm3, %v4164_v16  ;;  %20627 = vst [vmem:[#allocation401_spill] sm:$0xff] %v18070_v56  ;;  %v18074_v16 = vpack.c.bf16 %v4246_v43, %v4245_v3  ;;  %v18083_v43 = vpack.c.bf16 %v4398_v60, %v4397_v23  ;;  %v4400_v3 = vld [vmem:[#allocation6 + $0x1d8] sm:$0xff]  ;;  %v4403_v60 = vld [vmem:[#allocation6 + $0x1f0] sm:$0xff] }
 0xb56   : > { %13905 = vmatpush3.bf16.msra.mxu0 %v18059_v59  ;;  %12418 = vmatprep.mubr.msk.f32.mxu0 %vm16245_vm2, %v20305_v50  ;;  %v18088_v28 = vpack.c.bf16 %v4400_v3, %v4399_v54  ;;  %v4555_v54 = vld [vmem:[#allocation6 + $0x200] sm:$0xff]  ;;  %v4556_v3 = vld [vmem:[#allocation6 + $0x208] sm:$0xff] }
 0xb57   : > { %13906 = vmatprep.subr.bf16.mxu0 %v20165_v10  ;;  %20628 = vst [vmem:[#allocation402_spill] sm:$0xff] %v18074_v16  ;;  %20629 = vst [vmem:[#allocation403_spill] sm:$0xff] %v18083_v43 }
 0xb58   : > { %20630 = vst [vmem:[#allocation404_spill] sm:$0xff] %v18088_v28 }
 0xb5a   : > { %13908 = vmatpush3.bf16.msra.mxu0 %v18064_v44 }
 0xb5b   : > { %13909 = vmatprep.subr.bf16.mxu0 %v20165_v10 }
 0xb5e   : > { %13911 = vmatpush3.bf16.msra.mxu0 %v18070_v56 }
 0xb5f   : > { %13912 = vmatprep.subr.bf16.mxu0 %v20165_v10 }
 0xb62   : > { %13914 = vmatpush3.bf16.msra.mxu0 %v18074_v16 }
 0xb63   : > { %12421 = vmatprep.subr.mxu0 %v20305_v50 }
 0xc28   : > { %v4234_v36 = vpop.f32.mrb[38].mxu0 }
 0xc29   : > { %v12401_v35 = vpop.f32.mrb[39].mxu0  ;;  %12419 = vmatmul.mubr.msk.f32.vlgmr.msra.gmra.mrb[26].mxu0 %vm3298_vm4, %v4234_v36  ;;  %v4402_v36 = vld [vmem:[#allocation6 + $0x1e8] sm:$0xff] }
 0xc2a   : > { %12422 = vmatpush3.msra.mxu0 %v17912_v1  ;;  %12423 = vmatprep.mubr.msk.f32.mxu0 %vm16245_vm2, %v20305_v50  ;;  %v4401_v35 = vld [vmem:[#allocation6 + $0x1e0] sm:$0xff] }
 0xc2b   : > { %13915 = vmatprep.subr.bf16.mxu0 %v20165_v10  ;;  %v18094_v23 = vpack.c.bf16 %v4402_v36, %v4401_v35  ;;  %v4480_v35 = vld [vmem:[#allocation14 + $0x20] sm:$0xf] }
 0xc2c   : > { %v4557_v36 = vld [vmem:[#allocation6 + $0x210] sm:$0xff] }
 0xc2d   : > { %12424 = vmatmul.mubr.msk.f32.vlgmr.msra.gmra.mrb[40].mxu0 %vm3216_vm3, %v4322_v53  ;;  %20631 = vst [vmem:[#allocation405_spill] sm:$0xff] %v18094_v23  ;;  %v18098_v53 = vpack.c.bf16 %v4404_v25, %v4403_v60  ;;  %v18107_v25 = vpack.c.bf16 %v4556_v3, %v4555_v54  ;;  %v4558_v60 = vld [vmem:[#allocation6 + $0x218] sm:$0xff]  ;;  %v4561_v54 = vld [vmem:[#allocation6 + $0x230] sm:$0xff] }
 0xc2e   : > { %13917 = vmatpush3.bf16.msra.mxu0 %v18083_v43  ;;  %12442 = vmatprep.mubr.msk.f32.mxu0 %vm16245_vm2, %v20305_v50  ;;  %v18112_v9 = vpack.c.bf16 %v4558_v60, %v4557_v36  ;;  %v4562_v3 = vld [vmem:[#allocation6 + $0x238] sm:$0xff]  ;;  %v4638_v36 = vld [vmem:[#allocation9] sm:$0xff]  ;;  %v4639_v60 = vld [vmem:[#allocation9 + $0x8] sm:$0xff] }
 0xc2f   : > { %13918 = vmatprep.subr.bf16.mxu0 %v20165_v10  ;;  %20632 = vst [vmem:[#allocation406_spill] sm:$0xff] %v18098_v53  ;;  %20633 = vst [vmem:[#allocation407_spill] sm:$0xff] %v18107_v25  ;;  %v18127_v8 = vpack.c.bf16 %v4639_v60, %v4638_v36 }
 0xc30   : > { %20634 = vst [vmem:[#allocation408_spill] sm:$0xff] %v18112_v9 }
 0xc31   : > { %20637 = vst [vmem:[#allocation411_spill] sm:$0xff] %v18127_v8 }
 0xc32   : > { %13920 = vmatpush3.bf16.msra.mxu0 %v18088_v28 }
 0xc33   : > { %13921 = vmatprep.subr.bf16.mxu0 %v20165_v10 }
 0xc36   : > { %13923 = vmatpush3.bf16.msra.mxu0 %v18094_v23 }
 0xc37   : > { %13924 = vmatprep.subr.bf16.mxu0 %v20165_v10 }
 0xc3a   : > { %13926 = vmatpush3.bf16.msra.mxu0 %v18098_v53 }
 0xc3b   : > { %12445 = vmatprep.subr.mxu0 %v20305_v50 }
 0xd00   : > { %v4392_v18 = vpop.f32.mrb[40].mxu0 }
 0xd01   : > { %v12425_v17 = vpop.f32.mrb[41].mxu0  ;;  %12443 = vmatmul.mubr.msk.f32.vlgmr.msra.gmra.mrb[26].mxu0 %vm3298_vm4, %v4392_v18  ;;  %v4560_v18 = vld [vmem:[#allocation6 + $0x228] sm:$0xff] }
 0xd02   : > { %12446 = vmatpush3.msra.mxu0 %v17912_v1  ;;  %12447 = vmatprep.mubr.msk.f32.mxu0 %vm16245_vm2, %v20305_v50  ;;  %v4559_v17 = vld [vmem:[#allocation6 + $0x220] sm:$0xff] }
 0xd03   : > { %13927 = vmatprep.subr.bf16.mxu0 %v20165_v10  ;;  %v18118_v1 = vpack.c.bf16 %v4560_v18, %v4559_v17  ;;  %v4640_v17 = vld [vmem:[#allocation9 + $0x10] sm:$0xff]  ;;  %v4641_v18 = vld [vmem:[#allocation9 + $0x18] sm:$0xff] }
 0xd05   : > { %12448 = vmatmul.mubr.msk.f32.vlgmr.msra.gmra.mrb[42].mxu0 %vm3216_vm3, %v4480_v35  ;;  %20635 = vst [vmem:[#allocation409_spill] sm:$0xff] %v18118_v1  ;;  %v18122_v35 = vpack.c.bf16 %v4562_v3, %v4561_v54  ;;  %v18131_v54 = vpack.c.bf16 %v4641_v18, %v4640_v17  ;;  %v4642_v3 = vld [vmem:[#allocation9 + $0x20] sm:$0xff]  ;;  %v4721_v18 = vld [vmem:[#allocation9 + $0x48] sm:$0xff] }
 0xd06   : > { %13929 = vmatpush3.bf16.msra.mxu0 %v18107_v25  ;;  %12466 = vmatprep.mubr.msk.f32.mxu0 %vm16245_vm2, %v20305_v50  ;;  %v18137_v36 = vpack.c.bf16 %v4643_v58, %v4642_v3  ;;  %v4720_v17 = vld [vmem:[#allocation9 + $0x40] sm:$0xff] }
 0xd07   : > { %13930 = vmatprep.subr.bf16.mxu0 %v20165_v10  ;;  %20636 = vst [vmem:[#allocation410_spill] sm:$0xff] %v18122_v35  ;;  %20638 = vst [vmem:[#allocation412_spill] sm:$0xff] %v18131_v54  ;;  %v18146_v57 = vpack.c.bf16 %v4721_v18, %v4720_v17  ;;  %v4726_v17 = vld [vmem:[#allocation9 + $0x70] sm:$0xff]  ;;  %v4727_v18 = vld [vmem:[#allocation9 + $0x78] sm:$0xff] }
 0xd08   : > { %20639 = vst [vmem:[#allocation413_spill] sm:$0xff] %v18137_v36 }
 0xd09   : > { %20641 = vst [vmem:[#allocation415_spill] sm:$0xff] %v18146_v57 }
 0xd0a   : > { %13932 = vmatpush3.bf16.msra.mxu0 %v18112_v9 }
 0xd0b   : > { %13933 = vmatprep.subr.bf16.mxu0 %v20165_v10 }
 0xd0e   : > { %13935 = vmatpush3.bf16.msra.mxu0 %v18118_v1 }
 0xd0f   : > { %13936 = vmatprep.subr.bf16.mxu0 %v20165_v10 }
 0xd12   : > { %13938 = vmatpush3.bf16.msra.mxu0 %v18122_v35 }
 0xd13   : > { %13939 = vmatprep.subr.bf16.mxu0 %v20165_v10 }
 0xdd8   : > { %v4550_v0 = vpop.f32.mrb[42].mxu0 }
 0xdd9   : > { %v12449_v63 = vpop.f32.mrb[43].mxu0  ;;  %12467 = vmatmul.mubr.msk.f32.vlgmr.msra.gmra.mrb[26].mxu0 %vm3298_vm4, %v4550_v0  ;;  %v4645_v0 = vld [vmem:[#allocation9 + $0x38] sm:$0xff] }
 0xdda   : > { %13941 = vmatpush3.bf16.msra.mxu0 %v18127_v8  ;;  %12485 = vmatprep.mubr.msk.f32.mxu0 %vm16245_vm2, %v20305_v50  ;;  %v4644_v63 = vld [vmem:[#allocation9 + $0x30] sm:$0xff]  ;;  %v3212_v8 = vpop.permute.xlu0 %3211 }
 0xddb   : > { %13942 = vmatprep.subr.bf16.mxu0 %v20165_v10  ;;  %v18142_v60 = vpack.c.bf16 %v4645_v0, %v4644_v63 }
 0xddd   : > { %20640 = vst [vmem:[#allocation414_spill] sm:$0xff] %v18142_v60 }
 0xdde   : > { %13944 = vmatpush3.bf16.msra.mxu0 %v18131_v54 }
 0xddf   : > { %13945 = vmatprep.subr.bf16.mxu0 %v20165_v10 }
 0xde2   : > { %13947 = vmatpush3.bf16.msra.mxu0 %v18137_v36  ;;  %v4722_v36 = vld [vmem:[#allocation9 + $0x50] sm:$0xff] }
 0xde3   : > { %13948 = vmatprep.subr.bf16.mxu0 %v20165_v10  ;;  %v18153_v63 = vpack.c.bf16 %v4723_v51, %v4722_v36  ;;  %v4799_v51 = vld [vmem:[#allocation9 + $0x80] sm:$0xff]  ;;  %v4800_v36 = vld [vmem:[#allocation9 + $0x88] sm:$0xff] }
 0xde5   : > { %20642 = vst [vmem:[#allocation416_spill] sm:$0xff] %v18153_v63 }
 0xde6   : > { %13950 = vmatpush3.bf16.msra.mxu0 %v18142_v60 }
 0xde7   : > { %13951 = vmatprep.subr.bf16.mxu0 %v20165_v10 }
 0xeac   : > { %v4632_v54 = vpop.f32.mrb[26].mxu0 }
 0xead   : > { %v15582_v58 = vadd.f32 %v4632_v54, %v3212_v8  ;;  %v12468_v3 = vpop.f32.mrb[27].mxu0  ;;  %v4724_v8 = vld [vmem:[#allocation9 + $0x60] sm:$0xff]  ;;  %v4725_v54 = vld [vmem:[#allocation9 + $0x68] sm:$0xff] }
 0xeae   : > { %v18159_v0 = vpack.c.bf16 %v4725_v54, %v4724_v8  ;;  %v18167_v3 = vpack.c.bf16 %v4800_v36, %v4799_v51  ;;  %v4801_v8 = vld [vmem:[#allocation9 + $0x90] sm:$0xff]  ;;  %v4802_v54 = vld [vmem:[#allocation9 + $0x98] sm:$0xff] }
 0xeaf   : > { %v18148_v52 = vmax.f32 %v15582_v58, 0.0  ;;  %v18163_v58 = vpack.c.bf16 %v4727_v18, %v4726_v17  ;;  %v4803_v17 = vld [vmem:[#allocation9 + $0xa0] sm:$0xff]  ;;  %v4804_v18 = vld [vmem:[#allocation9 + $0xa8] sm:$0xff]  ;;  %v4805_v36 = vld [vmem:[#allocation9 + $0xb0] sm:$0xff] }
 0xeb0   : > { %20643 = vst [vmem:[#allocation417_spill] sm:$0xff] %v18159_v0  ;;  %20645 = vst [vmem:[#allocation419_spill] sm:$0xff] %v18167_v3  ;;  %v18179_v51 = vpack.c.bf16 %v4804_v18, %v4803_v17  ;;  %v4880_v17 = vld [vmem:[#allocation9 + $0xd0] sm:$0xff]  ;;  %v4881_v18 = vld [vmem:[#allocation9 + $0xd8] sm:$0xff] }
 0xeb1   : > { %12486 = vmatmul.mubr.msk.f32.vlgmr.msra.gmra.mrb[44].mxu0 %vm3298_vm4, %v18148_v52  ;;  %20644 = vst [vmem:[#allocation418_spill] sm:$0xff] %v18163_v58 }
 0xeb2   : > { %13953 = vmatpush3.bf16.msra.mxu0 %v18146_v57  ;;  %12504 = vmatprep.mubr.msk.f32.mxu0 %vm16245_vm2, %v20305_v50  ;;  %20647 = vst [vmem:[#allocation421_spill] sm:$0xff] %v18179_v51 }
 0xeb3   : > { %13954 = vmatprep.subr.bf16.mxu0 %v20165_v10 }
 0xeb6   : > { %13956 = vmatpush3.bf16.msra.mxu0 %v18153_v63 }
 0xeb7   : > { %13957 = vmatprep.subr.bf16.mxu0 %v20165_v10 }
 0xeba   : > { %13959 = vmatpush3.bf16.msra.mxu0 %v18159_v0  ;;  %v18173_v0 = vpack.c.bf16 %v4802_v54, %v4801_v8  ;;  %v4878_v8 = vld [vmem:[#allocation9 + $0xc0] sm:$0xff]  ;;  %v4879_v54 = vld [vmem:[#allocation9 + $0xc8] sm:$0xff] }
 0xebb   : > { %13960 = vmatprep.subr.bf16.mxu0 %v20165_v10  ;;  %v18187_v63 = vpack.c.bf16 %v4879_v54, %v4878_v8  ;;  %v4884_v54 = vld [vmem:[#allocation9 + $0xf0] sm:$0xff] }
 0xebc   : > { %20646 = vst [vmem:[#allocation420_spill] sm:$0xff] %v18173_v0 }
 0xebd   : > { %20649 = vst [vmem:[#allocation423_spill] sm:$0xff] %v18187_v63 }
 0xebe   : > { %13962 = vmatpush3.bf16.msra.mxu0 %v18163_v58  ;;  %v4806_v58 = vld [vmem:[#allocation9 + $0xb8] sm:$0xff] }
 0xebf   : > { %13963 = vmatprep.subr.bf16.mxu0 %v20165_v10 }
 0xec1   : > { %12505 = vmatmul.mubr.msk.f32.vlgmr.msra.gmra.mrb[46].mxu0 %vm3298_vm4, %v18148_v52 }
 0xec2   : > { %13965 = vmatpush3.bf16.msra.mxu0 %v18167_v3  ;;  %12523 = vmatprep.mubr.msk.f32.mxu0 %vm16245_vm2, %v20305_v50  ;;  %v18183_v3 = vpack.c.bf16 %v4806_v58, %v4805_v36  ;;  %v4882_v58 = vld [vmem:[#allocation9 + $0xe0] sm:$0xff]  ;;  %v4883_v36 = vld [vmem:[#allocation9 + $0xe8] sm:$0xff] }
 0xec3   : > { %13966 = vmatprep.subr.bf16.mxu0 %v20165_v10  ;;  %v18199_v8 = vpack.c.bf16 %v4883_v36, %v4882_v58 }
 0xec4   : > { %20648 = vst [vmem:[#allocation422_spill] sm:$0xff] %v18183_v3 }
 0xec5   : > { %20651 = vst [vmem:[#allocation425_spill] sm:$0xff] %v18199_v8 }
 0xec6   : > { %13968 = vmatpush3.bf16.msra.mxu0 %v18173_v0 }
 0xec7   : > { %13969 = vmatprep.subr.bf16.mxu0 %v20165_v10 }
 0xeca   : > { %13971 = vmatpush3.bf16.msra.mxu0 %v18179_v51  ;;  %v18193_v51 = vpack.c.bf16 %v4881_v18, %v4880_v17  ;;  %v4959_v17 = vld [vmem:[#allocation11] sm:$0xff]  ;;  %v4960_v18 = vld [vmem:[#allocation11 + $0x8] sm:$0xff] }
 0xecb   : > { %13972 = vmatprep.subr.bf16.mxu0 %v20165_v10  ;;  %v13988_v58 = vpack.c.bf16 %v4960_v18, %v4959_v17  ;;  %v5042_v17 = vld [vmem:[%s19490_s11] sm:$0xff] }
 0xecc   : > { %20650 = vst [vmem:[#allocation424_spill] sm:$0xff] %v18193_v51 }
 0xece   : > { %13974 = vmatpush3.bf16.msra.mxu0 %v18183_v3  ;;  %v4885_v3 = vld [vmem:[#allocation9 + $0xf8] sm:$0xff] }
 0xecf   : > { %13975 = vmatprep.subr.bf16.mxu0 %v20165_v10 }
 0xed1   : > { %12524 = vmatmul.mubr.msk.f32.vlgmr.msra.gmra.mrb[48].mxu0 %vm3298_vm4, %v18148_v52 }
 0xed2   : > { %13977 = vmatpush3.bf16.msra.mxu0 %v18187_v63  ;;  %12542 = vmatprep.mubr.msk.f32.mxu0 %vm16245_vm2, %v20305_v50  ;;  %v18203_v63 = vpack.c.bf16 %v4885_v3, %v4884_v54 }
 0xed3   : > { %13978 = vmatprep.subr.bf16.mxu0 %v20165_v10 }
 0xed4   : > { %20652 = vst [vmem:[#allocation426_spill] sm:$0xff] %v18203_v63 }
 0xed6   : > { %13980 = vmatpush3.bf16.msra.mxu0 %v18193_v51 }
 0xed7   : > { %13981 = vmatprep.subr.bf16.mxu0 %v20165_v10 }
 0xeda   : > { %13983 = vmatpush3.bf16.msra.mxu0 %v18199_v8 }
 0xedb   : > { %13984 = vmatprep.subr.bf16.mxu0 %v20165_v10 }
 0xede   : > { %13986 = vmatpush3.bf16.msra.mxu0 %v18203_v63 }
 0xedf   : > { %13987 = vmatprep.subr.bf16.mxu0 %v20165_v10 }
 0xee1   : > { %12543 = vmatmul.mubr.msk.f32.vlgmr.msra.gmra.mrb[50].mxu0 %vm3298_vm4, %v18148_v52 }
 0xee2   : > { %12549 = vmatprep.mubr.msk.f32.mxu0 %vm16245_vm2, %v20305_v50  ;;  %13989 = vmatpush3.bf16.msra.mxu0 %v13988_v58  ;;  %v11460_v58 = vld [vmem:[%s19490_s11 + $0x10] sm:$0xff] }
 0xee3   : > { %12552 = vmatprep.subr.mxu0 %v20305_v50 }
 0xf84   : > { %v4715_v3 = vpop.f32.mrb[44].mxu0 }
 0xf85   : > { %v12487_v36 = vpop.f32.mrb[45].mxu0 }
 0xf94   : > { %v4794_v54 = vpop.f32.mrb[46].mxu0 }
 0xf95   : > { %v4956_v8 = vmax.f32 %v4715_v3, %v4794_v54  ;;  %v12506_v51 = vpop.f32.mrb[47].mxu0  ;;  %v11464_v54 = vld [vmem:[%s19490_s11 + $0x18] sm:$0xff] }
 0xfa4   : > { %v4873_v63 = vpop.f32.mrb[48].mxu0 }
 0xfa5   : > { %v12525_v0 = vpop.f32.mrb[49].mxu0 }
 0xfb4   : > { %v4952_v10 = vpop.f32.mrb[50].mxu0 }
 0xfb5   : > { %v4957_v57 = vmax.f32 %v4873_v63, %v4952_v10  ;;  %v12544_v60 = vpop.f32.mrb[51].mxu0  ;;  %v11456_v63 = vld [vmem:[%s19490_s11 + $0x8] sm:$0xff] }
 0xfb7   : > { %v4958_v52 = vmax.f32 %v4956_v8, %v4957_v57  ;;  %v20653_v57 = vmov 0.0|0.0  }
 0xfb9   : > { %12550 = vmatmul.mubr.msk.f32.vlgmr.msra.gmra.mrb[52].mxu0 %vm4961_vm5, %v4958_v52 }
 0xfba   : > { %12554 = vmatprep.mubr.msk.f32.mxu0 %vm16245_vm2, %v20305_v50 }
0x108c   : > { %v18219_v18 = vpop.f32.mrb[52].mxu0 }
0x108d   : > { %v12551_v51 = vpop.f32.mrb[53].mxu0  ;;  %12553 = vmatpush3.msk.msra.mxu0 %vm5047_vm6, %v18219_v18 }
0x108e   : > { %12555 = vmatmul.mubr.msk.f32.vlgmr.msra.gmra.mrb[54].mxu0 %vm5043_vm7, %v5042_v17  ;;  %13990 = vmatprep.subr.bf16.mxu0 %v20653_v57  ;;  %v11468_v51 = vld [vmem:[%s19490_s11 + $0x20] sm:$0xff] }
0x108f   : > { %13992 = vmatpush3.bf16.msra.mxu0 %v17914_v6  ;;  %12573 = vmatprep.mubr.msk.f32.mxu0 %vm16245_vm2, %v20305_v50  ;;  %v20701_v6 = vld [vmem:[#allocation82_spill] sm:$0xff] }
0x1090   : > { %13993 = vmatprep.subr.bf16.mxu0 %v20653_v57 }
0x1093   : > { %13995 = vmatpush3.bf16.msra.mxu0 %v17920_v24  ;;  %v20700_v24 = vld [vmem:[#allocation81_spill] sm:$0xff] }
0x1094   : > { %13996 = vmatprep.subr.bf16.mxu0 %v20653_v57 }
0x1097   : > { %13998 = vmatpush3.bf16.msra.mxu0 %v17926_v30  ;;  %v20699_v30 = vld [vmem:[#allocation80_spill] sm:$0xff] }
0x1098   : > { %13999 = vmatprep.subr.bf16.mxu0 %v20653_v57 }
0x109b   : > { %14001 = vmatpush3.bf16.msra.mxu0 %v17930_v2  ;;  %v20698_v2 = vld [vmem:[#allocation79_spill] sm:$0xff] }
0x109c   : > { %12576 = vmatprep.subr.mxu0 %v20305_v50 }
0x1161   : > { %v5117_v10 = vpop.f32.mrb[54].mxu0 }
0x1162   : > { %v12556_v60 = vpop.f32.mrb[55].mxu0  ;;  %12574 = vmatmul.mubr.msk.f32.vlgmr.msra.gmra.mrb[56].mxu0 %vm3298_vm4, %v5117_v10 }
0x1163   : > { %12577 = vmatpush3.msk.msra.mxu0 %vm5047_vm6, %v18219_v18  ;;  %12578 = vmatprep.mubr.msk.f32.mxu0 %vm16245_vm2, %v20305_v50 }
0x1164   : > { %14002 = vmatprep.subr.bf16.mxu0 %v20653_v57 }
0x1166   : > { %12579 = vmatmul.mubr.msk.f32.vlgmr.msra.gmra.mrb[58].mxu0 %vm5043_vm7, %v11456_v63  ;;  %v11472_v63 = vld [vmem:[%s19490_s11 + $0x28] sm:$0xff] }
0x1167   : > { %14004 = vmatpush3.bf16.msra.mxu0 %v17939_v29  ;;  %12597 = vmatprep.mubr.msk.f32.mxu0 %vm16245_vm2, %v20305_v50  ;;  %v20697_v29 = vld [vmem:[#allocation78_spill] sm:$0xff] }
0x1168   : > { %14005 = vmatprep.subr.bf16.mxu0 %v20653_v57 }
0x116b   : > { %14007 = vmatpush3.bf16.msra.mxu0 %v17944_v7  ;;  %v20696_v7 = vld [vmem:[#allocation77_spill] sm:$0xff] }
0x116c   : > { %14008 = vmatprep.subr.bf16.mxu0 %v20653_v57 }
0x116f   : > { %14010 = vmatpush3.bf16.msra.mxu0 %v17950_v33  ;;  %v20695_v33 = vld [vmem:[#allocation76_spill] sm:$0xff] }
0x1170   : > { %14011 = vmatprep.subr.bf16.mxu0 %v20653_v57 }
0x1173   : > { %14013 = vmatpush3.bf16.msra.mxu0 %v17954_v42  ;;  %v20694_v42 = vld [vmem:[#allocation75_spill] sm:$0xff] }
0x1174   : > { %12600 = vmatprep.subr.mxu0 %v20305_v50 }
0x1239   : > { %v5266_v0 = vpop.f32.mrb[58].mxu0 }
0x123a   : > { %v12580_v8 = vpop.f32.mrb[59].mxu0  ;;  %12598 = vmatmul.mubr.msk.f32.vlgmr.msra.gmra.mrb[56].mxu0 %vm3298_vm4, %v5266_v0 }
0x123b   : > { %12601 = vmatpush3.msk.msra.mxu0 %vm5047_vm6, %v18219_v18  ;;  %12602 = vmatprep.mubr.msk.f32.mxu0 %vm16245_vm2, %v20305_v50 }
0x123c   : > { %14014 = vmatprep.subr.bf16.mxu0 %v20653_v57 }
0x123e   : > { %12603 = vmatmul.mubr.msk.f32.vlgmr.msra.gmra.mrb[60].mxu0 %vm5043_vm7, %v11460_v58  ;;  %v11476_v58 = vld [vmem:[%s19490_s11 + $0x30] sm:$0xff] }
0x123f   : > { %14016 = vmatpush3.bf16.msra.mxu0 %v17963_v61  ;;  %12621 = vmatprep.mubr.msk.f32.mxu0 %vm16245_vm2, %v20305_v50  ;;  %v20693_v61 = vld [vmem:[#allocation74_spill] sm:$0xff] }
0x1240   : > { %14017 = vmatprep.subr.bf16.mxu0 %v20653_v57 }
0x1243   : > { %14019 = vmatpush3.bf16.msra.mxu0 %v17968_v12  ;;  %v20692_v12 = vld [vmem:[#allocation73_spill] sm:$0xff] }
0x1244   : > { %14020 = vmatprep.subr.bf16.mxu0 %v20653_v57 }
0x1247   : > { %14022 = vmatpush3.bf16.msra.mxu0 %v17974_v5  ;;  %v20691_v5 = vld [vmem:[#allocation72_spill] sm:$0xff] }
0x1248   : > { %14023 = vmatprep.subr.bf16.mxu0 %v20653_v57 }
0x124b   : > { %14025 = vmatpush3.bf16.msra.mxu0 %v17978_v31  ;;  %v20690_v31 = vld [vmem:[#allocation71_spill] sm:$0xff] }
0x124c   : > { %12624 = vmatprep.subr.mxu0 %v20305_v50 }
0x1311   : > { %v5415_v3 = vpop.f32.mrb[60].mxu0 }
0x1312   : > { %v12604_v36 = vpop.f32.mrb[61].mxu0  ;;  %12622 = vmatmul.mubr.msk.f32.vlgmr.msra.gmra.mrb[56].mxu0 %vm3298_vm4, %v5415_v3 }
0x1313   : > { %12625 = vmatpush3.msk.msra.mxu0 %vm5047_vm6, %v18219_v18  ;;  %12626 = vmatprep.mubr.msk.f32.mxu0 %vm16245_vm2, %v20305_v50 }
0x1314   : > { %14026 = vmatprep.subr.bf16.mxu0 %v20653_v57 }
0x1316   : > { %12627 = vmatmul.mubr.msk.f32.vlgmr.msra.gmra.mrb[62].mxu0 %vm5043_vm7, %v11464_v54  ;;  %v11480_v54 = vld [vmem:[%s19490_s11 + $0x38] sm:$0xff] }
0x1317   : > { %14028 = vmatpush3.bf16.msra.mxu0 %v17987_v47  ;;  %12645 = vmatprep.mubr.msk.f32.mxu0 %vm16245_vm2, %v20305_v50  ;;  %v20689_v47 = vld [vmem:[#allocation70_spill] sm:$0xff] }
0x1318   : > { %14029 = vmatprep.subr.bf16.mxu0 %v20653_v57 }
0x131b   : > { %14031 = vmatpush3.bf16.msra.mxu0 %v17992_v22  ;;  %v20688_v22 = vld [vmem:[#allocation69_spill] sm:$0xff] }
0x131c   : > { %14032 = vmatprep.subr.bf16.mxu0 %v20653_v57 }
0x131f   : > { %14034 = vmatpush3.bf16.msra.mxu0 %v17998_v49  ;;  %v20687_v49 = vld [vmem:[#allocation68_spill] sm:$0xff] }
0x1320   : > { %14035 = vmatprep.subr.bf16.mxu0 %v20653_v57 }
0x1323   : > { %14037 = vmatpush3.bf16.msra.mxu0 %v18002_v15  ;;  %v20686_v15 = vld [vmem:[#allocation67_spill] sm:$0xff] }
0x1324   : > { %12648 = vmatprep.subr.mxu0 %v20305_v50 }
0x13e9   : > { %v5564_v52 = vpop.f32.mrb[62].mxu0 }
0x13ea   : > { %v12628_v17 = vpop.f32.mrb[63].mxu0  ;;  %12646 = vmatmul.mubr.msk.f32.vlgmr.msra.gmra.mrb[56].mxu0 %vm3298_vm4, %v5564_v52 }
0x13eb   : > { %12649 = vmatpush3.msk.msra.mxu0 %vm5047_vm6, %v18219_v18  ;;  %12650 = vmatprep.mubr.msk.f32.mxu0 %vm16245_vm2, %v20305_v50 }
0x13ec   : > { %14038 = vmatprep.subr.bf16.mxu0 %v20653_v57 }
0x13ee   : > { %12651 = vmatmul.mubr.msk.f32.vlgmr.msra.gmra.mrb[64].mxu0 %vm5043_vm7, %v11468_v51  ;;  %v11484_v51 = vld [vmem:[%s19490_s11 + $0x40] sm:$0xff] }
0x13ef   : > { %14040 = vmatpush3.bf16.msra.mxu0 %v18011_v19  ;;  %12669 = vmatprep.mubr.msk.f32.mxu0 %vm16245_vm2, %v20305_v50  ;;  %v20684_v19 = vld [vmem:[#allocation65_spill] sm:$0xff] }
0x13f0   : > { %14041 = vmatprep.subr.bf16.mxu0 %v20653_v57 }
0x13f3   : > { %14043 = vmatpush3.bf16.msra.mxu0 %v18016_v41  ;;  %v20683_v41 = vld [vmem:[#allocation64_spill] sm:$0xff] }
0x13f4   : > { %14044 = vmatprep.subr.bf16.mxu0 %v20653_v57 }
0x13f7   : > { %14046 = vmatpush3.bf16.msra.mxu0 %v18022_v48  ;;  %v20679_v48 = vld [vmem:[#allocation60_spill] sm:$0xff] }
0x13f8   : > { %14047 = vmatprep.subr.bf16.mxu0 %v20653_v57 }
0x13fb   : > { %14049 = vmatpush3.bf16.msra.mxu0 %v18026_v38  ;;  %v20677_v38 = vld [vmem:[#allocation58_spill] sm:$0xff] }
0x13fc   : > { %12672 = vmatprep.subr.mxu0 %v20305_v50 }
0x14c1   : > { %v5713_v10 = vpop.f32.mrb[64].mxu0 }
0x14c2   : > { %v12652_v60 = vpop.f32.mrb[65].mxu0  ;;  %12670 = vmatmul.mubr.msk.f32.vlgmr.msra.gmra.mrb[56].mxu0 %vm3298_vm4, %v5713_v10  ;;  %v6478_v10 = vld [vmem:[#allocation2] sm:$0x1] }
0x14c3   : > { %12673 = vmatpush3.msk.msra.mxu0 %vm5047_vm6, %v18219_v18  ;;  %12674 = vmatprep.mubr.msk.f32.mxu0 %vm16245_vm2, %v20305_v50  ;;  %v11498_v60 = vld [vmem:[%s19494_s15 + $0x4] sm:$0xf] }
0x14c4   : > { %14050 = vmatprep.subr.bf16.mxu0 %v20653_v57 }
0x14c6   : > { %12675 = vmatmul.mubr.msk.f32.vlgmr.msra.gmra.mrb[66].mxu0 %vm5043_vm7, %v11472_v63  ;;  %v11500_v63 = vld [vmem:[%s19494_s15 + $0xc] sm:$0xf] }
0x14c7   : > { %14052 = vmatpush3.bf16.msra.mxu0 %v18035_v37  ;;  %12693 = vmatprep.mubr.msk.f32.mxu0 %vm16245_vm2, %v20305_v50 }
0x14c8   : > { %14053 = vmatprep.subr.bf16.mxu0 %v20653_v57 }
0x14cb   : > { %14055 = vmatpush3.bf16.msra.mxu0 %v18040_v62 }
0x14cc   : > { %14056 = vmatprep.subr.bf16.mxu0 %v20653_v57 }
0x14cf   : > { %14058 = vmatpush3.bf16.msra.mxu0 %v18046_v4  ;;  %v20675_v4 = vld [vmem:[#allocation56_spill] sm:$0xff] }
0x14d0   : > { %14059 = vmatprep.subr.bf16.mxu0 %v20653_v57 }
0x14d3   : > { %14061 = vmatpush3.bf16.msra.mxu0 %v18050_v55  ;;  %v6936_v55 = vld [vmem:[#allocation15 + $0x3] sm:$0x1] }
0x14d4   : > { %12696 = vmatprep.subr.mxu0 %v20305_v50 }
0x1599   : > { %v5862_v0 = vpop.f32.mrb[66].mxu0 }
0x159a   : > { %v12676_v8 = vpop.f32.mrb[67].mxu0  ;;  %12694 = vmatmul.mubr.msk.f32.vlgmr.msra.gmra.mrb[56].mxu0 %vm3298_vm4, %v5862_v0  ;;  %v6389_v0 = vld [vmem:[#allocation12 + $0x8] sm:$0xff] }
0x159b   : > { %12697 = vmatpush3.msk.msra.mxu0 %vm5047_vm6, %v18219_v18  ;;  %12698 = vmatprep.mubr.msk.f32.mxu0 %vm16245_vm2, %v20305_v50  ;;  %v6391_v8 = vld [vmem:[#allocation12 + $0x18] sm:$0xff] }
0x159c   : > { %14062 = vmatprep.subr.bf16.mxu0 %v20653_v57 }
0x159e   : > { %12699 = vmatmul.mubr.msk.f32.vlgmr.msra.gmra.mrb[68].mxu0 %vm5043_vm7, %v11476_v58  ;;  %v6388_v58 = vld [vmem:[#allocation12] sm:$0xff] }
0x159f   : > { %14064 = vmatpush3.bf16.msra.mxu0 %v18059_v59  ;;  %12717 = vmatprep.mubr.msk.f32.mxu0 %vm16245_vm2, %v20305_v50  ;;  %v6787_v59 = vld [vmem:[#allocation15 + $0x2] sm:$0x1] }
0x15a0   : > { %14065 = vmatprep.subr.bf16.mxu0 %v20653_v57 }
0x15a3   : > { %14067 = vmatpush3.bf16.msra.mxu0 %v18064_v44  ;;  %v6638_v44 = vld [vmem:[#allocation15 + $0x1] sm:$0x1] }
0x15a4   : > { %14068 = vmatprep.subr.bf16.mxu0 %v20653_v57 }
0x15a7   : > { %14070 = vmatpush3.bf16.msra.mxu0 %v18070_v56  ;;  %v6489_v56 = vld [vmem:[#allocation15] sm:$0x1] }
0x15a8   : > { %14071 = vmatprep.subr.bf16.mxu0 %v20653_v57 }
0x15ab   : > { %14073 = vmatpush3.bf16.msra.mxu0 %v18074_v16 }
0x15ac   : > { %12720 = vmatprep.subr.mxu0 %v20305_v50 }
0x1671   : > { %v6011_v3 = vpop.f32.mrb[68].mxu0 }
0x1672   : > { %v12700_v36 = vpop.f32.mrb[69].mxu0  ;;  %12718 = vmatmul.mubr.msk.f32.vlgmr.msra.gmra.mrb[56].mxu0 %vm3298_vm4, %v6011_v3  ;;  %v14098_v3 = vpack.c.bf16 %v6391_v8, %v6389_v0  ;;  %v6397_v0 = vld [vmem:[#allocation12 + $0x48] sm:$0xff]  ;;  %v6399_v8 = vld [vmem:[#allocation12 + $0x58] sm:$0xff] }
0x1673   : > { %12721 = vmatpush3.msk.msra.mxu0 %vm5047_vm6, %v18219_v18  ;;  %12722 = vmatprep.mubr.msk.f32.mxu0 %vm16245_vm2, %v20305_v50  ;;  %v6390_v36 = vld [vmem:[#allocation12 + $0x10] sm:$0xff] }
0x1674   : > { %14074 = vmatprep.subr.bf16.mxu0 %v20653_v57  ;;  %14099 = vmatprep.subr.bf16.mxu1 %v14098_v3  ;;  %v6398_v3 = vld [vmem:[#allocation12 + $0x50] sm:$0xff] }
0x1676   : > { %12723 = vmatmul.mubr.msk.f32.vlgmr.msra.gmra.mrb[70].mxu0 %vm5043_vm7, %v11480_v54  ;;  %v11502_v54 = vld [vmem:[%s19494_s15 + $0x14] sm:$0xf] }
0x1677   : > { %14076 = vmatpush3.bf16.msra.mxu0 %v18083_v43  ;;  %12741 = vmatprep.mubr.msk.f32.mxu0 %vm16245_vm2, %v20305_v50 }
0x1678   : > { %14077 = vmatprep.subr.bf16.mxu0 %v20653_v57 }
0x167b   : > { %14079 = vmatpush3.bf16.msra.mxu0 %v18088_v28  ;;  %v20674_v28 = vld [vmem:[#allocation55_spill] sm:$0xff] }
0x167c   : > { %14080 = vmatprep.subr.bf16.mxu0 %v20653_v57 }
0x167f   : > { %14082 = vmatpush3.bf16.msra.mxu0 %v18094_v23  ;;  %v20673_v23 = vld [vmem:[#allocation54_spill] sm:$0xff] }
0x1680   : > { %14083 = vmatprep.subr.bf16.mxu0 %v20653_v57 }
0x1683   : > { %14085 = vmatpush3.bf16.msra.mxu0 %v18098_v53  ;;  %v20672_v53 = vld [vmem:[#allocation53_spill] sm:$0xff] }
0x1684   : > { %12744 = vmatprep.subr.mxu0 %v20305_v50 }
0x1749   : > { %v6160_v52 = vpop.f32.mrb[70].mxu0 }
0x174a   : > { %v12724_v17 = vpop.f32.mrb[71].mxu0  ;;  %12742 = vmatmul.mubr.msk.f32.vlgmr.msra.gmra.mrb[56].mxu0 %vm3298_vm4, %v6160_v52  ;;  %v14100_v52 = vpack.c.bf16 %v6390_v36, %v6388_v58  ;;  %v14106_v58 = vpack.c.bf16 %v6399_v8, %v6397_v0  ;;  %v7831_v36 = vld [vmem:[%s20654_s7] sm:$0xf]  ;;  %s845_s7 = sand.u32 1, %s21259_s4  }
0x174b   : > { %12745 = vmatpush3.msk.msra.mxu0 %vm5047_vm6, %v18219_v18  ;;  %12746 = vmatprep.mubr.msk.f32.mxu0 %vm16245_vm2, %v20305_v50  ;;  %v5035_v18 = vld [vmem:[%s19491_s12] sm:$0xff]  ;;  %s846_s3 = scalar_lea.vmem [#allocation20], %s845_s7  ;;  %s11204_s4 = scalar_lea.sflag [#allocation5], %s845_s7 }
0x174c   : > { %14086 = vmatprep.subr.bf16.mxu0 %v20653_v57  ;;  %5038 = vperm.xlu1 %15852, %v5035_v18   ;;  %v6393_v17 = vld [vmem:[#allocation12 + $0x28] sm:$0xff]  ;;  %v6392_v18 = vld [vmem:[#allocation12 + $0x20] sm:$0xff]  ;;  %s11216_s0 = sshll.u32 %s846_s3, 4  ;;  %s19439_s0 = int_to_ptr.vmem [resolvable:$true] %s11216_s0 }
0x174d   : > { %14101 = vmatpush1.bf16.msra.mxu1 %v14100_v52  ;;  %s16138_s25 = scalar_lea.vmem %s19439_s0, 16  ;;  %p16145_p10 = scmp.lt.s32.totalorder %s19439_s0, %s16143_s19 }
0x174e   : > { %12747 = vmatmul.mubr.msk.f32.vlgmr.msra.gmra.mrb[72].mxu0 %vm5043_vm7, %v11484_v51  ;;  %v6395_v51 = vld [vmem:[#allocation12 + $0x38] sm:$0xff]  ;;  %p16139_p5 = scmp.ne.s32.totalorder %s19439_s0, %s16138_s25  ;;  %p16146_p13 = scmp.lt.s32.totalorder %s16144_s21, %s16138_s25 }
0x174f   : > { %14088 = vmatpush3.bf16.msra.mxu0 %v18107_v25  ;;  %12765 = vmatprep.mubr.msk.f32.mxu0 %vm16245_vm2, %v20305_v50  ;;  %v20671_v25 = vld [vmem:[#allocation52_spill] sm:$0xff] }
0x1750   : > { %14089 = vmatprep.subr.bf16.mxu0 %v20653_v57  ;;  %6481 = vperm.xlu1 %15852, %v6478_v10   ;;  %v14102_v10 = vpack.c.bf16 %v6395_v51, %v6393_v17  ;;  %v6401_v51 = vld [vmem:[#allocation12 + $0x68] sm:$0xff]  ;;  %p16140_p0 = pnand %p16139_p5, %p21263_p6  ;;  %p16147_p12 = por %p16146_p13, %p16145_p10 }
0x1752   : > { %14103 = vmatprep.subr.bf16.mxu1 %v14102_v10  ;;  %p16141_p9 = pneg %p16140_p0 }
0x1753   : > { %14091 = vmatpush3.bf16.msra.mxu0 %v18112_v9  ;;  %v20670_v9 = vld [vmem:[#allocation51_spill] sm:$0xff] }
0x1754   : > { %14092 = vmatprep.subr.bf16.mxu0 %v20653_v57  ;;  %7931 = vperm.xlu1 %15852, %v11498_v60   ;;  %v6394_v60 = vld [vmem:[#allocation12 + $0x30] sm:$0xff]  ;;  %p16148_p1 = pnand %p16147_p12, %p16141_p9 }
0x1757   : > { %14094 = vmatpush3.bf16.msra.mxu0 %v18118_v1  ;;  %v6396_v1 = vld [vmem:[#allocation12 + $0x40] sm:$0xff] }
0x1758   : > { %14095 = vmatprep.subr.bf16.mxu0 %v20653_v57  ;;  %8095 = vperm.xlu1 %15852, %v11500_v63   ;;  %v14104_v63 = vpack.c.bf16 %v6394_v60, %v6392_v18  ;;  %v6403_v18 = vld [vmem:[#allocation12 + $0x78] sm:$0xff]  ;;  %v6402_v60 = vld [vmem:[#allocation12 + $0x70] sm:$0xff] }
0x1759   : > { %v14110_v10 = vpack.c.bf16 %v6403_v18, %v6401_v51  ;;  %v20659_v51 = vld [vmem:[#allocation40_spill] sm:$0xff]  ;;  %v20660_v18 = vld [vmem:[#allocation41_spill] sm:$0xff]  ;;  %v20702_v57 = vld [vmem:[#allocation83_spill] sm:$0xff] }
0x175a   : > { %14105 = vmatpush1.bf16.msra.mxu1 %v14104_v63 }
0x175b   : > { %14097 = vmatpush3.bf16.msra.mxu0 %v18122_v35  ;;  %v11504_v35 = vld [vmem:[%s19494_s15 + $0x1c] sm:$0xf]  ;;  %14107 = vmatprep.subr.bf16.mxu1 %v14106_v58 }
0x175c   : > { %8259 = vperm.xlu1 %15852, %v11502_v54   ;;  %v14108_v54 = vpack.c.bf16 %v6398_v3, %v6396_v1 }
0x175e   : > { %14109 = vmatpush1.bf16.msra.mxu1 %v14108_v54  ;;  %v20656_v54 = vld [vmem:[#allocation37_spill] sm:$0xff] }
0x175f   : > { %14111 = vmatprep.subr.bf16.mxu1 %v14110_v10  ;;  %v20661_v10 = vld [vmem:[#allocation42_spill] sm:$0xff] }
0x1760   : > { %8423 = vperm.xlu1 %15852, %v11504_v35   ;;  %v6400_v35 = vld [vmem:[#allocation12 + $0x60] sm:$0xff] }
0x1761   : > { %v14112_v63 = vpack.c.bf16 %v6402_v60, %v6400_v35  ;;  %v20662_v35 = vld [vmem:[#allocation43_spill] sm:$0xff]  ;;  %v20663_v60 = vld [vmem:[#allocation44_spill] sm:$0xff] }
0x1763   : > { %14113 = vmatpush1.bf16.msra.mxu1 %v14112_v63  ;;  %v20664_v63 = vld [vmem:[#allocation45_spill] sm:$0xff] }
0x1764   : > { %7834 = vperm.xlu1 %15852, %v7831_v36   ;;  %14115 = vmatprep.subr.bf16.mxu1 %v16702_v11  ;;  %v20655_v36 = vld [vmem:[#allocation36_spill] sm:$0xff] }
0x17cb   : > { %v5039_v1 = vpop.permute.xlu1 %5038 }
0x1821   : > { %v6309_v52 = vpop.f32.mrb[72].mxu0 }
0x1822   : > { %v12748_v17 = vpop.f32.mrb[73].mxu0  ;;  %12766 = vmatmul.mubr.msk.f32.vlgmr.msra.gmra.mrb[56].mxu0 %vm3298_vm4, %v6309_v52  ;;  %v20657_v52 = vld [vmem:[#allocation38_spill] sm:$0xff] }
0x1823   : > { %6557 = vmatprep.mubr.f32.mxu0 %v20305_v50  ;;  %v20658_v17 = vld [vmem:[#allocation39_spill] sm:$0xff] }
0x18f5   : > { %v6382_v0 = vpop.f32.mrb[56].mxu0 }
0x18f6   : > { %v15583_v8 = vadd.f32 %v6382_v0, %v5039_v1  ;;  %v12767_v58 = vpop.f32.mrb[57].mxu0  ;;  %v20665_v1 = vld [vmem:[#allocation46_spill] sm:$0xff]  ;;  %v20666_v0 = vld [vmem:[#allocation47_spill] sm:$0xff] }
0x18f7   : > { %v20668_v58 = vld [vmem:[#allocation49_spill] sm:$0xff] }
0x18f8   : > { %v6387_v3 = vmax.f32 %v15583_v8, 0.0  ;;  %v20667_v8 = vld [vmem:[#allocation48_spill] sm:$0xff] }
0x18fa   : > { %11488 = vmatmul.mubr.msk.f32.vlgmr.msra.gmra.mrb[4].mxu1 %vm3298_vm4, %v6387_v3  ;;  %v20669_v3 = vld [vmem:[#allocation50_spill] sm:$0xff] }
0x18fb   : > { %14117 = vmatpush1.bf16.msra.mxu1 %v16708_v13 }
0x18fc   : > { %14119 = vmatprep.subr.bf16.mxu1 %v16712_v14 }
0x18ff   : > { %14121 = vmatpush1.bf16.msra.mxu1 %v16724_v20 }
0x1900   : > { %14123 = vmatprep.subr.bf16.mxu1 %v16730_v21 }
0x1903   : > { %14125 = vmatpush1.bf16.msra.mxu1 %v16738_v26 }
0x1904   : > { %14127 = vmatprep.subr.bf16.mxu1 %v16741_v27 }
0x1907   : > { %14129 = vmatpush1.bf16.msra.mxu1 %v16744_v32 }
0x1908   : > { %14131 = vmatprep.subr.bf16.mxu1 %v16750_v34 }
0x190b   : > { %14133 = vmatpush1.bf16.msra.mxu1 %v16759_v39 }
0x190c   : > { %14135 = vmatprep.subr.bf16.mxu1 %v16762_v40 }
0x190f   : > { %14137 = vmatpush1.bf16.msra.mxu1 %v16765_v45 }
0x1910   : > { %14139 = vmatprep.subr.bf16.mxu1 %v16768_v46 }
0x1913   : > { %14141 = vmatpush1.bf16.msra.mxu1 %v20655_v36 }
0x1914   : > { %14143 = vmatprep.subr.bf16.mxu1 %v20656_v54 }
0x1917   : > { %14145 = vmatpush1.bf16.msra.mxu1 %v20657_v52 }
0x1918   : > { %14147 = vmatprep.subr.bf16.mxu1 %v20658_v17 }
0x191b   : > { %14149 = vmatpush1.bf16.msra.mxu1 %v20659_v51 }
0x191c   : > { %14151 = vmatprep.subr.bf16.mxu1 %v20660_v18 }
0x191f   : > { %14153 = vmatpush1.bf16.msra.mxu1 %v20661_v10 }
0x1920   : > { %14155 = vmatprep.subr.bf16.mxu1 %v20662_v35 }
0x1923   : > { %14157 = vmatpush1.bf16.msra.mxu1 %v20663_v60 }
0x1924   : > { %14159 = vmatprep.subr.bf16.mxu1 %v20664_v63 }
0x1927   : > { %14161 = vmatpush1.bf16.msra.mxu1 %v20665_v1 }
0x1928   : > { %14163 = vmatprep.subr.bf16.mxu1 %v20666_v0 }
0x192b   : > { %14165 = vmatpush1.bf16.msra.mxu1 %v20667_v8 }
0x192c   : > { %14167 = vmatprep.subr.bf16.mxu1 %v20668_v58 }
0x192f   : > { %14169 = vmatpush1.bf16.msra.mxu1 %v20669_v3 }
0x1930   : > { %14171 = vmatprep.subr.bf16.mxu1 %v20670_v9 }
0x1933   : > { %14173 = vmatpush1.bf16.msra.mxu1 %v20671_v25 }
0x1934   : > { %14175 = vmatprep.subr.bf16.mxu1 %v20672_v53 }
0x1937   : > { %14177 = vmatpush1.bf16.msra.mxu1 %v20673_v23 }
0x1938   : > { %14179 = vmatprep.subr.bf16.mxu1 %v20674_v28 }
0x19cd   : > { %v6473_v43 = vpop.f32.mrb[4].mxu1 }
0x19ce   : > { %v6475_v16 = vpop.f32.mrb[5].mxu1 }
0x19cf   : > { %6493 = vmatprep.subr.mxu0 %v6475_v16 }
0x19d0   : > { %6494 = vmatpush1.msra.mxu0 %v6473_v43 }
0x19d1   : > { %11489 = vmatmul.mubr.msk.f32.vlgmr.msra.gmra.mrb[74].mxu0 %vm3216_vm3, %v6489_v56  ;;  %6642 = vmatprep.subr.mxu0 %v6475_v16  ;;  %v7085_v56 = vld [vmem:[#allocation15 + $0x4] sm:$0x1] }
0x19d2   : > { %6643 = vmatpush1.msra.mxu0 %v6473_v43  ;;  %6706 = vmatprep.mubr.f32.mxu0 %v20305_v50 }
0x19d3   : > { %6791 = vmatprep.subr.mxu0 %v6475_v16 }
0x19d5   : > { %11490 = vmatmul.mubr.msk.f32.vlgmr.msra.gmra.mrb[76].mxu0 %vm3216_vm3, %v6638_v44  ;;  %v7234_v44 = vld [vmem:[#allocation15 + $0x5] sm:$0x1] }
0x19d6   : > { %6792 = vmatpush1.msra.mxu0 %v6473_v43  ;;  %6855 = vmatprep.mubr.f32.mxu0 %v20305_v50 }
0x19d7   : > { %6940 = vmatprep.subr.mxu0 %v6475_v16 }
0x19d9   : > { %11491 = vmatmul.mubr.msk.f32.vlgmr.msra.gmra.mrb[78].mxu0 %vm3216_vm3, %v6787_v59  ;;  %v7383_v59 = vld [vmem:[#allocation15 + $0x6] sm:$0x1] }
0x19da   : > { %6941 = vmatpush1.msra.mxu0 %v6473_v43  ;;  %7004 = vmatprep.mubr.f32.mxu0 %v20305_v50 }
0x19db   : > { %7089 = vmatprep.subr.mxu0 %v6475_v16 }
0x19dd   : > { %11492 = vmatmul.mubr.msk.f32.vlgmr.msra.gmra.mrb[80].mxu0 %vm3216_vm3, %v6936_v55  ;;  %v7532_v55 = vld [vmem:[#allocation15 + $0x7] sm:$0x1] }
0x19de   : > { %7090 = vmatpush1.msra.mxu0 %v6473_v43  ;;  %7153 = vmatprep.mubr.f32.mxu0 %v20305_v50 }
0x19df   : > { %7238 = vmatprep.subr.mxu0 %v6475_v16 }
0x19e1   : > { %11493 = vmatmul.mubr.msk.f32.vlgmr.msra.gmra.mrb[82].mxu0 %vm3216_vm3, %v7085_v56 }
0x19e2   : > { %7239 = vmatpush1.msra.mxu0 %v6473_v43  ;;  %7302 = vmatprep.mubr.f32.mxu0 %v20305_v50 }
0x19e3   : > { %7387 = vmatprep.subr.mxu0 %v6475_v16 }
0x19e5   : > { %11494 = vmatmul.mubr.msk.f32.vlgmr.msra.gmra.mrb[84].mxu0 %vm3216_vm3, %v7234_v44 }
0x19e6   : > { %7388 = vmatpush1.msra.mxu0 %v6473_v43  ;;  %7451 = vmatprep.mubr.f32.mxu0 %v20305_v50 }
0x19e7   : > { %7536 = vmatprep.subr.mxu0 %v6475_v16 }
0x19e9   : > { %11495 = vmatmul.mubr.msk.f32.vlgmr.msra.gmra.mrb[86].mxu0 %vm3216_vm3, %v7383_v59  ;;  %v20676_v59 = vld [vmem:[#allocation57_spill] sm:$0xff] }
0x19ea   : > { %7537 = vmatpush1.msra.mxu0 %v6473_v43  ;;  %7600 = vmatprep.mubr.f32.mxu0 %v20305_v50 }
0x19eb   : > { %7685 = vmatprep.subr.mxu0 %v6475_v16 }
0x19ed   : > { %11496 = vmatmul.mubr.msk.f32.vlgmr.msra.gmra.mrb[88].mxu0 %vm3216_vm3, %v7532_v55 }
0x19ee   : > { %7686 = vmatpush1.msra.mxu0 %v6473_v43  ;;  %7749 = vmatprep.mubr.f32.mxu0 %v20305_v50  ;;  %v20678_v43 = vld [vmem:[#allocation59_spill] sm:$0xff]  ;;  %v20703_v50 = vld [vmem:[#allocation84_spill] sm:$0xff] }
0x19ef   : > { %14691 = vmatprep.subr.bf16.mxu0 %v16702_v11  ;;  %v20680_v11 = vld [vmem:[#allocation61_spill] sm:$0xff] }
0x1aa4   : > { %v6559_v56 = vpop.f32.mrb[74].mxu0 }
0x1aa5   : > { %v6561_v44 = vpop.f32.mrb[75].mxu0 }
0x1aa6   : > { %6628 = vmatprep.mubr.f32.mxu1 %v6561_v44  ;;  %v20681_v44 = vld [vmem:[#allocation62_spill] sm:$0xff] }
0x1aa7   : > { %6629 = vmatmul.mubr.f32.vlgmr.msra.gmra.mrb[6].mxu1 %v6559_v56  ;;  %v20682_v56 = vld [vmem:[#allocation63_spill] sm:$0xff] }
0x1aa8   : > { %14181 = vmatpush1.bf16.msra.mxu1 %v20675_v4  ;;  %v6708_v62 = vpop.f32.mrb[76].mxu0 }
0x1aa9   : > { %14183 = vmatprep.subr.bf16.mxu1 %v20676_v59  ;;  %v6710_v37 = vpop.f32.mrb[77].mxu0 }
0x1aaa   : > { %6777 = vmatprep.mubr.f32.mxu1 %v6710_v37  ;;  %v20685_v37 = vld [vmem:[#allocation66_spill] sm:$0xff] }
0x1aac   : > { %14185 = vmatpush1.bf16.msra.mxu1 %v20677_v38  ;;  %v18468_v16 = vpop.f32.mrb[78].mxu0 }
0x1aad   : > { %14187 = vmatprep.subr.bf16.mxu1 %v20678_v43  ;;  %v6859_v55 = vpop.f32.mrb[79].mxu0 }
0x1ab0   : > { %14189 = vmatpush1.bf16.msra.mxu1 %v20679_v48 }
0x1ab1   : > { %14191 = vmatprep.subr.bf16.mxu1 %v20680_v11 }
0x1ab4   : > { %14193 = vmatpush1.bf16.msra.mxu1 %v20681_v44 }
0x1ab5   : > { %14195 = vmatprep.subr.bf16.mxu1 %v20682_v56 }
0x1ab8   : > { %14197 = vmatpush1.bf16.msra.mxu1 %v20683_v41 }
0x1ab9   : > { %14199 = vmatprep.subr.bf16.mxu1 %v20684_v19 }
0x1abc   : > { %14201 = vmatpush1.bf16.msra.mxu1 %v20685_v37 }
0x1abd   : > { %14203 = vmatprep.subr.bf16.mxu1 %v20686_v15 }
0x1ac0   : > { %14205 = vmatpush1.bf16.msra.mxu1 %v20687_v49 }
0x1ac1   : > { %14207 = vmatprep.subr.bf16.mxu1 %v20688_v22 }
0x1ac4   : > { %14209 = vmatpush1.bf16.msra.mxu1 %v20689_v47 }
0x1ac5   : > { %14211 = vmatprep.subr.bf16.mxu1 %v20690_v31 }
0x1ac8   : > { %14213 = vmatpush1.bf16.msra.mxu1 %v20691_v5 }
0x1ac9   : > { %14215 = vmatprep.subr.bf16.mxu1 %v20692_v12  ;;  %v20715_v12 = vld [vmem:[#allocation96_spill] sm:$0xff] }
0x1acc   : > { %14217 = vmatpush1.bf16.msra.mxu1 %v20693_v61  ;;  %v20704_v61 = vld [vmem:[#allocation85_spill] sm:$0xff] }
0x1acd   : > { %14219 = vmatprep.subr.bf16.mxu1 %v20694_v42  ;;  %v18497_v42 = vpop.f32.mrb[80].mxu0 }
0x1ad0   : > { %14221 = vmatpush1.bf16.msra.mxu1 %v20695_v33  ;;  %v20705_v33 = vld [vmem:[#allocation86_spill] sm:$0xff] }
0x1ad1   : > { %14223 = vmatprep.subr.bf16.mxu1 %v20696_v7  ;;  %v7008_v7 = vpop.f32.mrb[81].mxu0 }
0x1ad4   : > { %14225 = vmatpush1.bf16.msra.mxu1 %v20697_v29  ;;  %v20706_v29 = vld [vmem:[#allocation87_spill] sm:$0xff] }
0x1ad5   : > { %14227 = vmatprep.subr.bf16.mxu1 %v20698_v2  ;;  %v20707_v2 = vld [vmem:[#allocation88_spill] sm:$0xff] }
0x1ad8   : > { %14229 = vmatpush1.bf16.msra.mxu1 %v20699_v30  ;;  %v20713_v30 = vld [vmem:[#allocation94_spill] sm:$0xff] }
0x1ad9   : > { %14231 = vmatprep.subr.bf16.mxu1 %v20700_v24  ;;  %v20708_v24 = vld [vmem:[#allocation89_spill] sm:$0xff] }
0x1adc   : > { %14233 = vmatpush1.bf16.msra.mxu1 %v20701_v6  ;;  %v20709_v6 = vld [vmem:[#allocation90_spill] sm:$0xff] }
0x1add   : > { %14235 = vmatprep.subr.bf16.mxu1 %v20702_v57  ;;  %v20710_v57 = vld [vmem:[#allocation91_spill] sm:$0xff] }
0x1ae0   : > { %14237 = vmatpush1.bf16.msra.mxu1 %v20703_v50  ;;  %v20711_v50 = vld [vmem:[#allocation92_spill] sm:$0xff] }
0x1ae1   : > { %14239 = vmatprep.subr.bf16.mxu1 %v20704_v61  ;;  %v20712_v61 = vld [vmem:[#allocation93_spill] sm:$0xff] }
0x1ae4   : > { %14241 = vmatpush1.bf16.msra.mxu1 %v20705_v33  ;;  %v20714_v33 = vld [vmem:[#allocation95_spill] sm:$0xff] }
0x1ae5   : > { %14243 = vmatprep.subr.bf16.mxu1 %v20706_v29 }
0x1ae7   : > { %6778 = vmatmul.mubr.f32.vlgmr.msra.gmra.mrb[6].mxu1 %v6708_v62  ;;  %v20716_v62 = vld [vmem:[#allocation97_spill] sm:$0xff] }
0x1ae8   : > { %14245 = vmatpush1.bf16.msra.mxu1 %v20707_v2  ;;  %6926 = vmatprep.mubr.f32.mxu1 %v6859_v55  ;;  %v20717_v2 = vld [vmem:[#allocation98_spill] sm:$0xff]  ;;  %v20718_v55 = vld [vmem:[#allocation99_spill] sm:$0xff] }
0x1ae9   : > { %14247 = vmatprep.subr.bf16.mxu1 %v20708_v24  ;;  %v20719_v24 = vld [vmem:[#allocation100_spill] sm:$0xff] }
0x1aec   : > { %14249 = vmatpush1.bf16.msra.mxu1 %v20709_v6  ;;  %v20720_v6 = vld [vmem:[#allocation101_spill] sm:$0xff] }
0x1aed   : > { %14251 = vmatprep.subr.bf16.mxu1 %v20710_v57  ;;  %v20721_v57 = vld [vmem:[#allocation102_spill] sm:$0xff] }
0x1af0   : > { %14253 = vmatpush1.bf16.msra.mxu1 %v20711_v50  ;;  %v20722_v50 = vld [vmem:[#allocation103_spill] sm:$0xff] }
0x1af1   : > { %14255 = vmatprep.subr.bf16.mxu1 %v20712_v61  ;;  %v20723_v61 = vld [vmem:[#allocation104_spill] sm:$0xff] }
0x1af4   : > { %14257 = vmatpush1.bf16.msra.mxu1 %v20713_v30  ;;  %v20724_v30 = vld [vmem:[#allocation105_spill] sm:$0xff] }
0x1af5   : > { %14259 = vmatprep.subr.bf16.mxu1 %v20714_v33  ;;  %v20725_v33 = vld [vmem:[#allocation106_spill] sm:$0xff] }
0x1af8   : > { %14261 = vmatpush1.bf16.msra.mxu1 %v20715_v12  ;;  %v20726_v12 = vld [vmem:[#allocation107_spill] sm:$0xff] }
0x1af9   : > { %14263 = vmatprep.subr.bf16.mxu1 %v20716_v62  ;;  %v20727_v62 = vld [vmem:[#allocation108_spill] sm:$0xff] }
0x1afc   : > { %14265 = vmatpush1.bf16.msra.mxu1 %v20717_v2  ;;  %v20728_v2 = vld [vmem:[#allocation109_spill] sm:$0xff] }
0x1afd   : > { %14267 = vmatprep.subr.bf16.mxu1 %v20718_v55  ;;  %v20729_v55 = vld [vmem:[#allocation110_spill] sm:$0xff] }
0x1b00   : > { %14269 = vmatpush1.bf16.msra.mxu1 %v20719_v24  ;;  %v20730_v24 = vld [vmem:[#allocation111_spill] sm:$0xff] }
0x1b01   : > { %14271 = vmatprep.subr.bf16.mxu1 %v20720_v6  ;;  %v20731_v6 = vld [vmem:[#allocation112_spill] sm:$0xff] }
0x1b04   : > { %14273 = vmatpush1.bf16.msra.mxu1 %v20721_v57  ;;  %v20732_v57 = vld [vmem:[#allocation113_spill] sm:$0xff] }
0x1b05   : > { %14275 = vmatprep.subr.bf16.mxu1 %v20722_v50  ;;  %v20733_v50 = vld [vmem:[#allocation114_spill] sm:$0xff] }
0x1b08   : > { %14277 = vmatpush1.bf16.msra.mxu1 %v20723_v61  ;;  %v20734_v61 = vld [vmem:[#allocation115_spill] sm:$0xff] }
0x1b09   : > { %14279 = vmatprep.subr.bf16.mxu1 %v20724_v30  ;;  %v20735_v30 = vld [vmem:[#allocation116_spill] sm:$0xff] }
0x1b0c   : > { %14281 = vmatpush1.bf16.msra.mxu1 %v20725_v33  ;;  %v20736_v33 = vld [vmem:[#allocation117_spill] sm:$0xff] }
0x1b0d   : > { %14283 = vmatprep.subr.bf16.mxu1 %v20726_v12  ;;  %v18531_v12 = vpop.f32.mrb[82].mxu0 }
0x1b10   : > { %14285 = vmatpush1.bf16.msra.mxu1 %v20727_v62  ;;  %v20737_v62 = vld [vmem:[#allocation118_spill] sm:$0xff] }
0x1b11   : > { %14287 = vmatprep.subr.bf16.mxu1 %v20728_v2  ;;  %v7157_v2 = vpop.f32.mrb[83].mxu0 }
0x1b14   : > { %14289 = vmatpush1.bf16.msra.mxu1 %v20729_v55  ;;  %v20738_v55 = vld [vmem:[#allocation119_spill] sm:$0xff] }
0x1b15   : > { %14291 = vmatprep.subr.bf16.mxu1 %v20730_v24  ;;  %v20745_v24 = vld [vmem:[#allocation126_spill] sm:$0xff] }
0x1b18   : > { %14293 = vmatpush1.bf16.msra.mxu1 %v20731_v6  ;;  %v20739_v6 = vld [vmem:[#allocation120_spill] sm:$0xff] }
0x1b19   : > { %14295 = vmatprep.subr.bf16.mxu1 %v20732_v57  ;;  %v20740_v57 = vld [vmem:[#allocation121_spill] sm:$0xff] }
0x1b1c   : > { %14297 = vmatpush1.bf16.msra.mxu1 %v20733_v50  ;;  %v20741_v50 = vld [vmem:[#allocation122_spill] sm:$0xff] }
0x1b1d   : > { %14299 = vmatprep.subr.bf16.mxu1 %v20734_v61  ;;  %v20742_v61 = vld [vmem:[#allocation123_spill] sm:$0xff] }
0x1b20   : > { %14301 = vmatpush1.bf16.msra.mxu1 %v20735_v30  ;;  %v20743_v30 = vld [vmem:[#allocation124_spill] sm:$0xff] }
0x1b21   : > { %14303 = vmatprep.subr.bf16.mxu1 %v20736_v33  ;;  %v20744_v33 = vld [vmem:[#allocation125_spill] sm:$0xff] }
0x1b24   : > { %14305 = vmatpush1.bf16.msra.mxu1 %v20737_v62  ;;  %v20746_v62 = vld [vmem:[#allocation127_spill] sm:$0xff] }
0x1b25   : > { %14307 = vmatprep.subr.bf16.mxu1 %v20738_v55  ;;  %v20747_v55 = vld [vmem:[#allocation128_spill] sm:$0xff] }
0x1b27   : > { %6927 = vmatmul.mubr.f32.vlgmr.msra.gmra.mrb[6].mxu1 %v18468_v16  ;;  %v20748_v16 = vld [vmem:[#allocation129_spill] sm:$0xff] }
0x1b28   : > { %14309 = vmatpush1.bf16.msra.mxu1 %v20739_v6  ;;  %7075 = vmatprep.mubr.f32.mxu1 %v7008_v7  ;;  %v20749_v6 = vld [vmem:[#allocation130_spill] sm:$0xff]  ;;  %v20750_v7 = vld [vmem:[#allocation131_spill] sm:$0xff] }
0x1b29   : > { %14311 = vmatprep.subr.bf16.mxu1 %v20740_v57  ;;  %v20751_v57 = vld [vmem:[#allocation132_spill] sm:$0xff] }
0x1b2c   : > { %14313 = vmatpush1.bf16.msra.mxu1 %v20741_v50  ;;  %v20752_v50 = vld [vmem:[#allocation133_spill] sm:$0xff] }
0x1b2d   : > { %14315 = vmatprep.subr.bf16.mxu1 %v20742_v61  ;;  %v20753_v61 = vld [vmem:[#allocation134_spill] sm:$0xff] }
0x1b30   : > { %14317 = vmatpush1.bf16.msra.mxu1 %v20743_v30  ;;  %v20754_v30 = vld [vmem:[#allocation135_spill] sm:$0xff] }
0x1b31   : > { %14319 = vmatprep.subr.bf16.mxu1 %v20744_v33  ;;  %v20755_v33 = vld [vmem:[#allocation136_spill] sm:$0xff] }
0x1b34   : > { %14321 = vmatpush1.bf16.msra.mxu1 %v20745_v24  ;;  %v20756_v24 = vld [vmem:[#allocation137_spill] sm:$0xff] }
0x1b35   : > { %14323 = vmatprep.subr.bf16.mxu1 %v20746_v62  ;;  %v20757_v62 = vld [vmem:[#allocation138_spill] sm:$0xff] }
0x1b38   : > { %14325 = vmatpush1.bf16.msra.mxu1 %v20747_v55  ;;  %v20758_v55 = vld [vmem:[#allocation139_spill] sm:$0xff] }
0x1b39   : > { %14327 = vmatprep.subr.bf16.mxu1 %v20748_v16  ;;  %v7681_v16 = vld [vmem:[#allocation15 + $0x8] sm:$0x1] }
0x1b3a   : > { %11497 = vmatmul.mubr.msk.f32.vlgmr.msra.gmra.mrb[90].mxu0 %vm3216_vm3, %v7681_v16  ;;  %v20765_v16 = vld [vmem:[#allocation146_spill] sm:$0xff] }
0x1b3b   : > { %14693 = vmatpush1.bf16.msra.mxu0 %v16708_v13  ;;  %v20766_v13 = vld [vmem:[#allocation147_spill] sm:$0xff] }
0x1b3c   : > { %14329 = vmatpush1.bf16.msra.mxu1 %v20749_v6  ;;  %v20759_v6 = vld [vmem:[#allocation140_spill] sm:$0xff]  ;;  %14695 = vmatprep.subr.bf16.mxu0 %v16712_v14 }
0x1b3d   : > { %14331 = vmatprep.subr.bf16.mxu1 %v20750_v7  ;;  %v20767_v14 = vld [vmem:[#allocation148_spill] sm:$0xff] }
0x1b3f   : > { %14697 = vmatpush1.bf16.msra.mxu0 %v16724_v20  ;;  %v20768_v20 = vld [vmem:[#allocation149_spill] sm:$0xff] }
0x1b40   : > { %14333 = vmatpush1.bf16.msra.mxu1 %v20751_v57  ;;  %v20760_v57 = vld [vmem:[#allocation141_spill] sm:$0xff]  ;;  %14699 = vmatprep.subr.bf16.mxu0 %v16730_v21  ;;  %v18575_v21 = vpop.f32.mrb[84].mxu0 }
0x1b41   : > { %14335 = vmatprep.subr.bf16.mxu1 %v20752_v50 }
0x1b43   : > { %14701 = vmatpush1.bf16.msra.mxu0 %v16738_v26  ;;  %v20769_v26 = vld [vmem:[#allocation150_spill] sm:$0xff] }
0x1b44   : > { %14337 = vmatpush1.bf16.msra.mxu1 %v20753_v61  ;;  %14703 = vmatprep.subr.bf16.mxu0 %v16741_v27  ;;  %v7306_v27 = vpop.f32.mrb[85].mxu0 }
0x1b45   : > { %14339 = vmatprep.subr.bf16.mxu1 %v20754_v30  ;;  %v20761_v30 = vld [vmem:[#allocation142_spill] sm:$0xff] }
0x1b47   : > { %14705 = vmatpush1.bf16.msra.mxu0 %v16744_v32  ;;  %v20771_v32 = vld [vmem:[#allocation152_spill] sm:$0xff] }
0x1b48   : > { %14341 = vmatpush1.bf16.msra.mxu1 %v20755_v33  ;;  %v20762_v33 = vld [vmem:[#allocation143_spill] sm:$0xff]  ;;  %14707 = vmatprep.subr.bf16.mxu0 %v16750_v34  ;;  %v20772_v34 = vld [vmem:[#allocation153_spill] sm:$0xff] }
0x1b49   : > { %14343 = vmatprep.subr.bf16.mxu1 %v20756_v24 }
0x1b4b   : > { %14709 = vmatpush1.bf16.msra.mxu0 %v16759_v39  ;;  %v20773_v39 = vld [vmem:[#allocation154_spill] sm:$0xff] }
0x1b4c   : > { %14345 = vmatpush1.bf16.msra.mxu1 %v20757_v62  ;;  %v20764_v62 = vld [vmem:[#allocation145_spill] sm:$0xff]  ;;  %14711 = vmatprep.subr.bf16.mxu0 %v16762_v40  ;;  %v20774_v40 = vld [vmem:[#allocation155_spill] sm:$0xff] }
0x1b4d   : > { %14347 = vmatprep.subr.bf16.mxu1 %v20758_v55  ;;  %v20763_v55 = vld [vmem:[#allocation144_spill] sm:$0xff] }
0x1b4f   : > { %14713 = vmatpush1.bf16.msra.mxu0 %v16765_v45  ;;  %v20775_v45 = vld [vmem:[#allocation156_spill] sm:$0xff] }
0x1b50   : > { %14349 = vmatpush1.bf16.msra.mxu1 %v20759_v6  ;;  %14715 = vmatprep.subr.bf16.mxu0 %v16768_v46  ;;  %v20776_v46 = vld [vmem:[#allocation157_spill] sm:$0xff] }
0x1b51   : > { %14351 = vmatprep.subr.bf16.mxu1 %v20760_v57 }
0x1b53   : > { %14717 = vmatpush1.bf16.msra.mxu0 %v20655_v36  ;;  %v20779_v36 = vld [vmem:[#allocation160_spill] sm:$0xff] }
0x1b54   : > { %14353 = vmatpush1.bf16.msra.mxu1 %v20761_v30  ;;  %14719 = vmatprep.subr.bf16.mxu0 %v20656_v54  ;;  %v20780_v54 = vld [vmem:[#allocation161_spill] sm:$0xff] }
0x1b55   : > { %14355 = vmatprep.subr.bf16.mxu1 %v20762_v33 }
0x1b57   : > { %14721 = vmatpush1.bf16.msra.mxu0 %v20657_v52  ;;  %v20781_v52 = vld [vmem:[#allocation162_spill] sm:$0xff] }
0x1b58   : > { %14357 = vmatpush1.bf16.msra.mxu1 %v20763_v55  ;;  %14723 = vmatprep.subr.bf16.mxu0 %v20658_v17  ;;  %v20782_v17 = vld [vmem:[#allocation163_spill] sm:$0xff] }
0x1b59   : > { %14359 = vmatprep.subr.bf16.mxu1 %v20764_v62 }
0x1b5b   : > { %14725 = vmatpush1.bf16.msra.mxu0 %v20659_v51  ;;  %v20783_v51 = vld [vmem:[#allocation164_spill] sm:$0xff] }
0x1b5c   : > { %14361 = vmatpush1.bf16.msra.mxu1 %v20765_v16  ;;  %v20770_v16 = vld [vmem:[#allocation151_spill] sm:$0xff]  ;;  %14727 = vmatprep.subr.bf16.mxu0 %v20660_v18  ;;  %v20784_v18 = vld [vmem:[#allocation165_spill] sm:$0xff] }
0x1b5d   : > { %14363 = vmatprep.subr.bf16.mxu1 %v20766_v13 }
0x1b5f   : > { %14729 = vmatpush1.bf16.msra.mxu0 %v20661_v10  ;;  %v20785_v10 = vld [vmem:[#allocation166_spill] sm:$0xff] }
0x1b60   : > { %14365 = vmatpush1.bf16.msra.mxu1 %v20767_v14  ;;  %14731 = vmatprep.subr.bf16.mxu0 %v20662_v35  ;;  %v20786_v35 = vld [vmem:[#allocation167_spill] sm:$0xff] }
0x1b61   : > { %14367 = vmatprep.subr.bf16.mxu1 %v20768_v20 }
0x1b63   : > { %14733 = vmatpush1.bf16.msra.mxu0 %v20663_v60  ;;  %v20787_v60 = vld [vmem:[#allocation168_spill] sm:$0xff] }
0x1b64   : > { %14369 = vmatpush1.bf16.msra.mxu1 %v20769_v26  ;;  %14735 = vmatprep.subr.bf16.mxu0 %v20664_v63  ;;  %v20788_v63 = vld [vmem:[#allocation169_spill] sm:$0xff] }
0x1b65   : > { %14371 = vmatprep.subr.bf16.mxu1 %v20770_v16 }
0x1b67   : > { %7076 = vmatmul.mubr.f32.vlgmr.msra.gmra.mrb[6].mxu1 %v18497_v42  ;;  %v20778_v42 = vld [vmem:[#allocation159_spill] sm:$0xff]  ;;  %14737 = vmatpush1.bf16.msra.mxu0 %v20665_v1  ;;  %v20789_v1 = vld [vmem:[#allocation170_spill] sm:$0xff] }
0x1b68   : > { %14373 = vmatpush1.bf16.msra.mxu1 %v20771_v32  ;;  %7224 = vmatprep.mubr.f32.mxu1 %v7157_v2  ;;  %v20777_v2 = vld [vmem:[#allocation158_spill] sm:$0xff] }
0x1b69   : > { %14375 = vmatprep.subr.bf16.mxu1 %v20772_v34  ;;  %14739 = vmatprep.subr.bf16.mxu0 %v20666_v0  ;;  %v20790_v0 = vld [vmem:[#allocation171_spill] sm:$0xff] }
0x1b6b   : > { %14741 = vmatpush1.bf16.msra.mxu0 %v20667_v8  ;;  %v20791_v8 = vld [vmem:[#allocation172_spill] sm:$0xff] }
0x1b6c   : > { %14377 = vmatpush1.bf16.msra.mxu1 %v20773_v39  ;;  %14743 = vmatprep.subr.bf16.mxu0 %v20668_v58  ;;  %v20792_v58 = vld [vmem:[#allocation173_spill] sm:$0xff] }
0x1b6d   : > { %14379 = vmatprep.subr.bf16.mxu1 %v20774_v40 }
0x1b6f   : > { %14745 = vmatpush1.bf16.msra.mxu0 %v20669_v3  ;;  %v20794_v3 = vld [vmem:[#allocation175_spill] sm:$0xff] }
0x1b70   : > { %14381 = vmatpush1.bf16.msra.mxu1 %v20775_v45  ;;  %14747 = vmatprep.subr.bf16.mxu0 %v20670_v9  ;;  %v20793_v9 = vld [vmem:[#allocation174_spill] sm:$0xff] }
0x1b71   : > { %14383 = vmatprep.subr.bf16.mxu1 %v20776_v46 }
0x1b73   : > { %14749 = vmatpush1.bf16.msra.mxu0 %v20671_v25  ;;  %v20796_v25 = vld [vmem:[#allocation177_spill] sm:$0xff] }
0x1b74   : > { %14385 = vmatpush1.bf16.msra.mxu1 %v20777_v2  ;;  %14751 = vmatprep.subr.bf16.mxu0 %v20672_v53  ;;  %v20797_v53 = vld [vmem:[#allocation178_spill] sm:$0xff] }
0x1b75   : > { %14387 = vmatprep.subr.bf16.mxu1 %v20778_v42 }
0x1b77   : > { %14753 = vmatpush1.bf16.msra.mxu0 %v20673_v23  ;;  %v20800_v23 = vld [vmem:[#allocation181_spill] sm:$0xff] }
0x1b78   : > { %14389 = vmatpush1.bf16.msra.mxu1 %v20779_v36  ;;  %14755 = vmatprep.subr.bf16.mxu0 %v20674_v28  ;;  %v18634_v28 = vpop.f32.mrb[86].mxu0 }
0x1b79   : > { %14391 = vmatprep.subr.bf16.mxu1 %v20780_v54 }
0x1b7c   : > { %14393 = vmatpush1.bf16.msra.mxu1 %v20781_v52 }
0x1b7d   : > { %14395 = vmatprep.subr.bf16.mxu1 %v20782_v17 }
0x1b80   : > { %14397 = vmatpush1.bf16.msra.mxu1 %v20783_v51 }
0x1b81   : > { %14399 = vmatprep.subr.bf16.mxu1 %v20784_v18 }
0x1b84   : > { %14401 = vmatpush1.bf16.msra.mxu1 %v20785_v10 }
0x1b85   : > { %14403 = vmatprep.subr.bf16.mxu1 %v20786_v35 }
0x1b88   : > { %14405 = vmatpush1.bf16.msra.mxu1 %v20787_v60 }
0x1b89   : > { %14407 = vmatprep.subr.bf16.mxu1 %v20788_v63  ;;  %v20795_v63 = vld [vmem:[#allocation176_spill] sm:$0xff] }
0x1b8c   : > { %14409 = vmatpush1.bf16.msra.mxu1 %v20789_v1  ;;  %v20798_v1 = vld [vmem:[#allocation179_spill] sm:$0xff] }
0x1b8d   : > { %14411 = vmatprep.subr.bf16.mxu1 %v20790_v0  ;;  %v20799_v0 = vld [vmem:[#allocation180_spill] sm:$0xff] }
0x1b90   : > { %14413 = vmatpush1.bf16.msra.mxu1 %v20791_v8  ;;  %v20801_v8 = vld [vmem:[#allocation182_spill] sm:$0xff] }
0x1b91   : > { %14415 = vmatprep.subr.bf16.mxu1 %v20792_v58  ;;  %v7455_v58 = vpop.f32.mrb[87].mxu0 }
0x1b94   : > { %14417 = vmatpush1.bf16.msra.mxu1 %v20793_v9  ;;  %v20802_v9 = vld [vmem:[#allocation183_spill] sm:$0xff] }
0x1b95   : > { %14419 = vmatprep.subr.bf16.mxu1 %v20794_v3  ;;  %v20809_v3 = vld [vmem:[#allocation190_spill] sm:$0xff] }
0x1b98   : > { %14421 = vmatpush1.bf16.msra.mxu1 %v20795_v63  ;;  %v20803_v63 = vld [vmem:[#allocation184_spill] sm:$0xff] }
0x1b99   : > { %14423 = vmatprep.subr.bf16.mxu1 %v20796_v25  ;;  %v20804_v25 = vld [vmem:[#allocation185_spill] sm:$0xff] }
0x1b9c   : > { %14425 = vmatpush1.bf16.msra.mxu1 %v20797_v53  ;;  %v20805_v53 = vld [vmem:[#allocation186_spill] sm:$0xff] }
0x1b9d   : > { %14427 = vmatprep.subr.bf16.mxu1 %v20798_v1  ;;  %v20806_v1 = vld [vmem:[#allocation187_spill] sm:$0xff] }
0x1ba0   : > { %14429 = vmatpush1.bf16.msra.mxu1 %v20799_v0  ;;  %v20807_v0 = vld [vmem:[#allocation188_spill] sm:$0xff] }
0x1ba1   : > { %14431 = vmatprep.subr.bf16.mxu1 %v20800_v23  ;;  %v20808_v23 = vld [vmem:[#allocation189_spill] sm:$0xff] }
0x1ba4   : > { %14433 = vmatpush1.bf16.msra.mxu1 %v20801_v8  ;;  %v20810_v8 = vld [vmem:[#allocation191_spill] sm:$0xff] }
0x1ba5   : > { %14435 = vmatprep.subr.bf16.mxu1 %v20802_v9  ;;  %v20811_v9 = vld [vmem:[#allocation192_spill] sm:$0xff] }
0x1ba7   : > { %7225 = vmatmul.mubr.f32.vlgmr.msra.gmra.mrb[6].mxu1 %v18531_v12  ;;  %v20812_v12 = vld [vmem:[#allocation193_spill] sm:$0xff] }
0x1ba8   : > { %14437 = vmatpush1.bf16.msra.mxu1 %v20803_v63  ;;  %7373 = vmatprep.mubr.f32.mxu1 %v7306_v27  ;;  %v20813_v63 = vld [vmem:[#allocation194_spill] sm:$0xff]  ;;  %v20814_v27 = vld [vmem:[#allocation195_spill] sm:$0xff] }
0x1ba9   : > { %14439 = vmatprep.subr.bf16.mxu1 %v20804_v25  ;;  %v20815_v25 = vld [vmem:[#allocation196_spill] sm:$0xff] }
0x1bac   : > { %14441 = vmatpush1.bf16.msra.mxu1 %v20805_v53  ;;  %v20816_v53 = vld [vmem:[#allocation197_spill] sm:$0xff] }
0x1bad   : > { %14443 = vmatprep.subr.bf16.mxu1 %v20806_v1  ;;  %v20817_v1 = vld [vmem:[#allocation198_spill] sm:$0xff] }
0x1bb0   : > { %14445 = vmatpush1.bf16.msra.mxu1 %v20807_v0  ;;  %v20818_v0 = vld [vmem:[#allocation199_spill] sm:$0xff] }
0x1bb1   : > { %14447 = vmatprep.subr.bf16.mxu1 %v20808_v23  ;;  %v20819_v23 = vld [vmem:[#allocation200_spill] sm:$0xff] }
0x1bb4   : > { %14449 = vmatpush1.bf16.msra.mxu1 %v20809_v3  ;;  %v20820_v3 = vld [vmem:[#allocation201_spill] sm:$0xff] }
0x1bb5   : > { %14451 = vmatprep.subr.bf16.mxu1 %v20810_v8  ;;  %v20821_v8 = vld [vmem:[#allocation202_spill] sm:$0xff] }
0x1bb8   : > { %14453 = vmatpush1.bf16.msra.mxu1 %v20811_v9  ;;  %v20822_v9 = vld [vmem:[#allocation203_spill] sm:$0xff] }
0x1bb9   : > { %14455 = vmatprep.subr.bf16.mxu1 %v20812_v12  ;;  %v20823_v12 = vld [vmem:[#allocation204_spill] sm:$0xff] }
0x1bbc   : > { %14457 = vmatpush1.bf16.msra.mxu1 %v20813_v63  ;;  %v20824_v63 = vld [vmem:[#allocation205_spill] sm:$0xff] }
0x1bbd   : > { %14459 = vmatprep.subr.bf16.mxu1 %v20814_v27  ;;  %v20825_v27 = vld [vmem:[#allocation206_spill] sm:$0xff] }
0x1bc0   : > { %14461 = vmatpush1.bf16.msra.mxu1 %v20815_v25  ;;  %v20826_v25 = vld [vmem:[#allocation207_spill] sm:$0xff] }
0x1bc1   : > { %14463 = vmatprep.subr.bf16.mxu1 %v20816_v53  ;;  %v20827_v53 = vld [vmem:[#allocation208_spill] sm:$0xff] }
0x1bc4   : > { %14465 = vmatpush1.bf16.msra.mxu1 %v20817_v1  ;;  %v20828_v1 = vld [vmem:[#allocation209_spill] sm:$0xff] }
0x1bc5   : > { %14467 = vmatprep.subr.bf16.mxu1 %v20818_v0  ;;  %v20829_v0 = vld [vmem:[#allocation210_spill] sm:$0xff] }
0x1bc8   : > { %14469 = vmatpush1.bf16.msra.mxu1 %v20819_v23  ;;  %v20830_v23 = vld [vmem:[#allocation211_spill] sm:$0xff] }
0x1bc9   : > { %14471 = vmatprep.subr.bf16.mxu1 %v20820_v3  ;;  %v20831_v3 = vld [vmem:[#allocation212_spill] sm:$0xff] }
0x1bcc   : > { %14473 = vmatpush1.bf16.msra.mxu1 %v20821_v8  ;;  %v20832_v8 = vld [vmem:[#allocation213_spill] sm:$0xff] }
0x1bcd   : > { %14475 = vmatprep.subr.bf16.mxu1 %v20822_v9  ;;  %v18669_v9 = vpop.f32.mrb[88].mxu0 }
0x1bd0   : > { %14477 = vmatpush1.bf16.msra.mxu1 %v20823_v12  ;;  %v20833_v12 = vld [vmem:[#allocation214_spill] sm:$0xff] }
0x1bd1   : > { %14479 = vmatprep.subr.bf16.mxu1 %v20824_v63  ;;  %v7604_v63 = vpop.f32.mrb[89].mxu0 }
0x1bd4   : > { %14481 = vmatpush1.bf16.msra.mxu1 %v20825_v27  ;;  %v20834_v27 = vld [vmem:[#allocation215_spill] sm:$0xff] }
0x1bd5   : > { %14483 = vmatprep.subr.bf16.mxu1 %v20826_v25  ;;  %v20841_v25 = vld [vmem:[#allocation222_spill] sm:$0xff] }
0x1bd8   : > { %14485 = vmatpush1.bf16.msra.mxu1 %v20827_v53  ;;  %v20835_v53 = vld [vmem:[#allocation216_spill] sm:$0xff] }
0x1bd9   : > { %14487 = vmatprep.subr.bf16.mxu1 %v20828_v1  ;;  %v20836_v1 = vld [vmem:[#allocation217_spill] sm:$0xff] }
0x1bdc   : > { %14489 = vmatpush1.bf16.msra.mxu1 %v20829_v0  ;;  %v20837_v0 = vld [vmem:[#allocation218_spill] sm:$0xff] }
0x1bdd   : > { %14491 = vmatprep.subr.bf16.mxu1 %v20830_v23  ;;  %v20838_v23 = vld [vmem:[#allocation219_spill] sm:$0xff] }
0x1be0   : > { %14493 = vmatpush1.bf16.msra.mxu1 %v20831_v3  ;;  %v20839_v3 = vld [vmem:[#allocation220_spill] sm:$0xff] }
0x1be1   : > { %14495 = vmatprep.subr.bf16.mxu1 %v20832_v8  ;;  %v20840_v8 = vld [vmem:[#allocation221_spill] sm:$0xff] }
0x1be4   : > { %14497 = vmatpush1.bf16.msra.mxu1 %v20833_v12  ;;  %v20842_v12 = vld [vmem:[#allocation223_spill] sm:$0xff] }
0x1be5   : > { %14499 = vmatprep.subr.bf16.mxu1 %v20834_v27  ;;  %v20843_v27 = vld [vmem:[#allocation224_spill] sm:$0xff] }
0x1be7   : > { %7374 = vmatmul.mubr.f32.vlgmr.msra.gmra.mrb[6].mxu1 %v18575_v21  ;;  %v20844_v21 = vld [vmem:[#allocation225_spill] sm:$0xff] }
0x1be8   : > { %14501 = vmatpush1.bf16.msra.mxu1 %v20835_v53  ;;  %7522 = vmatprep.mubr.f32.mxu1 %v7455_v58  ;;  %v20845_v53 = vld [vmem:[#allocation226_spill] sm:$0xff]  ;;  %v20846_v58 = vld [vmem:[#allocation227_spill] sm:$0xff] }
0x1be9   : > { %14503 = vmatprep.subr.bf16.mxu1 %v20836_v1  ;;  %v20847_v1 = vld [vmem:[#allocation228_spill] sm:$0xff] }
0x1bec   : > { %14505 = vmatpush1.bf16.msra.mxu1 %v20837_v0  ;;  %v20848_v0 = vld [vmem:[#allocation229_spill] sm:$0xff] }
0x1bed   : > { %14507 = vmatprep.subr.bf16.mxu1 %v20838_v23  ;;  %v20849_v23 = vld [vmem:[#allocation230_spill] sm:$0xff] }
0x1bf0   : > { %14509 = vmatpush1.bf16.msra.mxu1 %v20839_v3  ;;  %v20850_v3 = vld [vmem:[#allocation231_spill] sm:$0xff] }
0x1bf1   : > { %14511 = vmatprep.subr.bf16.mxu1 %v20840_v8  ;;  %v20851_v8 = vld [vmem:[#allocation232_spill] sm:$0xff] }
0x1bf4   : > { %14513 = vmatpush1.bf16.msra.mxu1 %v20841_v25  ;;  %v20852_v25 = vld [vmem:[#allocation233_spill] sm:$0xff] }
0x1bf5   : > { %14515 = vmatprep.subr.bf16.mxu1 %v20842_v12  ;;  %v20853_v12 = vld [vmem:[#allocation234_spill] sm:$0xff] }
0x1bf8   : > { %14517 = vmatpush1.bf16.msra.mxu1 %v20843_v27  ;;  %v20854_v27 = vld [vmem:[#allocation235_spill] sm:$0xff] }
0x1bf9   : > { %14519 = vmatprep.subr.bf16.mxu1 %v20844_v21  ;;  %v20855_v21 = vld [vmem:[#allocation236_spill] sm:$0xff] }
0x1bfc   : > { %14521 = vmatpush1.bf16.msra.mxu1 %v20845_v53  ;;  %v20856_v53 = vld [vmem:[#allocation237_spill] sm:$0xff] }
0x1bfd   : > { %14523 = vmatprep.subr.bf16.mxu1 %v20846_v58  ;;  %v20857_v58 = vld [vmem:[#allocation238_spill] sm:$0xff] }
0x1c00   : > { %14525 = vmatpush1.bf16.msra.mxu1 %v20847_v1  ;;  %v20858_v1 = vld [vmem:[#allocation239_spill] sm:$0xff] }
0x1c01   : > { %14527 = vmatprep.subr.bf16.mxu1 %v20848_v0  ;;  %v20859_v0 = vld [vmem:[#allocation240_spill] sm:$0xff] }
0x1c04   : > { %14529 = vmatpush1.bf16.msra.mxu1 %v20849_v23  ;;  %v20860_v23 = vld [vmem:[#allocation241_spill] sm:$0xff] }
0x1c05   : > { %14531 = vmatprep.subr.bf16.mxu1 %v20850_v3  ;;  %v20861_v3 = vld [vmem:[#allocation242_spill] sm:$0xff] }
0x1c08   : > { %14533 = vmatpush1.bf16.msra.mxu1 %v20851_v8  ;;  %v20862_v8 = vld [vmem:[#allocation243_spill] sm:$0xff] }
0x1c09   : > { %14535 = vmatprep.subr.bf16.mxu1 %v20852_v25  ;;  %v20863_v25 = vld [vmem:[#allocation244_spill] sm:$0xff] }
0x1c0c   : > { %14537 = vmatpush1.bf16.msra.mxu1 %v20853_v12  ;;  %v20864_v12 = vld [vmem:[#allocation245_spill] sm:$0xff] }
0x1c0d   : > { %14539 = vmatprep.subr.bf16.mxu1 %v20854_v27  ;;  %v18704_v27 = vpop.f32.mrb[90].mxu0 }
0x1c10   : > { %14541 = vmatpush1.bf16.msra.mxu1 %v20855_v21  ;;  %v20865_v21 = vld [vmem:[#allocation246_spill] sm:$0xff] }
0x1c11   : > { %14543 = vmatprep.subr.bf16.mxu1 %v20856_v53  ;;  %v7753_v53 = vpop.f32.mrb[91].mxu0 }
0x1c14   : > { %14545 = vmatpush1.bf16.msra.mxu1 %v20857_v58  ;;  %v20866_v58 = vld [vmem:[#allocation247_spill] sm:$0xff] }
0x1c15   : > { %14547 = vmatprep.subr.bf16.mxu1 %v20858_v1  ;;  %v20873_v1 = vld [vmem:[#allocation258_spill] sm:$0xff] }
0x1c18   : > { %14549 = vmatpush1.bf16.msra.mxu1 %v20859_v0  ;;  %v20867_v0 = vld [vmem:[#allocation248_spill] sm:$0xff] }
0x1c19   : > { %14551 = vmatprep.subr.bf16.mxu1 %v20860_v23  ;;  %v20868_v23 = vld [vmem:[#allocation249_spill] sm:$0xff] }
0x1c1c   : > { %14553 = vmatpush1.bf16.msra.mxu1 %v20861_v3  ;;  %v20869_v3 = vld [vmem:[#allocation250_spill] sm:$0xff] }
0x1c1d   : > { %14555 = vmatprep.subr.bf16.mxu1 %v20862_v8  ;;  %v20870_v8 = vld [vmem:[#allocation251_spill] sm:$0xff] }
0x1c20   : > { %14557 = vmatpush1.bf16.msra.mxu1 %v20863_v25  ;;  %v20871_v25 = vld [vmem:[#allocation254_spill] sm:$0xff] }
0x1c21   : > { %14559 = vmatprep.subr.bf16.mxu1 %v20864_v12  ;;  %v20872_v12 = vld [vmem:[#allocation255_spill] sm:$0xff] }
0x1c24   : > { %14561 = vmatpush1.bf16.msra.mxu1 %v20865_v21  ;;  %v20874_v21 = vld [vmem:[#allocation259_spill] sm:$0xff] }
0x1c25   : > { %14563 = vmatprep.subr.bf16.mxu1 %v20866_v58  ;;  %v20875_v58 = vld [vmem:[#allocation262_spill] sm:$0xff] }
0x1c27   : > { %7523 = vmatmul.mubr.f32.vlgmr.msra.gmra.mrb[6].mxu1 %v18634_v28  ;;  %v20876_v28 = vld [vmem:[#allocation263_spill] sm:$0xff] }
0x1c28   : > { %14565 = vmatpush1.bf16.msra.mxu1 %v20867_v0  ;;  %7671 = vmatprep.mubr.f32.mxu1 %v7604_v63  ;;  %v20877_v0 = vld [vmem:[#allocation266_spill] sm:$0xff]  ;;  %v20878_v63 = vld [vmem:[#allocation267_spill] sm:$0xff] }
0x1c29   : > { %14567 = vmatprep.subr.bf16.mxu1 %v20868_v23  ;;  %v20879_v23 = vld [vmem:[#allocation270_spill] sm:$0xff] }
0x1c2c   : > { %14569 = vmatpush1.bf16.msra.mxu1 %v20869_v3  ;;  %v20880_v3 = vld [vmem:[#allocation271_spill] sm:$0xff] }
0x1c2d   : > { %14571 = vmatprep.subr.bf16.mxu1 %v20870_v8  ;;  %v20881_v8 = vld [vmem:[#allocation274_spill] sm:$0xff] }
0x1c30   : > { %14573 = vmatpush1.bf16.msra.mxu1 %v20871_v25  ;;  %v20882_v25 = vld [vmem:[#allocation275_spill] sm:$0xff] }
0x1c31   : > { %14575 = vmatprep.subr.bf16.mxu1 %v20872_v12  ;;  %v20883_v12 = vld [vmem:[#allocation278_spill] sm:$0xff] }
0x1c34   : > { %14577 = vmatpush1.bf16.msra.mxu1 %v20873_v1  ;;  %v20884_v1 = vld [vmem:[#allocation279_spill] sm:$0xff] }
0x1c35   : > { %14579 = vmatprep.subr.bf16.mxu1 %v20874_v21  ;;  %v20885_v21 = vld [vmem:[#allocation280_spill] sm:$0xff] }
0x1c38   : > { %14581 = vmatpush1.bf16.msra.mxu1 %v20875_v58  ;;  %v20886_v58 = vld [vmem:[#allocation281_spill] sm:$0xff] }
0x1c39   : > { %14583 = vmatprep.subr.bf16.mxu1 %v20876_v28  ;;  %v20887_v28 = vld [vmem:[#allocation282_spill] sm:$0xff] }
0x1c3c   : > { %14585 = vmatpush1.bf16.msra.mxu1 %v20877_v0  ;;  %v20888_v0 = vld [vmem:[#allocation283_spill] sm:$0xff] }
0x1c3d   : > { %14587 = vmatprep.subr.bf16.mxu1 %v20878_v63  ;;  %v20889_v63 = vld [vmem:[#allocation284_spill] sm:$0xff] }
0x1c40   : > { %14589 = vmatpush1.bf16.msra.mxu1 %v20879_v23  ;;  %v20890_v23 = vld [vmem:[#allocation285_spill] sm:$0xff] }
0x1c41   : > { %14591 = vmatprep.subr.bf16.mxu1 %v20880_v3  ;;  %v20891_v3 = vld [vmem:[#allocation286_spill] sm:$0xff] }
0x1c44   : > { %14593 = vmatpush1.bf16.msra.mxu1 %v20881_v8  ;;  %v20892_v8 = vld [vmem:[#allocation287_spill] sm:$0xff] }
0x1c45   : > { %14595 = vmatprep.subr.bf16.mxu1 %v20882_v25  ;;  %v20893_v25 = vld [vmem:[#allocation288_spill] sm:$0xff] }
0x1c48   : > { %14597 = vmatpush1.bf16.msra.mxu1 %v20883_v12  ;;  %v20894_v12 = vld [vmem:[#allocation289_spill] sm:$0xff] }
0x1c49   : > { %14599 = vmatprep.subr.bf16.mxu1 %v20884_v1  ;;  %v20895_v1 = vld [vmem:[#allocation290_spill] sm:$0xff] }
0x1c4c   : > { %14601 = vmatpush1.bf16.msra.mxu1 %v20885_v21  ;;  %v20896_v21 = vld [vmem:[#allocation291_spill] sm:$0xff] }
0x1c4d   : > { %14603 = vmatprep.subr.bf16.mxu1 %v20886_v58  ;;  %v20897_v58 = vld [vmem:[#allocation292_spill] sm:$0xff] }
0x1c50   : > { %14605 = vmatpush1.bf16.msra.mxu1 %v20887_v28  ;;  %v20898_v28 = vld [vmem:[#allocation293_spill] sm:$0xff] }
0x1c51   : > { %14607 = vmatprep.subr.bf16.mxu1 %v20888_v0 }
0x1c54   : > { %14609 = vmatpush1.bf16.msra.mxu1 %v20889_v63  ;;  %v20899_v63 = vld [vmem:[#allocation294_spill] sm:$0xff] }
0x1c55   : > { %14611 = vmatprep.subr.bf16.mxu1 %v20890_v23 }
0x1c58   : > { %14613 = vmatpush1.bf16.msra.mxu1 %v20891_v3  ;;  %v20900_v3 = vld [vmem:[#allocation295_spill] sm:$0xff] }
0x1c59   : > { %14615 = vmatprep.subr.bf16.mxu1 %v20892_v8  ;;  %v20901_v8 = vld [vmem:[#allocation296_spill] sm:$0xff] }
0x1c5c   : > { %14617 = vmatpush1.bf16.msra.mxu1 %v20893_v25  ;;  %v20902_v25 = vld [vmem:[#allocation297_spill] sm:$0xff] }
0x1c5d   : > { %14619 = vmatprep.subr.bf16.mxu1 %v20894_v12  ;;  %v20903_v12 = vld [vmem:[#allocation298_spill] sm:$0xff] }
0x1c60   : > { %14621 = vmatpush1.bf16.msra.mxu1 %v20895_v1  ;;  %v20904_v1 = vld [vmem:[#allocation299_spill] sm:$0xff] }
0x1c61   : > { %14623 = vmatprep.subr.bf16.mxu1 %v20896_v21  ;;  %v20905_v21 = vld [vmem:[#allocation300_spill] sm:$0xff] }
0x1c64   : > { %14625 = vmatpush1.bf16.msra.mxu1 %v20897_v58  ;;  %v20906_v58 = vld [vmem:[#allocation301_spill] sm:$0xff] }
0x1c65   : > { %14627 = vmatprep.subr.bf16.mxu1 %v20898_v28  ;;  %v20907_v28 = vld [vmem:[#allocation302_spill] sm:$0xff] }
0x1c67   : > { %7672 = vmatmul.mubr.f32.vlgmr.msra.gmra.mrb[6].mxu1 %v18669_v9  ;;  %v20908_v9 = vld [vmem:[#allocation303_spill] sm:$0xff] }
0x1c68   : > { %14629 = vmatpush1.bf16.msra.mxu1 %v20899_v63  ;;  %7820 = vmatprep.mubr.f32.mxu1 %v7753_v53  ;;  %v20909_v63 = vld [vmem:[#allocation304_spill] sm:$0xff]  ;;  %v20910_v53 = vld [vmem:[#allocation305_spill] sm:$0xff] }
0x1c69   : > { %14631 = vmatprep.subr.bf16.mxu1 %v20900_v3  ;;  %v20911_v3 = vld [vmem:[#allocation306_spill] sm:$0xff] }
0x1c6c   : > { %14633 = vmatpush1.bf16.msra.mxu1 %v20901_v8  ;;  %v20912_v8 = vld [vmem:[#allocation307_spill] sm:$0xff] }
0x1c6d   : > { %14635 = vmatprep.subr.bf16.mxu1 %v20902_v25  ;;  %v20913_v25 = vld [vmem:[#allocation308_spill] sm:$0xff] }
0x1c70   : > { %14637 = vmatpush1.bf16.msra.mxu1 %v20903_v12  ;;  %v20914_v12 = vld [vmem:[#allocation309_spill] sm:$0xff] }
0x1c71   : > { %14639 = vmatprep.subr.bf16.mxu1 %v20904_v1  ;;  %v20915_v1 = vld [vmem:[#allocation310_spill] sm:$0xff] }
0x1c74   : > { %14641 = vmatpush1.bf16.msra.mxu1 %v20905_v21  ;;  %v20916_v21 = vld [vmem:[#allocation311_spill] sm:$0xff] }
0x1c75   : > { %14643 = vmatprep.subr.bf16.mxu1 %v20906_v58  ;;  %v20917_v58 = vld [vmem:[#allocation312_spill] sm:$0xff] }
0x1c78   : > { %14645 = vmatpush1.bf16.msra.mxu1 %v20907_v28  ;;  %v20918_v28 = vld [vmem:[#allocation313_spill] sm:$0xff] }
0x1c79   : > { %14647 = vmatprep.subr.bf16.mxu1 %v20908_v9  ;;  %v20919_v9 = vld [vmem:[#allocation314_spill] sm:$0xff] }
0x1c7c   : > { %14649 = vmatpush1.bf16.msra.mxu1 %v20909_v63  ;;  %v20920_v63 = vld [vmem:[#allocation315_spill] sm:$0xff] }
0x1c7d   : > { %14651 = vmatprep.subr.bf16.mxu1 %v20910_v53  ;;  %v20921_v53 = vld [vmem:[#allocation316_spill] sm:$0xff] }
0x1c80   : > { %14653 = vmatpush1.bf16.msra.mxu1 %v20911_v3  ;;  %v20922_v3 = vld [vmem:[#allocation317_spill] sm:$0xff] }
0x1c81   : > { %14655 = vmatprep.subr.bf16.mxu1 %v20912_v8  ;;  %v20923_v8 = vld [vmem:[#allocation318_spill] sm:$0xff] }
0x1c84   : > { %14657 = vmatpush1.bf16.msra.mxu1 %v20913_v25  ;;  %v20924_v25 = vld [vmem:[#allocation319_spill] sm:$0xff] }
0x1c85   : > { %14659 = vmatprep.subr.bf16.mxu1 %v20914_v12  ;;  %v20925_v12 = vld [vmem:[#allocation320_spill] sm:$0xff] }
0x1c88   : > { %14661 = vmatpush1.bf16.msra.mxu1 %v20915_v1  ;;  %v20926_v1 = vld [vmem:[#allocation321_spill] sm:$0xff] }
0x1c89   : > { %14663 = vmatprep.subr.bf16.mxu1 %v20916_v21  ;;  %v20927_v21 = vld [vmem:[#allocation322_spill] sm:$0xff] }
0x1c8c   : > { %14665 = vmatpush1.bf16.msra.mxu1 %v20917_v58  ;;  %v20928_v58 = vld [vmem:[#allocation323_spill] sm:$0xff] }
0x1c8d   : > { %14667 = vmatprep.subr.bf16.mxu1 %v20918_v28  ;;  %v20929_v28 = vld [vmem:[#allocation324_spill] sm:$0xff] }
0x1c90   : > { %14669 = vmatpush1.bf16.msra.mxu1 %v20919_v9  ;;  %v20930_v9 = vld [vmem:[#allocation252_spill] sm:$0xff] }
0x1c91   : > { %14671 = vmatprep.subr.bf16.mxu1 %v20920_v63 }
0x1c94   : > { %14673 = vmatpush1.bf16.msra.mxu1 %v20921_v53  ;;  %v20931_v53 = vld [vmem:[#allocation253_spill] sm:$0xff] }
0x1c95   : > { %14675 = vmatprep.subr.bf16.mxu1 %v20922_v3  ;;  %v20932_v3 = vld [vmem:[#allocation256_spill] sm:$0xff] }
0x1c98   : > { %14677 = vmatpush1.bf16.msra.mxu1 %v20923_v8  ;;  %v20933_v8 = vld [vmem:[#allocation257_spill] sm:$0xff] }
0x1c99   : > { %14679 = vmatprep.subr.bf16.mxu1 %v20924_v25  ;;  %v20934_v25 = vld [vmem:[#allocation260_spill] sm:$0xff] }
0x1c9c   : > { %14681 = vmatpush1.bf16.msra.mxu1 %v20925_v12  ;;  %v20935_v12 = vld [vmem:[#allocation261_spill] sm:$0xff] }
0x1c9d   : > { %14683 = vmatprep.subr.bf16.mxu1 %v20926_v1  ;;  %v20936_v1 = vld [vmem:[#allocation264_spill] sm:$0xff] }
0x1ca0   : > { %14685 = vmatpush1.bf16.msra.mxu1 %v20927_v21  ;;  %v20937_v21 = vld [vmem:[#allocation265_spill] sm:$0xff] }
0x1ca1   : > { %14687 = vmatprep.subr.bf16.mxu1 %v20928_v58  ;;  %v20938_v58 = vld [vmem:[#allocation268_spill] sm:$0xff] }
0x1ca4   : > { %14689 = vmatpush1.bf16.msra.mxu1 %v20929_v28  ;;  %v20939_v28 = vld [vmem:[#allocation269_spill] sm:$0xff] }
0x1ca5   : > { %15267 = vmatprep.subr.bf16.mxu1 %v20930_v9  ;;  %v20940_v9 = vld [vmem:[#allocation272_spill] sm:$0xff] }
0x1ca7   : > { %7821 = vmatmul.mubr.f32.vlgmr.msra.gmra.mrb[6].mxu1 %v18704_v27  ;;  %v20941_v27 = vld [vmem:[#allocation273_spill] sm:$0xff] }
0x1ca8   : > { %15269 = vmatpush3.bf16.msra.mxu1 %v20931_v53  ;;  %v20942_v53 = vld [vmem:[#allocation276_spill] sm:$0xff] }
0x1ca9   : > { %15271 = vmatprep.subr.bf16.mxu1 %v20932_v3  ;;  %v20943_v3 = vld [vmem:[#allocation277_spill] sm:$0xff] }
0x1cac   : > { %15273 = vmatpush3.bf16.msra.mxu1 %v20933_v8  ;;  %v20944_v8 = vld [vmem:[#allocation325_spill] sm:$0xff] }
0x1cad   : > { %15275 = vmatprep.subr.bf16.mxu1 %v20934_v25  ;;  %v20945_v25 = vld [vmem:[#allocation326_spill] sm:$0xff] }
0x1cb0   : > { %15277 = vmatpush3.bf16.msra.mxu1 %v20935_v12  ;;  %v20946_v12 = vld [vmem:[#allocation327_spill] sm:$0xff] }
0x1cb1   : > { %15279 = vmatprep.subr.bf16.mxu1 %v20936_v1  ;;  %v6484_v1 = vlaneseq }
0x1cb4   : > { %15281 = vmatpush3.bf16.msra.mxu1 %v20937_v21  ;;  %v6485_v21 = vshrl.u32 %v6484_v1, 7 }
0x1cb5   : > { %15283 = vmatprep.subr.bf16.mxu1 %v20938_v58  ;;  %v6482_v58 = vpop.permute.xlu1 %6481 }
0x1cb6   : > { %v6486_v63 = vsub.s32 0, %v6485_v21 }
0x1cb8   : > { %15285 = vmatpush3.bf16.msra.mxu1 %v20939_v28  ;;  %v6487_v23 = vrot.slane %v6482_v58, %v6486_v63  ;;  %v20965_v58 = vld [vmem:[#allocation92_spill] sm:$0xff] }
0x1cb9   : > { %15287 = vmatprep.subr.bf16.mxu1 %v20940_v9  ;;  %v7932_v35 = vpop.permute.xlu1 %7931 }
0x1cbc   : > { %15289 = vmatpush3.bf16.msra.mxu1 %v20941_v27 }
0x1cbd   : > { %15291 = vmatprep.subr.bf16.mxu1 %v20942_v53 }
0x1cc0   : > { %15293 = vmatpush3.bf16.msra.mxu1 %v20943_v3 }
0x1cc1   : > { %15295 = vmatprep.subr.bf16.mxu1 %v20944_v8 }
0x1cc4   : > { %15297 = vmatpush3.bf16.msra.mxu1 %v20945_v25  ;;  %v7842_v25 = vpop.permute.xlu0 %7841 }
0x1cc5   : > { %15299 = vmatprep.subr.bf16.mxu1 %v20946_v12 }
0x1d7a   : > { %v7822_v28 = vpop.f32.mrb[6].mxu1 }
0x1d7b   : > { %v15584_v0 = vadd.f32 %v7822_v28, %v6487_v23  ;;  %v7824_v9 = vpop.f32.mrb[7].mxu1  ;;  %v20966_v28 = vld [vmem:[#allocation93_spill] sm:$0xff] }
0x1d7c   : > { %v15585_v60 = vadd.f32 %v7824_v9, %v6487_v23  ;;  %v20963_v23 = vld [vmem:[#allocation90_spill] sm:$0xff] }
0x1d7d   : > { %15854 = vtanh.f32 %v15584_v0  ;;  %v20962_v0 = vld [vmem:[#allocation89_spill] sm:$0xff]  ;;  %v20967_v9 = vld [vmem:[#allocation94_spill] sm:$0xff] }
0x1d7e   : > { %15856 = vtanh.f32 %v15585_v60  ;;  %v20961_v60 = vld [vmem:[#allocation88_spill] sm:$0xff] }
0x1d87   : > { %v15855_v27 = vpop.eup %15854 }
0x1d88   : > { %v15857_v53 = vpop.eup %15856  ;;  %v18791_v3 = vrot.slane %v15855_v27, %v6486_v63  ;;  %v20970_v27 = vld [vmem:[#allocation97_spill] sm:$0xff] }
0x1d89   : > { %v18793_v8 = vrot.slane %v15857_v53, %v6486_v63  ;;  %v20964_v63 = vld [vmem:[#allocation91_spill] sm:$0xff]  ;;  %v20971_v53 = vld [vmem:[#allocation98_spill] sm:$0xff] }
0x1d8a   : > { %v7852_v1 = vmul.f32 %v18791_v3, %v7842_v25 }
0x1d8b   : > { %v7853_v12 = vmul.f32 %v18793_v8, %v7842_v25  ;;  %v7935_v21 = vmul.f32 %v7932_v35, %v18793_v8  ;;  %v20972_v25 = vld [vmem:[#allocation99_spill] sm:$0xff] }
0x1d8d   : > { %7918 = vmatprep.mubr.f32.mxu0 %v7853_v12  ;;  %v20973_v12 = vld [vmem:[#allocation100_spill] sm:$0xff] }
0x1d8e   : > { %7919 = vmatmul.mubr.f32.vlgmr.msra.gmra.mrb[92].mxu0 %v7852_v1  ;;  %v20974_v1 = vld [vmem:[#allocation101_spill] sm:$0xff] }
0x1d8f   : > { %14757 = vmatpush1.bf16.msra.mxu0 %v20675_v4  ;;  %8000 = vmatprep.mubr.f32.mxu0 %v7935_v21  ;;  %v20951_v4 = vld [vmem:[#allocation77_spill] sm:$0xff]  ;;  %v20975_v21 = vld [vmem:[#allocation102_spill] sm:$0xff] }
0x1d90   : > { %14759 = vmatprep.subr.bf16.mxu0 %v20676_v59  ;;  %v20958_v59 = vld [vmem:[#allocation84_spill] sm:$0xff] }
0x1d93   : > { %14761 = vmatpush1.bf16.msra.mxu0 %v20677_v38  ;;  %v20948_v38 = vld [vmem:[#allocation74_spill] sm:$0xff] }
0x1d94   : > { %14763 = vmatprep.subr.bf16.mxu0 %v20678_v43  ;;  %v20959_v43 = vld [vmem:[#allocation85_spill] sm:$0xff] }
0x1d97   : > { %14765 = vmatpush1.bf16.msra.mxu0 %v20679_v48  ;;  %v20947_v48 = vld [vmem:[#allocation73_spill] sm:$0xff] }
0x1d98   : > { %14767 = vmatprep.subr.bf16.mxu0 %v20680_v11  ;;  %v20960_v11 = vld [vmem:[#allocation86_spill] sm:$0xff] }
0x1d9b   : > { %14769 = vmatpush1.bf16.msra.mxu0 %v20681_v44  ;;  %v8014_v44 = vpop.permute.xlu0 %8013 }
0x1d9c   : > { %14771 = vmatprep.subr.bf16.mxu0 %v20682_v56  ;;  %v7934_v56 = vmul.f32 %v7932_v35, %v18791_v3  ;;  %v20968_v35 = vld [vmem:[#allocation95_spill] sm:$0xff] }
0x1d9f   : > { %14773 = vmatpush1.bf16.msra.mxu0 %v20683_v41  ;;  %v20949_v41 = vld [vmem:[#allocation75_spill] sm:$0xff] }
0x1da0   : > { %14775 = vmatprep.subr.bf16.mxu0 %v20684_v19  ;;  %v20950_v19 = vld [vmem:[#allocation76_spill] sm:$0xff] }
0x1da3   : > { %14777 = vmatpush1.bf16.msra.mxu0 %v20685_v37  ;;  %v8017_v37 = vmul.f32 %v8014_v44, %v18793_v8 }
0x1da4   : > { %14779 = vmatprep.subr.bf16.mxu0 %v20686_v15  ;;  %v20952_v15 = vld [vmem:[#allocation78_spill] sm:$0xff] }
0x1da7   : > { %14781 = vmatpush1.bf16.msra.mxu0 %v20687_v49  ;;  %v20953_v49 = vld [vmem:[#allocation79_spill] sm:$0xff] }
0x1da8   : > { %14783 = vmatprep.subr.bf16.mxu0 %v20688_v22  ;;  %v20954_v22 = vld [vmem:[#allocation80_spill] sm:$0xff] }
0x1dab   : > { %14785 = vmatpush1.bf16.msra.mxu0 %v20689_v47  ;;  %v20955_v47 = vld [vmem:[#allocation81_spill] sm:$0xff] }
0x1dac   : > { %14787 = vmatprep.subr.bf16.mxu0 %v20690_v31  ;;  %v20956_v31 = vld [vmem:[#allocation82_spill] sm:$0xff] }
0x1daf   : > { %14789 = vmatpush1.bf16.msra.mxu0 %v20691_v5  ;;  %v20957_v5 = vld [vmem:[#allocation83_spill] sm:$0xff] }
0x1db0   : > { %14791 = vmatprep.subr.bf16.mxu0 %v20947_v48  ;;  %v20976_v48 = vld [vmem:[#allocation103_spill] sm:$0xff] }
0x1db3   : > { %14793 = vmatpush1.bf16.msra.mxu0 %v20948_v38  ;;  %v20977_v38 = vld [vmem:[#allocation104_spill] sm:$0xff] }
0x1db4   : > { %14795 = vmatprep.subr.bf16.mxu0 %v20949_v41  ;;  %v20978_v41 = vld [vmem:[#allocation105_spill] sm:$0xff] }
0x1db7   : > { %14797 = vmatpush1.bf16.msra.mxu0 %v20950_v19  ;;  %v20979_v19 = vld [vmem:[#allocation106_spill] sm:$0xff] }
0x1db8   : > { %14799 = vmatprep.subr.bf16.mxu0 %v20951_v4  ;;  %v20980_v4 = vld [vmem:[#allocation107_spill] sm:$0xff] }
0x1dbb   : > { %14801 = vmatpush1.bf16.msra.mxu0 %v20952_v15  ;;  %v20981_v15 = vld [vmem:[#allocation108_spill] sm:$0xff] }
0x1dbc   : > { %14803 = vmatprep.subr.bf16.mxu0 %v20953_v49  ;;  %v20982_v49 = vld [vmem:[#allocation109_spill] sm:$0xff] }
0x1dbf   : > { %14805 = vmatpush1.bf16.msra.mxu0 %v20954_v22  ;;  %v20983_v22 = vld [vmem:[#allocation110_spill] sm:$0xff] }
0x1dc0   : > { %14807 = vmatprep.subr.bf16.mxu0 %v20955_v47  ;;  %v20984_v47 = vld [vmem:[#allocation111_spill] sm:$0xff] }
0x1dc3   : > { %14809 = vmatpush1.bf16.msra.mxu0 %v20956_v31  ;;  %v20985_v31 = vld [vmem:[#allocation112_spill] sm:$0xff] }
0x1dc4   : > { %14811 = vmatprep.subr.bf16.mxu0 %v20957_v5  ;;  %v20986_v5 = vld [vmem:[#allocation113_spill] sm:$0xff] }
0x1dc7   : > { %14813 = vmatpush1.bf16.msra.mxu0 %v20958_v59  ;;  %v20987_v59 = vld [vmem:[#allocation114_spill] sm:$0xff] }
0x1dc8   : > { %14815 = vmatprep.subr.bf16.mxu0 %v20959_v43  ;;  %v20988_v43 = vld [vmem:[#allocation115_spill] sm:$0xff] }
0x1dcb   : > { %14817 = vmatpush1.bf16.msra.mxu0 %v20960_v11  ;;  %v20989_v11 = vld [vmem:[#allocation116_spill] sm:$0xff] }
0x1dcc   : > { %14819 = vmatprep.subr.bf16.mxu0 %v20706_v29  ;;  %v20969_v29 = vld [vmem:[#allocation96_spill] sm:$0xff] }
0x1dce   : > { %8001 = vmatmul.mubr.f32.vlgmr.msra.gmra.mrb[92].mxu0 %v7934_v56  ;;  %v20990_v56 = vld [vmem:[#allocation117_spill] sm:$0xff] }
0x1dcf   : > { %14821 = vmatpush1.bf16.msra.mxu0 %v20961_v60  ;;  %8082 = vmatprep.mubr.f32.mxu0 %v8017_v37  ;;  %v20991_v37 = vld [vmem:[#allocation118_spill] sm:$0xff]  ;;  %v8096_v60 = vpop.permute.xlu1 %8095 }
0x1dd0   : > { %14823 = vmatprep.subr.bf16.mxu0 %v20962_v0  ;;  %v8016_v0 = vmul.f32 %v8014_v44, %v18791_v3  ;;  %v21000_v44 = vld [vmem:[#allocation127_spill] sm:$0xff] }
0x1dd3   : > { %14825 = vmatpush1.bf16.msra.mxu0 %v20963_v23  ;;  %v20992_v23 = vld [vmem:[#allocation119_spill] sm:$0xff] }
0x1dd4   : > { %14827 = vmatprep.subr.bf16.mxu0 %v20964_v63  ;;  %v8099_v63 = vmul.f32 %v8096_v60, %v18793_v8 }
0x1dd7   : > { %14829 = vmatpush1.bf16.msra.mxu0 %v20965_v58  ;;  %v20993_v58 = vld [vmem:[#allocation120_spill] sm:$0xff] }
0x1dd8   : > { %14831 = vmatprep.subr.bf16.mxu0 %v20966_v28  ;;  %v20994_v28 = vld [vmem:[#allocation121_spill] sm:$0xff] }
0x1ddb   : > { %14833 = vmatpush1.bf16.msra.mxu0 %v20967_v9  ;;  %v20995_v9 = vld [vmem:[#allocation122_spill] sm:$0xff] }
0x1ddc   : > { %14835 = vmatprep.subr.bf16.mxu0 %v20968_v35  ;;  %v20996_v35 = vld [vmem:[#allocation123_spill] sm:$0xff] }
0x1ddf   : > { %14837 = vmatpush1.bf16.msra.mxu0 %v20969_v29  ;;  %v20997_v29 = vld [vmem:[#allocation124_spill] sm:$0xff] }
0x1de0   : > { %14839 = vmatprep.subr.bf16.mxu0 %v20970_v27  ;;  %v20998_v27 = vld [vmem:[#allocation125_spill] sm:$0xff] }
0x1de3   : > { %14841 = vmatpush1.bf16.msra.mxu0 %v20971_v53  ;;  %v20999_v53 = vld [vmem:[#allocation126_spill] sm:$0xff] }
0x1de4   : > { %14843 = vmatprep.subr.bf16.mxu0 %v20972_v25  ;;  %v21001_v25 = vld [vmem:[#allocation128_spill] sm:$0xff] }
0x1de7   : > { %14845 = vmatpush1.bf16.msra.mxu0 %v20973_v12  ;;  %v21002_v12 = vld [vmem:[#allocation129_spill] sm:$0xff] }
0x1de8   : > { %14847 = vmatprep.subr.bf16.mxu0 %v20974_v1  ;;  %v21003_v1 = vld [vmem:[#allocation130_spill] sm:$0xff] }
0x1deb   : > { %14849 = vmatpush1.bf16.msra.mxu0 %v20975_v21  ;;  %v21004_v21 = vld [vmem:[#allocation132_spill] sm:$0xff] }
0x1dec   : > { %14851 = vmatprep.subr.bf16.mxu0 %v20976_v48  ;;  %v21005_v48 = vld [vmem:[#allocation135_spill] sm:$0xff] }
0x1def   : > { %14853 = vmatpush1.bf16.msra.mxu0 %v20977_v38  ;;  %v21006_v38 = vld [vmem:[#allocation136_spill] sm:$0xff] }
0x1df0   : > { %14855 = vmatprep.subr.bf16.mxu0 %v20978_v41  ;;  %v21007_v41 = vld [vmem:[#allocation138_spill] sm:$0xff] }
0x1df3   : > { %14857 = vmatpush1.bf16.msra.mxu0 %v20979_v19  ;;  %v21008_v19 = vld [vmem:[#allocation139_spill] sm:$0xff] }
0x1df4   : > { %14859 = vmatprep.subr.bf16.mxu0 %v20980_v4  ;;  %v21033_v4 = vld [vmem:[#allocation190_spill] sm:$0xff] }
0x1df7   : > { %14861 = vmatpush1.bf16.msra.mxu0 %v20981_v15  ;;  %v21034_v15 = vld [vmem:[#allocation191_spill] sm:$0xff] }
0x1df8   : > { %14863 = vmatprep.subr.bf16.mxu0 %v20982_v49  ;;  %v21035_v49 = vld [vmem:[#allocation192_spill] sm:$0xff] }
0x1dfb   : > { %14865 = vmatpush1.bf16.msra.mxu0 %v20983_v22  ;;  %v21036_v22 = vld [vmem:[#allocation193_spill] sm:$0xff] }
0x1dfc   : > { %14867 = vmatprep.subr.bf16.mxu0 %v20984_v47  ;;  %v21037_v47 = vld [vmem:[#allocation194_spill] sm:$0xff] }
0x1dff   : > { %14869 = vmatpush1.bf16.msra.mxu0 %v20985_v31  ;;  %v21038_v31 = vld [vmem:[#allocation195_spill] sm:$0xff] }
0x1e00   : > { %14871 = vmatprep.subr.bf16.mxu0 %v20986_v5  ;;  %v21039_v5 = vld [vmem:[#allocation196_spill] sm:$0xff] }
0x1e03   : > { %14873 = vmatpush1.bf16.msra.mxu0 %v20987_v59  ;;  %v21040_v59 = vld [vmem:[#allocation197_spill] sm:$0xff] }
0x1e04   : > { %14875 = vmatprep.subr.bf16.mxu0 %v20988_v43  ;;  %v21041_v43 = vld [vmem:[#allocation198_spill] sm:$0xff] }
0x1e07   : > { %14877 = vmatpush1.bf16.msra.mxu0 %v20989_v11  ;;  %v21042_v11 = vld [vmem:[#allocation199_spill] sm:$0xff] }
0x1e08   : > { %14879 = vmatprep.subr.bf16.mxu0 %v20990_v56  ;;  %v21043_v56 = vld [vmem:[#allocation200_spill] sm:$0xff] }
0x1e0b   : > { %14881 = vmatpush1.bf16.msra.mxu0 %v20991_v37  ;;  %v21044_v37 = vld [vmem:[#allocation201_spill] sm:$0xff] }
0x1e0c   : > { %14883 = vmatprep.subr.bf16.mxu0 %v20992_v23  ;;  %v21047_v23 = vld [vmem:[#allocation204_spill] sm:$0xff] }
0x1e0e   : > { %8083 = vmatmul.mubr.f32.vlgmr.msra.gmra.mrb[92].mxu0 %v8016_v0  ;;  %v21046_v0 = vld [vmem:[#allocation203_spill] sm:$0xff] }
0x1e0f   : > { %14885 = vmatpush1.bf16.msra.mxu0 %v20993_v58  ;;  %8164 = vmatprep.mubr.f32.mxu0 %v8099_v63  ;;  %v21048_v63 = vld [vmem:[#allocation205_spill] sm:$0xff]  ;;  %v21049_v58 = vld [vmem:[#allocation206_spill] sm:$0xff] }
0x1e10   : > { %14887 = vmatprep.subr.bf16.mxu0 %v20994_v28  ;;  %v21050_v28 = vld [vmem:[#allocation207_spill] sm:$0xff] }
0x1e13   : > { %14889 = vmatpush1.bf16.msra.mxu0 %v20995_v9  ;;  %v21051_v9 = vld [vmem:[#allocation208_spill] sm:$0xff] }
0x1e14   : > { %14891 = vmatprep.subr.bf16.mxu0 %v20996_v35  ;;  %v21052_v35 = vld [vmem:[#allocation209_spill] sm:$0xff] }
0x1e17   : > { %14893 = vmatpush1.bf16.msra.mxu0 %v20997_v29  ;;  %v21053_v29 = vld [vmem:[#allocation210_spill] sm:$0xff] }
0x1e18   : > { %14895 = vmatprep.subr.bf16.mxu0 %v20998_v27  ;;  %v21054_v27 = vld [vmem:[#allocation211_spill] sm:$0xff] }
0x1e1b   : > { %14897 = vmatpush1.bf16.msra.mxu0 %v20999_v53  ;;  %v21055_v53 = vld [vmem:[#allocation212_spill] sm:$0xff] }
0x1e1c   : > { %14899 = vmatprep.subr.bf16.mxu0 %v21000_v44  ;;  %v21056_v44 = vld [vmem:[#allocation213_spill] sm:$0xff] }
0x1e1f   : > { %14901 = vmatpush1.bf16.msra.mxu0 %v21001_v25  ;;  %v21057_v25 = vld [vmem:[#allocation214_spill] sm:$0xff] }
0x1e20   : > { %14903 = vmatprep.subr.bf16.mxu0 %v21002_v12 }
0x1e23   : > { %14905 = vmatpush1.bf16.msra.mxu0 %v21003_v1 }
0x1e24   : > { %14907 = vmatprep.subr.bf16.mxu0 %v20750_v7  ;;  %v21015_v7 = vld [vmem:[#allocation172_spill] sm:$0xff] }
0x1e27   : > { %14909 = vmatpush1.bf16.msra.mxu0 %v21004_v21  ;;  %v21058_v21 = vld [vmem:[#allocation215_spill] sm:$0xff] }
0x1e28   : > { %14911 = vmatprep.subr.bf16.mxu0 %v20752_v50  ;;  %v21009_v50 = vld [vmem:[#allocation146_spill] sm:$0xff] }
0x1e2b   : > { %14913 = vmatpush1.bf16.msra.mxu0 %v20753_v61  ;;  %v21011_v61 = vld [vmem:[#allocation168_spill] sm:$0xff] }
0x1e2c   : > { %14915 = vmatprep.subr.bf16.mxu0 %v21005_v48 }
0x1e2f   : > { %14917 = vmatpush1.bf16.msra.mxu0 %v21006_v38  ;;  %v21059_v38 = vld [vmem:[#allocation216_spill] sm:$0xff] }
0x1e30   : > { %14919 = vmatprep.subr.bf16.mxu0 %v20756_v24  ;;  %v8098_v24 = vmul.f32 %v8096_v60, %v18791_v3  ;;  %v21045_v60 = vld [vmem:[#allocation202_spill] sm:$0xff] }
0x1e33   : > { %14921 = vmatpush1.bf16.msra.mxu0 %v21007_v41  ;;  %v21060_v41 = vld [vmem:[#allocation217_spill] sm:$0xff] }
0x1e34   : > { %14923 = vmatprep.subr.bf16.mxu0 %v21008_v19  ;;  %v21061_v19 = vld [vmem:[#allocation218_spill] sm:$0xff] }
0x1e37   : > { %14925 = vmatpush1.bf16.msra.mxu0 %v20759_v6  ;;  %v8178_v6 = vpop.permute.xlu0 %8177 }
0x1e38   : > { %14927 = vmatprep.subr.bf16.mxu0 %v20760_v57  ;;  %v21012_v57 = vld [vmem:[#allocation169_spill] sm:$0xff] }
0x1e3b   : > { %14929 = vmatpush1.bf16.msra.mxu0 %v20761_v30  ;;  %v8181_v30 = vmul.f32 %v8178_v6, %v18793_v8  ;;  %v8342_v12 = vpop.permute.xlu0 %8341 }
0x1e3c   : > { %14931 = vmatprep.subr.bf16.mxu0 %v20762_v33  ;;  %v21010_v33 = vld [vmem:[#allocation167_spill] sm:$0xff]  ;;  %v8345_v48 = vmul.f32 %v8342_v12, %v18793_v8 }
0x1e3f   : > { %14933 = vmatpush1.bf16.msra.mxu0 %v20763_v55  ;;  %v21014_v55 = vld [vmem:[#allocation171_spill] sm:$0xff] }
0x1e40   : > { %14935 = vmatprep.subr.bf16.mxu0 %v20764_v62  ;;  %v21013_v62 = vld [vmem:[#allocation170_spill] sm:$0xff] }
0x1e43   : > { %14937 = vmatpush1.bf16.msra.mxu0 %v21009_v50  ;;  %v21062_v50 = vld [vmem:[#allocation219_spill] sm:$0xff] }
0x1e44   : > { %14939 = vmatprep.subr.bf16.mxu0 %v20766_v13  ;;  %v21017_v13 = vld [vmem:[#allocation174_spill] sm:$0xff] }
0x1e47   : > { %14941 = vmatpush1.bf16.msra.mxu0 %v20767_v14  ;;  %v21018_v14 = vld [vmem:[#allocation175_spill] sm:$0xff] }
0x1e48   : > { %14943 = vmatprep.subr.bf16.mxu0 %v20768_v20  ;;  %v21019_v20 = vld [vmem:[#allocation176_spill] sm:$0xff] }
0x1e4b   : > { %14945 = vmatpush1.bf16.msra.mxu0 %v20769_v26  ;;  %v21020_v26 = vld [vmem:[#allocation177_spill] sm:$0xff] }
0x1e4c   : > { %14947 = vmatprep.subr.bf16.mxu0 %v20770_v16  ;;  %v21016_v16 = vld [vmem:[#allocation173_spill] sm:$0xff] }
0x1e4e   : > { %8165 = vmatmul.mubr.f32.vlgmr.msra.gmra.mrb[92].mxu0 %v8098_v24  ;;  %v21064_v24 = vld [vmem:[#allocation221_spill] sm:$0xff] }
0x1e4f   : > { %14949 = vmatpush1.bf16.msra.mxu0 %v20771_v32  ;;  %8246 = vmatprep.mubr.f32.mxu0 %v8181_v30  ;;  %v21021_v32 = vld [vmem:[#allocation178_spill] sm:$0xff] }
0x1e50   : > { %14951 = vmatprep.subr.bf16.mxu0 %v20772_v34  ;;  %v21022_v34 = vld [vmem:[#allocation179_spill] sm:$0xff]  ;;  %v21065_v30 = vld [vmem:[#allocation222_spill] sm:$0xff] }
0x1e53   : > { %14953 = vmatpush1.bf16.msra.mxu0 %v20773_v39  ;;  %v21023_v39 = vld [vmem:[#allocation180_spill] sm:$0xff] }
0x1e54   : > { %14955 = vmatprep.subr.bf16.mxu0 %v20774_v40  ;;  %v21024_v40 = vld [vmem:[#allocation181_spill] sm:$0xff] }
0x1e57   : > { %14957 = vmatpush1.bf16.msra.mxu0 %v20775_v45  ;;  %v21025_v45 = vld [vmem:[#allocation182_spill] sm:$0xff] }
0x1e58   : > { %14959 = vmatprep.subr.bf16.mxu0 %v20776_v46  ;;  %v8260_v46 = vpop.permute.xlu1 %8259 }
0x1e59   : > { %v8262_v1 = vmul.f32 %v8260_v46, %v18791_v3 }
0x1e5b   : > { %14961 = vmatpush1.bf16.msra.mxu0 %v20777_v2  ;;  %v8180_v2 = vmul.f32 %v8178_v6, %v18791_v3  ;;  %v21063_v6 = vld [vmem:[#allocation220_spill] sm:$0xff] }
0x1e5c   : > { %14963 = vmatprep.subr.bf16.mxu0 %v20778_v42  ;;  %v21026_v42 = vld [vmem:[#allocation183_spill] sm:$0xff] }
0x1e5f   : > { %14965 = vmatpush1.bf16.msra.mxu0 %v20779_v36  ;;  %v8263_v36 = vmul.f32 %v8260_v46, %v18793_v8  ;;  %v21082_v46 = vld [vmem:[#allocation239_spill] sm:$0xff] }
0x1e60   : > { %14967 = vmatprep.subr.bf16.mxu0 %v20780_v54  ;;  %v21027_v54 = vld [vmem:[#allocation184_spill] sm:$0xff] }
0x1e63   : > { %14969 = vmatpush1.bf16.msra.mxu0 %v20781_v52  ;;  %v21028_v52 = vld [vmem:[#allocation185_spill] sm:$0xff] }
0x1e64   : > { %14971 = vmatprep.subr.bf16.mxu0 %v20782_v17  ;;  %v21029_v17 = vld [vmem:[#allocation186_spill] sm:$0xff] }
0x1e67   : > { %14973 = vmatpush1.bf16.msra.mxu0 %v20783_v51  ;;  %v21030_v51 = vld [vmem:[#allocation187_spill] sm:$0xff] }
0x1e68   : > { %14975 = vmatprep.subr.bf16.mxu0 %v20784_v18  ;;  %v21031_v18 = vld [vmem:[#allocation188_spill] sm:$0xff] }
0x1e6b   : > { %14977 = vmatpush1.bf16.msra.mxu0 %v20785_v10  ;;  %v21032_v10 = vld [vmem:[#allocation189_spill] sm:$0xff] }
0x1e6c   : > { %14979 = vmatprep.subr.bf16.mxu0 %v21010_v33  ;;  %v21066_v33 = vld [vmem:[#allocation223_spill] sm:$0xff] }
0x1e6f   : > { %14981 = vmatpush1.bf16.msra.mxu0 %v21011_v61  ;;  %v21067_v61 = vld [vmem:[#allocation224_spill] sm:$0xff] }
0x1e70   : > { %14983 = vmatprep.subr.bf16.mxu0 %v21012_v57  ;;  %v21068_v57 = vld [vmem:[#allocation225_spill] sm:$0xff] }
0x1e73   : > { %14985 = vmatpush1.bf16.msra.mxu0 %v21013_v62  ;;  %v21069_v62 = vld [vmem:[#allocation226_spill] sm:$0xff] }
0x1e74   : > { %14987 = vmatprep.subr.bf16.mxu0 %v21014_v55  ;;  %v21070_v55 = vld [vmem:[#allocation227_spill] sm:$0xff] }
0x1e77   : > { %14989 = vmatpush1.bf16.msra.mxu0 %v21015_v7  ;;  %v21071_v7 = vld [vmem:[#allocation228_spill] sm:$0xff] }
0x1e78   : > { %14991 = vmatprep.subr.bf16.mxu0 %v21016_v16  ;;  %v21072_v16 = vld [vmem:[#allocation229_spill] sm:$0xff] }
0x1e7b   : > { %14993 = vmatpush1.bf16.msra.mxu0 %v21017_v13  ;;  %v21073_v13 = vld [vmem:[#allocation230_spill] sm:$0xff] }
0x1e7c   : > { %14995 = vmatprep.subr.bf16.mxu0 %v21018_v14  ;;  %v21074_v14 = vld [vmem:[#allocation231_spill] sm:$0xff] }
0x1e7f   : > { %14997 = vmatpush1.bf16.msra.mxu0 %v21019_v20  ;;  %v21075_v20 = vld [vmem:[#allocation232_spill] sm:$0xff] }
0x1e80   : > { %14999 = vmatprep.subr.bf16.mxu0 %v21020_v26  ;;  %v21076_v26 = vld [vmem:[#allocation233_spill] sm:$0xff] }
0x1e83   : > { %15001 = vmatpush1.bf16.msra.mxu0 %v21021_v32  ;;  %v21077_v32 = vld [vmem:[#allocation234_spill] sm:$0xff] }
0x1e84   : > { %15003 = vmatprep.subr.bf16.mxu0 %v21022_v34  ;;  %v21078_v34 = vld [vmem:[#allocation235_spill] sm:$0xff] }
0x1e87   : > { %15005 = vmatpush1.bf16.msra.mxu0 %v21023_v39  ;;  %v21079_v39 = vld [vmem:[#allocation236_spill] sm:$0xff] }
0x1e88   : > { %15007 = vmatprep.subr.bf16.mxu0 %v21024_v40  ;;  %v21080_v40 = vld [vmem:[#allocation237_spill] sm:$0xff] }
0x1e8b   : > { %15009 = vmatpush1.bf16.msra.mxu0 %v21025_v45  ;;  %v21081_v45 = vld [vmem:[#allocation238_spill] sm:$0xff] }
0x1e8c   : > { %15011 = vmatprep.subr.bf16.mxu0 %v21026_v42  ;;  %v21084_v42 = vld [vmem:[#allocation241_spill] sm:$0xff] }
0x1e8e   : > { %8247 = vmatmul.mubr.f32.vlgmr.msra.gmra.mrb[92].mxu0 %v8180_v2  ;;  %v21083_v2 = vld [vmem:[#allocation240_spill] sm:$0xff] }
0x1e8f   : > { %15013 = vmatpush1.bf16.msra.mxu0 %v21027_v54  ;;  %8328 = vmatprep.mubr.f32.mxu0 %v8263_v36  ;;  %v21085_v36 = vld [vmem:[#allocation242_spill] sm:$0xff]  ;;  %v21086_v54 = vld [vmem:[#allocation243_spill] sm:$0xff] }
0x1e90   : > { %15015 = vmatprep.subr.bf16.mxu0 %v21028_v52  ;;  %v21087_v52 = vld [vmem:[#allocation244_spill] sm:$0xff] }
0x1e93   : > { %15017 = vmatpush1.bf16.msra.mxu0 %v21029_v17  ;;  %v21088_v17 = vld [vmem:[#allocation245_spill] sm:$0xff] }
0x1e94   : > { %15019 = vmatprep.subr.bf16.mxu0 %v21030_v51  ;;  %v21089_v51 = vld [vmem:[#allocation246_spill] sm:$0xff] }
0x1e97   : > { %15021 = vmatpush1.bf16.msra.mxu0 %v21031_v18  ;;  %v8424_v18 = vpop.permute.xlu1 %8423 }
0x1e98   : > { %15023 = vmatprep.subr.bf16.mxu0 %v21032_v10  ;;  %v8344_v10 = vmul.f32 %v8342_v12, %v18791_v3  ;;  %v21114_v12 = vld [vmem:[#allocation285_spill] sm:$0xff] }
0x1e9b   : > { %15025 = vmatpush1.bf16.msra.mxu0 %v21033_v4  ;;  %v21090_v4 = vld [vmem:[#allocation247_spill] sm:$0xff] }
0x1e9c   : > { %15027 = vmatprep.subr.bf16.mxu0 %v21034_v15  ;;  %v8427_v15 = vmul.f32 %v8424_v18, %v18793_v8 }
0x1e9f   : > { %15029 = vmatpush1.bf16.msra.mxu0 %v21035_v49  ;;  %v21091_v49 = vld [vmem:[#allocation248_spill] sm:$0xff] }
0x1ea0   : > { %15031 = vmatprep.subr.bf16.mxu0 %v21036_v22  ;;  %v21092_v22 = vld [vmem:[#allocation249_spill] sm:$0xff] }
0x1ea3   : > { %15033 = vmatpush1.bf16.msra.mxu0 %v21037_v47  ;;  %v21093_v47 = vld [vmem:[#allocation250_spill] sm:$0xff] }
0x1ea4   : > { %15035 = vmatprep.subr.bf16.mxu0 %v21038_v31  ;;  %v21094_v31 = vld [vmem:[#allocation251_spill] sm:$0xff] }
0x1ea7   : > { %15037 = vmatpush1.bf16.msra.mxu0 %v21039_v5  ;;  %v21095_v5 = vld [vmem:[#allocation254_spill] sm:$0xff] }
0x1ea8   : > { %15039 = vmatprep.subr.bf16.mxu0 %v21040_v59  ;;  %v21096_v59 = vld [vmem:[#allocation255_spill] sm:$0xff] }
0x1eab   : > { %15041 = vmatpush1.bf16.msra.mxu0 %v21041_v43  ;;  %v21097_v43 = vld [vmem:[#allocation258_spill] sm:$0xff] }
0x1eac   : > { %15043 = vmatprep.subr.bf16.mxu0 %v21042_v11  ;;  %v21098_v11 = vld [vmem:[#allocation259_spill] sm:$0xff] }
0x1eaf   : > { %15045 = vmatpush1.bf16.msra.mxu0 %v21043_v56  ;;  %v21099_v56 = vld [vmem:[#allocation262_spill] sm:$0xff] }
0x1eb0   : > { %15047 = vmatprep.subr.bf16.mxu0 %v21044_v37  ;;  %v21100_v37 = vld [vmem:[#allocation263_spill] sm:$0xff] }
0x1eb3   : > { %15049 = vmatpush1.bf16.msra.mxu0 %v21045_v60  ;;  %v21101_v60 = vld [vmem:[#allocation266_spill] sm:$0xff] }
0x1eb4   : > { %15051 = vmatprep.subr.bf16.mxu0 %v21046_v0  ;;  %v21102_v0 = vld [vmem:[#allocation267_spill] sm:$0xff] }
0x1eb7   : > { %15053 = vmatpush1.bf16.msra.mxu0 %v21047_v23  ;;  %v21103_v23 = vld [vmem:[#allocation270_spill] sm:$0xff] }
0x1eb8   : > { %15055 = vmatprep.subr.bf16.mxu0 %v21048_v63  ;;  %v21104_v63 = vld [vmem:[#allocation271_spill] sm:$0xff] }
0x1ebb   : > { %15057 = vmatpush1.bf16.msra.mxu0 %v21049_v58  ;;  %v21105_v58 = vld [vmem:[#allocation274_spill] sm:$0xff] }
0x1ebc   : > { %15059 = vmatprep.subr.bf16.mxu0 %v21050_v28  ;;  %v21106_v28 = vld [vmem:[#allocation275_spill] sm:$0xff] }
0x1ebf   : > { %15061 = vmatpush1.bf16.msra.mxu0 %v21051_v9  ;;  %v21107_v9 = vld [vmem:[#allocation278_spill] sm:$0xff] }
0x1ec0   : > { %15063 = vmatprep.subr.bf16.mxu0 %v21052_v35  ;;  %v21108_v35 = vld [vmem:[#allocation279_spill] sm:$0xff] }
0x1ec3   : > { %15065 = vmatpush1.bf16.msra.mxu0 %v21053_v29  ;;  %v21109_v29 = vld [vmem:[#allocation280_spill] sm:$0xff] }
0x1ec4   : > { %15067 = vmatprep.subr.bf16.mxu0 %v21054_v27  ;;  %v21110_v27 = vld [vmem:[#allocation281_spill] sm:$0xff] }
0x1ec7   : > { %15069 = vmatpush1.bf16.msra.mxu0 %v21055_v53  ;;  %v21111_v53 = vld [vmem:[#allocation282_spill] sm:$0xff] }
0x1ec8   : > { %15071 = vmatprep.subr.bf16.mxu0 %v21056_v44  ;;  %v21112_v44 = vld [vmem:[#allocation283_spill] sm:$0xff] }
0x1ecb   : > { %15073 = vmatpush1.bf16.msra.mxu0 %v21057_v25  ;;  %v21113_v25 = vld [vmem:[#allocation284_spill] sm:$0xff] }
0x1ecc   : > { %15075 = vmatprep.subr.bf16.mxu0 %v21058_v21  ;;  %v21116_v21 = vld [vmem:[#allocation287_spill] sm:$0xff] }
0x1ece   : > { %8329 = vmatmul.mubr.f32.vlgmr.msra.gmra.mrb[92].mxu0 %v8262_v1  ;;  %v21115_v1 = vld [vmem:[#allocation286_spill] sm:$0xff] }
0x1ecf   : > { %15077 = vmatpush1.bf16.msra.mxu0 %v21059_v38  ;;  %8410 = vmatprep.mubr.f32.mxu0 %v8345_v48  ;;  %v21117_v48 = vld [vmem:[#allocation288_spill] sm:$0xff]  ;;  %v21118_v38 = vld [vmem:[#allocation289_spill] sm:$0xff] }
0x1ed0   : > { %15079 = vmatprep.subr.bf16.mxu0 %v21060_v41  ;;  %v21119_v41 = vld [vmem:[#allocation290_spill] sm:$0xff] }
0x1ed3   : > { %15081 = vmatpush1.bf16.msra.mxu0 %v21061_v19  ;;  %v21120_v19 = vld [vmem:[#allocation291_spill] sm:$0xff] }
0x1ed4   : > { %15083 = vmatprep.subr.bf16.mxu0 %v21062_v50  ;;  %v21121_v50 = vld [vmem:[#allocation292_spill] sm:$0xff] }
0x1ed7   : > { %15085 = vmatpush1.bf16.msra.mxu0 %v21063_v6  ;;  %v8506_v6 = vpop.permute.xlu0 %8505 }
0x1ed8   : > { %15087 = vmatprep.subr.bf16.mxu0 %v21064_v24  ;;  %v8426_v24 = vmul.f32 %v8424_v18, %v18791_v3  ;;  %v21147_v18 = vld [vmem:[#allocation318_spill] sm:$0xff] }
0x1edb   : > { %15089 = vmatpush1.bf16.msra.mxu0 %v21065_v30  ;;  %v21122_v30 = vld [vmem:[#allocation293_spill] sm:$0xff] }
0x1edc   : > { %15091 = vmatprep.subr.bf16.mxu0 %v21066_v33  ;;  %v8509_v33 = vmul.f32 %v8506_v6, %v18793_v8  ;;  %v21132_v8 = vld [vmem:[#allocation303_spill] sm:$0xff] }
0x1edf   : > { %15093 = vmatpush1.bf16.msra.mxu0 %v21067_v61  ;;  %v21123_v61 = vld [vmem:[#allocation294_spill] sm:$0xff] }
0x1ee0   : > { %15095 = vmatprep.subr.bf16.mxu0 %v21068_v57  ;;  %v21124_v57 = vld [vmem:[#allocation295_spill] sm:$0xff] }
0x1ee3   : > { %15097 = vmatpush1.bf16.msra.mxu0 %v21069_v62  ;;  %v21125_v62 = vld [vmem:[#allocation296_spill] sm:$0xff] }
0x1ee4   : > { %15099 = vmatprep.subr.bf16.mxu0 %v21070_v55  ;;  %v21126_v55 = vld [vmem:[#allocation297_spill] sm:$0xff] }
0x1ee7   : > { %15101 = vmatpush1.bf16.msra.mxu0 %v21071_v7  ;;  %v21127_v7 = vld [vmem:[#allocation298_spill] sm:$0xff] }
0x1ee8   : > { %15103 = vmatprep.subr.bf16.mxu0 %v21072_v16  ;;  %v21128_v16 = vld [vmem:[#allocation299_spill] sm:$0xff] }
0x1eeb   : > { %15105 = vmatpush1.bf16.msra.mxu0 %v21073_v13  ;;  %v21129_v13 = vld [vmem:[#allocation300_spill] sm:$0xff] }
0x1eec   : > { %15107 = vmatprep.subr.bf16.mxu0 %v21074_v14  ;;  %v21130_v14 = vld [vmem:[#allocation301_spill] sm:$0xff] }
0x1eef   : > { %15109 = vmatpush1.bf16.msra.mxu0 %v21075_v20  ;;  %v21131_v20 = vld [vmem:[#allocation302_spill] sm:$0xff] }
0x1ef0   : > { %15111 = vmatprep.subr.bf16.mxu0 %v21076_v26  ;;  %v21133_v26 = vld [vmem:[#allocation304_spill] sm:$0xff] }
0x1ef3   : > { %15113 = vmatpush1.bf16.msra.mxu0 %v21077_v32  ;;  %v21134_v32 = vld [vmem:[#allocation305_spill] sm:$0xff] }
0x1ef4   : > { %15115 = vmatprep.subr.bf16.mxu0 %v21078_v34  ;;  %v21135_v34 = vld [vmem:[#allocation306_spill] sm:$0xff] }
0x1ef7   : > { %15117 = vmatpush1.bf16.msra.mxu0 %v21079_v39  ;;  %v21136_v39 = vld [vmem:[#allocation307_spill] sm:$0xff] }
0x1ef8   : > { %15119 = vmatprep.subr.bf16.mxu0 %v21080_v40  ;;  %v21137_v40 = vld [vmem:[#allocation308_spill] sm:$0xff] }
0x1efb   : > { %15121 = vmatpush1.bf16.msra.mxu0 %v21081_v45  ;;  %v21138_v45 = vld [vmem:[#allocation309_spill] sm:$0xff] }
0x1efc   : > { %15123 = vmatprep.subr.bf16.mxu0 %v21082_v46  ;;  %v21139_v46 = vld [vmem:[#allocation310_spill] sm:$0xff] }
0x1eff   : > { %15125 = vmatpush1.bf16.msra.mxu0 %v21083_v2  ;;  %v21140_v2 = vld [vmem:[#allocation311_spill] sm:$0xff] }
0x1f00   : > { %15127 = vmatprep.subr.bf16.mxu0 %v21084_v42  ;;  %v21141_v42 = vld [vmem:[#allocation312_spill] sm:$0xff] }
0x1f03   : > { %15129 = vmatpush1.bf16.msra.mxu0 %v21085_v36  ;;  %v21142_v36 = vld [vmem:[#allocation313_spill] sm:$0xff] }
0x1f04   : > { %15131 = vmatprep.subr.bf16.mxu0 %v21086_v54  ;;  %v21143_v54 = vld [vmem:[#allocation314_spill] sm:$0xff] }
0x1f07   : > { %15133 = vmatpush1.bf16.msra.mxu0 %v21087_v52  ;;  %v21144_v52 = vld [vmem:[#allocation315_spill] sm:$0xff] }
0x1f08   : > { %15135 = vmatprep.subr.bf16.mxu0 %v21088_v17  ;;  %v21145_v17 = vld [vmem:[#allocation316_spill] sm:$0xff] }
0x1f0b   : > { %15137 = vmatpush1.bf16.msra.mxu0 %v21089_v51  ;;  %v21146_v51 = vld [vmem:[#allocation317_spill] sm:$0xff] }
0x1f0c   : > { %15139 = vmatprep.subr.bf16.mxu0 %v21090_v4  ;;  %v21149_v4 = vld [vmem:[#allocation320_spill] sm:$0xff] }
0x1f0e   : > { %8411 = vmatmul.mubr.f32.vlgmr.msra.gmra.mrb[92].mxu0 %v8344_v10  ;;  %v21148_v10 = vld [vmem:[#allocation319_spill] sm:$0xff] }
0x1f0f   : > { %15141 = vmatpush1.bf16.msra.mxu0 %v21091_v49  ;;  %8492 = vmatprep.mubr.f32.mxu0 %v8427_v15  ;;  %v21150_v15 = vld [vmem:[#allocation321_spill] sm:$0xff]  ;;  %v21151_v49 = vld [vmem:[#allocation322_spill] sm:$0xff] }
0x1f10   : > { %15143 = vmatprep.subr.bf16.mxu0 %v21092_v22  ;;  %v21152_v22 = vld [vmem:[#allocation323_spill] sm:$0xff] }
0x1f13   : > { %15145 = vmatpush1.bf16.msra.mxu0 %v21093_v47  ;;  %v21153_v47 = vld [vmem:[#allocation324_spill] sm:$0xff] }
0x1f14   : > { %15147 = vmatprep.subr.bf16.mxu0 %v21094_v31  ;;  %v8508_v31 = vmul.f32 %v8506_v6, %v18791_v3  ;;  %v21163_v3 = vld [vmem:[#allocation352_spill] sm:$0xff] }
0x1f15   : > { %v21175_v6 = vld [vmem:[#allocation332_spill] sm:$0xff] }
0x1f17   : > { %15149 = vmatpush1.bf16.msra.mxu0 %v21095_v5  ;;  %v21154_v5 = vld [vmem:[#allocation343_spill] sm:$0xff] }
0x1f18   : > { %15151 = vmatprep.subr.bf16.mxu0 %v21096_v59  ;;  %v21155_v59 = vld [vmem:[#allocation344_spill] sm:$0xff] }
0x1f1b   : > { %15153 = vmatpush1.bf16.msra.mxu0 %v21097_v43  ;;  %v21156_v43 = vld [vmem:[#allocation345_spill] sm:$0xff] }
0x1f1c   : > { %15155 = vmatprep.subr.bf16.mxu0 %v21098_v11  ;;  %v21157_v11 = vld [vmem:[#allocation346_spill] sm:$0xff] }
0x1f1f   : > { %15157 = vmatpush1.bf16.msra.mxu0 %v21099_v56  ;;  %v21158_v56 = vld [vmem:[#allocation347_spill] sm:$0xff] }
0x1f20   : > { %15159 = vmatprep.subr.bf16.mxu0 %v21100_v37  ;;  %v21159_v37 = vld [vmem:[#allocation348_spill] sm:$0xff] }
0x1f23   : > { %15161 = vmatpush1.bf16.msra.mxu0 %v21101_v60  ;;  %v21160_v60 = vld [vmem:[#allocation349_spill] sm:$0xff] }
0x1f24   : > { %15163 = vmatprep.subr.bf16.mxu0 %v21102_v0  ;;  %v21161_v0 = vld [vmem:[#allocation350_spill] sm:$0xff] }
0x1f27   : > { %15165 = vmatpush1.bf16.msra.mxu0 %v21103_v23  ;;  %v21162_v23 = vld [vmem:[#allocation351_spill] sm:$0xff] }
0x1f28   : > { %15167 = vmatprep.subr.bf16.mxu0 %v21104_v63  ;;  %v21164_v63 = vld [vmem:[#allocation353_spill] sm:$0xff] }
0x1f2b   : > { %15169 = vmatpush1.bf16.msra.mxu0 %v21105_v58  ;;  %v21165_v58 = vld [vmem:[#allocation354_spill] sm:$0xff] }
0x1f2c   : > { %15171 = vmatprep.subr.bf16.mxu0 %v21106_v28  ;;  %v21166_v28 = vld [vmem:[#allocation355_spill] sm:$0xff] }
0x1f2f   : > { %15173 = vmatpush1.bf16.msra.mxu0 %v21107_v9  ;;  %v21167_v9 = vld [vmem:[#allocation356_spill] sm:$0xff] }
0x1f30   : > { %15175 = vmatprep.subr.bf16.mxu0 %v21108_v35  ;;  %v21168_v35 = vld [vmem:[#allocation357_spill] sm:$0xff] }
0x1f33   : > { %15177 = vmatpush1.bf16.msra.mxu0 %v21109_v29  ;;  %v21169_v29 = vld [vmem:[#allocation358_spill] sm:$0xff] }
0x1f34   : > { %15179 = vmatprep.subr.bf16.mxu0 %v21110_v27  ;;  %v21170_v27 = vmov 0.0  }
0x1f37   : > { %15181 = vmatpush1.bf16.msra.mxu0 %v21111_v53  ;;  %v7835_v53 = vpop.permute.xlu1 %7834 }
0x1f38   : > { %15183 = vmatprep.subr.bf16.mxu0 %v21112_v44 }
0x1f3b   : > { %15185 = vmatpush1.bf16.msra.mxu0 %v21113_v25 }
0x1f3c   : > { %15187 = vmatprep.subr.bf16.mxu0 %v21114_v12 }
0x1f3f   : > { %15189 = vmatpush1.bf16.msra.mxu0 %v21115_v1 }
0x1f40   : > { %15191 = vmatprep.subr.bf16.mxu0 %v21116_v21 }
0x1f43   : > { %15193 = vmatpush1.bf16.msra.mxu0 %v21117_v48 }
0x1f44   : > { %15195 = vmatprep.subr.bf16.mxu0 %v21118_v38  ;;  %v21171_v38 = vld [vmem:[#allocation328_spill] sm:$0xff] }
0x1f47   : > { %15197 = vmatpush1.bf16.msra.mxu0 %v21119_v41  ;;  %v21172_v41 = vld [vmem:[#allocation329_spill] sm:$0xff] }
0x1f48   : > { %15199 = vmatprep.subr.bf16.mxu0 %v21120_v19  ;;  %v21173_v19 = vld [vmem:[#allocation330_spill] sm:$0xff] }
0x1f4b   : > { %15201 = vmatpush1.bf16.msra.mxu0 %v21121_v50  ;;  %v21174_v50 = vld [vmem:[#allocation331_spill] sm:$0xff] }
0x1f4c   : > { %15203 = vmatprep.subr.bf16.mxu0 %v21122_v30  ;;  %v21177_v30 = vld [vmem:[#allocation334_spill] sm:$0xff] }
0x1f4e   : > { %8493 = vmatmul.mubr.f32.vlgmr.msra.gmra.mrb[92].mxu0 %v8426_v24  ;;  %v21176_v24 = vld [vmem:[#allocation333_spill] sm:$0xff] }
0x1f4f   : > { %15205 = vmatpush1.bf16.msra.mxu0 %v21123_v61  ;;  %8574 = vmatprep.mubr.f32.mxu0 %v8509_v33  ;;  %v21178_v33 = vld [vmem:[#allocation335_spill] sm:$0xff]  ;;  %v21179_v61 = vld [vmem:[#allocation336_spill] sm:$0xff] }
0x1f50   : > { %15207 = vmatprep.subr.bf16.mxu0 %v21124_v57  ;;  %v21180_v57 = vld [vmem:[#allocation337_spill] sm:$0xff] }
0x1f53   : > { %15209 = vmatpush1.bf16.msra.mxu0 %v21125_v62  ;;  %v21181_v62 = vld [vmem:[#allocation338_spill] sm:$0xff] }
0x1f54   : > { %15211 = vmatprep.subr.bf16.mxu0 %v21126_v55  ;;  %v21182_v55 = vld [vmem:[#allocation339_spill] sm:$0xff] }
0x1f57   : > { %15213 = vmatpush1.bf16.msra.mxu0 %v21127_v7  ;;  %v21183_v7 = vld [vmem:[#allocation340_spill] sm:$0xff] }
0x1f58   : > { %15215 = vmatprep.subr.bf16.mxu0 %v21128_v16  ;;  %v21184_v16 = vld [vmem:[#allocation341_spill] sm:$0xff] }
0x1f5b   : > { %15217 = vmatpush1.bf16.msra.mxu0 %v21129_v13  ;;  %v21185_v13 = vld [vmem:[#allocation342_spill] sm:$0xff] }
0x1f5c   : > { %15219 = vmatprep.subr.bf16.mxu0 %v21130_v14  ;;  %v21186_v14 = vld [vmem:[#allocation359_spill] sm:$0xff] }
0x1f5f   : > { %15221 = vmatpush1.bf16.msra.mxu0 %v21131_v20  ;;  %v21187_v20 = vld [vmem:[#allocation360_spill] sm:$0xff] }
0x1f60   : > { %15223 = vmatprep.subr.bf16.mxu0 %v21132_v8  ;;  %v21188_v8 = vld [vmem:[#allocation361_spill] sm:$0xff] }
0x1f63   : > { %15225 = vmatpush1.bf16.msra.mxu0 %v21133_v26  ;;  %v21189_v26 = vld [vmem:[#allocation362_spill] sm:$0xff] }
0x1f64   : > { %15227 = vmatprep.subr.bf16.mxu0 %v21134_v32  ;;  %v21190_v32 = vld [vmem:[#allocation363_spill] sm:$0xff] }
0x1f67   : > { %15229 = vmatpush1.bf16.msra.mxu0 %v21135_v34  ;;  %v21191_v34 = vld [vmem:[#allocation364_spill] sm:$0xff] }
0x1f68   : > { %15231 = vmatprep.subr.bf16.mxu0 %v21136_v39  ;;  %v21192_v39 = vld [vmem:[#allocation365_spill] sm:$0xff] }
0x1f6b   : > { %15233 = vmatpush1.bf16.msra.mxu0 %v21137_v40  ;;  %v21193_v40 = vld [vmem:[#allocation366_spill] sm:$0xff] }
0x1f6c   : > { %15235 = vmatprep.subr.bf16.mxu0 %v21138_v45  ;;  %v21194_v45 = vld [vmem:[#allocation367_spill] sm:$0xff] }
0x1f6f   : > { %15237 = vmatpush1.bf16.msra.mxu0 %v21139_v46  ;;  %v21195_v46 = vld [vmem:[#allocation368_spill] sm:$0xff] }
0x1f70   : > { %15239 = vmatprep.subr.bf16.mxu0 %v21140_v2  ;;  %v21196_v2 = vld [vmem:[#allocation369_spill] sm:$0xff] }
0x1f73   : > { %15241 = vmatpush1.bf16.msra.mxu0 %v21141_v42  ;;  %v21197_v42 = vld [vmem:[#allocation370_spill] sm:$0xff] }
0x1f74   : > { %15243 = vmatprep.subr.bf16.mxu0 %v21142_v36  ;;  %v21198_v36 = vld [vmem:[#allocation371_spill] sm:$0xff] }
0x1f77   : > { %15245 = vmatpush1.bf16.msra.mxu0 %v21143_v54  ;;  %v21199_v54 = vld [vmem:[#allocation372_spill] sm:$0xff] }
0x1f78   : > { %15247 = vmatprep.subr.bf16.mxu0 %v21144_v52  ;;  %v21200_v52 = vld [vmem:[#allocation373_spill] sm:$0xff] }
0x1f7b   : > { %15249 = vmatpush1.bf16.msra.mxu0 %v21145_v17  ;;  %v21201_v17 = vld [vmem:[#allocation374_spill] sm:$0xff] }
0x1f7c   : > { %15251 = vmatprep.subr.bf16.mxu0 %v21146_v51 }
0x1f7f   : > { %15253 = vmatpush1.bf16.msra.mxu0 %v21147_v18 }
0x1f80   : > { %15255 = vmatprep.subr.bf16.mxu0 %v21148_v10 }
0x1f83   : > { %15257 = vmatpush1.bf16.msra.mxu0 %v21149_v4 }
0x1f84   : > { %15259 = vmatprep.subr.bf16.mxu0 %v21150_v15 }
0x1f87   : > { %15261 = vmatpush1.bf16.msra.mxu0 %v21151_v49 }
0x1f88   : > { %15263 = vmatprep.subr.bf16.mxu0 %v21152_v22 }
0x1f8b   : > { %15265 = vmatpush1.bf16.msra.mxu0 %v21153_v47 }
0x1f8c   : > { %15331 = vmatprep.subr.bf16.mxu0 %v21154_v5 }
0x1f8e   : > { %8575 = vmatmul.mubr.f32.vlgmr.msra.gmra.mrb[92].mxu0 %v8508_v31 }
0x1f8f   : > { %15333 = vmatpush3.bf16.msra.mxu0 %v21155_v59 }
0x1f90   : > { %15335 = vmatprep.subr.bf16.mxu0 %v21156_v43 }
0x1f93   : > { %15337 = vmatpush3.bf16.msra.mxu0 %v21157_v11 }
0x1f94   : > { %15339 = vmatprep.subr.bf16.mxu0 %v21158_v56 }
0x1f97   : > { %15341 = vmatpush3.bf16.msra.mxu0 %v21159_v37 }
0x1f98   : > { %15343 = vmatprep.subr.bf16.mxu0 %v21160_v60  ;;  %v8875_v60 = vld [vmem:[%s21202_s30] sm:$0xff] }
0x1f9b   : > { %15345 = vmatpush3.bf16.msra.mxu0 %v21161_v0  ;;  %v11513_v0 = vld [vmem:[%s21202_s30 + $0x10] sm:$0xff] }
0x1f9c   : > { %15347 = vmatprep.subr.bf16.mxu0 %v21162_v23  ;;  %v11517_v23 = vld [vmem:[%s21202_s30 + $0x18] sm:$0xff] }
0x1f9f   : > { %15349 = vmatpush3.bf16.msra.mxu0 %v21163_v3  ;;  %v21203_v3 = vmov 0.0|0.0  }
0x1fa0   : > { %15351 = vmatprep.subr.bf16.mxu0 %v21164_v63  ;;  %v21204_v63 = vld [vmem:[#allocation375_spill] sm:$0xff] }
0x1fa3   : > { %15353 = vmatpush3.bf16.msra.mxu0 %v21165_v58  ;;  %v11521_v58 = vld [vmem:[%s21202_s30 + $0x20] sm:$0xff] }
0x1fa4   : > { %15355 = vmatprep.subr.bf16.mxu0 %v21166_v28  ;;  %v21205_v28 = vld [vmem:[#allocation376_spill] sm:$0xff] }
0x1fa7   : > { %15357 = vmatpush3.bf16.msra.mxu0 %v21167_v9  ;;  %v11525_v9 = vld [vmem:[%s21202_s30 + $0x28] sm:$0xff] }
0x1fa8   : > { %15359 = vmatprep.subr.bf16.mxu0 %v21168_v35  ;;  %v21206_v35 = vld [vmem:[#allocation377_spill] sm:$0xff] }
0x1fab   : > { %15361 = vmatpush3.bf16.msra.mxu0 %v21169_v29  ;;  %v11529_v29 = vld [vmem:[%s21202_s30 + $0x30] sm:$0xff] }
0x1fac   : > { %12768 = vmatprep.subr.mxu0 %v21170_v27 }
0x2061   : > { %v8576_v44 = vpop.f32.mrb[92].mxu0 }
0x2062   : > { %v15586_v25 = vadd.f32 %v8576_v44, %v7835_v53  ;;  %v8578_v12 = vpop.f32.mrb[93].mxu0  ;;  %v11533_v44 = vld [vmem:[%s21202_s30 + $0x38] sm:$0xff] }
0x2063   : > { %v15587_v1 = vadd.f32 %v8578_v12, %v7835_v53  ;;  %v21207_v53 = vld [vmem:[#allocation378_spill] sm:$0xff]  ;;  %v21208_v12 = vld [vmem:[#allocation411_spill] sm:$0xff] }
0x2064   : > { %v8583_v48 = vmax.f32 %v15586_v25, 0.0  ;;  %v11537_v25 = vld [vmem:[%s21202_s30 + $0x40] sm:$0xff] }
0x2065   : > { %v8584_v21 = vmax.f32 %v15587_v1, 0.0  ;;  %v21209_v1 = vld [vmem:[#allocation412_spill] sm:$0xff] }
0x2067   : > { %8649 = vmatprep.mubr.f32.mxu1 %v8584_v21  ;;  %8789 = vmatprep.mubr.f32.mxu0 %v8584_v21 }
0x2068   : > { %8650 = vmatmul.mubr.f32.vlgmr.msra.gmra.mrb[8].mxu1 %v8583_v48  ;;  %8790 = vmatmul.mubr.f32.vlgmr.msra.gmra.mrb[94].mxu0 %v8583_v48 }
0x2069   : > { %15301 = vmatpush3.bf16.msra.mxu1 %v21171_v38  ;;  %8719 = vmatprep.mubr.f32.mxu1 %v8584_v21 }
0x206a   : > { %15303 = vmatprep.subr.bf16.mxu1 %v21172_v41  ;;  %12770 = vmatprep.mubr.msk.f32.mxu0 %vm16245_vm2, %v21170_v27 }
0x206d   : > { %15305 = vmatpush3.bf16.msra.mxu1 %v21173_v19  ;;  %v11509_v19 = vld [vmem:[%s21202_s30 + $0x8] sm:$0xff] }
0x206e   : > { %15307 = vmatprep.subr.bf16.mxu1 %v21174_v50  ;;  %v21212_v50 = vld [vmem:[#allocation379_spill] sm:$0xff] }
0x2071   : > { %15309 = vmatpush3.bf16.msra.mxu1 %v21175_v6  ;;  %v21213_v6 = vld [vmem:[#allocation380_spill] sm:$0xff] }
0x2072   : > { %15311 = vmatprep.subr.bf16.mxu1 %v21176_v24  ;;  %v21214_v24 = vld [vmem:[#allocation381_spill] sm:$0xff] }
0x2075   : > { %15313 = vmatpush3.bf16.msra.mxu1 %v21177_v30  ;;  %v21215_v30 = vld [vmem:[#allocation382_spill] sm:$0xff] }
0x2076   : > { %15315 = vmatprep.subr.bf16.mxu1 %v21178_v33 }
0x2079   : > { %15317 = vmatpush3.bf16.msra.mxu1 %v21179_v61 }
0x207a   : > { %15319 = vmatprep.subr.bf16.mxu1 %v21180_v57 }
0x207d   : > { %15321 = vmatpush3.bf16.msra.mxu1 %v21181_v62 }
0x207e   : > { %15323 = vmatprep.subr.bf16.mxu1 %v21182_v55 }
0x2081   : > { %15325 = vmatpush3.bf16.msra.mxu1 %v21183_v7 }
0x2082   : > { %15327 = vmatprep.subr.bf16.mxu1 %v21184_v16 }
0x2085   : > { %15329 = vmatpush3.bf16.msra.mxu1 %v21185_v13 }
0x2086   : > { %15363 = vmatprep.subr.bf16.mxu1 %v21186_v14 }
0x2088   : > { %8720 = vmatmul.mubr.f32.vlgmr.msra.gmra.mrb[10].mxu1 %v8583_v48 }
0x2089   : > { %15365 = vmatpush3.bf16.msra.mxu1 %v21187_v20  ;;  %8859 = vmatprep.mubr.f32.mxu1 %v8584_v21  ;;  %v21210_v21 = vld [vmem:[#allocation413_spill] sm:$0xff] }
0x208a   : > { %15367 = vmatprep.subr.bf16.mxu1 %v21188_v8 }
0x208d   : > { %15369 = vmatpush3.bf16.msra.mxu1 %v21189_v26 }
0x208e   : > { %15371 = vmatprep.subr.bf16.mxu1 %v21190_v32 }
0x2091   : > { %15373 = vmatpush3.bf16.msra.mxu1 %v21191_v34 }
0x2092   : > { %15375 = vmatprep.subr.bf16.mxu1 %v21192_v39 }
0x2095   : > { %15377 = vmatpush3.bf16.msra.mxu1 %v21193_v40 }
0x2096   : > { %15379 = vmatprep.subr.bf16.mxu1 %v21194_v45  ;;  %v21216_v45 = vld [vmem:[#allocation383_spill] sm:$0xff] }
0x2099   : > { %15381 = vmatpush3.bf16.msra.mxu1 %v21195_v46  ;;  %v21217_v46 = vld [vmem:[#allocation384_spill] sm:$0xff] }
0x209a   : > { %15383 = vmatprep.subr.bf16.mxu1 %v21196_v2  ;;  %v21218_v2 = vld [vmem:[#allocation385_spill] sm:$0xff] }
0x209d   : > { %15385 = vmatpush3.bf16.msra.mxu1 %v21197_v42  ;;  %v21219_v42 = vld [vmem:[#allocation386_spill] sm:$0xff] }
0x209e   : > { %15387 = vmatprep.subr.bf16.mxu1 %v21198_v36  ;;  %v21220_v36 = vld [vmem:[#allocation387_spill] sm:$0xff] }
0x20a1   : > { %15389 = vmatpush3.bf16.msra.mxu1 %v21199_v54  ;;  %v21221_v54 = vld [vmem:[#allocation388_spill] sm:$0xff] }
0x20a2   : > { %15391 = vmatprep.subr.bf16.mxu1 %v21200_v52  ;;  %v21222_v52 = vld [vmem:[#allocation389_spill] sm:$0xff] }
0x20a5   : > { %15393 = vmatpush3.bf16.msra.mxu1 %v21201_v17  ;;  %v21223_v17 = vld [vmem:[#allocation390_spill] sm:$0xff] }
0x20a6   : > { %12816 = vmatprep.subr.mxu1 %v21170_v27 }
0x20a8   : > { %8860 = vmatmul.mubr.f32.vlgmr.msra.gmra.mrb[12].mxu1 %v8583_v48  ;;  %v21211_v48 = vld [vmem:[#allocation414_spill] sm:$0xff] }
0x20a9   : > { %12818 = vmatprep.mubr.msk.f32.mxu1 %vm16245_vm2, %v21170_v27 }
0x213b   : > { %v11981_v51 = vpop.f32.mrb[8].mxu1  ;;  %v12051_v18 = vpop.f32.mrb[94].mxu0 }
0x213c   : > { %v11982_v10 = vpop.f32.mrb[9].mxu1  ;;  %v12052_v4 = vpop.f32.mrb[95].mxu0 }
0x213d   : > { %v11983_v15 = vadd.f32 %v11982_v10, %v11981_v51  ;;  %v12053_v49 = vadd.f32 %v12052_v4, %v12051_v18  ;;  %v21224_v51 = vld [vmem:[#allocation391_spill] sm:$0xff]  ;;  %v21225_v18 = vld [vmem:[#allocation392_spill] sm:$0xff]  ;;  %v21226_v10 = vld [vmem:[#allocation393_spill] sm:$0xff] }
0x213e   : > { %v21227_v4 = vld [vmem:[#allocation394_spill] sm:$0xff] }
0x215b   : > { %v12016_v22 = vpop.f32.mrb[10].mxu1 }
0x215c   : > { %v12017_v47 = vpop.f32.mrb[11].mxu1 }
0x215d   : > { %v12018_v31 = vadd.f32 %v12017_v47, %v12016_v22  ;;  %v21230_v22 = vld [vmem:[#allocation397_spill] sm:$0xff]  ;;  %v21231_v47 = vld [vmem:[#allocation398_spill] sm:$0xff] }
0x215f   : > { %v8865_v5 = vmax.f32 %v11983_v15, %v12018_v31  ;;  %v21228_v15 = vld [vmem:[#allocation395_spill] sm:$0xff] }
0x2160   : > { %v21232_v31 = vld [vmem:[#allocation399_spill] sm:$0xff] }
0x217b   : > { %v12086_v59 = vpop.f32.mrb[12].mxu1 }
0x217c   : > { %v12087_v43 = vpop.f32.mrb[13].mxu1 }
0x217d   : > { %v12088_v11 = vadd.f32 %v12087_v43, %v12086_v59  ;;  %v21234_v59 = vld [vmem:[#allocation401_spill] sm:$0xff]  ;;  %v21235_v43 = vld [vmem:[#allocation402_spill] sm:$0xff] }
0x217f   : > { %v8866_v56 = vmax.f32 %v12053_v49, %v12088_v11  ;;  %v21229_v49 = vld [vmem:[#allocation396_spill] sm:$0xff]  ;;  %v21236_v11 = vld [vmem:[#allocation403_spill] sm:$0xff] }
0x2181   : > { %v8867_v37 = vmax.f32 %v8865_v5, %v8866_v56  ;;  %v21233_v5 = vld [vmem:[#allocation400_spill] sm:$0xff] }
0x2182   : > { %v21237_v56 = vld [vmem:[#allocation404_spill] sm:$0xff] }
0x2183   : > { %12769 = vmatpush3.msk.msra.mxu0 %vm5047_vm6, %v8867_v37  ;;  %12817 = vmatpush3.msk.msra.mxu1 %vm5047_vm6, %v8867_v37 }
0x2184   : > { %12771 = vmatmul.mubr.msk.f32.vlgmr.msra.gmra.mrb[96].mxu0 %vm5043_vm7, %v8875_v60  ;;  %12819 = vmatmul.mubr.msk.f32.vlgmr.msra.gmra.mrb[14].mxu1 %vm5043_vm7, %v11513_v0  ;;  %v21239_v60 = vld [vmem:[#allocation406_spill] sm:$0xff]  ;;  %v21240_v0 = vld [vmem:[#allocation407_spill] sm:$0xff] }
0x2185   : > { %12840 = vmatprep.subr.mxu1 %v21170_v27  ;;  %12842 = vmatprep.mubr.msk.f32.mxu1 %vm16245_vm2, %v21170_v27 }
0x2186   : > { %12841 = vmatpush3.msk.msra.mxu1 %vm5047_vm6, %v8867_v37  ;;  %15394 = vmatprep.subr.bf16.mxu0 %v21203_v3 }
0x2187   : > { %12864 = vmatprep.subr.mxu1 %v21170_v27  ;;  %15396 = vmatpush3.bf16.msra.mxu0 %v21204_v63  ;;  %v21242_v63 = vld [vmem:[#allocation409_spill] sm:$0xff] }
0x2188   : > { %12843 = vmatmul.mubr.msk.f32.vlgmr.msra.gmra.mrb[16].mxu1 %vm5043_vm7, %v11517_v23  ;;  %15397 = vmatprep.subr.bf16.mxu0 %v21203_v3  ;;  %v21241_v23 = vld [vmem:[#allocation408_spill] sm:$0xff] }
0x2189   : > { %12865 = vmatpush3.msk.msra.mxu1 %vm5047_vm6, %v8867_v37  ;;  %12866 = vmatprep.mubr.msk.f32.mxu1 %vm16245_vm2, %v21170_v27 }
0x218a   : > { %12888 = vmatprep.subr.mxu1 %v21170_v27  ;;  %12789 = vmatprep.mubr.msk.f32.mxu0 %vm16245_vm2, %v21170_v27 }
0x218b   : > { %15399 = vmatpush3.bf16.msra.mxu0 %v21205_v28  ;;  %v8872_v28 = vpop.permute.xlu0 %8871 }
0x218c   : > { %12867 = vmatmul.mubr.msk.f32.vlgmr.msra.gmra.mrb[18].mxu1 %vm5043_vm7, %v11521_v58  ;;  %15400 = vmatprep.subr.bf16.mxu0 %v21203_v3  ;;  %v21243_v58 = vld [vmem:[#allocation410_spill] sm:$0xff] }
0x218d   : > { %12889 = vmatpush3.msk.msra.mxu1 %vm5047_vm6, %v8867_v37  ;;  %12890 = vmatprep.mubr.msk.f32.mxu1 %vm16245_vm2, %v21170_v27 }
0x218e   : > { %12912 = vmatprep.subr.mxu1 %v21170_v27 }
0x218f   : > { %15402 = vmatpush3.bf16.msra.mxu0 %v21206_v35 }
0x2190   : > { %12891 = vmatmul.mubr.msk.f32.vlgmr.msra.gmra.mrb[20].mxu1 %vm5043_vm7, %v11525_v9  ;;  %15403 = vmatprep.subr.bf16.mxu0 %v21203_v3 }
0x2191   : > { %12913 = vmatpush3.msk.msra.mxu1 %vm5047_vm6, %v8867_v37  ;;  %12914 = vmatprep.mubr.msk.f32.mxu1 %vm16245_vm2, %v21170_v27 }
0x2192   : > { %12936 = vmatprep.subr.mxu1 %v21170_v27 }
0x2193   : > { %15405 = vmatpush3.bf16.msra.mxu0 %v21207_v53 }
0x2194   : > { %12915 = vmatmul.mubr.msk.f32.vlgmr.msra.gmra.mrb[22].mxu1 %vm5043_vm7, %v11529_v29  ;;  %12792 = vmatprep.subr.mxu0 %v21170_v27 }
0x2195   : > { %12937 = vmatpush3.msk.msra.mxu1 %vm5047_vm6, %v8867_v37  ;;  %12938 = vmatprep.mubr.msk.f32.mxu1 %vm16245_vm2, %v21170_v27 }
0x2196   : > { %12960 = vmatprep.subr.mxu1 %v21170_v27 }
0x2198   : > { %12939 = vmatmul.mubr.msk.f32.vlgmr.msra.gmra.mrb[24].mxu1 %vm5043_vm7, %v11533_v44  ;;  %v21244_v44 = vld [vmem:[#allocation415_spill] sm:$0xff] }
0x2199   : > { %12961 = vmatpush3.msk.msra.mxu1 %vm5047_vm6, %v8867_v37  ;;  %12962 = vmatprep.mubr.msk.f32.mxu1 %vm16245_vm2, %v21170_v27 }
0x219a   : > { %15502 = vmatprep.subr.bf16.mxu1 %v21203_v3 }
0x219c   : > { %12963 = vmatmul.mubr.msk.f32.vlgmr.msra.gmra.mrb[26].mxu1 %vm5043_vm7, %v11537_v25  ;;  %v21245_v25 = vld [vmem:[#allocation416_spill] sm:$0xff] }
0x219d   : > { %15504 = vmatpush3.bf16.msra.mxu1 %v21208_v12  ;;  %13000 = vmatprep.mubr.msk.f32.mxu1 %vm16245_vm2, %v21170_v27  ;;  %v21246_v12 = vld [vmem:[#allocation417_spill] sm:$0xff] }
0x219e   : > { %15505 = vmatprep.subr.bf16.mxu1 %v21203_v3 }
0x21a1   : > { %15507 = vmatpush3.bf16.msra.mxu1 %v21209_v1  ;;  %v21247_v1 = vld [vmem:[#allocation418_spill] sm:$0xff] }
0x21a2   : > { %15508 = vmatprep.subr.bf16.mxu1 %v21203_v3 }
0x21a5   : > { %15510 = vmatpush3.bf16.msra.mxu1 %v21210_v21  ;;  %v21248_v21 = vld [vmem:[#allocation419_spill] sm:$0xff] }
0x21a6   : > { %15511 = vmatprep.subr.bf16.mxu1 %v21203_v3 }
0x21a9   : > { %15513 = vmatpush3.bf16.msra.mxu1 %v21211_v48  ;;  %v21249_v48 = vld [vmem:[#allocation420_spill] sm:$0xff] }
0x21aa   : > { %15514 = vmatprep.subr.bf16.mxu1 %v21203_v3 }
0x2257   : > { %v8948_v38 = vpop.f32.mrb[96].mxu0  ;;  %v9246_v33 = vpop.f32.mrb[14].mxu1 }
0x2258   : > { %12790 = vmatmul.mubr.msk.f32.vlgmr.msra.gmra.mrb[98].mxu0 %vm3298_vm4, %v8948_v38  ;;  %v12772_v41 = vpop.f32.mrb[97].mxu0  ;;  %v12820_v61 = vpop.f32.mrb[15].mxu1  ;;  %v21250_v38 = vld [vmem:[#allocation421_spill] sm:$0xff] }
0x2259   : > { %12793 = vmatpush3.msk.msra.mxu0 %vm5047_vm6, %v8867_v37  ;;  %12794 = vmatprep.mubr.msk.f32.mxu0 %vm16245_vm2, %v21170_v27  ;;  %v21238_v37 = vld [vmem:[#allocation405_spill] sm:$0xff]  ;;  %v21251_v41 = vld [vmem:[#allocation422_spill] sm:$0xff] }
0x225a   : > { %15406 = vmatprep.subr.bf16.mxu0 %v21203_v3 }
0x225b   : > { %v9395_v57 = vpop.f32.mrb[16].mxu1 }
0x225c   : > { %12795 = vmatmul.mubr.msk.f32.vlgmr.msra.gmra.mrb[100].mxu0 %vm5043_vm7, %v11509_v19  ;;  %v12844_v62 = vpop.f32.mrb[17].mxu1  ;;  %v21252_v19 = vld [vmem:[#allocation423_spill] sm:$0xff] }
0x225d   : > { %15408 = vmatpush3.bf16.msra.mxu0 %v21212_v50  ;;  %12813 = vmatprep.mubr.msk.f32.mxu0 %vm16245_vm2, %v21170_v27  ;;  %v21253_v50 = vld [vmem:[#allocation424_spill] sm:$0xff] }
0x225e   : > { %15409 = vmatprep.subr.bf16.mxu0 %v21203_v3  ;;  %v11123_v62 = vld [vmem:[%s21258_s13 + $0x8] sm:$0xff] }
0x225f   : > { %v9544_v55 = vpop.f32.mrb[18].mxu1 }
0x2260   : > { %v12868_v7 = vpop.f32.mrb[19].mxu1 }
0x2261   : > { %15411 = vmatpush3.bf16.msra.mxu0 %v21213_v6  ;;  %v21254_v6 = vld [vmem:[#allocation425_spill] sm:$0xff] }
0x2262   : > { %15412 = vmatprep.subr.bf16.mxu0 %v21203_v3 }
0x2263   : > { %v9693_v16 = vpop.f32.mrb[20].mxu1 }
0x2264   : > { %v12892_v13 = vpop.f32.mrb[21].mxu1 }
0x2265   : > { %15414 = vmatpush3.bf16.msra.mxu0 %v21214_v24  ;;  %v21255_v24 = vld [vmem:[#allocation426_spill] sm:$0xff] }
0x2266   : > { %15415 = vmatprep.subr.bf16.mxu0 %v21203_v3 }
0x2267   : > { %v9842_v14 = vpop.f32.mrb[22].mxu1 }
0x2268   : > { %v12916_v20 = vpop.f32.mrb[23].mxu1 }
0x2269   : > { %15417 = vmatpush3.bf16.msra.mxu0 %v21215_v30  ;;  %v10506_v30 = vld [vmem:[%s21256_s24] sm:$0xff] }
0x226a   : > { %15418 = vmatprep.subr.bf16.mxu0 %v21203_v3 }
0x226b   : > { %v19220_v8 = vpop.f32.mrb[24].mxu1 }
0x226c   : > { %v12940_v26 = vpop.f32.mrb[25].mxu1 }
0x226f   : > { %v19222_v32 = vpop.f32.mrb[26].mxu1 }
0x2270   : > { %v12964_v34 = vpop.f32.mrb[27].mxu1 }
0x2271   : > { %v11547_v34 = vld [vmem:[%s21257_s27 + $0x18] sm:$0xff] }
0x232f   : > { %v9097_v39 = vpop.f32.mrb[100].mxu0 }
0x2330   : > { %12814 = vmatmul.mubr.msk.f32.vlgmr.msra.gmra.mrb[98].mxu0 %vm3298_vm4, %v9097_v39  ;;  %v12796_v40 = vpop.f32.mrb[101].mxu0 }
0x2331   : > { %15420 = vmatpush3.bf16.msra.mxu0 %v21216_v45  ;;  %12837 = vmatprep.mubr.msk.f32.mxu0 %vm16245_vm2, %v21170_v27 }
0x2332   : > { %15421 = vmatprep.subr.bf16.mxu0 %v21203_v3 }
0x2335   : > { %15423 = vmatpush3.bf16.msra.mxu0 %v21217_v46 }
0x2336   : > { %15424 = vmatprep.subr.bf16.mxu0 %v21203_v3 }
0x2339   : > { %15426 = vmatpush3.bf16.msra.mxu0 %v21218_v2 }
0x233a   : > { %15427 = vmatprep.subr.bf16.mxu0 %v21203_v3 }
0x233d   : > { %15429 = vmatpush3.bf16.msra.mxu0 %v21219_v42  ;;  %v11549_v42 = vld [vmem:[%s21257_s27 + $0x20] sm:$0xff] }
0x233e   : > { %15430 = vmatprep.subr.bf16.mxu0 %v21203_v3 }
0x2340   : > { %12838 = vmatmul.mubr.msk.f32.vlgmr.msra.gmra.mrb[98].mxu0 %vm3298_vm4, %v9246_v33  ;;  %v10507_v33 = vld [vmem:[%s21257_s27 + $0x8] sm:$0xff] }
0x2341   : > { %15432 = vmatpush3.bf16.msra.mxu0 %v21220_v36  ;;  %12861 = vmatprep.mubr.msk.f32.mxu0 %vm16245_vm2, %v21170_v27  ;;  %v15551_v61 = vpack.c.bf16 %v10507_v33, %v10506_v30  ;;  %v11550_v36 = vld [vmem:[%s21257_s27 + $0x28] sm:$0xff] }
0x2342   : > { %15433 = vmatprep.subr.bf16.mxu0 %v21203_v3 }
0x2345   : > { %15435 = vmatpush3.bf16.msra.mxu0 %v21221_v54  ;;  %v15557_v54 = vpack.c.bf16 %v11550_v36, %v11549_v42 }
0x2346   : > { %15436 = vmatprep.subr.bf16.mxu0 %v21203_v3 }
0x2349   : > { %15438 = vmatpush3.bf16.msra.mxu0 %v21222_v52 }
0x234a   : > { %15439 = vmatprep.subr.bf16.mxu0 %v21203_v3 }
0x234d   : > { %15441 = vmatpush3.bf16.msra.mxu0 %v21223_v17  ;;  %v11552_v17 = vld [vmem:[%s21257_s27 + $0x30] sm:$0xff] }
0x234e   : > { %15442 = vmatprep.subr.bf16.mxu0 %v21203_v3 }
0x2350   : > { %12862 = vmatmul.mubr.msk.f32.vlgmr.msra.gmra.mrb[98].mxu0 %vm3298_vm4, %v9395_v57  ;;  %v11122_v57 = vld [vmem:[%s21258_s13] sm:$0xff] }
0x2351   : > { %15444 = vmatpush3.bf16.msra.mxu0 %v21224_v51  ;;  %12885 = vmatprep.mubr.msk.f32.mxu0 %vm16245_vm2, %v21170_v27  ;;  %v11553_v51 = vld [vmem:[%s21257_s27 + $0x38] sm:$0xff] }
0x2352   : > { %15445 = vmatprep.subr.bf16.mxu0 %v21203_v3 }
0x2355   : > { %15447 = vmatpush3.bf16.msra.mxu0 %v21225_v18  ;;  %v15560_v18 = vpack.c.bf16 %v11553_v51, %v11552_v17 }
0x2356   : > { %15448 = vmatprep.subr.bf16.mxu0 %v21203_v3 }
0x2359   : > { %15450 = vmatpush3.bf16.msra.mxu0 %v21226_v10 }
0x235a   : > { %15451 = vmatprep.subr.bf16.mxu0 %v21203_v3 }
0x235d   : > { %15453 = vmatpush3.bf16.msra.mxu0 %v21227_v4  ;;  %v11555_v4 = vld [vmem:[%s21257_s27 + $0x40] sm:$0xff] }
0x235e   : > { %15454 = vmatprep.subr.bf16.mxu0 %v21203_v3 }
0x2360   : > { %12886 = vmatmul.mubr.msk.f32.vlgmr.msra.gmra.mrb[98].mxu0 %vm3298_vm4, %v9544_v55  ;;  %v15575_v55 = vpack.c.bf16 %v11123_v62, %v11122_v57 }
0x2361   : > { %15456 = vmatpush3.bf16.msra.mxu0 %v21228_v15  ;;  %12909 = vmatprep.mubr.msk.f32.mxu0 %vm16245_vm2, %v21170_v27  ;;  %v11556_v15 = vld [vmem:[%s21257_s27 + $0x48] sm:$0xff] }
0x2362   : > { %15457 = vmatprep.subr.bf16.mxu0 %v21203_v3 }
0x2365   : > { %15459 = vmatpush3.bf16.msra.mxu0 %v21229_v49  ;;  %v15563_v49 = vpack.c.bf16 %v11556_v15, %v11555_v4 }
0x2366   : > { %15460 = vmatprep.subr.bf16.mxu0 %v21203_v3 }
0x2369   : > { %15462 = vmatpush3.bf16.msra.mxu0 %v21230_v22 }
0x236a   : > { %15463 = vmatprep.subr.bf16.mxu0 %v21203_v3 }
0x236d   : > { %15465 = vmatpush3.bf16.msra.mxu0 %v21231_v47  ;;  %v11558_v47 = vld [vmem:[%s21257_s27 + $0x50] sm:$0xff] }
0x236e   : > { %15466 = vmatprep.subr.bf16.mxu0 %v21203_v3 }
0x2370   : > { %12910 = vmatmul.mubr.msk.f32.vlgmr.msra.gmra.mrb[98].mxu0 %vm3298_vm4, %v9693_v16 }
0x2371   : > { %15468 = vmatpush3.bf16.msra.mxu0 %v21232_v31  ;;  %12933 = vmatprep.mubr.msk.f32.mxu0 %vm16245_vm2, %v21170_v27  ;;  %v11559_v31 = vld [vmem:[%s21257_s27 + $0x58] sm:$0xff] }
0x2372   : > { %15469 = vmatprep.subr.bf16.mxu0 %v21203_v3 }
0x2375   : > { %15471 = vmatpush3.bf16.msra.mxu0 %v21233_v5  ;;  %v15566_v5 = vpack.c.bf16 %v11559_v31, %v11558_v47 }
0x2376   : > { %15472 = vmatprep.subr.bf16.mxu0 %v21203_v3 }
0x2379   : > { %15474 = vmatpush3.bf16.msra.mxu0 %v21234_v59 }
0x237a   : > { %15475 = vmatprep.subr.bf16.mxu0 %v21203_v3 }
0x237d   : > { %15477 = vmatpush3.bf16.msra.mxu0 %v21235_v43  ;;  %v11561_v43 = vld [vmem:[%s21257_s27 + $0x60] sm:$0xff] }
0x237e   : > { %15478 = vmatprep.subr.bf16.mxu0 %v21203_v3 }
0x2380   : > { %12934 = vmatmul.mubr.msk.f32.vlgmr.msra.gmra.mrb[98].mxu0 %vm3298_vm4, %v9842_v14 }
0x2381   : > { %15480 = vmatpush3.bf16.msra.mxu0 %v21236_v11  ;;  %12957 = vmatprep.mubr.msk.f32.mxu0 %vm16245_vm2, %v21170_v27  ;;  %v11562_v11 = vld [vmem:[%s21257_s27 + $0x68] sm:$0xff] }
0x2382   : > { %15481 = vmatprep.subr.bf16.mxu0 %v21203_v3 }
0x2385   : > { %15483 = vmatpush3.bf16.msra.mxu0 %v21237_v56  ;;  %v15569_v56 = vpack.c.bf16 %v11562_v11, %v11561_v43 }
0x2386   : > { %15484 = vmatprep.subr.bf16.mxu0 %v21203_v3 }
0x2389   : > { %15486 = vmatpush3.bf16.msra.mxu0 %v21238_v37 }
0x238a   : > { %15487 = vmatprep.subr.bf16.mxu0 %v21203_v3 }
0x238d   : > { %15489 = vmatpush3.bf16.msra.mxu0 %v21239_v60  ;;  %v11564_v60 = vld [vmem:[%s21257_s27 + $0x70] sm:$0xff] }
0x238e   : > { %15490 = vmatprep.subr.bf16.mxu0 %v21203_v3 }
0x2390   : > { %12958 = vmatmul.mubr.msk.f32.vlgmr.msra.gmra.mrb[98].mxu0 %vm3298_vm4, %v19220_v8 }
0x2391   : > { %15492 = vmatpush3.bf16.msra.mxu0 %v21240_v0  ;;  %12981 = vmatprep.mubr.msk.f32.mxu0 %vm16245_vm2, %v21170_v27  ;;  %v11565_v0 = vld [vmem:[%s21257_s27 + $0x78] sm:$0xff] }
0x2392   : > { %15493 = vmatprep.subr.bf16.mxu0 %v21203_v3 }
0x2395   : > { %15495 = vmatpush3.bf16.msra.mxu0 %v21241_v23  ;;  %v15572_v23 = vpack.c.bf16 %v11565_v0, %v11564_v60 }
0x2396   : > { %15496 = vmatprep.subr.bf16.mxu0 %v21203_v3 }
0x2399   : > { %15498 = vmatpush3.bf16.msra.mxu0 %v21242_v63 }
0x239a   : > { %15499 = vmatprep.subr.bf16.mxu0 %v21203_v3 }
0x239d   : > { %15501 = vmatpush3.bf16.msra.mxu0 %v21243_v58 }
0x239e   : > { %15574 = vmatprep.subr.bf16.mxu0 %v21203_v3 }
0x23a0   : > { %12982 = vmatmul.mubr.msk.f32.vlgmr.msra.gmra.mrb[98].mxu0 %vm3298_vm4, %v19222_v32  ;;  %v11546_v32 = vld [vmem:[%s21257_s27 + $0x10] sm:$0xff] }
0x23a1   : > { %13124 = vmatprep.mubr.msk.f32.mxu0 %vm16245_vm2, %v21170_v27  ;;  %15576 = vmatpush3.bf16.msra.mxu0 %v15575_v55  ;;  %v15554_v46 = vpack.c.bf16 %v11547_v34, %v11546_v32 }
0x23a2   : > { %15577 = vmatprep.subr.bf16.mxu0 %v21203_v3 }
0x2473   : > { %v10213_v9 = vpop.f32.mrb[98].mxu0 }
0x2474   : > { %v15588_v35 = vadd.f32 %v10213_v9, %v8872_v28  ;;  %v12983_v29 = vpop.f32.mrb[99].mxu0  ;;  %v11125_v28 = vld [vmem:[%s21258_s13 + $0x18] sm:$0xff] }
0x2476   : > { %v10218_v53 = vmax.f32 %v15588_v35, 0.0  ;;  %v10505_v35 = vld [vmem:[#allocation17] sm:$0x1] }
0x2478   : > { %13001 = vmatmul.mubr.msk.f32.vlgmr.msra.gmra.mrb[28].mxu1 %vm3298_vm4, %v10218_v53 }
0x2479   : > { %15516 = vmatpush3.bf16.msra.mxu1 %v21244_v44  ;;  %13019 = vmatprep.mubr.msk.f32.mxu1 %vm16245_vm2, %v21170_v27 }
0x247a   : > { %15517 = vmatprep.subr.bf16.mxu1 %v21203_v3 }
0x247d   : > { %15519 = vmatpush3.bf16.msra.mxu1 %v21245_v25  ;;  %v11126_v25 = vld [vmem:[#allocation18] sm:$0x1] }
0x247e   : > { %15520 = vmatprep.subr.bf16.mxu1 %v21203_v3 }
0x2481   : > { %15522 = vmatpush3.bf16.msra.mxu1 %v21246_v12 }
0x2482   : > { %15523 = vmatprep.subr.bf16.mxu1 %v21203_v3 }
0x2485   : > { %15525 = vmatpush3.bf16.msra.mxu1 %v21247_v1 }
0x2486   : > { %15526 = vmatprep.subr.bf16.mxu1 %v21203_v3 }
0x2488   : > { %13020 = vmatmul.mubr.msk.f32.vlgmr.msra.gmra.mrb[30].mxu1 %vm3298_vm4, %v10218_v53 }
0x2489   : > { %15528 = vmatpush3.bf16.msra.mxu1 %v21248_v21  ;;  %13038 = vmatprep.mubr.msk.f32.mxu1 %vm16245_vm2, %v21170_v27 }
0x248a   : > { %15529 = vmatprep.subr.bf16.mxu1 %v21203_v3 }
0x248d   : > { %15531 = vmatpush3.bf16.msra.mxu1 %v21249_v48 }
0x248e   : > { %15532 = vmatprep.subr.bf16.mxu1 %v21203_v3 }
0x2491   : > { %15534 = vmatpush3.bf16.msra.mxu1 %v21250_v38 }
0x2492   : > { %15535 = vmatprep.subr.bf16.mxu1 %v21203_v3 }
0x2495   : > { %15537 = vmatpush3.bf16.msra.mxu1 %v21251_v41 }
0x2496   : > { %15538 = vmatprep.subr.bf16.mxu1 %v21203_v3 }
0x2498   : > { %13039 = vmatmul.mubr.msk.f32.vlgmr.msra.gmra.mrb[32].mxu1 %vm3298_vm4, %v10218_v53 }
0x2499   : > { %15540 = vmatpush3.bf16.msra.mxu1 %v21252_v19  ;;  %13057 = vmatprep.mubr.msk.f32.mxu1 %vm16245_vm2, %v21170_v27 }
0x249a   : > { %15541 = vmatprep.subr.bf16.mxu1 %v21203_v3 }
0x249d   : > { %15543 = vmatpush3.bf16.msra.mxu1 %v21253_v50 }
0x249e   : > { %15544 = vmatprep.subr.bf16.mxu1 %v21203_v3 }
0x24a1   : > { %15546 = vmatpush3.bf16.msra.mxu1 %v21254_v6 }
0x24a2   : > { %15547 = vmatprep.subr.bf16.mxu1 %v21203_v3 }
0x24a5   : > { %15549 = vmatpush3.bf16.msra.mxu1 %v21255_v24 }
0x24a6   : > { %15550 = vmatprep.subr.bf16.mxu1 %v21203_v3 }
0x24a8   : > { %13058 = vmatmul.mubr.msk.f32.vlgmr.msra.gmra.mrb[34].mxu1 %vm3298_vm4, %v10218_v53 }
0x24a9   : > { %13064 = vmatprep.mubr.msk.f32.mxu1 %vm16245_vm2, %v21170_v27  ;;  %15552 = vmatpush3.bf16.msra.mxu1 %v15551_v61 }
0x24aa   : > { %15553 = vmatprep.subr.bf16.mxu1 %v21203_v3 }
0x254b   : > { %v10288_v7 = vpop.f32.mrb[28].mxu1 }
0x254c   : > { %v13002_v16 = vpop.f32.mrb[29].mxu1 }
0x255b   : > { %v10358_v13 = vpop.f32.mrb[30].mxu1 }
0x255c   : > { %v10502_v14 = vmax.f32 %v10288_v7, %v10358_v13  ;;  %v13021_v20 = vpop.f32.mrb[31].mxu1 }
0x256b   : > { %v10428_v8 = vpop.f32.mrb[32].mxu1 }
0x256c   : > { %v13040_v26 = vpop.f32.mrb[33].mxu1 }
0x257b   : > { %v10498_v39 = vpop.f32.mrb[34].mxu1 }
0x257c   : > { %v10503_v40 = vmax.f32 %v10428_v8, %v10498_v39  ;;  %v13059_v45 = vpop.f32.mrb[35].mxu1 }
0x257e   : > { %v10504_v2 = vmax.f32 %v10502_v14, %v10503_v40 }
0x2580   : > { %13065 = vmatmul.mubr.msk.f32.vlgmr.msra.gmra.mrb[36].mxu1 %vm4961_vm5, %v10504_v2  ;;  %v10585_v52 = vrot.slane %v10504_v2, 1  ;;  %v10662_v10 = vrot.slane %v10504_v2, 2  ;;  %v10739_v22 = vrot.slane %v10504_v2, 3  ;;  %v10816_v59 = vrot.slane %v10504_v2, 4 }
0x2581   : > { %15555 = vmatpush3.bf16.msra.mxu1 %v15554_v46  ;;  %13071 = vmatprep.mubr.msk.f32.mxu1 %vm16245_vm2, %v21170_v27  ;;  %v10893_v37 = vrot.slane %v10504_v2, 5  ;;  %v10970_v63 = vrot.slane %v10504_v2, 6  ;;  %v11047_v58 = vrot.slane %v10504_v2, 7 }
0x2582   : > { %15556 = vmatprep.subr.bf16.mxu1 %v21203_v3 }
0x2588   : > { %13072 = vmatmul.mubr.msk.f32.vlgmr.msra.gmra.mrb[36].mxu1 %vm4961_vm5, %v10585_v52 }
0x2589   : > { %15558 = vmatpush3.bf16.msra.mxu1 %v15557_v54  ;;  %13078 = vmatprep.mubr.msk.f32.mxu1 %vm16245_vm2, %v21170_v27 }
0x258a   : > { %15559 = vmatprep.subr.bf16.mxu1 %v21203_v3 }
0x2590   : > { %13079 = vmatmul.mubr.msk.f32.vlgmr.msra.gmra.mrb[36].mxu1 %vm4961_vm5, %v10662_v10 }
0x2591   : > { %15561 = vmatpush3.bf16.msra.mxu1 %v15560_v18  ;;  %13085 = vmatprep.mubr.msk.f32.mxu1 %vm16245_vm2, %v21170_v27 }
0x2592   : > { %15562 = vmatprep.subr.bf16.mxu1 %v21203_v3 }
0x2598   : > { %13086 = vmatmul.mubr.msk.f32.vlgmr.msra.gmra.mrb[36].mxu1 %vm4961_vm5, %v10739_v22 }
0x2599   : > { %15564 = vmatpush3.bf16.msra.mxu1 %v15563_v49  ;;  %13092 = vmatprep.mubr.msk.f32.mxu1 %vm16245_vm2, %v21170_v27 }
0x259a   : > { %15565 = vmatprep.subr.bf16.mxu1 %v21203_v3 }
0x25a0   : > { %13093 = vmatmul.mubr.msk.f32.vlgmr.msra.gmra.mrb[36].mxu1 %vm4961_vm5, %v10816_v59 }
0x25a1   : > { %15567 = vmatpush3.bf16.msra.mxu1 %v15566_v5  ;;  %13099 = vmatprep.mubr.msk.f32.mxu1 %vm16245_vm2, %v21170_v27 }
0x25a2   : > { %15568 = vmatprep.subr.bf16.mxu1 %v21203_v3 }
0x25a8   : > { %13100 = vmatmul.mubr.msk.f32.vlgmr.msra.gmra.mrb[36].mxu1 %vm4961_vm5, %v10893_v37 }
0x25a9   : > { %15570 = vmatpush3.bf16.msra.mxu1 %v15569_v56  ;;  %13106 = vmatprep.mubr.msk.f32.mxu1 %vm16245_vm2, %v21170_v27 }
0x25aa   : > { %15571 = vmatprep.subr.bf16.mxu1 %v21203_v3  ;;  %v11124_v3 = vld [vmem:[%s21258_s13 + $0x10] sm:$0xff] }
0x25ab   : > { %v15578_v9 = vpack.c.bf16 %v11125_v28, %v11124_v3 }
0x25ad   : > { %15579 = vmatpush3.bf16.msra.mxu0 %v15578_v9 }
0x25b0   : > { %13107 = vmatmul.mubr.msk.f32.vlgmr.msra.gmra.mrb[36].mxu1 %vm4961_vm5, %v10970_v63 }
0x25b1   : > { %15573 = vmatpush3.bf16.msra.mxu1 %v15572_v23  ;;  %13113 = vmatprep.mubr.msk.f32.mxu1 %vm16245_vm2, %v21170_v27 }
0x25b8   : > { %13114 = vmatmul.mubr.msk.f32.vlgmr.msra.gmra.mrb[36].mxu1 %vm4961_vm5, %v11047_v58 }
0x268b   : > { %v11116_v29 = vpop.f32.mrb[36].mxu1 }
0x268c   : > { %v15589_v53 = vadd.f32 %v11116_v29, %v10505_v35  ;;  %v13115_v44 = vpop.f32.mrb[37].mxu1 }
0x268e   : > { %v11121_v27 = vmax.f32 %v15589_v53, 0.0 }
0x2690   : > { %13125 = vmatmul.mubr.msk.f32.vlgmr.msra.gmra.mrb[102].mxu0 %vm11127_vm8, %v11121_v27 }
0x2763   : > { %v11197_v12 = vpop.f32.mrb[102].mxu0 }
0x2764   : > { %v11198_v1 = vadd.f32 %v11197_v12, %v11126_v25  ;;  %v13126_v21 = vpop.f32.mrb[103].mxu0 }
0x2766   : > { %11202 = vst.msk [vmem:[%s846_s3] sm:$0x1] %vm11201_vm9, %v11198_v1 }
0x2767   : > { %16151 = shalt.err (!%p16148_p1)
}
0x2768   : > { %s16152_s23 = scalar_lea.hbm %s19437_s6, 16  ;;  %s16156_s3 = scalar_lea.hbm %s21262_s16, 32 }
0x2769   : > { %p16153_p2 = scmp.ne.s32.totalorder %s19437_s6, %s16152_s23  ;;  %p16157_p7 = scmp.lt.u32.totalorder %s19437_s6, %s21262_s16 }
0x276a   : > { %p16158_p8 = scmp.lt.u32.totalorder %s16156_s3, %s16152_s23  ;;  %p16160_p5 = scmp.lt.u32.totalorder %s16152_s23, %s19437_s6 }
0x276b   : > { %p16154_p3 = pnand %p16153_p2, %p21263_p6 }
0x276c   : > { %p16159_p11 = por %p16158_p8, %p16157_p7 }
0x276d   : > { %p16155_p4 = pneg %p16154_p3 }
0x276e   : > { %p16161_p0 = por %p16160_p5, %p16159_p11 }
0x2770   : > { %p16162_p9 = pnand %p16161_p0, %p16155_p4 }
0x2772   : > { %16165 = shalt.err (!%p16162_p9)
}
0x2773   : > { %15740 = dma.vmem_to_hbm [thread:$0]  (%p21263_p6), %s19439_s0, 16, %s19437_s6, %s11204_s4  }
0x2774 PF: > { %s21264_s5 = sld [smem:[#allocation31_spill]]  ;;  %s21265_s25 = sld [smem:[#allocation28_spill]] }
0x2775   : > { %s21266_s14 = sld [smem:[#allocation35_spill]] }
0x277a   : > { %p15797_p10 = scmp.ge.s32.totalorder %s21264_s5, 2  ;;  %s11228_s19 = sand.u32 1, %s21265_s25  }
0x277b   : > { %p21267_p13 = scmp.ne.s32.totalorder %s21266_s14, 0  ;;  %s11229_s21 = scalar_lea.sflag [#allocation5], %s11228_s19 }
0x277d   : > { %p15774_p12 = pnand %p15797_p10, %p21267_p13 }
0x277f   : > { %16207 = dma.done.wait (!%p15774_p12), %s11229_s21, 16  }
0x2780   : > { %16209 = vsyncadd (!%p15774_p12), %s11229_s21, 4294967280  ;;  %s21268_s1 = sld [smem:[#allocation32_spill]]  ;;  %s21269_s24 = sld [smem:[#allocation29_spill]] }
0x2781   : > { %s21270_s25 = sld [smem:[#allocation30_spill]]  ;;  %s21271_s5 = sld [smem:[#allocation33_spill]] }
0x2786   : > { %p41_p1 = scmp.ge.s32.totalorder %s21268_s1, 4  }
0x2788   :  { %43 = sbr.rel (!%p41_p1) target bundleno = 24 (0x18), region = 265 }
0x278f   :  { %11233 = vsyncpa [#allocation4], 1 }
0x2790   :  { %11235 = vsyncpa [#allocation4 + $0x1], 1 }
0x2791   :  { %11236 = vsyncpa [#allocation7], 1 }
0x2792   :  { %11237 = vsyncpa [#allocation10], 1 }
0x2793   :  { %11238 = vsyncpa [#allocation13], 1 }
0x2794   :  { %11239 = vsyncpa [#allocation16], 1 }
0x2795   :  { %11240 = vsyncpa [#allocation19], 1 }
0x2796   :  { %11241 = vsyncpa [#allocation5], 1 }
0x2797   :  { %11243 = vsyncpa [#allocation5 + $0x1], 1 }

</bundles_post_ra>
